<compile_context>
chip_gen: v5e
topology: v5e:2x2
jax: 0.10.0
libtpu: 0.0.40
codegen_flags: <defaults>
</compile_context>

<pallas_src>
import jax
import jax.numpy as jnp
from jax.experimental import pallas as pl
from jax.experimental.pallas import tpu as pltpu

# ----------------------- model hyper-parameters ----------------------------
INPUT_DIM = 2                    # coords dim
N_ENC = 6                        # input_n_encoding_functions
HIDDEN = 32                      # hidden_dim
N_HIDDEN_LAYERS = 4              # hidden_n_layers
OUTPUT_DIM = 3                   # output_dim
DF = INPUT_DIM * N_ENC           # per-trig encoded width (12)
SKIP_DIM = 2 * DF + INPUT_DIM    # 26 (append_coords=True)
ENC_PAD = HIDDEN                 # encoding rows zero-padded to 32 -> clean K=32 matmuls
INPUT_OMEGA_0 = 30.0
HIDDEN_OMEGA_0 = 30.0
DELTA_OMEGA_0 = 10.0
BATCH = 512


# ----------------------------- Pallas kernel -------------------------------
def chirp_net_kernel(coords_ref, enc_ab_ref, w_ref, b_ref, w5b5_ref, out_ref):
    f32 = jnp.float32
    ct = coords_ref[...]                                   # [2, T]   batch on lanes
    ab = enc_ab_ref[...]                                   # [32, 3]  (scale_x, scale_y, bias)

    # Fused InputEncoding, padded to 32 rows (VPU broadcast-multiply, no K=2 MXU pass):
    #   rows  0..11 : sin(freq * xs)                (the (x+1)/2+1 affine folded into scale/bias)
    #   rows 12..23 : cos(freq * xs) = sin(.+pi/2)  (phase folded into the bias)
    #   rows 24..25 : xs pass-through
    #   rows 26..31 : zero padding (matching weight columns are zero)
    p = ab[:, 0:1] * ct[0:1, :] + ab[:, 1:2] * ct[1:2, :] + ab[:, 2:3]        # [32, T]
    # sin only on the 24 harmonic rows (three aligned (8,128) tiles); rest passes through.
    enc = jnp.concatenate([jnp.sin(p[0:2 * DF, :]), p[2 * DF:, :]], axis=0)   # [32, T]

    def chirp(z, omega0, delta0):
        return jnp.sin((omega0 + delta0 * jnp.tanh(omega0 * z)) * z)

    def dense(wi, bi, x):
        return jnp.dot(w_ref[wi], x, preferred_element_type=f32) + b_ref[:, bi:bi + 1]

    # layer 0: ChirpLayer(26 -> 32), first layer, single K=32 (padded) matmul
    h = chirp(dense(0, 0, enc), INPUT_OMEGA_0, DELTA_OMEGA_0)
    # layer 1: ChirpLayer(32 -> 32)
    h = chirp(dense(1, 1, h), HIDDEN_OMEGA_0, DELTA_OMEGA_0)
    # layer 2: mid-skip ChirpLayer(32 + 26 -> 32): cat([h, enc]) realized as two matmuls
    z2 = (jnp.dot(w_ref[2], h, preferred_element_type=f32)
          + jnp.dot(w_ref[3], enc, preferred_element_type=f32)
          + b_ref[:, 2:3])
    h = chirp(z2, HIDDEN_OMEGA_0, DELTA_OMEGA_0)
    # layers 3, 4: ChirpLayer(32 -> 32)
    h = chirp(dense(4, 3, h), HIDDEN_OMEGA_0, DELTA_OMEGA_0)
    h = chirp(dense(5, 4, h), HIDDEN_OMEGA_0, DELTA_OMEGA_0)
    # last layer: plain Linear(32 -> 3) (is_last_linear=True), lane-dense store
    w5b5 = w5b5_ref[...]                                   # [3, 33] = [w5 | b5]
    out_ref[...] = (jnp.dot(w5b5[:, :HIDDEN], h, preferred_element_type=f32)
                    + w5b5[:, HIDDEN:HIDDEN + 1])


# --------------------------- parameter setup --------------------------------
def init_chirp_layer(key, fan_in, fan_out, *, is_first=False, omega_0=30.0):
    """ChirpLayer init (torch layout [out, in]; torch default bias init)."""
    kw, kb = jax.random.split(key)
    wb = (1.0 / fan_in) if is_first else ((6.0 / fan_in) ** 0.5 / omega_0)
    bb = 1.0 / (fan_in ** 0.5)
    w = jax.random.uniform(kw, (fan_out, fan_in), jnp.float32, -wb, wb)
    b = jax.random.uniform(kb, (fan_out,), jnp.float32, -bb, bb)
    return w, b


def init_last_linear(key, fan_in, fan_out, *, small_weight=True):
    kw, kb = jax.random.split(key)
    wb = 1e-4 if small_weight else ((6.0 / fan_in) ** 0.5 / HIDDEN_OMEGA_0)
    bb = 1.0 / (fan_in ** 0.5)
    w = jax.random.uniform(kw, (fan_out, fan_in), jnp.float32, -wb, wb)
    b = jax.random.uniform(kb, (fan_out,), jnp.float32, -bb, bb)
    return w, b


def make_params(key):
    keys = jax.random.split(key, 6)
    # layers: [(26->32 first), (32->32), (32+26->32 skip, n_skip=3), (32->32), (32->32), Linear(32->3)]
    w0, b0 = init_chirp_layer(keys[0], SKIP_DIM, HIDDEN, is_first=True, omega_0=INPUT_OMEGA_0)
    w1, b1 = init_chirp_layer(keys[1], HIDDEN, HIDDEN, omega_0=HIDDEN_OMEGA_0)
    w2, b2 = init_chirp_layer(keys[2], HIDDEN + SKIP_DIM, HIDDEN, omega_0=HIDDEN_OMEGA_0)
    w3, b3 = init_chirp_layer(keys[3], HIDDEN, HIDDEN, omega_0=HIDDEN_OMEGA_0)
    w4, b4 = init_chirp_layer(keys[4], HIDDEN, HIDDEN, omega_0=HIDDEN_OMEGA_0)
    w5, b5 = init_last_linear(keys[5], HIDDEN, OUTPUT_DIM, small_weight=True)

    freq = (2.0 ** jnp.arange(N_ENC, dtype=jnp.float32)) * 1.0   # base_omega_0 = 1

    # Fused-encoding scale/bias for the transposed layout (rows = [sin | cos | xs | 0-pad]):
    #   rows d*F+f      : 0.5*freq[f]*coord[d] + 1.5*freq[f]  -> sin == sin(freq*xs)
    #   rows 12+d*F+f   : same + pi/2                         -> sin == cos(freq*xs)
    #   rows 24+d       : 0.5*coord[d] + 1.5                  -> xs (pass-through)
    #   rows 26..31     : zero (padding)
    block = jnp.kron(jnp.eye(INPUT_DIM, dtype=jnp.float32), freq[:, None])          # [12, 2]
    a26 = jnp.concatenate([0.5 * block, 0.5 * block,
                           0.5 * jnp.eye(INPUT_DIM, dtype=jnp.float32)], axis=0)    # [26, 2]
    bias_sin = 1.5 * jnp.tile(freq, INPUT_DIM)                                      # [12]
    b26 = jnp.concatenate([bias_sin, bias_sin + jnp.pi / 2,
                           jnp.full((INPUT_DIM,), 1.5, jnp.float32)])                # [26]
    enc_ab = jnp.zeros((ENC_PAD, 3), jnp.float32)
    enc_ab = enc_ab.at[:SKIP_DIM, 0:2].set(a26).at[:SKIP_DIM, 2].set(b26)            # [32, 3]

    # split the mid-skip weight along its input = cat([h, enc]); zero-pad K dims to 32
    w2h, w2e = w2[:, :HIDDEN], w2[:, HIDDEN:]
    padk = lambda w: jnp.pad(w, ((0, 0), (0, ENC_PAD - w.shape[1])))
    w_slab = jnp.stack([padk(w0), w1, w2h, padk(w2e), w3, w4], axis=0)               # [6, 32, 32]
    b_slab = jnp.stack([b0, b1, b2, b3, b4], axis=1)                                 # [32, 5]
    w5b5 = jnp.concatenate([w5, b5[:, None]], axis=1)                                # [3, 33]

    kernel_args = (enc_ab, w_slab, b_slab, w5b5)
    full = dict(w0=w0, b0=b0, w1=w1, b1=b1, w2=w2, b2=b2,
                w3=w3, b3=b3, w4=w4, b4=b4, w5=w5, b5=b5, freq=freq)
    return kernel_args, full


# ------------------------------- wrapper ------------------------------------
def chirp_net_forward(coords, kernel_args, tile_b=None):
    B = coords.shape[0]
    if tile_b is None:
        # grid=2 when possible: feeds both v7x TensorCores via "parallel"; on v5e/v6e the
        # one extra grid step costs ~0.35us on a ~10us kernel. Else grid=1 (whole batch).
        tile_b = B // 2 if (B % 256 == 0) else B
    assert B % tile_b == 0 and (tile_b % 128 == 0 or tile_b == B), (B, tile_b)

    coords_t = coords.T                                       # [2, B], batch -> lanes
    enc_ab, w_slab, b_slab, w5b5 = kernel_args

    const2 = lambda i: (0, 0)
    const3 = lambda i: (0, 0, 0)
    in_specs = [
        pl.BlockSpec((INPUT_DIM, tile_b), lambda i: (0, i)),  # coords tile (auto-pipelined)
        # packed params: full-array blocks, constant index_map -> DMA'd once, VMEM-resident
        pl.BlockSpec(enc_ab.shape, const2),
        pl.BlockSpec(w_slab.shape, const3),
        pl.BlockSpec(b_slab.shape, const2),
        pl.BlockSpec(w5b5.shape, const2),
    ]

    cost = pl.CostEstimate(flops=12_600 * B, transcendentals=344 * B,
                           bytes_accessed=20 * B + 26_000)

    out_t = pl.pallas_call(
        chirp_net_kernel,
        out_shape=jax.ShapeDtypeStruct((OUTPUT_DIM, B), jnp.float32),
        grid_spec=pltpu.PrefetchScalarGridSpec(
            num_scalar_prefetch=0,
            grid=(B // tile_b,),
            in_specs=in_specs,
            out_specs=pl.BlockSpec((OUTPUT_DIM, tile_b), lambda i: (0, i)),
        ),
        compiler_params=pltpu.CompilerParams(dimension_semantics=("parallel",)),
        cost_estimate=cost,
    )(coords_t, *kernel_args)

    # PyTorch forward(clone=True) returns (x, coords).
    # TODO(synk): clone()/requires_grad_ autograd-graph semantics have no Pallas equivalent.
    return out_t.T, coords


# ------------------------ pure-JAX reference (for check) --------------------
def _chirp(z, omega0, delta0):
    return jnp.sin((omega0 + delta0 * jnp.tanh(omega0 * z)) * z)


def _dense(x, w, b):
    return jnp.dot(x, w.T, precision=jax.lax.Precision.HIGHEST) + b


def chirp_net_reference(coords, p):
    xs = (coords + 1.0) / 2.0 + 1.0
    enc = (xs[..., None] * p["freq"]).reshape(coords.shape[0], -1)
    x = jnp.concatenate([jnp.sin(enc), jnp.cos(enc), xs], axis=-1)
    add_to_skip = x
    x = _chirp(_dense(x, p["w0"], p["b0"]), INPUT_OMEGA_0, DELTA_OMEGA_0)
    x = _chirp(_dense(x, p["w1"], p["b1"]), HIDDEN_OMEGA_0, DELTA_OMEGA_0)
    x = jnp.concatenate([x, add_to_skip], axis=-1)            # mid-skip (n_skip == 3)
    x = _chirp(_dense(x, p["w2"], p["b2"]), HIDDEN_OMEGA_0, DELTA_OMEGA_0)
    x = _chirp(_dense(x, p["w3"], p["b3"]), HIDDEN_OMEGA_0, DELTA_OMEGA_0)
    x = _chirp(_dense(x, p["w4"], p["b4"]), HIDDEN_OMEGA_0, DELTA_OMEGA_0)
    return _dense(x, p["w5"], p["b5"])                        # last layer: plain Linear


# --------------------------------- main --------------------------------------
if __name__ == "__main__":
    key = jax.random.PRNGKey(0)
    k_coords, k_params = jax.random.split(key)
    coords = jax.random.uniform(k_coords, (BATCH, INPUT_DIM), jnp.float32, -1.0, 1.0)

    kernel_args, full_params = make_params(k_params)

    out, coords_out = chirp_net_forward(coords, kernel_args)
    out = jax.block_until_ready(out)

    ref = chirp_net_reference(coords, full_params)
    assert out.shape == (BATCH, OUTPUT_DIM), out.shape
    max_err = jnp.max(jnp.abs(out - ref))
    # Slightly loosened tolerance: kernel uses default Mosaic f32 matmul decomposition
    # (reference pins HIGHEST), and omega_0=30 amplifies rounding differences per chip.
    assert jnp.allclose(out, ref, atol=2e-4, rtol=2e-3), f"max abs err {max_err}"
    assert jnp.array_equal(coords_out, coords)

    print("KERNEL_OK")
</pallas_src>

<mosaic_0001>
module attributes {stable_mosaic.version = 11 : i64} {
  func.func @chirp_net_kernel(%arg0: i32, %arg1: memref<2x256xf32, #tpu.memory_space<vmem>>, %arg2: memref<32x3xf32, #tpu.memory_space<vmem>>, %arg3: memref<6x32x32xf32, #tpu.memory_space<vmem>>, %arg4: memref<32x5xf32, #tpu.memory_space<vmem>>, %arg5: memref<3x33xf32, #tpu.memory_space<vmem>>, %arg6: memref<3x256xf32, #tpu.memory_space<vmem>>) attributes {dimension_semantics = [#tpu.dimension_semantics<parallel>], iteration_bounds = array<i64: 2>, scalar_prefetch = 0 : i64, scratch_operands = 0 : i64, tpu.core_type = #tpu.core_type<tc>, window_params = [{transform_indices = @transform_0, window_bounds = array<i64: 2, 256>}, {pipeline_mode = #tpu.pipeline_mode<synchronous>, transform_indices = @transform_1, window_bounds = array<i64: 32, 3>}, {pipeline_mode = #tpu.pipeline_mode<synchronous>, transform_indices = @transform_2, window_bounds = array<i64: 6, 32, 32>}, {pipeline_mode = #tpu.pipeline_mode<synchronous>, transform_indices = @transform_3, window_bounds = array<i64: 32, 5>}, {pipeline_mode = #tpu.pipeline_mode<synchronous>, transform_indices = @transform_4, window_bounds = array<i64: 3, 33>}, {transform_indices = @transform_5, window_bounds = array<i64: 3, 256>}]} {
    %c0 = arith.constant 0 : index
    %c0_0 = arith.constant 0 : index
    %0 = vector.load %arg1[%c0, %c0_0] : memref<2x256xf32, #tpu.memory_space<vmem>>, vector<2x256xf32>
    %c0_1 = arith.constant 0 : index
    %c0_2 = arith.constant 0 : index
    %1 = vector.load %arg2[%c0_1, %c0_2] : memref<32x3xf32, #tpu.memory_space<vmem>>, vector<32x3xf32>
    %2 = vector.extract_strided_slice %1 {offsets = [0, 0], sizes = [32, 1], strides = [1, 1]} : vector<32x3xf32> to vector<32x1xf32>
    %3 = vector.extract_strided_slice %0 {offsets = [0, 0], sizes = [1, 256], strides = [1, 1]} : vector<2x256xf32> to vector<1x256xf32>
    %4 = vector.broadcast %2 : vector<32x1xf32> to vector<32x256xf32>
    %5 = vector.broadcast %3 : vector<1x256xf32> to vector<32x256xf32>
    %6 = arith.mulf %4, %5 : vector<32x256xf32>
    %7 = vector.extract_strided_slice %1 {offsets = [0, 1], sizes = [32, 1], strides = [1, 1]} : vector<32x3xf32> to vector<32x1xf32>
    %8 = vector.extract_strided_slice %0 {offsets = [1, 0], sizes = [1, 256], strides = [1, 1]} : vector<2x256xf32> to vector<1x256xf32>
    %9 = vector.broadcast %7 : vector<32x1xf32> to vector<32x256xf32>
    %10 = vector.broadcast %8 : vector<1x256xf32> to vector<32x256xf32>
    %11 = arith.mulf %9, %10 : vector<32x256xf32>
    %12 = arith.addf %6, %11 : vector<32x256xf32>
    %13 = vector.extract_strided_slice %1 {offsets = [0, 2], sizes = [32, 1], strides = [1, 1]} : vector<32x3xf32> to vector<32x1xf32>
    %14 = vector.broadcast %13 : vector<32x1xf32> to vector<32x256xf32>
    %15 = arith.addf %12, %14 : vector<32x256xf32>
    %16 = vector.extract_strided_slice %15 {offsets = [0, 0], sizes = [24, 256], strides = [1, 1]} : vector<32x256xf32> to vector<24x256xf32>
    %17 = math.sin %16 : vector<24x256xf32>
    %18 = vector.extract_strided_slice %15 {offsets = [24, 0], sizes = [8, 256], strides = [1, 1]} : vector<32x256xf32> to vector<8x256xf32>
    %19 = tpu.concatenate %17, %18 in 0 : vector<24x256xf32>, vector<8x256xf32> -> vector<32x256xf32>
    %c0_3 = arith.constant 0 : index
    %c0_4 = arith.constant 0 : index
    %c0_5 = arith.constant 0 : index
    %20 = vector.load %arg3[%c0_3, %c0_4, %c0_5] : memref<6x32x32xf32, #tpu.memory_space<vmem>>, vector<1x32x32xf32>
    %21 = vector.shape_cast %20 : vector<1x32x32xf32> to vector<32x32xf32>
    %cst = arith.constant dense<0.000000e+00> : vector<32x256xf32>
    %22 = tpu.matmul %21, %19, %cst {dimension_numbers = #tpu.dot_dimension_numbers<[1], [0], [0], [1], [0, 0, 1, 1], [], []>} : vector<32x32xf32>, vector<32x256xf32>, vector<32x256xf32> -> vector<32x256xf32>
    %c0_6 = arith.constant 0 : index
    %c0_7 = arith.constant 0 : index
    %23 = vector.load %arg4[%c0_6, %c0_7] : memref<32x5xf32, #tpu.memory_space<vmem>>, vector<32x1xf32>
    %24 = vector.broadcast %23 : vector<32x1xf32> to vector<32x256xf32>
    %25 = arith.addf %22, %24 : vector<32x256xf32>
    %cst_8 = arith.constant 3.000000e+01 : f32
    %26 = vector.broadcast %cst_8 : f32 to vector<32x256xf32>
    %27 = arith.mulf %26, %25 : vector<32x256xf32>
    %28 = math.tanh %27 : vector<32x256xf32>
    %cst_9 = arith.constant 1.000000e+01 : f32
    %29 = vector.broadcast %cst_9 : f32 to vector<32x256xf32>
    %30 = arith.mulf %29, %28 : vector<32x256xf32>
    %cst_10 = arith.constant 3.000000e+01 : f32
    %31 = vector.broadcast %cst_10 : f32 to vector<32x256xf32>
    %32 = arith.addf %31, %30 : vector<32x256xf32>
    %33 = arith.mulf %32, %25 : vector<32x256xf32>
    %34 = math.sin %33 : vector<32x256xf32>
    %c1 = arith.constant 1 : index
    %c0_11 = arith.constant 0 : index
    %c0_12 = arith.constant 0 : index
    %35 = vector.load %arg3[%c1, %c0_11, %c0_12] : memref<6x32x32xf32, #tpu.memory_space<vmem>>, vector<1x32x32xf32>
    %36 = vector.shape_cast %35 : vector<1x32x32xf32> to vector<32x32xf32>
    %cst_13 = arith.constant dense<0.000000e+00> : vector<32x256xf32>
    %37 = tpu.matmul %36, %34, %cst_13 {dimension_numbers = #tpu.dot_dimension_numbers<[1], [0], [0], [1], [0, 0, 1, 1], [], []>} : vector<32x32xf32>, vector<32x256xf32>, vector<32x256xf32> -> vector<32x256xf32>
    %c0_14 = arith.constant 0 : index
    %c1_15 = arith.constant 1 : index
    %38 = vector.load %arg4[%c0_14, %c1_15] : memref<32x5xf32, #tpu.memory_space<vmem>>, vector<32x1xf32>
    %39 = vector.broadcast %38 : vector<32x1xf32> to vector<32x256xf32>
    %40 = arith.addf %37, %39 : vector<32x256xf32>
    %cst_16 = arith.constant 3.000000e+01 : f32
    %41 = vector.broadcast %cst_16 : f32 to vector<32x256xf32>
    %42 = arith.mulf %41, %40 : vector<32x256xf32>
    %43 = math.tanh %42 : vector<32x256xf32>
    %cst_17 = arith.constant 1.000000e+01 : f32
    %44 = vector.broadcast %cst_17 : f32 to vector<32x256xf32>
    %45 = arith.mulf %44, %43 : vector<32x256xf32>
    %cst_18 = arith.constant 3.000000e+01 : f32
    %46 = vector.broadcast %cst_18 : f32 to vector<32x256xf32>
    %47 = arith.addf %46, %45 : vector<32x256xf32>
    %48 = arith.mulf %47, %40 : vector<32x256xf32>
    %49 = math.sin %48 : vector<32x256xf32>
    %c2 = arith.constant 2 : index
    %c0_19 = arith.constant 0 : index
    %c0_20 = arith.constant 0 : index
    %50 = vector.load %arg3[%c2, %c0_19, %c0_20] : memref<6x32x32xf32, #tpu.memory_space<vmem>>, vector<1x32x32xf32>
    %51 = vector.shape_cast %50 : vector<1x32x32xf32> to vector<32x32xf32>
    %cst_21 = arith.constant dense<0.000000e+00> : vector<32x256xf32>
    %52 = tpu.matmul %51, %49, %cst_21 {dimension_numbers = #tpu.dot_dimension_numbers<[1], [0], [0], [1], [0, 0, 1, 1], [], []>} : vector<32x32xf32>, vector<32x256xf32>, vector<32x256xf32> -> vector<32x256xf32>
    %c3 = arith.constant 3 : index
    %c0_22 = arith.constant 0 : index
    %c0_23 = arith.constant 0 : index
    %53 = vector.load %arg3[%c3, %c0_22, %c0_23] : memref<6x32x32xf32, #tpu.memory_space<vmem>>, vector<1x32x32xf32>
    %54 = vector.shape_cast %53 : vector<1x32x32xf32> to vector<32x32xf32>
    %cst_24 = arith.constant dense<0.000000e+00> : vector<32x256xf32>
    %55 = tpu.matmul %54, %19, %cst_24 {dimension_numbers = #tpu.dot_dimension_numbers<[1], [0], [0], [1], [0, 0, 1, 1], [], []>} : vector<32x32xf32>, vector<32x256xf32>, vector<32x256xf32> -> vector<32x256xf32>
    %56 = arith.addf %52, %55 : vector<32x256xf32>
    %c0_25 = arith.constant 0 : index
    %c2_26 = arith.constant 2 : index
    %57 = vector.load %arg4[%c0_25, %c2_26] : memref<32x5xf32, #tpu.memory_space<vmem>>, vector<32x1xf32>
    %58 = vector.broadcast %57 : vector<32x1xf32> to vector<32x256xf32>
    %59 = arith.addf %56, %58 : vector<32x256xf32>
    %cst_27 = arith.constant 3.000000e+01 : f32
    %60 = vector.broadcast %cst_27 : f32 to vector<32x256xf32>
    %61 = arith.mulf %60, %59 : vector<32x256xf32>
    %62 = math.tanh %61 : vector<32x256xf32>
    %cst_28 = arith.constant 1.000000e+01 : f32
    %63 = vector.broadcast %cst_28 : f32 to vector<32x256xf32>
    %64 = arith.mulf %63, %62 : vector<32x256xf32>
    %cst_29 = arith.constant 3.000000e+01 : f32
    %65 = vector.broadcast %cst_29 : f32 to vector<32x256xf32>
    %66 = arith.addf %65, %64 : vector<32x256xf32>
    %67 = arith.mulf %66, %59 : vector<32x256xf32>
    %68 = math.sin %67 : vector<32x256xf32>
    %c4 = arith.constant 4 : index
    %c0_30 = arith.constant 0 : index
    %c0_31 = arith.constant 0 : index
    %69 = vector.load %arg3[%c4, %c0_30, %c0_31] : memref<6x32x32xf32, #tpu.memory_space<vmem>>, vector<1x32x32xf32>
    %70 = vector.shape_cast %69 : vector<1x32x32xf32> to vector<32x32xf32>
    %cst_32 = arith.constant dense<0.000000e+00> : vector<32x256xf32>
    %71 = tpu.matmul %70, %68, %cst_32 {dimension_numbers = #tpu.dot_dimension_numbers<[1], [0], [0], [1], [0, 0, 1, 1], [], []>} : vector<32x32xf32>, vector<32x256xf32>, vector<32x256xf32> -> vector<32x256xf32>
    %c0_33 = arith.constant 0 : index
    %c3_34 = arith.constant 3 : index
    %72 = vector.load %arg4[%c0_33, %c3_34] : memref<32x5xf32, #tpu.memory_space<vmem>>, vector<32x1xf32>
    %73 = vector.broadcast %72 : vector<32x1xf32> to vector<32x256xf32>
    %74 = arith.addf %71, %73 : vector<32x256xf32>
    %cst_35 = arith.constant 3.000000e+01 : f32
    %75 = vector.broadcast %cst_35 : f32 to vector<32x256xf32>
    %76 = arith.mulf %75, %74 : vector<32x256xf32>
    %77 = math.tanh %76 : vector<32x256xf32>
    %cst_36 = arith.constant 1.000000e+01 : f32
    %78 = vector.broadcast %cst_36 : f32 to vector<32x256xf32>
    %79 = arith.mulf %78, %77 : vector<32x256xf32>
    %cst_37 = arith.constant 3.000000e+01 : f32
    %80 = vector.broadcast %cst_37 : f32 to vector<32x256xf32>
    %81 = arith.addf %80, %79 : vector<32x256xf32>
    %82 = arith.mulf %81, %74 : vector<32x256xf32>
    %83 = math.sin %82 : vector<32x256xf32>
    %c5 = arith.constant 5 : index
    %c0_38 = arith.constant 0 : index
    %c0_39 = arith.constant 0 : index
    %84 = vector.load %arg3[%c5, %c0_38, %c0_39] : memref<6x32x32xf32, #tpu.memory_space<vmem>>, vector<1x32x32xf32>
    %85 = vector.shape_cast %84 : vector<1x32x32xf32> to vector<32x32xf32>
    %cst_40 = arith.constant dense<0.000000e+00> : vector<32x256xf32>
    %86 = tpu.matmul %85, %83, %cst_40 {dimension_numbers = #tpu.dot_dimension_numbers<[1], [0], [0], [1], [0, 0, 1, 1], [], []>} : vector<32x32xf32>, vector<32x256xf32>, vector<32x256xf32> -> vector<32x256xf32>
    %c0_41 = arith.constant 0 : index
    %c4_42 = arith.constant 4 : index
    %87 = vector.load %arg4[%c0_41, %c4_42] : memref<32x5xf32, #tpu.memory_space<vmem>>, vector<32x1xf32>
    %88 = vector.broadcast %87 : vector<32x1xf32> to vector<32x256xf32>
    %89 = arith.addf %86, %88 : vector<32x256xf32>
    %cst_43 = arith.constant 3.000000e+01 : f32
    %90 = vector.broadcast %cst_43 : f32 to vector<32x256xf32>
    %91 = arith.mulf %90, %89 : vector<32x256xf32>
    %92 = math.tanh %91 : vector<32x256xf32>
    %cst_44 = arith.constant 1.000000e+01 : f32
    %93 = vector.broadcast %cst_44 : f32 to vector<32x256xf32>
    %94 = arith.mulf %93, %92 : vector<32x256xf32>
    %cst_45 = arith.constant 3.000000e+01 : f32
    %95 = vector.broadcast %cst_45 : f32 to vector<32x256xf32>
    %96 = arith.addf %95, %94 : vector<32x256xf32>
    %97 = arith.mulf %96, %89 : vector<32x256xf32>
    %98 = math.sin %97 : vector<32x256xf32>
    %c0_46 = arith.constant 0 : index
    %c0_47 = arith.constant 0 : index
    %99 = vector.load %arg5[%c0_46, %c0_47] : memref<3x33xf32, #tpu.memory_space<vmem>>, vector<3x33xf32>
    %100 = vector.extract_strided_slice %99 {offsets = [0, 0], sizes = [3, 32], strides = [1, 1]} : vector<3x33xf32> to vector<3x32xf32>
    %cst_48 = arith.constant dense<0.000000e+00> : vector<3x256xf32>
    %101 = tpu.matmul %100, %98, %cst_48 {dimension_numbers = #tpu.dot_dimension_numbers<[1], [0], [0], [1], [0, 0, 1, 1], [], []>} : vector<3x32xf32>, vector<32x256xf32>, vector<3x256xf32> -> vector<3x256xf32>
    %102 = vector.extract_strided_slice %99 {offsets = [0, 32], sizes = [3, 1], strides = [1, 1]} : vector<3x33xf32> to vector<3x1xf32>
    %103 = vector.broadcast %102 : vector<3x1xf32> to vector<3x256xf32>
    %104 = arith.addf %101, %103 : vector<3x256xf32>
    %c0_49 = arith.constant 0 : index
    %c0_50 = arith.constant 0 : index
    %105 = vector.load %arg6[%c0_49, %c0_50] : memref<3x256xf32, #tpu.memory_space<vmem>>, vector<3x256xf32>
    tpu.vector_store %arg6[%c0_49, %c0_50], %104 {strides = array<i32>} : memref<3x256xf32, #tpu.memory_space<vmem>>, vector<3x256xf32>,
    return
  }
  func.func @transform_0(%arg0: i32) -> (i32, i32) {
    %c0_i32 = arith.constant 0 : i32
    %c0_i32_0 = arith.constant 0 : i32
    return %c0_i32, %arg0 : i32, i32
  }
  func.func @transform_1(%arg0: i32) -> (i32, i32) {
    %c0_i32 = arith.constant 0 : i32
    %c0_i32_0 = arith.constant 0 : i32
    %c0_i32_1 = arith.constant 0 : i32
    return %c0_i32, %c0_i32_0 : i32, i32
  }
  func.func @transform_2(%arg0: i32) -> (i32, i32, i32) {
    %c0_i32 = arith.constant 0 : i32
    %c0_i32_0 = arith.constant 0 : i32
    %c0_i32_1 = arith.constant 0 : i32
    %c0_i32_2 = arith.constant 0 : i32
    return %c0_i32, %c0_i32_0, %c0_i32_1 : i32, i32, i32
  }
  func.func @transform_3(%arg0: i32) -> (i32, i32) {
    %c0_i32 = arith.constant 0 : i32
    %c0_i32_0 = arith.constant 0 : i32
    %c0_i32_1 = arith.constant 0 : i32
    return %c0_i32, %c0_i32_0 : i32, i32
  }
  func.func @transform_4(%arg0: i32) -> (i32, i32) {
    %c0_i32 = arith.constant 0 : i32
    %c0_i32_0 = arith.constant 0 : i32
    %c0_i32_1 = arith.constant 0 : i32
    return %c0_i32, %c0_i32_0 : i32, i32
  }
  func.func @transform_5(%arg0: i32) -> (i32, i32) {
    %c0_i32 = arith.constant 0 : i32
    %c0_i32_0 = arith.constant 0 : i32
    return %c0_i32, %arg0 : i32, i32
  }
}

</mosaic_0001>

<bundles_post_ra>
// kernel: tpu_custom_call.1
= control target key start
LH: loop header
LB: loop body
LE: loop exit
PB: predicated region body
PF: predicated region fallthrough
CT: control target
= control target key end

     0   :  { %10 = vsyncpa [#allocation3], 0  ;;  %s15045_s0 = inlined_call_operand.vmem [shape: f32[2,512], index: 0, kind: input, shape index: {}]   ;;  %s15046_s1 = inlined_call_operand.vmem [shape: f32[32,3], index: 1, kind: input, shape index: {}]   ;;  %s15047_s2 = inlined_call_operand.hbm [shape: f32[6,32,32], index: 2, kind: input, shape index: {}]   ;;  %s15048_s3 = inlined_call_operand.vmem [shape: f32[32,5], index: 3, kind: input, shape index: {}]   ;;  %s15049_s4 = inlined_call_operand.vmem [shape: f32[3,33], index: 4, kind: input, shape index: {}]   ;;  %s15050_s5 = inlined_call_operand.hbm [shape: f32[3,512], index: 5, kind: output, shape index: {}]  }
   0x1   :  { %11 = vsyncpa [#allocation4], 0 }
   0x2   :  { %13 = vsyncpa [#allocation4 + $0x1], 0  ;;  %s8890_s18 = smov 0   ;;  %s8892_s19 = smov 0  }
   0x3   :  { %s8894_s20 = smov 0   ;;  %s8896_s21 = smov 0  }
   0x4 LB: > { %s8911_s22 = sadd.s32 4294967295, %s8843_s21   ;;  %s8364_s23 = sadd.s32 4294967294, %s8843_s21   ;;  %s8843_s21 = sphi %s8896_s21, %s15318_s21   ;;  %s8839_s20 = sphi %s8894_s20, %s15317_s20   ;;  %s8835_s19 = sphi %s8892_s19, %s15316_s19   ;;  %s8831_s18 = sphi %s8890_s18, %s15315_s18  }
   0x5   : > { %s8915_s24 = sadd.s32 1, %s8843_s21   ;;  %s136_s25 = sadd.s32 1, %s8839_s20 }
   0x6   : > { %s133_s26 = ssub.s32 %s8843_s21, %s8915_s24  ;;  %p146_p0 = scmp.ne.s32.totalorder %s8839_s20, %s8835_s19 }
   0x7   : > { %p134_p1 = scmp.eq.s32.totalorder %s133_s26, 0  ;;  %p147_p2 = scmp.eq.s32.totalorder %s8911_s22, 1 }
   0x8   : > { %p152_p3 = scmp.ne.s32.totalorder %s8835_s19, %s8831_s18  ;;  %p153_p4 = scmp.eq.s32.totalorder %s8364_s23, 1 }
   0x9   : > { %s8926_s27 = scalar_select %p134_p1, %s8839_s20, %s136_s25  }
   0xa   : > { %p8928_p5 = por %p147_p2, %p146_p0  ;;  %p8932_p6 = por %p153_p4, %p152_p3 }
   0xb   : > { %p8365_p7 = scmp.ge.s32.totalorder %s8843_s21, 1  ;;  %p160_p8 = scmp.lt.s32.totalorder %s8843_s21, 3 }
   0xc   : > { %p8581_p9 = scmp.eq.s32.totalorder %s8911_s22, 0  ;;  %s174_s7 = sshll.u32 %s15047_s2, 4  ;;  %s175_s7 = int_to_ptr.hbm [resolvable:$true] %s174_s7 }
   0xd   : > { %p161_p10 = pnand %p8365_p7, %p160_p8  ;;  %s8845_s8 = smov [#allocation2]  }
   0xe   : > { %s176_s9 = sshll.u32 %s8845_s8, 4  ;;  %s8846_s10 = smov 128   ;;  %s177_s9 = int_to_ptr.vmem [resolvable:$true] %s176_s9 }
   0xf   : > { %p8573_p11 = pneg %p161_p10  ;;  %s8847_s11 = smov 8  }
  0x10   : > { %207 = sbr.rel (%p161_p10) target bundleno = 3018 (0xbca), region = 40 }
  0x11   : > { %p8574_p12 = pnand %p8581_p9, %p8573_p11 }
  0x13   : > { %8576 = dma.hbm_to_vmem [thread:$0]  (!%p8574_p12), %s175_s7, 3072, %s177_s9, [#allocation3], %s8846_s10, %s8846_s10, %s8847_s11  }
  0x15   : > { %8822 = dma.done.wait (%p8581_p9), [#allocation3], 3072  }
  0x16   : > { %8824 = vsyncadd (%p8581_p9), [#allocation3], 4294964224  ;;  %v15066_v0 = vmov 0   ;;  %v246_v1 = vld [vmem:[%s15046_s1 + $0x10] sm:$0xff]  ;;  %v245_v2 = vld [vmem:[%s15046_s1 + $0x8] sm:$0xff]  ;;  %v8849_v4 = vmov 1  }
  0x17   : > { %8633 = vset.pattern.permute.xlu1 %v15066_v0  ;;  %8631 = vset.pattern.permute.xlu0 %v15066_v0  ;;  %v244_v3 = vld [vmem:[%s15046_s1] sm:$0xff]  ;;  %v8850_v5 = vmov 2   ;;  %v247_v6 = vld [vmem:[%s15046_s1 + $0x18] sm:$0xff]  ;;  %s8371_s26 = sshll.u32 %s8911_s22, 1  ;;  %s233_s25 = sand.u32 1, %s8835_s19  }
  0x18   : > { %8635 = vset.pattern.permute.xlu2 %v15066_v0  ;;  %260 = vperm.xlu0 %8631, %v246_v1   ;;  %p237_p13 = scmp.lt.s32.totalorder %s8371_s26, 3  ;;  %s8797_s16 = scalar_lea.hbm %s15050_s5, 16 }
  0x19   : > { %255 = vperm.xlu1 %8633, %v245_v2   ;;  %250 = vperm.xlu2 %8635, %v244_v3  }
  0x1a   : > { %s15320_s26 = smov (!%p237_p13, %s8371_s26), 3 }
  0x1b   : > { %s8372_s30 = sshll.u32 %s15320_s26, 1  ;;  %s8370_s26 = sshll.u32 %s233_s25, 3 }
  0x1c   : > { %s240_s8 = scalar_lea.vmem %s15045_s0, %s8372_s30  ;;  %s8566_s30 = sshll.u32 %s8911_s22, 3 }
  0x1d   : > { %v243_v7 = vld [vmem:[%s240_s8] sm:$0xf]  ;;  %s8288_s8 = scalar_lea.hbm %s15050_s5, %s8566_s30  ;;  %s235_s9 = scalar_lea.vmem [#allocation5], %s8370_s26 }
  0x1e   : > { %v269_v8 = vperm.slane %v243_v7, 0  ;;  %v270_v9 = vperm.slane %v243_v7, 2  ;;  %v299_v15 = vperm.slane %v243_v7, 1  ;;  %v300_v16 = vperm.slane %v243_v7, 3  ;;  %s8290_s10 = sshll.u32 %s235_s9, 4  ;;  %s8292_s11 = sshll.u32 %s8288_s8, 4  ;;  %s8291_s10 = int_to_ptr.vmem [resolvable:$true] %s8290_s10  ;;  %s8293_s11 = int_to_ptr.hbm [resolvable:$true] %s8292_s11 }
  0x1f   : > { %s8277_s22 = scalar_lea.sflag [#allocation4], %s233_s25  ;;  %s8791_s12 = sshra.s32 %s8293_s11, 4  ;;  %s8792_s12 = int_to_ptr.hbm [resolvable:$true] %s8791_s12 }
  0x20   : > { %8632 = vset.pattern.permute.xlu0 %v8849_v4  ;;  %v273_v10 = vperm.slane %v269_v8, 0  ;;  %v274_v11 = vperm.slane %v270_v9, 0  ;;  %v303_v17 = vperm.slane %v299_v15, 1  ;;  %v304_v18 = vperm.slane %v300_v16, 1  ;;  %s8793_s13 = scalar_lea.hbm %s8792_s12, 8  ;;  %p8798_p3 = scmp.lt.s32.totalorder %s8792_s12, %s15050_s5 }
  0x21   : > { %8634 = vset.pattern.permute.xlu1 %v8849_v4  ;;  %292 = vperm.xlu0 %8632, %v246_v1   ;;  %p8794_p0 = scmp.ne.s32.totalorder %s8792_s12, %s8793_s13  ;;  %p8799_p4 = scmp.lt.s32.totalorder %s8797_s16, %s8793_s13 }
  0x22   : > { %288 = vperm.xlu1 %8634, %v245_v2   ;;  %8636 = vset.pattern.permute.xlu2 %v8849_v4 }
  0x23   : > { %284 = vperm.xlu2 %8636, %v244_v3   ;;  %p8795_p1 = pnand %p8794_p0, %p8928_p5  ;;  %p8800_p7 = por %p8799_p4, %p8798_p3 }
  0x25   : > { %p8796_p2 = pneg %p8795_p1 }
  0x27   : > { %p8801_p8 = pnand %p8800_p7, %p8796_p2 }
  0x29   : > { %8639 = vset.pattern.permute.xlu0 %v8850_v5 }
  0x2a   : > { %8637 = vset.pattern.permute.xlu1 %v8850_v5  ;;  %322 = vperm.xlu0 %8639, %v244_v3  }
  0x2b   : > { %330 = vperm.xlu1 %8637, %v246_v1   ;;  %8638 = vset.pattern.permute.xlu2 %v8850_v5 }
  0x2c   : > { %326 = vperm.xlu2 %8638, %v245_v2  }
  0x32   : > { %8644 = vset.pattern.permute.xlu0 %v15066_v0 }
  0x33   : > { %8640 = vset.pattern.permute.xlu1 %v15066_v0 }
  0x34   : > { %265 = vperm.xlu1 %8640, %v247_v6   ;;  %8641 = vset.pattern.permute.xlu2 %v8849_v4 }
  0x35   : > { %296 = vperm.xlu2 %8641, %v247_v6  }
  0x3c   : > { %8642 = vset.pattern.permute.xlu1 %v8850_v5 }
  0x3d   : > { %334 = vperm.xlu1 %8642, %v247_v6   ;;  %8643 = vset.pattern.permute.xlu2 %v15066_v0 }
  0x45   : > { %8645 = vset.pattern.permute.xlu1 %v15066_v0 }
  0x73   : > { %v251_v12 = vpop.permute.xlu2 %250 }
  0x74   : > { %v275_v13 = vmul.f32 %v273_v10, %v251_v12  ;;  %v276_v14 = vmul.f32 %v274_v11, %v251_v12 }
  0x7d   : > { %v285_v19 = vpop.permute.xlu2 %284 }
  0x7e   : > { %v305_v20 = vmul.f32 %v303_v17, %v285_v19  ;;  %v306_v21 = vmul.f32 %v304_v18, %v285_v19 }
  0x80   : > { %v313_v22 = vadd.f32 %v305_v20, %v275_v13  ;;  %v314_v23 = vadd.f32 %v306_v21, %v276_v14  ;;  %v15061_v20 = vmov 2475754826  }
  0x86   : > { %v327_v32 = vpop.permute.xlu2 %326 }
  0x8a   : > { %v261_v25 = vpop.permute.xlu0 %260 }
  0x8b   : > { %v256_v24 = vpop.permute.xlu1 %255  ;;  %v279_v38 = vmul.f32 %v273_v10, %v261_v25  ;;  %v280_v39 = vmul.f32 %v274_v11, %v261_v25  ;;  %v15059_v25 = vmov 2131351028  }
  0x8c   : > { %v278_v26 = vmul.f32 %v274_v11, %v256_v24  ;;  %v277_v28 = vmul.f32 %v273_v10, %v256_v24 }
  0x8f   : > { %v297_v53 = vpop.permute.xlu2 %296 }
  0x90   : > { %v311_v59 = vmul.f32 %v303_v17, %v297_v53  ;;  %v312_v60 = vmul.f32 %v304_v18, %v297_v53 }
  0x93   : > { %v293_v29 = vpop.permute.xlu0 %292 }
  0x94   : > { %v289_v27 = vpop.permute.xlu1 %288  ;;  %v309_v35 = vmul.f32 %v303_v17, %v293_v29  ;;  %v310_v36 = vmul.f32 %v304_v18, %v293_v29 }
  0x95   : > { %v307_v30 = vmul.f32 %v303_v17, %v289_v27  ;;  %v308_v31 = vmul.f32 %v304_v18, %v289_v27  ;;  %v15063_v18 = vmov 683565275  }
  0x96   : > { %v317_v40 = vadd.f32 %v309_v35, %v279_v38  ;;  %v318_v41 = vadd.f32 %v310_v36, %v280_v39  ;;  %v15055_v36 = vmov 920167782  }
  0x97   : > { %v315_v33 = vadd.f32 %v307_v30, %v277_v28  ;;  %v316_v34 = vadd.f32 %v308_v31, %v278_v26  ;;  %v15057_v31 = vmov 2102212464  }
  0x99   : > { %v8979_v37 = vadd.f32 %v327_v32, %v316_v34  ;;  %v8985_v45 = vadd.f32 %v327_v32, %v315_v33 }
  0x9b   : > { %v658_v50 = vand.u32 2139095040, %v8985_v45  ;;  %v813_v54 = vand.u32 2139095040, %v8979_v37 }
  0x9c   : > { %v323_v56 = vpop.permute.xlu0 %322 }
  0x9d   : > { %v331_v42 = vpop.permute.xlu1 %330  ;;  %v659_v61 = vshrl.u32 %v658_v50, 23  ;;  %v814_v1 = vshrl.u32 %v813_v54, 23  ;;  %v8991_v3 = vadd.f32 %v323_v56, %v313_v22  ;;  %v8994_v8 = vadd.f32 %v323_v56, %v314_v23 }
  0x9e   : > { %v8981_v43 = vadd.f32 %v331_v42, %v317_v40  ;;  %v8983_v44 = vadd.f32 %v331_v42, %v318_v41  ;;  %v15053_v42 = vmov 1326507024  }
  0x9f   : > { %v8379_v14 = vadd.s32 4294967169, %v659_v61  ;;  %v8382_v15 = vadd.s32 4294967169, %v814_v1  ;;  %v348_v16 = vand.u32 2139095040, %v8991_v3  ;;  %v503_v17 = vand.u32 2139095040, %v8994_v8 }
  0xa0   : > { %v968_v46 = vand.u32 2139095040, %v8981_v43  ;;  %v1123_v47 = vand.u32 2139095040, %v8983_v44  ;;  %v965_v6 = vand.u32 2147483647, %v8981_v43 }
  0xa2   : > { %v969_v48 = vshrl.u32 %v968_v46, 23  ;;  %v1124_v49 = vshrl.u32 %v1123_v47, 23 }
  0xa4   : > { %v8385_v51 = vadd.s32 4294967169, %v969_v48  ;;  %v8388_v52 = vadd.s32 4294967169, %v1124_v49 }
  0xa6   : > { %v975_v55 = vadd.s32 1, %v8385_v51  ;;  %v266_v57 = vpop.permute.xlu1 %265  ;;  %v1130_v58 = vadd.s32 1, %v8388_v52 }
  0xa7   : > { %v281_v62 = vmul.f32 %v273_v10, %v266_v57  ;;  %v282_v63 = vmul.f32 %v274_v11, %v266_v57  ;;  %v972_v10 = vand.u32 8388607, %v965_v6 }
  0xa8   : > { %vm976_vm0 = vcmp.gt.s32.totalorder %v975_v55, 0  ;;  %vm1131_vm1 = vcmp.gt.s32.totalorder %v1130_v58, 0 }
  0xa9   : > { %v977_v2 = vsel %vm976_vm0, %v975_v55, 0  ;;  %v319_v12 = vadd.f32 %v311_v59, %v281_v62  ;;  %v320_v13 = vadd.f32 %v312_v60, %v282_v63  ;;  %v1132_v11 = vsel %vm1131_vm1, %v1130_v58, 0 }
  0xaa   : > { %v979_v7 = vand.u32 31, %v977_v2  ;;  %v978_v22 = vshrl.u32 %v977_v2, 5  ;;  %v973_v33 = vor.u32 8388608, %v972_v10  ;;  %v9012_v39 = vand.u32 31, %v1132_v11 }
  0xab   : > { %v1120_v62 = vand.u32 2147483647, %v8983_v44  ;;  %vm967_vm1 = vcmp.lt.s32.totalorder %v8981_v43, 0 }
  0xac   : > { %v980_v9 = vsub.s32 32, %v979_v7  ;;  %v982_v19 = vshll.u32 %v15063_v18, %v979_v7  ;;  %v985_v24 = vshll.u32 %v15061_v20, %v979_v7  ;;  %v988_v27 = vshll.u32 %v15059_v25, %v979_v7 }
  0xad   : > { %v991_v35 = vshll.u32 %v15057_v31, %v979_v7  ;;  %v994_v41 = vshll.u32 %v15055_v36, %v979_v7  ;;  %vm997_vm2 = vcmp.lt.s32.totalorder %v978_v22, 1  ;;  %vm1000_vm3 = vcmp.lt.s32.totalorder %v978_v22, 4 }
  0xae   : > { %v983_v21 = vshrl.u32 %v15061_v20, %v980_v9  ;;  %v986_v26 = vshrl.u32 %v15059_v25, %v980_v9  ;;  %v989_v32 = vshrl.u32 %v15057_v31, %v980_v9  ;;  %v992_v38 = vshrl.u32 %v15055_v36, %v980_v9 }
  0xaf   : > { %v335_v23 = vpop.permute.xlu1 %334  ;;  %v995_v46 = vshrl.u32 %v15053_v42, %v980_v9  ;;  %v981_v47 = vshrl.u32 %v15063_v18, %v980_v9  ;;  %vm998_vm4 = vcmp.lt.s32.totalorder %v978_v22, 2  ;;  %vm999_vm5 = vcmp.lt.s32.totalorder %v978_v22, 3 }
  0xb0   : > { %v9005_v28 = vadd.f32 %v335_v23, %v319_v12  ;;  %v9007_v29 = vadd.f32 %v335_v23, %v320_v13  ;;  %v984_v30 = vor.u32 %v983_v21, %v982_v19  ;;  %v987_v34 = vor.u32 %v986_v26, %v985_v24 }
  0xb1   : > { %v990_v40 = vor.u32 %v989_v32, %v988_v27  ;;  %v993_v48 = vor.u32 %v992_v38, %v991_v35  ;;  %v996_v49 = vor.u32 %v995_v46, %v994_v41  ;;  %v9019_v54 = vshll.u32 %v973_v33, 8 }
  0xb2   : > { %1328 = vmatpush.msra.mxu0 %v9005_v28  ;;  %1357 = vmatpush.msra.mxu1 %v9007_v29  ;;  %v1005_v51 = vsel %vm997_vm2, %v984_v30, %v987_v34  ;;  %v1001_v55 = vsel %vm997_vm2, %v981_v47, %v984_v30  ;;  %v9026_v9 = vadd.s32 1, %v8379_v14  ;;  %v9028_v12 = vadd.s32 1, %v8382_v15 }
  0xb3   : > { %v1002_v50 = vsel %vm1000_vm3, %v990_v40, 2102212464  ;;  %v1006_v52 = vsel %vm1000_vm3, %v993_v48, 920167782  ;;  %v1009_v53 = vsel %vm997_vm2, %v987_v34, %v990_v40  ;;  %v1010_v58 = vsel %vm1000_vm3, %v996_v49, 1326507024 }
  0xb4   : > { %v1003_v56 = vsel %vm999_vm5, %v987_v34, %v1002_v50  ;;  %v1007_v57 = vsel %vm999_vm5, %v990_v40, %v1006_v52  ;;  %v1011_v60 = vsel %vm999_vm5, %v993_v48, %v1010_v58  ;;  %v1014_v61 = vand.u32 65535, %v9019_v54 }
  0xb5   : > { %v1008_v59 = vsel %vm998_vm4, %v1005_v51, %v1007_v57  ;;  %v1012_v63 = vsel %vm998_vm4, %v1009_v53, %v1011_v60  ;;  %v1015_v1 = vshrl.u32 %v9019_v54, 16  ;;  %v9030_v19 = vshrl.u32 %v1132_v11, 5 }
  0xb6   : > { %v1038_v2 = vand.u32 65535, %v1008_v59  ;;  %v1039_v7 = vshrl.u32 %v1008_v59, 16  ;;  %v1016_v13 = vand.u32 65535, %v1012_v63  ;;  %v1017_v10 = vshrl.u32 %v1012_v63, 16 }
  0xb7   : > { %v9033_v21 = vsub.s32 32, %v9012_v39  ;;  %v9036_v26 = vsel %vm998_vm4, %v1001_v55, %v1003_v56  ;;  %v9040_v14 = vand.u32 8388607, %v1120_v62  ;;  %v1137_v52 = vshll.u32 %v15063_v18, %v9012_v39 }
  0xb8   : > { %v1041_v23 = vmul.u32 %v1039_v7, %v1014_v61  ;;  %v1042_v24 = vmul.u32 %v1038_v2, %v1015_v1  ;;  %v1019_v27 = vmul.u32 %v1017_v10, %v1014_v61  ;;  %v1020_v30 = vmul.u32 %v1016_v13, %v1015_v1 }
  0xb9   : > { %v1018_v15 = vmul.u32 %v1016_v13, %v1014_v61  ;;  %v1040_v32 = vmul.u32 %v1038_v2, %v1014_v61  ;;  %v1043_v33 = vmul.u32 %v1039_v7, %v1015_v1  ;;  %v1021_v11 = vmul.u32 %v1017_v10, %v1015_v1 }
  0xba   : > { %v1044_v34 = vshll.u32 %v1041_v23, 16  ;;  %v1022_v35 = vshll.u32 %v1019_v27, 16  ;;  %v1045_v38 = vshrl.u32 %v1041_v23, 16  ;;  %v1046_v40 = vshll.u32 %v1042_v24, 16 }
  0xbb   : > { %v1023_v41 = vshrl.u32 %v1019_v27, 16  ;;  %v1047_v46 = vshrl.u32 %v1042_v24, 16  ;;  %v1024_v47 = vshll.u32 %v1020_v30, 16  ;;  %v1138_v56 = vshrl.u32 %v15061_v20, %v9033_v21 }
  0xbc   : > { %vm1048_vm6 = vc.u32 %v1040_v32, %v1044_v34  ;;  %v1050_v22 = vadd.s32 %v1044_v34, %v1040_v32  ;;  %vm1026_vm7 = vc.u32 %v1018_v15, %v1022_v35  ;;  %v1028_v48 = vadd.s32 %v1022_v35, %v1018_v15 }
  0xbd   : > { %v1049_v49 = vsel %vm1048_vm6, 1, %v15066_v0  ;;  %v1027_v50 = vsel %vm1026_vm7, 1, %v15066_v0  ;;  %v1140_v59 = vshll.u32 %v15061_v20, %v9012_v39  ;;  %v1141_v60 = vshrl.u32 %v15059_v25, %v9033_v21 }
  0xbe   : > { %v1051_v51 = vadd.s32 %v1049_v49, %v1043_v33  ;;  %vm1052_vm8 = vc.u32 %v1050_v22, %v1046_v40  ;;  %v1029_v53 = vadd.s32 %v1027_v50, %v1021_v11  ;;  %vm1030_vm9 = vc.u32 %v1028_v48, %v1024_v47 }
  0xbf   : > { %v1053_v55 = vsel %vm1052_vm8, 1, %v15066_v0  ;;  %v1031_v57 = vsel %vm1030_vm9, 1, %v15066_v0  ;;  %v1139_v63 = vor.u32 %v1138_v56, %v1137_v52  ;;  %v1143_v1 = vshll.u32 %v15059_v25, %v9012_v39 }
  0xc0   : > { %v1055_v58 = vadd.s32 %v1053_v55, %v1051_v51  ;;  %v1033_v61 = vadd.s32 %v1031_v57, %v1029_v53  ;;  %v1144_v2 = vshrl.u32 %v15057_v31, %v9033_v21  ;;  %v1142_v13 = vor.u32 %v1141_v60, %v1140_v59 }
  0xc1   : > { %v1146_v10 = vshll.u32 %v15057_v31, %v9012_v39  ;;  %v1147_v23 = vshrl.u32 %v15055_v36, %v9033_v21  ;;  %v1025_v24 = vshrl.u32 %v1020_v30, 16  ;;  %v1149_v15 = vshll.u32 %v15055_v36, %v9012_v39 }
  0xc2   : > { %v1056_v7 = vadd.s32 %v1055_v58, %v1045_v38  ;;  %v1034_v27 = vadd.s32 %v1033_v61, %v1023_v41  ;;  %v1150_v32 = vshrl.u32 %v15053_v42, %v9033_v21  ;;  %v1128_v34 = vor.u32 8388608, %v9040_v14 }
  0xc3   : > { %v1145_v11 = vor.u32 %v1144_v2, %v1143_v1  ;;  %v1148_v35 = vor.u32 %v1147_v23, %v1146_v10  ;;  %v9069_v47 = vadd.s32 %v1050_v22, %v1046_v40  ;;  %vm1152_vm10 = vcmp.lt.s32.totalorder %v9030_v19, 1 }
  0xc4   : > { %v1057_v33 = vadd.s32 %v1056_v7, %v1047_v46  ;;  %v9067_v38 = vadd.s32 %v1034_v27, %v1025_v24  ;;  %v1151_v48 = vor.u32 %v1150_v32, %v1149_v15  ;;  %vm666_vm11 = vcmp.gt.s32.totalorder %v9026_v9, 0 }
  0xc5   : > { %vm1155_vm12 = vcmp.lt.s32.totalorder %v9030_v19, 4  ;;  %v1160_v39 = vsel %vm1152_vm10, %v1139_v63, %v1142_v13  ;;  %v1058_v14 = vmul.u32 %v9019_v54, %v9036_v26  ;;  %vm1154_vm14 = vcmp.lt.s32.totalorder %v9030_v19, 3 }
  0xc6   : > { %v1061_v30 = vadd.s32 1, %v1057_v33  ;;  %vm1060_vm13 = vc.u32 %v9067_v38, %v9069_v47  ;;  %v1161_v40 = vsel %vm1155_vm12, %v1148_v35, 920167782  ;;  %vm1153_vm15 = vcmp.lt.s32.totalorder %v9030_v19, 2 }
  0xc7   : > { %v1162_v46 = vsel %vm1154_vm14, %v1145_v11, %v1161_v40  ;;  %v1164_v22 = vsel %vm1152_vm10, %v1142_v13, %v1145_v11  ;;  %v1165_v54 = vsel %vm1155_vm12, %v1151_v48, 1326507024  ;;  %v9088_v26 = vshll.u32 %v1128_v34, 8 }
  0xc8   : > { %v1062_v41 = vsel %vm1060_vm13, %v1061_v30, %v1057_v33  ;;  %v1163_v50 = vsel %vm1153_vm15, %v1160_v39, %v1162_v46  ;;  %vm821_vm0 = vcmp.gt.s32.totalorder %v9028_v12, 0  ;;  %v1157_v51 = vsel %vm1155_vm12, %v1145_v11, 2102212464 }
  0xc9   : > { %v1063_v49 = vadd.s32 %v1062_v41, %v1058_v14  ;;  %v1166_v52 = vsel %vm1154_vm14, %v1148_v35, %v1165_v54  ;;  %v1194_v53 = vshrl.u32 %v1163_v50, 16  ;;  %v1169_v57 = vand.u32 65535, %v9088_v26 }
  0xca   : > { %v1167_v56 = vsel %vm1153_vm15, %v1164_v22, %v1166_v52  ;;  %v1193_v58 = vand.u32 65535, %v1163_v50  ;;  %v1136_v59 = vshrl.u32 %v15063_v18, %v9033_v21  ;;  %v1170_v60 = vshrl.u32 %v9088_v26, 16 }
  0xcb   : > { %v1064_v55 = vadd.s32 536870912, %v1063_v49  ;;  %v1171_v61 = vand.u32 65535, %v1167_v56  ;;  %v1172_v1 = vshrl.u32 %v1167_v56, 16  ;;  %v667_v2 = vsel %vm666_vm11, %v9026_v9, 0 }
  0xcc   : > { %v9104_v7 = vshrl.u32 %v348_v16, 23  ;;  %v1196_v23 = vmul.u32 %v1194_v53, %v1169_v57  ;;  %v1156_v24 = vsel %vm1152_vm10, %v1136_v59, %v1139_v63  ;;  %v1158_v21 = vsel %vm1154_vm14, %v1142_v13, %v1157_v51 }
  0xcd   : > { %v1065_v10 = vshrl.u32 %v1064_v55, 30  ;;  %v1174_v27 = vmul.u32 %v1172_v1, %v1169_v57  ;;  %v1175_v15 = vmul.u32 %v1171_v61, %v1170_v60  ;;  %v9113_v32 = vsel %vm821_vm0, %v9028_v12, 0 }
  0xce   : > { %v9117_v9 = vshrl.u32 %v503_v17, 23  ;;  %v1197_v33 = vmul.u32 %v1193_v58, %v1170_v60  ;;  %v9119_v34 = vand.u32 31, %v667_v2  ;;  %v1173_v11 = vmul.u32 %v1171_v61, %v1169_v57 }
  0xcf   : > { %v1066_v16 = vshll.u32 %v1065_v10, 30  ;;  %v1177_v63 = vshll.u32 %v1174_v27, 16  ;;  %v1199_v35 = vshll.u32 %v1196_v23, 16  ;;  %v9125_v13 = vsel %vm1153_vm15, %v1156_v24, %v1158_v21 }
  0xd0   : > { %v1176_v30 = vmul.u32 %v1172_v1, %v1170_v60  ;;  %v1195_v12 = vmul.u32 %v1193_v58, %v1169_v57  ;;  %v1179_v39 = vshll.u32 %v1175_v15, 16  ;;  %v1198_v14 = vmul.u32 %v1194_v53, %v1170_v60 }
  0xd1   : > { %v9121_v48 = vsub.s32 %v1063_v49, %v1066_v16  ;;  %vm1181_vm2 = vc.u32 %v1173_v11, %v1177_v63  ;;  %v1183_v17 = vadd.s32 %v1177_v63, %v1173_v11  ;;  %v1201_v46 = vshll.u32 %v1197_v33, 16 }
  0xd2   : > { %v1182_v41 = vsel %vm1181_vm2, 1, %v15066_v0  ;;  %vm1203_vm5 = vc.u32 %v1195_v12, %v1199_v35  ;;  %v1205_v19 = vadd.s32 %v1199_v35, %v1195_v12  ;;  %v1178_v50 = vshrl.u32 %v1174_v27, 16 }
  0xd3   : > { %vm1068_vm3 = vcmp.lt.s32.totalorder %v9121_v48, 0  ;;  %v1069_v40 = vsub.s32 0, %v9121_v48  ;;  %v1184_v22 = vadd.s32 %v1182_v41, %v1176_v30  ;;  %vm1185_vm4 = vc.u32 %v1183_v17, %v1179_v39 }
  0xd4   : > { %v1186_v54 = vsel %vm1185_vm4, 1, %v15066_v0  ;;  %v1204_v51 = vsel %vm1203_vm5, 1, %v15066_v0  ;;  %vm1207_vm6 = vc.u32 %v1205_v19, %v1201_v46  ;;  %v1089_v56 = vsub.s32 4, %v1065_v10 }
  0xd5   : > { %v1070_v49 = vsel %vm1068_vm3, %v1069_v40, %v9121_v48  ;;  %v1188_v53 = vadd.s32 %v1186_v54, %v1184_v22  ;;  %v1206_v55 = vadd.s32 %v1204_v51, %v1198_v14  ;;  %v1180_v57 = vshrl.u32 %v1175_v15, 16 }
  0xd6   : > { %v1071_v52 = vclz %v1070_v49  ;;  %v1208_v58 = vsel %vm1207_vm6, 1, %v15066_v0  ;;  %v655_v59 = vand.u32 2147483647, %v8985_v45  ;;  %v1200_v1 = vshrl.u32 %v1196_v23, 16 }
  0xd7   : > { %v1189_v61 = vadd.s32 %v1188_v53, %v1178_v50  ;;  %v1210_v24 = vadd.s32 %v1208_v58, %v1206_v55  ;;  %v9136_v21 = vshrl.u32 %v667_v2, 5  ;;  %v9139_v27 = vsub.s32 32, %v9119_v34 }
  0xd8   : > { %v8386_v60 = vadd.s32 4294967294, %v1071_v52  ;;  %v9142_v16 = vshrl.u32 %v9113_v32, 5  ;;  %v1059_v11 = vadd.s32 %v9069_v47, %v9067_v38  ;;  %vm9148_vm7 = vcmp.le.f32.partialorder %v965_v6, 0.7853982 }
  0xd9   : > { %v9152_v23 = vadd.s32 %v1189_v61, %v1180_v57  ;;  %v1202_v2 = vshrl.u32 %v1197_v33, 16  ;;  %v1211_v63 = vadd.s32 %v1210_v24, %v1200_v1  ;;  %v1090_v30 = vsel %vm967_vm1, %v1089_v56, %v1065_v10 }
  0xda   : > { %vm8387_vm8 = vcmp.lt.s32.totalorder %v8386_v60, 0  ;;  %v9156_v12 = vadd.s32 %v1205_v19, %v1201_v46  ;;  %v1213_v38 = vmul.u32 %v9088_v26, %v9125_v13  ;;  %v662_v17 = vand.u32 8388607, %v655_v59 }
  0xdb   : > { %v1074_v35 = vsel %vm8387_vm8, 0, %v8386_v60  ;;  %v1212_v6 = vadd.s32 %v1211_v63, %v1202_v2  ;;  %v673_v33 = vshrl.u32 %v15061_v20, %v9139_v27  ;;  %v675_v10 = vshll.u32 %v15061_v20, %v9119_v34 }
  0xdc   : > { %v1075_v47 = vsub.s32 32, %v1074_v35  ;;  %v1079_v39 = vsub.s32 4294967266, %v1074_v35  ;;  %vm1215_vm9 = vc.u32 %v9152_v23, %v9156_v12  ;;  %v676_v14 = vshrl.u32 %v15059_v25, %v9139_v27 }
  0xdd   : > { %v1076_v26 = vshll.u32 %v9121_v48, %v1074_v35  ;;  %v1216_v41 = vadd.s32 1, %v1212_v6  ;;  %v678_v22 = vshll.u32 %v15059_v25, %v9119_v34  ;;  %v679_v19 = vshrl.u32 %v15057_v31, %v9139_v27 }
  0xde   : > { %v1077_v13 = vshrl.u32 %v1059_v11, %v1075_v47  ;;  %v1080_v40 = vadd.s32 127, %v1079_v39  ;;  %v9171_v46 = vor.u32 %v676_v14, %v675_v10  ;;  %v682_v49 = vshrl.u32 %v15055_v36, %v9139_v27 }
  0xdf   : > { %v1217_v51 = vsel %vm1215_vm9, %v1216_v41, %v1212_v6  ;;  %v681_v48 = vshll.u32 %v15057_v31, %v9119_v34  ;;  %v680_v53 = vor.u32 %v679_v19, %v678_v22  ;;  %v684_v55 = vshll.u32 %v15055_v36, %v9119_v34 }
  0xe0   : > { %v1078_v50 = vor.u32 %v1077_v13, %v1076_v26  ;;  %v1081_v54 = vshll.u32 %v1080_v40, 23  ;;  %v1218_v52 = vadd.s32 %v1217_v51, %v1213_v38  ;;  %v685_v56 = vshrl.u32 %v15053_v42, %v9139_v27 }
  0xe1   : > { %v9186_v57 = vand.u32 31, %v9113_v32  ;;  %v672_v60 = vshll.u32 %v15063_v18, %v9119_v34  ;;  %v683_v61 = vor.u32 %v682_v49, %v681_v48  ;;  %v1092_v1 = vsel %vm9148_vm7, 0, %v1090_v30 }
  0xe2   : > { %v1082_v58 = vor.u32 4788187, %v1081_v54  ;;  %v1219_v24 = vadd.s32 536870912, %v1218_v52  ;;  %v663_v11 = vor.u32 8388608, %v662_v17  ;;  %v686_v2 = vor.u32 %v685_v56, %v684_v55 }
  0xe3   : > { %v1085_v35 = vcvt.s32.f32 %v1078_v50  ;;  %v9192_v38 = vor.u32 %v673_v33, %v672_v60  ;;  %vm687_vm10 = vcmp.lt.s32.totalorder %v9136_v21, 1  ;;  %v8373_v32 = vadd.s32 4294967169, %v9104_v7 }
  0xe4   : > { %v1083_v63 = vand.u32 2147483647, %v1082_v58  ;;  %v9196_v47 = vshrl.u32 %v1219_v24, 30  ;;  %vm690_vm11 = vcmp.lt.s32.totalorder %v9136_v21, 4  ;;  %v699_v34 = vsel %vm687_vm10, %v9171_v46, %v680_v53 }
  0xe5   : > { %vm689_vm12 = vcmp.lt.s32.totalorder %v9136_v21, 3  ;;  %v696_v39 = vsel %vm690_vm11, %v683_v61, 920167782  ;;  %v700_v6 = vsel %vm690_vm11, %v686_v2, 1326507024  ;;  %v1109_v17 = vadd.s32 3, %v1092_v1 }
  0xe6   : > { %v1086_v30 = vmul.f32 %v1085_v35, %v1083_v63  ;;  %v1221_v7 = vshll.u32 %v9196_v47, 30  ;;  %vm688_vm13 = vcmp.lt.s32.totalorder %v9136_v21, 2  ;;  %v701_v33 = vsel %vm689_vm12, %v683_v61, %v700_v6 }
  0xe7   : > { %v695_v14 = vsel %vm687_vm10, %v9192_v38, %v9171_v46  ;;  %v702_v26 = vsel %vm688_vm13, %v699_v34, %v701_v33  ;;  %v9217_v13 = vshll.u32 %v663_v11, 8  ;;  %v697_v41 = vsel %vm689_vm12, %v680_v53, %v696_v39 }
  0xe8   : > { %v1087_v10 = vxor.u32 2147483648, %v1086_v30  ;;  %v9219_v40 = vsub.s32 %v1218_v52, %v1221_v7  ;;  %v706_v22 = vand.u32 65535, %v702_v26  ;;  %v707_v19 = vshrl.u32 %v702_v26, 16 }
  0xe9   : > { %v9224_v49 = vsub.s32 32, %v9186_v57  ;;  %v9226_v50 = vadd.s32 1, %v8373_v32  ;;  %v704_v51 = vand.u32 65535, %v9217_v13  ;;  %v9239_v55 = vshrl.u32 %v9217_v13, 16 }
  0xea   : > { %v1088_v54 = vsel %vm967_vm1, %v1087_v10, %v1086_v30  ;;  %vm1223_vm14 = vcmp.lt.s32.totalorder %v9219_v40, 0  ;;  %v1224_v52 = vsub.s32 0, %v9219_v40  ;;  %v9243_v58 = vand.u32 3, %v1109_v17 }
  0xeb   : > { %v9234_v48 = vsel %vm9148_vm7, %v8981_v43, %v1088_v54  ;;  %vm1122_vm15 = vcmp.lt.s32.totalorder %v8983_v44, 0  ;;  %v9248_v60 = vsel %vm688_vm13, %v695_v14, %v697_v41  ;;  %v709_v15 = vmul.u32 %v707_v19, %v704_v51 }
  0xec   : > { %v1093_v56 = vmul.f32 %v9234_v48, %v9234_v48  ;;  %v1214_v61 = vadd.s32 %v9156_v12, %v9152_v23  ;;  %v1225_v1 = vsel %vm1223_vm14, %v1224_v52, %v9219_v40  ;;  %v671_v24 = vshrl.u32 %v15063_v18, %v9139_v27 }
  0xed   : > { %v9256_v11 = vmul.u32 %v706_v22, %v9239_v55  ;;  %v1226_v35 = vclz %v1225_v1  ;;  %v712_v32 = vshll.u32 %v709_v15, 16  ;;  %v1244_v34 = vsub.s32 4, %v9196_v47 }
  0xee   : > { %v1094_v2 = vmul.f32 -0.001358992, %v1093_v56  ;;  %v1101_v63 = vmul.f32 -0.00019511016, %v1093_v56  ;;  %v692_v30 = vsel %vm690_vm11, %v680_v53, 2102212464  ;;  %v708_v39 = vmul.u32 %v706_v22, %v704_v51 }
  0xef   : > { %v729_v23 = vshrl.u32 %v9248_v60, 16  ;;  %v8389_v17 = vadd.s32 4294967294, %v1226_v35  ;;  %v728_v27 = vand.u32 65535, %v9248_v60  ;;  %v711_v7 = vmul.u32 %v707_v19, %v9239_v55 }
  0xf0   : > { %v1095_v12 = vadd.f32 0.041655596, %v1094_v2  ;;  %v1102_v6 = vadd.f32 0.008332121, %v1101_v63  ;;  %v714_v33 = vshll.u32 %v9256_v11, 16  ;;  %vm716_vm0 = vc.u32 %v708_v39, %v712_v32 }
  0xf1   : > { %v718_v10 = vadd.s32 %v712_v32, %v708_v39  ;;  %vm8390_vm1 = vcmp.lt.s32.totalorder %v8389_v17, 0  ;;  %v717_v41 = vsel %vm716_vm0, 1, %v15066_v0  ;;  %v731_v54 = vmul.u32 %v729_v23, %v704_v51 }
  0xf2   : > { %v1096_v14 = vmul.f32 %v1095_v12, %v1093_v56  ;;  %v1103_v26 = vmul.f32 %v1102_v6, %v1093_v56  ;;  %v1229_v53 = vsel %vm8390_vm1, 0, %v8389_v17  ;;  %v719_v22 = vadd.s32 %v717_v41, %v711_v7 }
  0xf3   : > { %vm720_vm2 = vc.u32 %v718_v10, %v714_v33  ;;  %vm9268_vm3 = vcmp.le.f32.partialorder %v1120_v62, 0.7853982  ;;  %v1230_v19 = vsub.s32 32, %v1229_v53  ;;  %v691_v2 = vsel %vm687_vm10, %v671_v24, %v9192_v38 }
  0xf4   : > { %v1097_v52 = vadd.f32 -0.4999988, %v1096_v14  ;;  %v1104_v1 = vadd.f32 -0.16666654, %v1103_v26  ;;  %vm1112_vm4 = vcmp.eq.s32.totalorder %v9243_v58, 0  ;;  %vm1115_vm5 = vcmp.eq.s32.totalorder %v9243_v58, 2 }
  0xf5   : > { %v1234_v63 = vsub.s32 4294967266, %v1229_v53  ;;  %v1245_v35 = vsel %vm1122_vm15, %v1244_v34, %v9196_v47  ;;  %v721_v32 = vsel %vm720_vm2, 1, %v15066_v0  ;;  %v732_v62 = vmul.u32 %v728_v27, %v9239_v55 }
  0xf6   : > { %vm356_vm6 = vcmp.gt.s32.totalorder %v9226_v50, 0  ;;  %v1098_v39 = vmul.f32 %v1097_v52, %v1093_v56  ;;  %v1105_v12 = vmul.f32 %v1104_v1, %v1093_v56  ;;  %vm1111_vm7 = vcmp.lt.s32.totalorder %v9243_v58, 2 }
  0xf7   : > { %v1232_v38 = vshrl.u32 %v1214_v61, %v1230_v19  ;;  %v723_v24 = vadd.s32 %v721_v32, %v719_v22  ;;  %vm1108_vm8 = vweird.f32 %v8981_v43  ;;  %v1231_v6 = vshll.u32 %v9219_v40, %v1229_v53 }
  0xf8   : > { %v1235_v17 = vadd.s32 127, %v1234_v63  ;;  %v730_v7 = vmul.u32 %v728_v27, %v704_v51  ;;  %v734_v33 = vshll.u32 %v731_v54, 16  ;;  %v1099_v47 = vadd.f32 1.0, %v1098_v39 }
  0xf9   : > { %v1106_v34 = vadd.f32 1.0, %v1105_v12  ;;  %v713_v10 = vshrl.u32 %v709_v15, 16  ;;  %v736_v14 = vshll.u32 %v732_v62, 16  ;;  %v1233_v26 = vor.u32 %v1232_v38, %v1231_v6 }
  0xfa   : > { %v1236_v41 = vshll.u32 %v1235_v17, 23  ;;  %vm738_vm9 = vc.u32 %v730_v7, %v734_v33  ;;  %v740_v52 = vadd.s32 %v734_v33, %v730_v7  ;;  %v1116_v1 = vxor.u32 2147483648, %v1099_v47 }
  0xfb   : > { %v1107_v56 = vmul.f32 %v1106_v34, %v9234_v48  ;;  %v724_v61 = vadd.s32 %v723_v24, %v713_v10  ;;  %v733_v22 = vmul.u32 %v729_v23, %v9239_v55  ;;  %v693_v40 = vsel %vm689_vm12, %v9171_v46, %v692_v30 }
  0xfc   : > { %v1237_v19 = vor.u32 4788187, %v1236_v41  ;;  %v739_v51 = vsel %vm738_vm9, 1, %v15066_v0  ;;  %vm742_vm10 = vc.u32 %v740_v52, %v736_v14  ;;  %v715_v27 = vshrl.u32 %v9256_v11, 16 }
  0xfd   : > { %v1113_v15 = vxor.u32 2147483648, %v1107_v56  ;;  %v741_v53 = vadd.s32 %v739_v51, %v733_v22  ;;  %v743_v63 = vsel %vm742_vm10, 1, %v15066_v0  ;;  %v1240_v48 = vcvt.s32.f32 %v1233_v26 }
  0xfe   : > { %v1238_v32 = vand.u32 2147483647, %v1237_v19  ;;  %v1247_v39 = vsel %vm9268_vm3, 0, %v1245_v35  ;;  %v735_v55 = vshrl.u32 %v731_v54, 16  ;;  %v1117_v46 = vsel %vm1115_vm5, %v1116_v1, %v1107_v56 }
  0xff   : > { %v1114_v23 = vsel %vm1112_vm4, %v1099_v47, %v1113_v15  ;;  %v9300_v30 = vadd.s32 %v724_v61, %v715_v27  ;;  %v745_v12 = vadd.s32 %v743_v63, %v741_v53  ;;  %v694_v24 = vsel %vm688_vm13, %v691_v2, %v693_v40 }
 0x100   : > { %v1118_v11 = vsel %vm1111_vm7, %v1114_v23, %v1117_v46  ;;  %v1241_v38 = vmul.f32 %v1240_v48, %v1238_v32  ;;  %v810_v6 = vand.u32 2147483647, %v8979_v37  ;;  %v737_v35 = vshrl.u32 %v732_v62, 16 }
 0x101   : > { %v9309_v54 = vsel %vm1108_vm8, nan, %v1118_v11  ;;  %v9311_v17 = vadd.s32 %v740_v52, %v736_v14  ;;  %v746_v7 = vadd.s32 %v745_v12, %v735_v55  ;;  %v357_v33 = vsel %vm356_vm6, %v9226_v50, 0 }
 0x102   : > { %v8376_v58 = vadd.s32 4294967169, %v9117_v9  ;;  %1329 = vmatpush.msra.mxu0 %v9309_v54  ;;  %v1242_v21 = vxor.u32 2147483648, %v1241_v38  ;;  %v1264_v2 = vadd.s32 3, %v1247_v39  ;;  %v748_v34 = vmul.u32 %v9217_v13, %v694_v24 }
 0x103   : > { %v747_v47 = vadd.s32 %v746_v7, %v737_v35  ;;  %vm750_vm11 = vc.u32 %v9300_v30, %v9311_v17  ;;  %v831_v43 = vshrl.u32 %v15059_v25, %v9224_v49  ;;  %v817_v50 = vand.u32 8388607, %v810_v6 }
 0x104   : > { %v1243_v62 = vsel %vm1122_vm15, %v1242_v21, %v1241_v38  ;;  %v830_v9 = vshll.u32 %v15061_v20, %v9186_v57  ;;  %v834_v10 = vshrl.u32 %v15057_v31, %v9224_v49  ;;  %v833_v26 = vshll.u32 %v15059_v25, %v9186_v57 }
 0x105   : > { %v9334_v13 = vsel %vm9268_vm3, %v8983_v44, %v1243_v62  ;;  %v751_v14 = vadd.s32 1, %v747_v47  ;;  %v837_v41 = vshrl.u32 %v15055_v36, %v9224_v49  ;;  %v828_v56 = vshrl.u32 %v15061_v20, %v9224_v49 }
 0x106   : > { %v1248_v52 = vmul.f32 %v9334_v13, %v9334_v13  ;;  %v839_v1 = vshll.u32 %v15055_v36, %v9186_v57  ;;  %v840_v60 = vshrl.u32 %v15053_v42, %v9224_v49  ;;  %v9348_v22 = vor.u32 %v831_v43, %v830_v9 }
 0x107   : > { %v752_v61 = vsel %vm750_vm11, %v751_v14, %v747_v47  ;;  %v9350_v19 = vor.u32 %v834_v10, %v833_v26  ;;  %v836_v40 = vshll.u32 %v15057_v31, %v9186_v57  ;;  %v9354_v63 = vand.u32 3, %v1264_v2 }
 0x108   : > { %v1249_v51 = vmul.f32 -0.001358992, %v1248_v52  ;;  %v1256_v15 = vmul.f32 -0.00019511016, %v1248_v52  ;;  %v753_v27 = vadd.s32 %v752_v61, %v748_v34  ;;  %v841_v53 = vor.u32 %v840_v60, %v839_v1 }
 0x109   : > { %v818_v32 = vor.u32 8388608, %v817_v50  ;;  %v827_v48 = vshll.u32 %v15063_v18, %v9186_v57  ;;  %v838_v39 = vor.u32 %v837_v41, %v836_v40  ;;  %vm845_vm12 = vcmp.lt.s32.totalorder %v9142_v16, 4 }
 0x10a   : > { %v1250_v55 = vadd.f32 0.041655596, %v1249_v51  ;;  %v1257_v23 = vadd.f32 0.008332121, %v1256_v15  ;;  %v754_v46 = vadd.s32 536870912, %v753_v27  ;;  %vm842_vm13 = vcmp.lt.s32.totalorder %v9142_v16, 1 }
 0x10b   : > { %v9359_v12 = vor.u32 %v828_v56, %v827_v48  ;;  %vm844_vm14 = vcmp.lt.s32.totalorder %v9142_v16, 3  ;;  %v855_v11 = vsel %vm845_vm12, %v841_v53, 1326507024  ;;  %v854_v57 = vsel %vm842_vm13, %v9348_v22, %v9350_v19 }
 0x10c   : > { %v1251_v38 = vmul.f32 %v1250_v55, %v1248_v52  ;;  %v1258_v24 = vmul.f32 %v1257_v23, %v1248_v52  ;;  %v9365_v35 = vshrl.u32 %v754_v46, 30  ;;  %v9371_v7 = vadd.s32 1, %v8376_v58 }
 0x10d   : > { %v851_v21 = vsel %vm845_vm12, %v838_v39, 920167782  ;;  %v856_v2 = vsel %vm844_vm14, %v838_v39, %v855_v11  ;;  %v9377_v47 = vshll.u32 %v818_v32, 8  ;;  %vm843_vm15 = vcmp.lt.s32.totalorder %v9142_v16, 2 }
 0x10e   : > { %v1252_v34 = vadd.f32 -0.4999988, %v1251_v38  ;;  %v1259_v43 = vadd.f32 -0.16666654, %v1258_v24  ;;  %v756_v62 = vshll.u32 %v9365_v35, 30  ;;  %v9381_v50 = vshrl.u32 %v357_v33, 5 }
 0x10f   : > { %v9383_v9 = vand.u32 31, %v357_v33  ;;  %v850_v58 = vsel %vm842_vm13, %v9359_v12, %v9348_v22  ;;  %v857_v10 = vsel %vm843_vm15, %v854_v57, %v856_v2  ;;  %vm1266_vm0 = vcmp.lt.s32.totalorder %v9354_v63, 2 }
 0x110   : > { %v1253_v14 = vmul.f32 %v1252_v34, %v1248_v52  ;;  %v1260_v26 = vmul.f32 %v1259_v43, %v1248_v52  ;;  %v9392_v41 = vsub.s32 %v753_v27, %v756_v62  ;;  %v852_v56 = vsel %vm844_vm14, %v9350_v19, %v851_v21 }
 0x111   : > { %vm1263_vm1 = vweird.f32 %v8983_v44  ;;  %v859_v33 = vand.u32 65535, %v9377_v47  ;;  %v860_v1 = vshrl.u32 %v9377_v47, 16  ;;  %v861_v60 = vand.u32 65535, %v857_v10 }
 0x112   : > { %v862_v61 = vshrl.u32 %v857_v10, 16  ;;  %v1254_v40 = vadd.f32 1.0, %v1253_v14  ;;  %v1261_v51 = vadd.f32 1.0, %v1260_v26  ;;  %vm758_vm2 = vcmp.lt.s32.totalorder %v9392_v41, 0 }
 0x113   : > { %v759_v52 = vsub.s32 0, %v9392_v41  ;;  %vm1267_vm3 = vcmp.eq.s32.totalorder %v9354_v63, 0  ;;  %vm657_vm4 = vcmp.lt.s32.totalorder %v8985_v45, 0  ;;  %v853_v15 = vsel %vm843_vm15, %v850_v58, %v852_v56 }
 0x114   : > { %v864_v27 = vmul.u32 %v862_v61, %v859_v33  ;;  %v9406_v53 = vmul.u32 %v861_v60, %v860_v1  ;;  %v1262_v32 = vmul.f32 %v1261_v51, %v9334_v13  ;;  %vm1270_vm5 = vcmp.eq.s32.totalorder %v9354_v63, 2 }
 0x115   : > { %v1271_v48 = vxor.u32 2147483648, %v1254_v40  ;;  %v760_v39 = vsel %vm758_vm2, %v759_v52, %v9392_v41  ;;  %v749_v55 = vadd.s32 %v9311_v17, %v9300_v30  ;;  %v826_v46 = vshrl.u32 %v15063_v18, %v9224_v49 }
 0x116   : > { %v761_v23 = vclz %v760_v39  ;;  %v867_v11 = vshll.u32 %v864_v27, 16  ;;  %v1268_v38 = vxor.u32 2147483648, %v1262_v32  ;;  %vm9417_vm6 = vcmp.le.f32.partialorder %v655_v59, 0.7853982 }
 0x117   : > { %v779_v13 = vsub.s32 4, %v9365_v35  ;;  %v863_v57 = vmul.u32 %v861_v60, %v859_v33  ;;  %v883_v21 = vand.u32 65535, %v853_v15  ;;  %v1272_v2 = vsel %vm1270_vm5, %v1271_v48, %v1262_v32 }
 0x118   : > { %v8380_v34 = vadd.s32 4294967294, %v761_v23  ;;  %v866_v43 = vmul.u32 %v862_v61, %v860_v1  ;;  %v869_v30 = vshll.u32 %v9406_v53, 16  ;;  %v1269_v49 = vsel %vm1267_vm3, %v1254_v40, %v1268_v38 }
 0x119   : > { %vm871_vm7 = vc.u32 %v863_v57, %v867_v11  ;;  %v873_v17 = vadd.s32 %v867_v11, %v863_v57  ;;  %v884_v62 = vshrl.u32 %v853_v15, 16  ;;  %v1273_v59 = vsel %vm1266_vm0, %v1269_v49, %v1272_v2 }
 0x11a   : > { %vm8381_vm8 = vcmp.lt.s32.totalorder %v8380_v34, 0  ;;  %v846_v58 = vsel %vm842_vm13, %v826_v46, %v9359_v12  ;;  %v872_v10 = vsel %vm871_vm7, 1, %v15066_v0  ;;  %v9433_v14 = vsel %vm1263_vm1, nan, %v1273_v59 }
 0x11b   : > { %v764_v26 = vsel %vm8381_vm8, 0, %v8380_v34  ;;  %v874_v56 = vadd.s32 %v872_v10, %v866_v43  ;;  %vm875_vm9 = vc.u32 %v873_v17, %v869_v30  ;;  %1358 = vmatpush.msra.mxu1 %v9433_v14  ;;  %v847_v63 = vsel %vm845_vm12, %v9350_v19, 2102212464 }
 0x11c   : > { %v765_v60 = vsub.s32 32, %v764_v26  ;;  %v769_v61 = vsub.s32 4294967266, %v764_v26  ;;  %v876_v40 = vsel %vm875_vm9, 1, %v15066_v0  ;;  %v780_v12 = vsel %vm657_vm4, %v779_v13, %v9365_v35 }
 0x11d   : > { %v878_v44 = vadd.s32 %v876_v40, %v874_v56  ;;  %v886_v51 = vmul.u32 %v884_v62, %v859_v33  ;;  %v887_v52 = vmul.u32 %v883_v21, %v860_v1  ;;  %v766_v15 = vshll.u32 %v9392_v41, %v764_v26 }
 0x11e   : > { %v767_v32 = vshrl.u32 %v749_v55, %v765_v60  ;;  %v770_v48 = vadd.s32 127, %v769_v61  ;;  %v345_v39 = vand.u32 2147483647, %v8991_v3  ;;  %v848_v23 = vsel %vm844_vm14, %v9348_v22, %v847_v63 }
 0x11f   : > { %v868_v19 = vshrl.u32 %v864_v27, 16  ;;  %v885_v46 = vmul.u32 %v883_v21, %v859_v33  ;;  %v889_v11 = vshll.u32 %v886_v51, 16  ;;  %v782_v35 = vsel %vm9417_vm6, 0, %v780_v12 }
 0x120   : > { %v768_v38 = vor.u32 %v767_v32, %v766_v15  ;;  %v771_v57 = vshll.u32 %v770_v48, 23  ;;  %v888_v13 = vmul.u32 %v884_v62, %v860_v1  ;;  %vm511_vm10 = vcmp.gt.s32.totalorder %v9371_v7, 0 }
 0x121   : > { %v879_v41 = vadd.s32 %v878_v44, %v868_v19  ;;  %v891_v55 = vshll.u32 %v887_v52, 16  ;;  %vm893_vm11 = vc.u32 %v885_v46, %v889_v11  ;;  %v895_v2 = vadd.s32 %v889_v11, %v885_v46 }
 0x122   : > { %v9452_v34 = vsub.s32 32, %v9383_v9  ;;  %v772_v43 = vor.u32 4788187, %v771_v57  ;;  %v894_v22 = vsel %vm893_vm11, 1, %v15066_v0  ;;  %v352_v33 = vand.u32 8388607, %v345_v39 }
 0x123   : > { %v849_v27 = vsel %vm843_vm15, %v846_v58, %v848_v23  ;;  %v870_v1 = vshrl.u32 %v9406_v53, 16  ;;  %v896_v21 = vadd.s32 %v894_v22, %v888_v13  ;;  %vm897_vm12 = vc.u32 %v895_v2, %v891_v55 }
 0x124   : > { %v773_v30 = vand.u32 2147483647, %v772_v43  ;;  %v775_v49 = vcvt.s32.f32 %v768_v38  ;;  %v799_v17 = vadd.s32 3, %v782_v35  ;;  %v898_v62 = vsel %vm897_vm12, 1, %v15066_v0 }
 0x125   : > { %v9461_v59 = vadd.s32 %v879_v41, %v870_v1  ;;  %v890_v10 = vshrl.u32 %v886_v51, 16  ;;  %v892_v26 = vshrl.u32 %v887_v52, 16  ;;  %v900_v56 = vadd.s32 %v898_v62, %v896_v21 }
 0x126   : > { %v776_v60 = vmul.f32 %v775_v49, %v773_v30  ;;  %v9463_v61 = vadd.s32 %v895_v2, %v891_v55  ;;  %v353_v63 = vor.u32 8388608, %v352_v33  ;;  %v366_v16 = vshrl.u32 %v15059_v25, %v9452_v34 }
 0x127   : > { %v901_v53 = vadd.s32 %v900_v56, %v890_v10  ;;  %v362_v58 = vshll.u32 %v15063_v18, %v9383_v9  ;;  %v363_v40 = vshrl.u32 %v15061_v20, %v9452_v34  ;;  %v369_v12 = vshrl.u32 %v15057_v31, %v9452_v34 }
 0x128   : > { %v777_v44 = vxor.u32 2147483648, %v776_v60  ;;  %v365_v51 = vshll.u32 %v15061_v20, %v9383_v9  ;;  %v371_v52 = vshll.u32 %v15057_v31, %v9383_v9  ;;  %v372_v15 = vshrl.u32 %v15055_v36, %v9452_v34 }
 0x129   : > { %v902_v32 = vadd.s32 %v901_v53, %v892_v26  ;;  %v368_v48 = vshll.u32 %v15059_v25, %v9383_v9  ;;  %v374_v23 = vshll.u32 %v15055_v36, %v9383_v9  ;;  %v375_v19 = vshrl.u32 %v15053_v42, %v9452_v34 }
 0x12a   : > { %v778_v46 = vsel %vm657_vm4, %v777_v44, %v776_v60  ;;  %vm905_vm13 = vc.u32 %v9461_v59, %v9463_v61  ;;  %v9489_v11 = vor.u32 %v366_v16, %v365_v51  ;;  %v373_v38 = vor.u32 %v372_v15, %v371_v52 }
 0x12b   : > { %v781_v57 = vsel %vm9417_vm6, %v8985_v45, %v778_v46  ;;  %v906_v35 = vadd.s32 1, %v902_v32  ;;  %v9494_v13 = vor.u32 %v369_v12, %v368_v48  ;;  %v376_v9 = vor.u32 %v375_v19, %v374_v23 }
 0x12c   : > { %v512_v41 = vsel %vm511_vm10, %v9371_v7, 0  ;;  %v783_v55 = vmul.f32 %v781_v57, %v781_v57  ;;  %v903_v2 = vmul.u32 %v9377_v47, %v849_v27  ;;  %v9500_v22 = vor.u32 %v363_v40, %v362_v58 }
 0x12d   : > { %v907_v43 = vsel %vm905_vm13, %v906_v35, %v902_v32  ;;  %vm377_vm14 = vcmp.lt.s32.totalorder %v9381_v50, 1  ;;  %vm380_vm15 = vcmp.lt.s32.totalorder %v9381_v50, 4  ;;  %v9506_v30 = vand.u32 3, %v799_v17 }
 0x12e   : > { %v784_v24 = vmul.f32 -0.001358992, %v783_v55  ;;  %v791_v33 = vmul.f32 -0.00019511016, %v783_v55  ;;  %v908_v1 = vadd.s32 %v907_v43, %v903_v2  ;;  %v386_v21 = vsel %vm380_vm15, %v373_v38, 920167782 }
 0x12f   : > { %v389_v7 = vsel %vm377_vm14, %v9489_v11, %v9494_v13  ;;  %v390_v47 = vsel %vm380_vm15, %v376_v9, 1326507024  ;;  %v9514_v27 = vshll.u32 %v353_v63, 8  ;;  %vm379_vm0 = vcmp.lt.s32.totalorder %v9381_v50, 3 }
 0x130   : > { %v785_v49 = vadd.f32 0.041655596, %v784_v24  ;;  %v792_v62 = vadd.f32 0.008332121, %v791_v33  ;;  %v909_v10 = vadd.s32 536870912, %v908_v1  ;;  %vm378_vm1 = vcmp.lt.s32.totalorder %v9381_v50, 2 }
 0x131   : > { %v385_v17 = vsel %vm377_vm14, %v9500_v22, %v9489_v11  ;;  %v387_v26 = vsel %vm379_vm0, %v9494_v13, %v386_v21  ;;  %v391_v56 = vsel %vm379_vm0, %v373_v38, %v390_v47  ;;  %v394_v58 = vand.u32 65535, %v9514_v27 }
 0x132   : > { %v786_v60 = vmul.f32 %v785_v49, %v783_v55  ;;  %v793_v63 = vmul.f32 %v792_v62, %v783_v55  ;;  %v9527_v16 = vshrl.u32 %v909_v10, 30  ;;  %v392_v53 = vsel %vm378_vm1, %v389_v7, %v391_v56 }
 0x133   : > { %v395_v40 = vshrl.u32 %v9514_v27, 16  ;;  %v396_v12 = vand.u32 65535, %v392_v53  ;;  %v397_v44 = vshrl.u32 %v392_v53, 16  ;;  %v388_v32 = vsel %vm378_vm1, %v385_v17, %v387_v26 }
 0x134   : > { %v787_v51 = vadd.f32 -0.4999988, %v786_v60  ;;  %v794_v52 = vadd.f32 -0.16666654, %v793_v63  ;;  %v911_v15 = vshll.u32 %v9527_v16, 30  ;;  %v9536_v48 = vshrl.u32 %v512_v41, 5 }
 0x135   : > { %v9538_v23 = vand.u32 31, %v512_v41  ;;  %v399_v19 = vmul.u32 %v397_v44, %v394_v58  ;;  %v400_v46 = vmul.u32 %v396_v12, %v395_v40  ;;  %vm801_vm2 = vcmp.lt.s32.totalorder %v9506_v30, 2 }
 0x136   : > { %v788_v38 = vmul.f32 %v787_v51, %v783_v55  ;;  %v795_v35 = vmul.f32 %v794_v52, %v783_v55  ;;  %v912_v9 = vsub.s32 %v908_v1, %v911_v15  ;;  %vm798_vm3 = vweird.f32 %v8985_v45 }
 0x137   : > { %v398_v2 = vmul.u32 %v396_v12, %v394_v58  ;;  %v402_v43 = vshll.u32 %v399_v19, 16  ;;  %v418_v24 = vand.u32 65535, %v388_v32  ;;  %v419_v33 = vshrl.u32 %v388_v32, 16 }
 0x138   : > { %v789_v21 = vadd.f32 1.0, %v788_v38  ;;  %v796_v7 = vadd.f32 1.0, %v795_v35  ;;  %vm913_vm4 = vcmp.lt.s32.totalorder %v912_v9, 0  ;;  %v914_v47 = vsub.s32 0, %v912_v9 }
 0x139   : > { %v401_v49 = vmul.u32 %v397_v44, %v395_v40  ;;  %v404_v41 = vshll.u32 %v400_v46, 16  ;;  %vm406_vm5 = vc.u32 %v398_v2, %v402_v43  ;;  %v408_v62 = vadd.s32 %v402_v43, %v398_v2 }
 0x13a   : > { %v797_v10 = vmul.f32 %v796_v7, %v781_v57  ;;  %v806_v17 = vxor.u32 2147483648, %v789_v21  ;;  %v915_v55 = vsel %vm913_vm4, %v914_v47, %v912_v9  ;;  %v407_v26 = vsel %vm406_vm5, 1, %v15066_v0 }
 0x13b   : > { %vm802_vm6 = vcmp.eq.s32.totalorder %v9506_v30, 0  ;;  %v916_v1 = vclz %v915_v55  ;;  %v409_v56 = vadd.s32 %v407_v26, %v401_v49  ;;  %vm410_vm7 = vc.u32 %v408_v62, %v404_v41 }
 0x13c   : > { %v803_v60 = vxor.u32 2147483648, %v797_v10  ;;  %vm805_vm8 = vcmp.eq.s32.totalorder %v9506_v30, 2  ;;  %v411_v63 = vsel %vm410_vm7, 1, %v15066_v0  ;;  %v421_v53 = vmul.u32 %v419_v33, %v394_v58 }
 0x13d   : > { %v904_v12 = vadd.s32 %v9463_v61, %v9461_v59  ;;  %v8383_v44 = vadd.s32 4294967294, %v916_v1  ;;  %v361_v57 = vshrl.u32 %v15063_v18, %v9452_v34  ;;  %v403_v51 = vshrl.u32 %v399_v19, 16 }
 0x13e   : > { %v804_v52 = vsel %vm802_vm6, %v789_v21, %v803_v60  ;;  %v807_v15 = vsel %vm805_vm8, %v806_v17, %v797_v10  ;;  %v413_v32 = vadd.s32 %v411_v63, %v409_v56  ;;  %v422_v38 = vmul.u32 %v418_v24, %v395_v40 }
 0x13f   : > { %v808_v35 = vsel %vm801_vm2, %v804_v52, %v807_v15  ;;  %vm8384_vm9 = vcmp.lt.s32.totalorder %v8383_v44, 0  ;;  %v381_v2 = vsel %vm377_vm14, %v361_v57, %v9500_v22  ;;  %v424_v43 = vshll.u32 %v421_v53, 16 }
 0x140   : > { %v9557_v59 = vsel %vm798_vm3, nan, %v808_v35  ;;  %v919_v61 = vsel %vm8384_vm9, 0, %v8383_v44  ;;  %v414_v34 = vadd.s32 %v413_v32, %v403_v51  ;;  %v420_v19 = vmul.u32 %v418_v24, %v394_v58 }
 0x141   : > { %1330 = vmatpush.msra.mxu0 %v9557_v59  ;;  %v920_v21 = vsub.s32 32, %v919_v61  ;;  %v924_v7 = vsub.s32 4294967266, %v919_v61  ;;  %v382_v30 = vsel %vm380_vm15, %v9494_v13, 2102212464  ;;  %v405_v47 = vshrl.u32 %v400_v46, 16 }
 0x142   : > { %v423_v49 = vmul.u32 %v419_v33, %v395_v40  ;;  %v426_v41 = vshll.u32 %v422_v38, 16  ;;  %vm428_vm10 = vc.u32 %v420_v19, %v424_v43  ;;  %v430_v22 = vadd.s32 %v424_v43, %v420_v19 }
 0x143   : > { %v921_v62 = vshll.u32 %v912_v9, %v919_v61  ;;  %v922_v45 = vshrl.u32 %v904_v12, %v920_v21  ;;  %v925_v10 = vadd.s32 127, %v924_v7  ;;  %v429_v17 = vsel %vm428_vm10, 1, %v15066_v0 }
 0x144   : > { %v383_v58 = vsel %vm379_vm0, %v9489_v11, %v382_v30  ;;  %v9567_v24 = vadd.s32 %v414_v34, %v405_v47  ;;  %v431_v55 = vadd.s32 %v429_v17, %v423_v49  ;;  %vm432_vm11 = vc.u32 %v430_v22, %v426_v41 }
 0x145   : > { %v9570_v13 = vsub.s32 32, %v9538_v23  ;;  %v923_v40 = vor.u32 %v922_v45, %v921_v62  ;;  %v926_v46 = vshll.u32 %v925_v10, 23  ;;  %v433_v33 = vsel %vm432_vm11, 1, %v15066_v0 }
 0x146   : > { %v425_v9 = vshrl.u32 %v421_v53, 16  ;;  %v9573_v26 = vadd.s32 %v430_v22, %v426_v41  ;;  %v435_v1 = vadd.s32 %v433_v33, %v431_v55  ;;  %v500_v56 = vand.u32 2147483647, %v8994_v8 }
 0x147   : > { %vm812_vm12 = vcmp.lt.s32.totalorder %v8979_v37, 0  ;;  %v927_v11 = vor.u32 4788187, %v926_v46  ;;  %v934_v60 = vsub.s32 4, %v9527_v16  ;;  %v384_v63 = vsel %vm378_vm1, %v381_v2, %v383_v58 }
 0x148   : > { %v930_v12 = vcvt.s32.f32 %v923_v40  ;;  %v427_v44 = vshrl.u32 %v422_v38, 16  ;;  %v436_v57 = vadd.s32 %v435_v1, %v425_v9  ;;  %vm440_vm13 = vc.u32 %v9567_v24, %v9573_v26 }
 0x149   : > { %v928_v53 = vand.u32 2147483647, %v927_v11  ;;  %v520_v51 = vshll.u32 %v15061_v20, %v9538_v23  ;;  %v521_v52 = vshrl.u32 %v15059_v25, %v9570_v13  ;;  %v524_v15 = vshrl.u32 %v15057_v31, %v9570_v13 }
 0x14a   : > { %v437_v32 = vadd.s32 %v436_v57, %v427_v44  ;;  %v507_v50 = vand.u32 8388607, %v500_v56  ;;  %v523_v38 = vshll.u32 %v15059_v25, %v9538_v23  ;;  %v527_v35 = vshrl.u32 %v15055_v36, %v9570_v13 }
 0x14b   : > { %v931_v2 = vmul.f32 %v930_v12, %v928_v53  ;;  %v518_v43 = vshrl.u32 %v15061_v20, %v9570_v13  ;;  %v9596_v61 = vor.u32 %v521_v52, %v520_v51  ;;  %v526_v34 = vshll.u32 %v15057_v31, %v9538_v23 }
 0x14c   : > { %v441_v19 = vadd.s32 1, %v437_v32  ;;  %v9600_v21 = vor.u32 %v524_v15, %v523_v38  ;;  %v529_v7 = vshll.u32 %v15055_v36, %v9538_v23  ;;  %v530_v30 = vshrl.u32 %v15053_v42, %v9570_v13 }
 0x14d   : > { %vm9608_vm14 = vcmp.le.f32.partialorder %v810_v6, 0.7853982  ;;  %v932_v49 = vxor.u32 2147483648, %v931_v2  ;;  %v438_v41 = vmul.u32 %v9514_v27, %v384_v63  ;;  %v517_v22 = vshll.u32 %v15063_v18, %v9538_v23 }
 0x14e   : > { %v442_v62 = vsel %vm440_vm13, %v441_v19, %v437_v32  ;;  %v508_v45 = vor.u32 8388608, %v507_v50  ;;  %v528_v10 = vor.u32 %v527_v35, %v526_v34  ;;  %v531_v17 = vor.u32 %v530_v30, %v529_v7 }
 0x14f   : > { %v933_v58 = vsel %vm812_vm12, %v932_v49, %v931_v2  ;;  %v935_v6 = vsel %vm812_vm12, %v934_v60, %v9527_v16  ;;  %v443_v55 = vadd.s32 %v442_v62, %v438_v41  ;;  %vm532_vm15 = vcmp.lt.s32.totalorder %v9536_v48, 1 }
 0x150   : > { %v936_v27 = vsel %vm9608_vm14, %v8979_v37, %v933_v58  ;;  %v9627_v23 = vor.u32 %v518_v43, %v517_v22  ;;  %vm535_vm0 = vcmp.lt.s32.totalorder %v9536_v48, 4  ;;  %v544_v40 = vsel %vm532_vm15, %v9596_v61, %v9600_v21 }
 0x151   : > { %v938_v46 = vmul.f32 %v936_v27, %v936_v27  ;;  %v444_v33 = vadd.s32 536870912, %v443_v55  ;;  %vm534_vm1 = vcmp.lt.s32.totalorder %v9536_v48, 3  ;;  %v545_v16 = vsel %vm535_vm0, %v531_v17, 1326507024 }
 0x152   : > { %vm533_vm2 = vcmp.lt.s32.totalorder %v9536_v48, 2  ;;  %v541_v9 = vsel %vm535_vm0, %v528_v10, 920167782  ;;  %v546_v1 = vsel %vm534_vm1, %v528_v10, %v545_v16  ;;  %v9642_v11 = vshll.u32 %v508_v45, 8 }
 0x153   : > { %v939_v60 = vmul.f32 -0.001358992, %v938_v46  ;;  %v946_v63 = vmul.f32 -0.00019511016, %v938_v46  ;;  %v9644_v12 = vshrl.u32 %v444_v33, 30  ;;  %v547_v44 = vsel %vm533_vm2, %v544_v40, %v546_v1 }
 0x154   : > { %v549_v57 = vand.u32 65535, %v9642_v11  ;;  %v9650_v53 = vshrl.u32 %v9642_v11, 16  ;;  %v551_v51 = vand.u32 65535, %v547_v44  ;;  %v552_v52 = vshrl.u32 %v547_v44, 16 }
 0x155   : > { %v937_v15 = vsel %vm9608_vm14, 0, %v935_v6  ;;  %v940_v32 = vadd.f32 0.041655596, %v939_v60  ;;  %v947_v50 = vadd.f32 0.008332121, %v946_v63  ;;  %v446_v38 = vshll.u32 %v9644_v12, 30 }
 0x156   : > { %v540_v35 = vsel %vm532_vm15, %v9627_v23, %v9596_v61  ;;  %v9659_v2 = vmul.u32 %v552_v52, %v549_v57  ;;  %v9662_v43 = vmul.u32 %v551_v51, %v9650_v53  ;;  %v542_v30 = vsel %vm534_vm1, %v9600_v21, %v541_v9 }
 0x157   : > { %v941_v34 = vmul.f32 %v940_v32, %v938_v46  ;;  %v948_v19 = vmul.f32 %v947_v50, %v938_v46  ;;  %v447_v7 = vsub.s32 %v443_v55, %v446_v38  ;;  %v954_v47 = vadd.s32 3, %v937_v15 }
 0x158   : > { %v553_v49 = vmul.u32 %v551_v51, %v549_v57  ;;  %v557_v41 = vshll.u32 %v9659_v2, 16  ;;  %v543_v10 = vsel %vm533_vm2, %v540_v35, %v542_v30  ;;  %v559_v17 = vshll.u32 %v9662_v43, 16 }
 0x159   : > { %v942_v22 = vadd.f32 -0.4999988, %v941_v34  ;;  %v949_v62 = vadd.f32 -0.16666654, %v948_v19  ;;  %vm448_vm3 = vcmp.lt.s32.totalorder %v447_v7, 0  ;;  %v449_v45 = vsub.s32 0, %v447_v7 }
 0x15a   : > { %vm561_vm4 = vc.u32 %v553_v49, %v557_v41  ;;  %v563_v58 = vadd.s32 %v557_v41, %v553_v49  ;;  %v955_v16 = vand.u32 3, %v954_v47  ;;  %v556_v1 = vmul.u32 %v552_v52, %v9650_v53 }
 0x15b   : > { %v943_v6 = vmul.f32 %v942_v22, %v938_v46  ;;  %v950_v55 = vmul.f32 %v949_v62, %v938_v46  ;;  %v450_v40 = vsel %vm448_vm3, %v449_v45, %v447_v7  ;;  %v562_v33 = vsel %vm561_vm4, 1, %v15066_v0 }
 0x15c   : > { %v451_v9 = vclz %v450_v40  ;;  %vm565_vm5 = vc.u32 %v563_v58, %v559_v17  ;;  %v573_v44 = vand.u32 65535, %v543_v10  ;;  %vm953_vm6 = vweird.f32 %v8979_v37 }
 0x15d   : > { %v944_v60 = vadd.f32 1.0, %v943_v6  ;;  %v951_v63 = vadd.f32 1.0, %v950_v55  ;;  %v564_v15 = vadd.s32 %v562_v33, %v556_v1  ;;  %v566_v38 = vsel %vm565_vm5, 1, %v15066_v0 }
 0x15e   : > { %v8374_v51 = vadd.s32 4294967294, %v451_v9  ;;  %v574_v46 = vshrl.u32 %v543_v10, 16  ;;  %vm956_vm7 = vcmp.lt.s32.totalorder %v955_v16, 2  ;;  %vm957_vm8 = vcmp.eq.s32.totalorder %v955_v16, 0 }
 0x15f   : > { %v952_v32 = vmul.f32 %v951_v63, %v936_v27  ;;  %v961_v50 = vxor.u32 2147483648, %v944_v60  ;;  %vm960_vm9 = vcmp.eq.s32.totalorder %v955_v16, 2  ;;  %v439_v52 = vadd.s32 %v9573_v26, %v9567_v24 }
 0x160   : > { %vm8375_vm10 = vcmp.lt.s32.totalorder %v8374_v51, 0  ;;  %v577_v19 = vmul.u32 %v573_v44, %v9650_v53  ;;  %v568_v49 = vadd.s32 %v566_v38, %v564_v15  ;;  %v576_v41 = vmul.u32 %v574_v46, %v549_v57 }
 0x161   : > { %v958_v35 = vxor.u32 2147483648, %v952_v32  ;;  %v454_v34 = vsel %vm8375_vm10, 0, %v8374_v51  ;;  %v962_v22 = vsel %vm960_vm9, %v961_v50, %v952_v32  ;;  %v575_v45 = vmul.u32 %v573_v44, %v549_v57 }
 0x162   : > { %v455_v30 = vsub.s32 32, %v454_v34  ;;  %v459_v47 = vsub.s32 4294967266, %v454_v34  ;;  %v456_v62 = vshll.u32 %v447_v7, %v454_v34  ;;  %v579_v6 = vshll.u32 %v576_v41, 16 }
 0x163   : > { %v959_v27 = vsel %vm957_vm8, %v944_v60, %v958_v35  ;;  %v558_v24 = vshrl.u32 %v9659_v2, 16  ;;  %v578_v26 = vmul.u32 %v574_v46, %v9650_v53  ;;  %v581_v40 = vshll.u32 %v577_v19, 16 }
 0x164   : > { %v963_v10 = vsel %vm956_vm7, %v959_v27, %v962_v22  ;;  %v457_v17 = vshrl.u32 %v439_v52, %v455_v30  ;;  %v460_v58 = vadd.s32 127, %v459_v47  ;;  %vm583_vm11 = vc.u32 %v575_v45, %v579_v6 }
 0x165   : > { %v9681_v55 = vsel %vm953_vm6, nan, %v963_v10  ;;  %v585_v57 = vadd.s32 %v579_v6, %v575_v45  ;;  %v569_v7 = vadd.s32 %v568_v49, %v558_v24  ;;  %v584_v16 = vsel %vm583_vm11, 1, %v15066_v0 }
 0x166   : > { %1359 = vmatpush.msra.mxu1 %v9681_v55  ;;  %v458_v33 = vor.u32 %v457_v17, %v456_v62  ;;  %v461_v9 = vshll.u32 %v460_v58, 23  ;;  %v537_v37 = vsel %vm535_vm0, %v9600_v21, 2102212464  ;;  %v586_v60 = vadd.s32 %v584_v16, %v578_v26 }
 0x167   : > { %vm587_vm12 = vc.u32 %v585_v57, %v581_v40  ;;  %v516_v53 = vshrl.u32 %v15063_v18, %v9570_v13  ;;  %v560_v2 = vshrl.u32 %v9662_v43, 16  ;;  %v580_v15 = vshrl.u32 %v576_v41, 16 }
 0x168   : > { %v462_v1 = vor.u32 4788187, %v461_v9  ;;  %v588_v63 = vsel %vm587_vm12, 1, %v15066_v0  ;;  %v465_v51 = vcvt.s32.f32 %v458_v33  ;;  %v538_v21 = vsel %vm534_vm1, %v9596_v61, %v537_v37 }
 0x169   : > { %v590_v32 = vadd.s32 %v588_v63, %v586_v60  ;;  %v536_v50 = vsel %vm532_vm15, %v516_v53, %v9627_v23  ;;  %v570_v38 = vadd.s32 %v569_v7, %v560_v2  ;;  %v582_v35 = vshrl.u32 %v577_v19, 16 }
 0x16a   : > { %v463_v44 = vand.u32 2147483647, %v462_v1  ;;  %v589_v52 = vadd.s32 %v585_v57, %v581_v40  ;;  %v539_v34 = vsel %vm533_vm2, %v536_v50, %v538_v21  ;;  %vm347_vm13 = vcmp.lt.s32.totalorder %v8991_v3, 0 }
 0x16b   : > { %v591_v13 = vadd.s32 %v590_v32, %v580_v15  ;;  %vm9705_vm15 = vcmp.le.f32.partialorder %v345_v39, 0.7853982  ;;  %v469_v19 = vsub.s32 4, %v9644_v12  ;;  %v593_v48 = vmul.u32 %v9642_v11, %v539_v34 }
 0x16c   : > { %v466_v46 = vmul.f32 %v465_v51, %v463_v44  ;;  %vm595_vm14 = vc.u32 %v570_v38, %v589_v52  ;;  %vm488_vm5 = vweird.f32 %v8991_v3  ;;  %vm1303_vm6 = vcmask 261120  }
 0x16d   : > { %v592_v30 = vadd.s32 %v591_v13, %v582_v35  ;;  %v470_v39 = vsel %vm347_vm13, %v469_v19, %v9644_v12  ;;  %vm502_vm7 = vcmp.lt.s32.totalorder %v8994_v8, 0  ;;  %vm9728_vm8 = vcmp.le.f32.partialorder %v500_v56, 0.7853982 }
 0x16e   : > { %v467_v43 = vxor.u32 2147483648, %v466_v46  ;;  %v472_v24 = vsel %vm9705_vm15, 0, %v470_v39  ;;  %vm643_vm12 = vweird.f32 %v8994_v8 }
 0x16f   : > { %v596_v47 = vadd.s32 1, %v592_v30  ;;  %v489_v57 = vadd.s32 3, %v472_v24 }
 0x170   : > { %v468_v61 = vsel %vm347_vm13, %v467_v43, %v466_v46  ;;  %v594_v43 = vadd.s32 %v589_v52, %v570_v38 }
 0x171   : > { %v471_v49 = vsel %vm9705_vm15, %v8991_v3, %v468_v61  ;;  %v597_v27 = vsel %vm595_vm14, %v596_v47, %v592_v30  ;;  %v490_v53 = vand.u32 3, %v489_v57 }
 0x172   : > { %v473_v41 = vmul.f32 %v471_v49, %v471_v49  ;;  %v598_v22 = vadd.s32 %v597_v27, %v593_v48  ;;  %v1275_v48 = vld [vmem:[#allocation2] sm:$0xff] }
 0x173   : > { %vm492_vm1 = vcmp.eq.s32.totalorder %v490_v53, 0  ;;  %vm495_vm2 = vcmp.eq.s32.totalorder %v490_v53, 2  ;;  %vm491_vm3 = vcmp.lt.s32.totalorder %v490_v53, 2 }
 0x174   : > { %v474_v62 = vmul.f32 -0.001358992, %v473_v41  ;;  %v481_v45 = vmul.f32 -0.00019511016, %v473_v41  ;;  %v599_v10 = vadd.s32 536870912, %v598_v22 }
 0x176   : > { %v475_v17 = vadd.f32 0.041655596, %v474_v62  ;;  %v482_v58 = vadd.f32 0.008332121, %v481_v45  ;;  %v9715_v6 = vshrl.u32 %v599_v10, 30 }
 0x178   : > { %v476_v26 = vmul.f32 %v475_v17, %v473_v41  ;;  %v483_v40 = vmul.f32 %v482_v58, %v473_v41  ;;  %v601_v33 = vshll.u32 %v9715_v6, 30  ;;  %v624_v62 = vsub.s32 4, %v9715_v6  ;;  %v1277_v58 = vld [vmem:[#allocation2 + $0x10] sm:$0xff] }
 0x17a   : > { %v477_v11 = vadd.f32 -0.4999988, %v476_v26  ;;  %v484_v9 = vadd.f32 -0.16666654, %v483_v40  ;;  %v602_v7 = vsub.s32 %v598_v22, %v601_v33  ;;  %v1276_v22 = vld [vmem:[#allocation2 + $0x8] sm:$0xff]  ;;  %v625_v17 = vsel %vm502_vm7, %v624_v62, %v9715_v6 }
 0x17b   : > { %v627_v26 = vsel %vm9728_vm8, 0, %v625_v17 }
 0x17c   : > { %v478_v16 = vmul.f32 %v477_v11, %v473_v41  ;;  %v485_v1 = vmul.f32 %v484_v9, %v473_v41  ;;  %vm603_vm0 = vcmp.lt.s32.totalorder %v602_v7, 0  ;;  %v604_v12 = vsub.s32 0, %v602_v7  ;;  %v1280_v11 = vld [vmem:[%s15048_s3 + $0x8] sm:$0xff] }
 0x17d   : > { %1290 = vperm.xlu1 %8645, %v1280_v11  }
 0x17e   : > { %v479_v37 = vadd.f32 1.0, %v478_v16  ;;  %v486_v60 = vadd.f32 1.0, %v485_v1  ;;  %v605_v2 = vsel %vm603_vm0, %v604_v12, %v602_v7  ;;  %v1278_v1 = vld [vmem:[#allocation2 + $0x18] sm:$0xff] }
 0x17f   : > { %v606_v51 = vclz %v605_v2 }
 0x180   : > { %v487_v63 = vmul.f32 %v486_v60, %v471_v49  ;;  %v496_v44 = vxor.u32 2147483648, %v479_v37 }
 0x181   : > { %v8377_v32 = vadd.s32 4294967294, %v606_v51 }
 0x182   : > { %v493_v15 = vxor.u32 2147483648, %v487_v63  ;;  %v497_v21 = vsel %vm495_vm2, %v496_v44, %v487_v63  ;;  %v1281_v63 = vld [vmem:[%s15048_s3 + $0x10] sm:$0xff]  ;;  %v1282_v44 = vld [vmem:[%s15048_s3 + $0x18] sm:$0xff] }
 0x183   : > { %vm8378_vm4 = vcmp.lt.s32.totalorder %v8377_v32, 0  ;;  %1295 = vperm.xlu0 %8644, %v1281_v63   ;;  %1300 = vperm.xlu2 %8643, %v1282_v44  }
 0x184   : > { %v494_v50 = vsel %vm492_vm1, %v479_v37, %v493_v15  ;;  %v609_v35 = vsel %vm8378_vm4, 0, %v8377_v32 }
 0x185   : > { %v498_v46 = vsel %vm491_vm3, %v494_v50, %v497_v21  ;;  %v610_v34 = vsub.s32 32, %v609_v35  ;;  %v614_v30 = vsub.s32 4294967266, %v609_v35  ;;  %v611_v23 = vshll.u32 %v602_v7, %v609_v35  ;;  %8646 = vset.pattern.permute.xlu1 %v8849_v4 }
 0x186   : > { %v499_v13 = vsel %vm488_vm5, nan, %v498_v46  ;;  %v644_v7 = vadd.s32 3, %v627_v26  ;;  %2672 = vperm.xlu1 %8646, %v1282_v44   ;;  %v1279_v46 = vld [vmem:[%s15048_s3] sm:$0xff] }
 0x187   : > { %1331 = vmatpush.msra.mxu0 %v499_v13  ;;  %v612_v61 = vshrl.u32 %v594_v43, %v610_v34  ;;  %v615_v47 = vadd.s32 127, %v614_v30 }
 0x188   : > { %8391 = vmatmul.msk.f32.vlgmr.msra.gmra.mxu0 %vm1303_vm6, %v1275_v48  ;;  %v645_v60 = vand.u32 3, %v644_v7 }
 0x189   : > { %4059 = vmatpush.msrb.mxu0 %v9005_v28  ;;  %v613_v19 = vor.u32 %v612_v61, %v611_v23  ;;  %v616_v49 = vshll.u32 %v615_v47, 23 }
 0x18a   : > { %vm647_vm9 = vcmp.eq.s32.totalorder %v645_v60, 0  ;;  %vm650_vm10 = vcmp.eq.s32.totalorder %v645_v60, 2  ;;  %vm646_vm11 = vcmp.lt.s32.totalorder %v645_v60, 2 }
 0x18b   : > { %4060 = vmatpush.msrb.mxu0 %v9309_v54  ;;  %v617_v41 = vor.u32 4788187, %v616_v49  ;;  %v620_v38 = vcvt.s32.f32 %v613_v19  ;;  %1285 = vperm.xlu2 %8643, %v1279_v46  }
 0x18c   : > { %8648 = vset.pattern.permute.xlu0 %v8849_v4 }
 0x18d   : > { %4061 = vmatpush.msrb.mxu0 %v9557_v59  ;;  %v618_v3 = vand.u32 2147483647, %v617_v41  ;;  %2664 = vperm.xlu0 %8648, %v1280_v11  }
 0x18e   : > { %2660 = vperm.xlu1 %8646, %v1279_v46  }
 0x18f   : > { %4062 = vmatpush.msrb.mxu0 %v499_v13  ;;  %v621_v52 = vmul.f32 %v620_v38, %v618_v3 }
 0x190   : > { %8392 = vmatmul.msk.f32.gmra.mxu0 %vm1303_vm6, %v1276_v22 }
 0x191   : > { %v622_v27 = vxor.u32 2147483648, %v621_v52 }
 0x193   : > { %v623_v54 = vsel %vm502_vm7, %v622_v27, %v621_v52  ;;  %8647 = vset.pattern.permute.xlu2 %v8849_v4 }
 0x194   : > { %v626_v59 = vsel %vm9728_vm8, %v8994_v8, %v623_v54  ;;  %2668 = vperm.xlu2 %8647, %v1281_v63  }
 0x195   : > { %v628_v45 = vmul.f32 %v626_v59, %v626_v59  ;;  %8651 = vset.pattern.permute.xlu0 %v8850_v5 }
 0x196   : > { %8650 = vset.pattern.permute.xlu1 %v8850_v5  ;;  %4176 = vperm.xlu0 %8651, %v1279_v46  }
 0x197   : > { %v629_v39 = vmul.f32 -0.001358992, %v628_v45  ;;  %v636_v10 = vmul.f32 -0.00019511016, %v628_v45  ;;  %4184 = vperm.xlu1 %8650, %v1281_v63  }
 0x198   : > { %8393 = vmatmul.msk.f32.gmra.mxu0 %vm1303_vm6, %v1277_v58 }
 0x199   : > { %v630_v24 = vadd.f32 0.041655596, %v629_v39  ;;  %v637_v56 = vadd.f32 0.008332121, %v636_v10 }
 0x19b   : > { %v631_v40 = vmul.f32 %v630_v24, %v628_v45  ;;  %v638_v33 = vmul.f32 %v637_v56, %v628_v45 }
 0x19c   : > { %8649 = vset.pattern.permute.xlu2 %v8850_v5 }
 0x19d   : > { %v632_v9 = vadd.f32 -0.4999988, %v631_v40  ;;  %v639_v57 = vadd.f32 -0.16666654, %v638_v33  ;;  %4188 = vperm.xlu2 %8649, %v1282_v44  }
 0x19f   : > { %v633_v16 = vmul.f32 %v632_v9, %v628_v45  ;;  %v640_v6 = vmul.f32 %v639_v57, %v628_v45 }
 0x1a0   : > { %8394 = vmatmul.msk.f32.gmra.mxu0 %vm1303_vm6, %v1278_v1 }
 0x1a1   : > { %v634_v12 = vadd.f32 1.0, %v633_v16  ;;  %v641_v37 = vadd.f32 1.0, %v640_v6 }
 0x1a3   : > { %v642_v53 = vmul.f32 %v641_v37, %v626_v59  ;;  %v651_v2 = vxor.u32 2147483648, %v634_v12 }
 0x1a5   : > { %v648_v51 = vxor.u32 2147483648, %v642_v53  ;;  %v652_v32 = vsel %vm650_vm10, %v651_v2, %v642_v53  ;;  %4180 = vperm.xlu2 %8649, %v1280_v11  }
 0x1a7   : > { %v649_v15 = vsel %vm647_vm9, %v634_v12, %v648_v51 }
 0x1a8   : > { %v653_v50 = vsel %vm646_vm11, %v649_v15, %v652_v32 }
 0x1a9   : > { %v654_v21 = vsel %vm643_vm12, nan, %v653_v50 }
 0x1aa   : > { %1360 = vmatpush.msra.mxu1 %v654_v21 }
 0x1ab   : > { %8395 = vmatmul.msk.f32.vlgmr.msra.gmra.mxu1 %vm1303_vm6, %v1275_v48 }
 0x1ac   : > { %4088 = vmatpush.msrb.mxu1 %v9007_v29 }
 0x1ae   : > { %4089 = vmatpush.msrb.mxu1 %v9433_v14 }
 0x1b0   : > { %4090 = vmatpush.msrb.mxu1 %v9681_v55 }
 0x1b2   : > { %4091 = vmatpush.msrb.mxu1 %v654_v21 }
 0x1b3   : > { %8396 = vmatmul.msk.f32.gmra.mxu1 %vm1303_vm6, %v1276_v22 }
 0x1bb   : > { %8397 = vmatmul.msk.f32.gmra.mxu1 %vm1303_vm6, %v1277_v58 }
 0x1c3   : > { %8398 = vmatmul.msk.f32.gmra.mxu1 %vm1303_vm6, %v1278_v1 }
 0x1dd   : > { %v1301_v8 = vpop.permute.xlu2 %1300 }
 0x1e5   : > { %v1286_v14 = vpop.permute.xlu2 %1285 }
 0x1ef   : > { %v1291_v35 = vpop.permute.xlu1 %1290 }
 0x1f5   : > { %v1296_v30 = vpop.permute.xlu0 %1295 }
 0x205   : > { %v1333_v29 = vpop.f32.mrf.mxu0 }
 0x206   : > { %v1334_v55 = vadd.f32 %v1333_v29, %v1286_v14 }
 0x208   : > { %v1374_v4 = vmul.f32 30.0, %v1334_v55 }
 0x20a   : > { %8659 = vtanh.f32 %v1374_v4 }
 0x20d   : > { %v1336_v13 = vpop.f32.mrf.mxu0 }
 0x20e   : > { %v1337_v43 = vadd.f32 %v1336_v13, %v1291_v35 }
 0x210   : > { %v1376_v34 = vmul.f32 30.0, %v1337_v43  ;;  %v8660_v61 = vpop.eup %8659 }
 0x211   : > { %v1390_v49 = vmul.f32 10.0, %v8660_v61 }
 0x212   : > { %8661 = vtanh.f32 %v1376_v34 }
 0x213   : > { %v1398_v3 = vadd.f32 30.0, %v1390_v49 }
 0x215   : > { %v1339_v23 = vpop.f32.mrf.mxu0  ;;  %v9768_v54 = vmul.f32 %v1398_v3, %v1334_v55 }
 0x216   : > { %v1340_v47 = vadd.f32 %v1339_v23, %v1296_v30 }
 0x217   : > { %v1417_v10 = vand.u32 2139095040, %v9768_v54 }
 0x218   : > { %v8662_v5 = vpop.eup %8661  ;;  %v1378_v19 = vmul.f32 30.0, %v1340_v47 }
 0x219   : > { %v1392_v41 = vmul.f32 10.0, %v8662_v5  ;;  %v1418_v26 = vshrl.u32 %v1417_v10, 23 }
 0x21a   : > { %8663 = vtanh.f32 %v1378_v19 }
 0x21b   : > { %v1400_v52 = vadd.f32 30.0, %v1392_v41  ;;  %v8399_v1 = vadd.s32 4294967169, %v1418_v26 }
 0x21d   : > { %v1342_v38 = vpop.f32.mrf.mxu0  ;;  %v9770_v59 = vmul.f32 %v1400_v52, %v1337_v43  ;;  %v1424_v44 = vadd.s32 1, %v8399_v1 }
 0x21e   : > { %v1343_v27 = vadd.f32 %v1342_v38, %v1301_v8 }
 0x21f   : > { %v1727_v58 = vand.u32 2139095040, %v9770_v59  ;;  %vm1425_vm13 = vcmp.gt.s32.totalorder %v1424_v44, 0 }
 0x220   : > { %v8664_v22 = vpop.eup %8663  ;;  %v1380_v28 = vmul.f32 30.0, %v1343_v27  ;;  %v9787_v34 = vsel %vm1425_vm13, %v1424_v44, 0 }
 0x221   : > { %v1394_v62 = vmul.f32 10.0, %v8664_v22  ;;  %v1728_v11 = vshrl.u32 %v1727_v58, 23  ;;  %v9792_v49 = vand.u32 31, %v9787_v34 }
 0x222   : > { %8665 = vtanh.f32 %v1380_v28 }
 0x223   : > { %v1402_v39 = vadd.f32 30.0, %v1394_v62  ;;  %v8405_v60 = vadd.s32 4294967169, %v1728_v11 }
 0x225   : > { %v9776_v56 = vmul.f32 %v1402_v39, %v1340_v47  ;;  %v1734_v15 = vadd.s32 1, %v8405_v60 }
 0x227   : > { %v2037_v6 = vand.u32 2139095040, %v9776_v56  ;;  %vm1735_vm14 = vcmp.gt.s32.totalorder %v1734_v15, 0 }
 0x228   : > { %v1362_v48 = vpop.f32.mrf.mxu1  ;;  %v8666_v24 = vpop.eup %8665  ;;  %v1736_v47 = vsel %vm1735_vm14, %v1734_v15, 0 }
 0x229   : > { %v9773_v17 = vadd.f32 %v1362_v48, %v1286_v14  ;;  %v1396_v40 = vmul.f32 10.0, %v8666_v24  ;;  %v2038_v63 = vshrl.u32 %v2037_v6, 23  ;;  %v9796_v3 = vshrl.u32 %v1736_v47, 5 }
 0x22a   : > { %v9810_v1 = vand.u32 31, %v1736_v47 }
 0x22b   : > { %v1375_v33 = vmul.f32 30.0, %v9773_v17  ;;  %v1404_v16 = vadd.f32 30.0, %v1396_v40  ;;  %v8411_v29 = vadd.s32 4294967169, %v2038_v63 }
 0x22d   : > { %v9782_v37 = vmul.f32 %v1404_v16, %v1343_v27  ;;  %8667 = vtanh.f32 %v1375_v33 }
 0x22f   : > { %v2347_v2 = vand.u32 2139095040, %v9782_v37  ;;  %v2344_v14 = vand.u32 2147483647, %v9782_v37 }
 0x230   : > { %v1365_v45 = vpop.f32.mrf.mxu1 }
 0x231   : > { %v9779_v57 = vadd.f32 %v1365_v45, %v1291_v35  ;;  %v2348_v51 = vshrl.u32 %v2347_v2, 23 }
 0x233   : > { %v1377_v53 = vmul.f32 30.0, %v9779_v57  ;;  %v8417_v50 = vadd.s32 4294967169, %v2348_v51  ;;  %v8668_v46 = vpop.eup %8667 }
 0x234   : > { %v1391_v43 = vmul.f32 10.0, %v8668_v46 }
 0x235   : > { %v2354_v4 = vadd.s32 1, %v8417_v50 }
 0x236   : > { %v9794_v48 = vadd.f32 30.0, %v1391_v43 }
 0x237   : > { %vm2355_vm15 = vcmp.gt.s32.totalorder %v2354_v4, 0 }
 0x238   : > { %v1368_v9 = vpop.f32.mrf.mxu1  ;;  %v2356_v23 = vsel %vm2355_vm15, %v2354_v4, 0 }
 0x239   : > { %v1369_v7 = vadd.f32 %v1368_v9, %v1296_v30  ;;  %v2044_v30 = vadd.s32 1, %v8411_v29  ;;  %v2358_v19 = vand.u32 31, %v2356_v23  ;;  %v2357_v28 = vshrl.u32 %v2356_v23, 5 }
 0x23b   : > { %v1379_v12 = vmul.f32 30.0, %v1369_v7  ;;  %v2359_v41 = vsub.s32 32, %v2358_v19  ;;  %vm2045_vm0 = vcmp.gt.s32.totalorder %v2044_v30, 0  ;;  %v2361_v10 = vshll.u32 %v15063_v18, %v2358_v19 }
 0x23c   : > { %v2364_v58 = vshll.u32 %v15061_v20, %v2358_v19  ;;  %v2367_v24 = vshll.u32 %v15059_v25, %v2358_v19  ;;  %v2370_v40 = vshll.u32 %v15057_v31, %v2358_v19  ;;  %v2373_v11 = vshll.u32 %v15055_v36, %v2358_v19 }
 0x23d   : > { %8669 = vtanh.f32 %v1379_v12  ;;  %v2362_v62 = vshrl.u32 %v15061_v20, %v2359_v41  ;;  %v2365_v45 = vshrl.u32 %v15059_v25, %v2359_v41  ;;  %v2368_v26 = vshrl.u32 %v15057_v31, %v2359_v41 }
 0x23e   : > { %8671 = vtanh.f32 %v1377_v53  ;;  %v2371_v33 = vshrl.u32 %v15055_v36, %v2359_v41  ;;  %v2374_v6 = vshrl.u32 %v15053_v42, %v2359_v41  ;;  %v9813_v2 = vsel %vm2045_vm0, %v2044_v30, 0 }
 0x23f   : > { %v2366_v16 = vor.u32 %v2365_v45, %v2364_v58  ;;  %v2369_v60 = vor.u32 %v2368_v26, %v2367_v24  ;;  %v2360_v15 = vshrl.u32 %v15063_v18, %v2359_v41  ;;  %vm2376_vm1 = vcmp.lt.s32.totalorder %v2357_v28, 1 }
 0x240   : > { %v1371_v32 = vpop.f32.mrf.mxu1  ;;  %v2372_v53 = vor.u32 %v2371_v33, %v2370_v40  ;;  %v2375_v51 = vor.u32 %v2374_v6, %v2373_v11  ;;  %vm2379_vm2 = vcmp.lt.s32.totalorder %v2357_v28, 4  ;;  %vm2378_vm3 = vcmp.lt.s32.totalorder %v2357_v28, 3 }
 0x241   : > { %v1372_v21 = vadd.f32 %v1371_v32, %v1301_v8  ;;  %v2351_v8 = vand.u32 8388607, %v2344_v14  ;;  %vm2377_vm4 = vcmp.lt.s32.totalorder %v2357_v28, 2 }
 0x242   : > { %v2385_v29 = vsel %vm2379_vm2, %v2372_v53, 920167782 }
 0x243   : > { %v8670_v55 = vpop.eup %8669  ;;  %v1381_v35 = vmul.f32 30.0, %v1372_v21  ;;  %v2352_v52 = vor.u32 8388608, %v2351_v8  ;;  %v2386_v4 = vsel %vm2378_vm3, %v2369_v60, %v2385_v29 }
 0x244   : > { %v1395_v13 = vmul.f32 10.0, %v8670_v55  ;;  %v8672_v61 = vpop.eup %8671  ;;  %v2381_v55 = vsel %vm2379_vm2, %v2369_v60, 2102212464 }
 0x245   : > { %8673 = vtanh.f32 %v1381_v35  ;;  %v1393_v38 = vmul.f32 10.0, %v8672_v61  ;;  %v9819_v32 = vshll.u32 %v2352_v52, 8  ;;  %v2388_v35 = vsel %vm2376_vm1, %v2366_v16, %v2369_v60 }
 0x246   : > { %v1403_v5 = vadd.f32 30.0, %v1395_v13  ;;  %v2389_v13 = vsel %vm2379_vm2, %v2375_v51, 1326507024  ;;  %v2382_v19 = vsel %vm2378_vm3, %v2366_v16, %v2381_v55 }
 0x247   : > { %v1401_v12 = vadd.f32 30.0, %v1393_v38  ;;  %v2390_v61 = vsel %vm2378_vm3, %v2372_v53, %v2389_v13  ;;  %v2394_v47 = vshrl.u32 %v9819_v32, 16  ;;  %v2393_v52 = vand.u32 65535, %v9819_v32 }
 0x248   : > { %v9798_v22 = vmul.f32 %v1403_v5, %v1369_v7  ;;  %v2363_v7 = vor.u32 %v2362_v62, %v2361_v10  ;;  %v2391_v41 = vsel %vm2377_vm4, %v2388_v35, %v2390_v61 }
 0x249   : > { %v2396_v62 = vshrl.u32 %v2391_v41, 16 }
 0x24a   : > { %v2192_v63 = vand.u32 2139095040, %v9798_v22  ;;  %v2384_v46 = vsel %vm2376_vm1, %v2363_v7, %v2366_v16  ;;  %v2380_v23 = vsel %vm2376_vm1, %v2360_v15, %v2363_v7  ;;  %vm2346_vm1 = vcmp.lt.s32.totalorder %v9782_v37, 0 }
 0x24b   : > { %v8674_v27 = vpop.eup %8673  ;;  %v2387_v8 = vsel %vm2377_vm4, %v2384_v46, %v2386_v4  ;;  %v9836_v26 = vsel %vm2377_vm4, %v2380_v23, %v2382_v19  ;;  %v2398_v40 = vmul.u32 %v2396_v62, %v2393_v52  ;;  %v2400_v60 = vmul.u32 %v2396_v62, %v2394_v47 }
 0x24c   : > { %v1397_v39 = vmul.f32 10.0, %v8674_v27  ;;  %v2193_v43 = vshrl.u32 %v2192_v63, 23  ;;  %v2417_v38 = vand.u32 65535, %v2387_v8  ;;  %v2395_v27 = vand.u32 65535, %v2391_v41 }
 0x24d   : > { %v2418_v45 = vshrl.u32 %v2387_v8, 16  ;;  %v2401_v53 = vshll.u32 %v2398_v40, 16  ;;  %vm9915_vm4 = vcmp.le.f32.partialorder %v2344_v14, 0.7853982 }
 0x24e   : > { %v1405_v9 = vadd.f32 30.0, %v1397_v39  ;;  %v9833_v39 = vmul.f32 %v1401_v12, %v9779_v57  ;;  %v8414_v10 = vadd.s32 4294967169, %v2193_v43  ;;  %v2421_v24 = vmul.u32 %v2417_v38, %v2394_v47 }
 0x24f   : > { %v2399_v33 = vmul.u32 %v2395_v27, %v2394_v47  ;;  %v2419_v7 = vmul.u32 %v2417_v38, %v2393_v52  ;;  %v2420_v16 = vmul.u32 %v2418_v45, %v2393_v52  ;;  %v2422_v63 = vmul.u32 %v2418_v45, %v2394_v47 }
 0x250   : > { %v9816_v44 = vmul.f32 %v1405_v9, %v1372_v21  ;;  %v9824_v21 = vand.u32 31, %v9813_v2  ;;  %v2397_v9 = vmul.u32 %v2395_v27, %v2393_v52  ;;  %v2402_v12 = vshrl.u32 %v2398_v40, 16 }
 0x251   : > { %v2423_v51 = vshll.u32 %v2420_v16, 16  ;;  %v2425_v15 = vshll.u32 %v2421_v24, 16  ;;  %v2403_v28 = vshll.u32 %v2399_v33, 16  ;;  %v2404_v35 = vshrl.u32 %v2399_v33, 16 }
 0x252   : > { %v2502_v50 = vand.u32 2139095040, %v9816_v44  ;;  %v2499_v11 = vand.u32 2147483647, %v9816_v44  ;;  %vm2405_vm7 = vc.u32 %v2397_v9, %v2401_v53  ;;  %v2407_v46 = vadd.s32 %v2401_v53, %v2397_v9 }
 0x253   : > { %v2406_v55 = vsel %vm2405_vm7, 1, %v15066_v0  ;;  %vm2427_vm8 = vc.u32 %v2419_v7, %v2423_v51  ;;  %v2429_v4 = vadd.s32 %v2423_v51, %v2419_v7  ;;  %v2424_v23 = vshrl.u32 %v2420_v16, 16 }
 0x254   : > { %v2503_v30 = vshrl.u32 %v2502_v50, 23  ;;  %v2408_v13 = vadd.s32 %v2406_v55, %v2400_v60  ;;  %vm2409_vm9 = vc.u32 %v2407_v46, %v2403_v28  ;;  %v2428_v43 = vsel %vm2427_vm8, 1, %v15066_v0 }
 0x255   : > { %v2430_v8 = vadd.s32 %v2428_v43, %v2422_v63  ;;  %vm2431_vm10 = vc.u32 %v2429_v4, %v2425_v15  ;;  %v2426_v47 = vshrl.u32 %v2421_v24, 16  ;;  %v2506_v19 = vand.u32 8388607, %v2499_v11 }
 0x256   : > { %v8420_v5 = vadd.s32 4294967169, %v2503_v30  ;;  %v2410_v30 = vsel %vm2409_vm9, 1, %v15066_v0  ;;  %v2433_v40 = vadd.s32 %v2429_v4, %v2425_v15  ;;  %v2199_v46 = vadd.s32 1, %v8414_v10 }
 0x257   : > { %v2412_v61 = vadd.s32 %v2410_v30, %v2408_v13  ;;  %v2437_v15 = vmul.u32 %v9819_v32, %v9836_v26  ;;  %v2507_v55 = vor.u32 8388608, %v2506_v19  ;;  %v1882_v30 = vand.u32 2139095040, %v9833_v39 }
 0x258   : > { %v2509_v58 = vadd.s32 1, %v8420_v5  ;;  %v2432_v5 = vsel %vm2431_vm10, 1, %v15066_v0  ;;  %vm2200_vm0 = vcmp.gt.s32.totalorder %v2199_v46, 0 }
 0x259   : > { %v2434_v41 = vadd.s32 %v2432_v5, %v2430_v8  ;;  %v2413_v62 = vadd.s32 %v2412_v61, %v2402_v12  ;;  %v9883_v19 = vshll.u32 %v2507_v55, 8  ;;  %v2034_v55 = vand.u32 2147483647, %v9776_v56 }
 0x25a   : > { %vm2510_vm5 = vcmp.gt.s32.totalorder %v2509_v58, 0 }
 0x25b   : > { %v2511_v6 = vsel %vm2510_vm5, %v2509_v58, 0  ;;  %v2435_v33 = vadd.s32 %v2434_v41, %v2424_v23  ;;  %v2414_v16 = vadd.s32 %v2413_v62, %v2404_v35  ;;  %v9886_v62 = vshrl.u32 %v9813_v2, 5 }
 0x25c   : > { %v2513_v57 = vand.u32 31, %v2511_v6  ;;  %v9839_v50 = vshrl.u32 %v2511_v6, 5  ;;  %v2041_v14 = vand.u32 8388607, %v2034_v55 }
 0x25d   : > { %v2436_v63 = vadd.s32 %v2435_v33, %v2426_v47  ;;  %vm2439_vm11 = vc.u32 %v2414_v16, %v2433_v40  ;;  %v9893_v33 = vsub.s32 32, %v9824_v21 }
 0x25e   : > { %v9841_v29 = vsub.s32 32, %v2513_v57  ;;  %v2516_v38 = vshll.u32 %v15063_v18, %v2513_v57  ;;  %v2519_v27 = vshll.u32 %v15061_v20, %v2513_v57  ;;  %v2522_v58 = vshll.u32 %v15059_v25, %v2513_v57 }
 0x25f   : > { %v2525_v9 = vshll.u32 %v15057_v31, %v2513_v57  ;;  %v2528_v51 = vshll.u32 %v15055_v36, %v2513_v57  ;;  %v2440_v4 = vadd.s32 1, %v2436_v63  ;;  %vm2531_vm12 = vcmp.lt.s32.totalorder %v9839_v50, 1 }
 0x260   : > { %v2517_v52 = vshrl.u32 %v15061_v20, %v9841_v29  ;;  %v2520_v45 = vshrl.u32 %v15059_v25, %v9841_v29  ;;  %v2523_v24 = vshrl.u32 %v15057_v31, %v9841_v29  ;;  %v2526_v7 = vshrl.u32 %v15055_v36, %v9841_v29 }
 0x261   : > { %v2529_v28 = vshrl.u32 %v15053_v42, %v9841_v29  ;;  %vm2534_vm13 = vcmp.lt.s32.totalorder %v9839_v50, 4  ;;  %vm2533_vm14 = vcmp.lt.s32.totalorder %v9839_v50, 3  ;;  %v2441_v43 = vsel %vm2439_vm11, %v2440_v4, %v2436_v63 }
 0x262   : > { %v2518_v6 = vor.u32 %v2517_v52, %v2516_v38  ;;  %v2521_v60 = vor.u32 %v2520_v45, %v2519_v27  ;;  %v2524_v53 = vor.u32 %v2523_v24, %v2522_v58  ;;  %v2527_v12 = vor.u32 %v2526_v7, %v2525_v9 }
 0x263   : > { %v2530_v13 = vor.u32 %v2529_v28, %v2528_v51  ;;  %vm2532_vm15 = vcmp.lt.s32.totalorder %v9839_v50, 2  ;;  %v2442_v23 = vadd.s32 %v2441_v43, %v2437_v15  ;;  %v2515_v45 = vshrl.u32 %v15063_v18, %v9841_v29 }
 0x264   : > { %v2539_v57 = vsel %vm2531_vm12, %v2518_v6, %v2521_v60  ;;  %v2540_v35 = vsel %vm2534_vm13, %v2527_v12, 920167782  ;;  %v2543_v10 = vsel %vm2531_vm12, %v2521_v60, %v2524_v53  ;;  %v2536_v47 = vsel %vm2534_vm13, %v2524_v53, 2102212464 }
 0x265   : > { %v2541_v32 = vsel %vm2533_vm14, %v2524_v53, %v2540_v35  ;;  %v2544_v26 = vsel %vm2534_vm13, %v2530_v13, 1326507024  ;;  %v2443_v41 = vadd.s32 536870912, %v2442_v23  ;;  %v2548_v58 = vand.u32 65535, %v9883_v19 }
 0x266   : > { %v2542_v8 = vsel %vm2532_vm15, %v2539_v57, %v2541_v32  ;;  %v2545_v61 = vsel %vm2533_vm14, %v2527_v12, %v2544_v26  ;;  %v2549_v24 = vshrl.u32 %v9883_v19, 16  ;;  %v9895_v9 = vsel %vm2200_vm0, %v2199_v46, 0 }
 0x267   : > { %v2546_v5 = vsel %vm2532_vm15, %v2543_v10, %v2545_v61  ;;  %v2573_v27 = vshrl.u32 %v2542_v8, 16  ;;  %v2444_v7 = vshrl.u32 %v2443_v41, 30  ;;  %v2572_v53 = vand.u32 65535, %v2542_v8 }
 0x268   : > { %v2550_v38 = vand.u32 65535, %v2546_v5  ;;  %v2551_v52 = vshrl.u32 %v2546_v5, 16  ;;  %v2535_v63 = vsel %vm2531_vm12, %v2515_v45, %v2518_v6  ;;  %v2537_v2 = vsel %vm2533_vm14, %v2521_v60, %v2536_v47 }
 0x269   : > { %v9901_v29 = vshrl.u32 %v1882_v30, 23  ;;  %v2445_v28 = vshll.u32 %v2444_v7, 30  ;;  %v2575_v15 = vmul.u32 %v2573_v27, %v2548_v58  ;;  %v9905_v4 = vand.u32 31, %v9895_v9 }
 0x26a   : > { %v2553_v12 = vmul.u32 %v2551_v52, %v2548_v58  ;;  %v2554_v51 = vmul.u32 %v2550_v38, %v2549_v24  ;;  %v2438_v46 = vadd.s32 %v2433_v40, %v2414_v16  ;;  %v2552_v13 = vmul.u32 %v2550_v38, %v2548_v58 }
 0x26b   : > { %v2446_v6 = vsub.s32 %v2442_v23, %v2445_v28  ;;  %v9910_v60 = vsel %vm2532_vm15, %v2535_v63, %v2537_v2  ;;  %v2555_v35 = vmul.u32 %v2551_v52, %v2549_v24  ;;  %v2576_v10 = vmul.u32 %v2572_v53, %v2549_v24 }
 0x26c   : > { %v2556_v57 = vshll.u32 %v2553_v12, 16  ;;  %v2558_v43 = vshll.u32 %v2554_v51, 16  ;;  %v2578_v26 = vshll.u32 %v2575_v15, 16  ;;  %v2468_v8 = vsub.s32 4, %v2444_v7 }
 0x26d   : > { %vm2447_vm3 = vcmp.lt.s32.totalorder %v2446_v6, 0  ;;  %v2448_v30 = vsub.s32 0, %v2446_v6  ;;  %v2557_v50 = vshrl.u32 %v2553_v12, 16  ;;  %v2574_v23 = vmul.u32 %v2572_v53, %v2548_v58 }
 0x26e   : > { %vm2560_vm2 = vc.u32 %v2552_v13, %v2556_v57  ;;  %v2562_v32 = vadd.s32 %v2556_v57, %v2552_v13  ;;  %v2577_v41 = vmul.u32 %v2573_v27, %v2549_v24  ;;  %v2580_v38 = vshll.u32 %v2576_v10, 16 }
 0x26f   : > { %v2561_v61 = vsel %vm2560_vm2, 1, %v15066_v0  ;;  %v2449_v47 = vsel %vm2447_vm3, %v2448_v30, %v2446_v6  ;;  %vm2582_vm7 = vc.u32 %v2574_v23, %v2578_v26  ;;  %v2584_v63 = vadd.s32 %v2578_v26, %v2574_v23 }
 0x270   : > { %v2563_v16 = vadd.s32 %v2561_v61, %v2555_v35  ;;  %vm2564_vm5 = vc.u32 %v2562_v32, %v2558_v43  ;;  %v2450_v52 = vclz %v2449_v47  ;;  %v2559_v2 = vshrl.u32 %v2554_v51, 16 }
 0x271   : > { %v2565_v5 = vsel %vm2564_vm5, 1, %v15066_v0  ;;  %v2583_v28 = vsel %vm2582_vm7, 1, %v15066_v0  ;;  %v2051_v12 = vshll.u32 %v15063_v18, %v9824_v21  ;;  %vm2586_vm8 = vc.u32 %v2584_v63, %v2580_v38 }
 0x272   : > { %v2567_v45 = vadd.s32 %v2565_v5, %v2563_v16  ;;  %v8418_v13 = vadd.s32 4294967294, %v2450_v52  ;;  %v2585_v53 = vadd.s32 %v2583_v28, %v2577_v41  ;;  %v2469_v27 = vsel %vm2346_vm1, %v2468_v8, %v2444_v7 }
 0x273   : > { %v2579_v24 = vshrl.u32 %v2575_v15, 16  ;;  %v2587_v57 = vsel %vm2586_vm8, 1, %v15066_v0  ;;  %v2052_v51 = vshrl.u32 %v15061_v20, %v9893_v33  ;;  %v2581_v43 = vshrl.u32 %v2576_v10, 16 }
 0x274   : > { %v2568_v58 = vadd.s32 %v2567_v45, %v2557_v50  ;;  %vm8419_vm9 = vcmp.lt.s32.totalorder %v8418_v13, 0  ;;  %v2589_v32 = vadd.s32 %v2587_v57, %v2585_v53  ;;  %v9932_v30 = vadd.s32 %v2584_v63, %v2580_v38 }
 0x275   : > { %v2453_v26 = vsel %vm8419_vm9, 0, %v8418_v13  ;;  %v2054_v61 = vshll.u32 %v15061_v20, %v9824_v21  ;;  %v2055_v7 = vshrl.u32 %v15059_v25, %v9893_v33  ;;  %v2058_v16 = vshrl.u32 %v15057_v31, %v9893_v33 }
 0x276   : > { %v9930_v35 = vadd.s32 %v2568_v58, %v2559_v2  ;;  %v2454_v15 = vsub.s32 32, %v2453_v26  ;;  %v2458_v8 = vsub.s32 4294967266, %v2453_v26  ;;  %v2590_v50 = vadd.s32 %v2589_v32, %v2579_v24 }
 0x277   : > { %v2455_v23 = vshll.u32 %v2446_v6, %v2453_v26  ;;  %v2471_v10 = vsel %vm9915_vm4, 0, %v2469_v27  ;;  %v2057_v47 = vshll.u32 %v15059_v25, %v9824_v21  ;;  %v9946_v52 = vor.u32 %v2055_v7, %v2054_v61 }
 0x278   : > { %vm2594_vm10 = vc.u32 %v9930_v35, %v9932_v30  ;;  %v2456_v5 = vshrl.u32 %v2438_v46, %v2454_v15  ;;  %v2459_v41 = vadd.s32 127, %v2458_v8  ;;  %v2591_v38 = vadd.s32 %v2590_v50, %v2581_v43 }
 0x279   : > { %v2060_v45 = vshll.u32 %v15057_v31, %v9824_v21  ;;  %v2061_v6 = vshrl.u32 %v15055_v36, %v9893_v33  ;;  %v2063_v63 = vshll.u32 %v15055_v36, %v9824_v21  ;;  %v2064_v2 = vshrl.u32 %v15053_v42, %v9893_v33 }
 0x27a   : > { %v2457_v28 = vor.u32 %v2456_v5, %v2455_v23  ;;  %v2460_v13 = vshll.u32 %v2459_v41, 23  ;;  %v2595_v58 = vadd.s32 1, %v2591_v38  ;;  %v2059_v46 = vor.u32 %v2058_v16, %v2057_v47 }
 0x27b   : > { %v2592_v53 = vmul.u32 %v9883_v19, %v9910_v60  ;;  %v9958_v27 = vor.u32 %v2052_v51, %v2051_v12  ;;  %v2062_v24 = vor.u32 %v2061_v6, %v2060_v45  ;;  %v2065_v57 = vor.u32 %v2064_v2, %v2063_v63 }
 0x27c   : > { %v2461_v43 = vor.u32 4788187, %v2460_v13  ;;  %v2596_v32 = vsel %vm2594_vm10, %v2595_v58, %v2591_v38  ;;  %v2042_v21 = vor.u32 8388608, %v2041_v14  ;;  %vm2069_vm11 = vcmp.lt.s32.totalorder %v9886_v62, 4 }
 0x27d   : > { %v2488_v26 = vadd.s32 3, %v2471_v10  ;;  %v2597_v61 = vadd.s32 %v2596_v32, %v2592_v53  ;;  %vm2066_vm12 = vcmp.lt.s32.totalorder %v9886_v62, 1  ;;  %v2075_v7 = vsel %vm2069_vm11, %v2062_v24, 920167782 }
 0x27e   : > { %v2462_v19 = vand.u32 2147483647, %v2461_v43  ;;  %v2464_v60 = vcvt.s32.f32 %v2457_v28  ;;  %vm2068_vm13 = vcmp.lt.s32.totalorder %v9886_v62, 3  ;;  %v2078_v12 = vsel %vm2066_vm12, %v9946_v52, %v2059_v46 }
 0x27f   : > { %v2598_v51 = vadd.s32 536870912, %v2597_v61  ;;  %v2074_v14 = vsel %vm2066_vm12, %v9958_v27, %v9946_v52  ;;  %v2076_v15 = vsel %vm2068_vm13, %v2059_v46, %v2075_v7  ;;  %v2079_v8 = vsel %vm2069_vm11, %v2065_v57, 1326507024 }
 0x280   : > { %v2465_v50 = vmul.f32 %v2464_v60, %v2462_v19  ;;  %vm2067_vm14 = vcmp.lt.s32.totalorder %v9886_v62, 2  ;;  %v2080_v16 = vsel %vm2068_vm13, %v2062_v24, %v2079_v8  ;;  %v9982_v23 = vshll.u32 %v2042_v21, 8 }
 0x281   : > { %v9986_v10 = vmul.f32 %v9794_v48, %v9773_v17  ;;  %v9989_v47 = vadd.s32 4294967169, %v9901_v29  ;;  %v2599_v5 = vshrl.u32 %v2598_v51, 30  ;;  %v2081_v41 = vsel %vm2067_vm14, %v2078_v12, %v2080_v16 }
 0x282   : > { %v9994_v38 = vshrl.u32 %v9895_v9, 5  ;;  %v2466_v45 = vxor.u32 2147483648, %v2465_v50  ;;  %v2077_v6 = vsel %vm2067_vm14, %v2074_v14, %v2076_v15  ;;  %v2085_v63 = vand.u32 65535, %v2081_v41 }
 0x283   : > { %v2600_v2 = vshll.u32 %v2599_v5, 30  ;;  %v2083_v28 = vand.u32 65535, %v9982_v23  ;;  %v2084_v17 = vshrl.u32 %v9982_v23, 16  ;;  %v2086_v48 = vshrl.u32 %v2081_v41, 16 }
 0x284   : > { %v10001_v29 = vsub.s32 32, %v9905_v4  ;;  %v2467_v13 = vsel %vm2346_vm1, %v2466_v45, %v2465_v50  ;;  %v10005_v58 = vand.u32 3, %v2488_v26  ;;  %v2050_v9 = vshrl.u32 %v15063_v18, %v9893_v33 }
 0x285   : > { %v10012_v53 = vsel %vm9915_vm4, %v9782_v37, %v2467_v13  ;;  %v10014_v24 = vsub.s32 %v2597_v61, %v2600_v2  ;;  %v2088_v57 = vmul.u32 %v2086_v48, %v2083_v28  ;;  %v10016_v43 = vmul.u32 %v2085_v63, %v2084_v17 }
 0x286   : > { %v2472_v32 = vmul.f32 %v10012_v53, %v10012_v53  ;;  %vm2501_vm15 = vcmp.lt.s32.totalorder %v9816_v44, 0  ;;  %v2593_v21 = vadd.s32 %v9932_v30, %v9930_v35  ;;  %v2071_v33 = vsel %vm2069_vm11, %v2059_v46, 2102212464 }
 0x287   : > { %v2107_v26 = vand.u32 65535, %v2077_v6  ;;  %vm2602_vm0 = vcmp.lt.s32.totalorder %v10014_v24, 0  ;;  %v2603_v40 = vsub.s32 0, %v10014_v24  ;;  %v2087_v61 = vmul.u32 %v2085_v63, %v2083_v28 }
 0x288   : > { %v2091_v7 = vshll.u32 %v2088_v57, 16  ;;  %v2473_v19 = vmul.f32 -0.001358992, %v2472_v32  ;;  %v2480_v60 = vmul.f32 -0.00019511016, %v2472_v32  ;;  %v2090_v12 = vmul.u32 %v2086_v48, %v2084_v17 }
 0x289   : > { %v2108_v51 = vshrl.u32 %v2077_v6, 16  ;;  %v2604_v14 = vsel %vm2602_vm0, %v2603_v40, %v10014_v24  ;;  %v2093_v15 = vshll.u32 %v10016_v43, 16  ;;  %v2623_v16 = vsub.s32 4, %v2599_v5 }
 0x28a   : > { %vm2095_vm1 = vc.u32 %v2087_v61, %v2091_v7  ;;  %v2097_v35 = vadd.s32 %v2091_v7, %v2087_v61  ;;  %v2474_v30 = vadd.f32 0.041655596, %v2473_v19  ;;  %v2481_v8 = vadd.f32 0.008332121, %v2480_v60 }
 0x28b   : > { %v2605_v46 = vclz %v2604_v14  ;;  %v2096_v50 = vsel %vm2095_vm1, 1, %v15066_v0  ;;  %v2070_v41 = vsel %vm2066_vm12, %v2050_v9, %v9958_v27  ;;  %v2072_v45 = vsel %vm2068_vm13, %v9946_v52, %v2071_v33 }
 0x28c   : > { %v2098_v6 = vadd.s32 %v2096_v50, %v2090_v12  ;;  %v2475_v63 = vmul.f32 %v2474_v30, %v2472_v32  ;;  %v2482_v2 = vmul.f32 %v2481_v8, %v2472_v32  ;;  %vm2099_vm2 = vc.u32 %v2097_v35, %v2093_v15 }
 0x28d   : > { %v8421_v48 = vadd.s32 4294967294, %v2605_v46  ;;  %vm10038_vm3 = vcmp.le.f32.partialorder %v2499_v11, 0.7853982  ;;  %v2100_v40 = vsel %vm2099_vm2, 1, %v15066_v0  ;;  %v2109_v61 = vmul.u32 %v2107_v26, %v2083_v28 }
 0x28e   : > { %v2110_v7 = vmul.u32 %v2108_v51, %v2083_v28  ;;  %v2111_v27 = vmul.u32 %v2107_v26, %v2084_v17  ;;  %v2476_v9 = vadd.f32 -0.4999988, %v2475_v63  ;;  %v2483_v19 = vadd.f32 -0.16666654, %v2482_v2 }
 0x28f   : > { %vm8422_vm4 = vcmp.lt.s32.totalorder %v8421_v48, 0  ;;  %v2102_v52 = vadd.s32 %v2100_v40, %v2098_v6  ;;  %vm2491_vm5 = vcmp.eq.s32.totalorder %v10005_v58, 0  ;;  %v2624_v60 = vsel %vm2501_vm15, %v2623_v16, %v2599_v5 }
 0x290   : > { %v2608_v33 = vsel %vm8422_vm4, 0, %v8421_v48  ;;  %v2092_v12 = vshrl.u32 %v2088_v57, 16  ;;  %v2113_v11 = vshll.u32 %v2110_v7, 16  ;;  %v2477_v14 = vmul.f32 %v2476_v9, %v2472_v32 }
 0x291   : > { %v2484_v15 = vmul.f32 %v2483_v19, %v2472_v32  ;;  %vm2490_vm7 = vcmp.lt.s32.totalorder %v10005_v58, 2  ;;  %v2609_v35 = vsub.s32 32, %v2608_v33  ;;  %v2112_v30 = vmul.u32 %v2108_v51, %v2084_v17 }
 0x292   : > { %vm2487_vm8 = vweird.f32 %v9782_v37  ;;  %v2613_v28 = vsub.s32 4294967266, %v2608_v33  ;;  %v2103_v26 = vadd.s32 %v2102_v52, %v2092_v12  ;;  %v2115_v8 = vshll.u32 %v2111_v27, 16 }
 0x293   : > { %vm2117_vm9 = vc.u32 %v2109_v61, %v2113_v11  ;;  %v2478_v46 = vadd.f32 1.0, %v2477_v14  ;;  %v2485_v50 = vadd.f32 1.0, %v2484_v15  ;;  %v2611_v6 = vshrl.u32 %v2593_v21, %v2609_v35 }
 0x294   : > { %v2118_v63 = vsel %vm2117_vm9, 1, %v15066_v0  ;;  %v2610_v5 = vshll.u32 %v10014_v24, %v2608_v33  ;;  %v2614_v57 = vadd.s32 127, %v2613_v28  ;;  %v2119_v16 = vadd.s32 %v2113_v11, %v2109_v61 }
 0x295   : > { %v2120_v32 = vadd.s32 %v2118_v63, %v2112_v30  ;;  %v2486_v2 = vmul.f32 %v2485_v50, %v10012_v53  ;;  %vm2494_vm10 = vcmp.eq.s32.totalorder %v10005_v58, 2  ;;  %v2495_v17 = vxor.u32 2147483648, %v2478_v46 }
 0x296   : > { %v2094_v51 = vshrl.u32 %v10016_v43, 16  ;;  %v2612_v48 = vor.u32 %v2611_v6, %v2610_v5  ;;  %v2615_v40 = vshll.u32 %v2614_v57, 23  ;;  %v2073_v9 = vsel %vm2067_vm14, %v2070_v41, %v2072_v45 }
 0x297   : > { %vm2121_vm11 = vc.u32 %v2119_v16, %v2115_v8  ;;  %v2492_v21 = vxor.u32 2147483648, %v2486_v2  ;;  %v2626_v24 = vsel %vm10038_vm3, 0, %v2624_v60  ;;  %v2114_v52 = vshrl.u32 %v2110_v7, 16 }
 0x298   : > { %v10057_v19 = vadd.s32 %v2103_v26, %v2094_v51  ;;  %v2122_v61 = vsel %vm2121_vm11, 1, %v15066_v0  ;;  %v2616_v53 = vor.u32 4788187, %v2615_v40  ;;  %v2189_v12 = vand.u32 2147483647, %v9798_v22 }
 0x299   : > { %v2124_v33 = vadd.s32 %v2122_v61, %v2120_v32  ;;  %v2493_v43 = vsel %vm2491_vm5, %v2478_v46, %v2492_v21  ;;  %v2496_v62 = vsel %vm2494_vm10, %v2495_v17, %v2486_v2  ;;  %v2116_v41 = vshrl.u32 %v2111_v27, 16 }
 0x29a   : > { %v2123_v45 = vadd.s32 %v2119_v16, %v2115_v8  ;;  %v2497_v60 = vsel %vm2490_vm7, %v2493_v43, %v2496_v62  ;;  %v2617_v11 = vand.u32 2147483647, %v2616_v53  ;;  %v2619_v14 = vcvt.s32.f32 %v2612_v48 }
 0x29b   : > { %v2125_v15 = vadd.s32 %v2124_v33, %v2114_v52  ;;  %v2498_v7 = vsel %vm2487_vm8, nan, %v2497_v60  ;;  %v2643_v35 = vadd.s32 3, %v2626_v24  ;;  %v2127_v30 = vmul.u32 %v9982_v23, %v2073_v9 }
 0x29c   : > { %vm2129_vm12 = vc.u32 %v10057_v19, %v2123_v45  ;;  %2699 = vmatpush.msra.mxu2 %v2498_v7  ;;  %v2620_v28 = vmul.f32 %v2619_v14, %v2617_v11  ;;  %v2196_v27 = vand.u32 8388607, %v2189_v12  ;;  %v2210_v58 = vshrl.u32 %v15059_v25, %v10001_v29 }
 0x29d   : > { %v2126_v26 = vadd.s32 %v2125_v15, %v2116_v41  ;;  %v2206_v8 = vshll.u32 %v15063_v18, %v9905_v4  ;;  %v2209_v37 = vshll.u32 %v15061_v20, %v9905_v4  ;;  %v2213_v23 = vshrl.u32 %v15057_v31, %v10001_v29 }
 0x29e   : > { %v2216_v46 = vshrl.u32 %v15055_v36, %v10001_v29  ;;  %v2621_v50 = vxor.u32 2147483648, %v2620_v28  ;;  %v2212_v63 = vshll.u32 %v15059_v25, %v9905_v4  ;;  %v2215_v5 = vshll.u32 %v15057_v31, %v9905_v4 }
 0x29f   : > { %v2130_v6 = vadd.s32 1, %v2126_v26  ;;  %v2207_v57 = vshrl.u32 %v15061_v20, %v10001_v29  ;;  %v10089_v16 = vor.u32 %v2210_v58, %v2209_v37  ;;  %v2218_v32 = vshll.u32 %v15055_v36, %v9905_v4 }
 0x2a0   : > { %v2219_v2 = vshrl.u32 %v15053_v42, %v10001_v29  ;;  %v2622_v17 = vsel %vm2501_vm15, %v2621_v50, %v2620_v28  ;;  %v2214_v48 = vor.u32 %v2213_v23, %v2212_v63  ;;  %v2217_v40 = vor.u32 %v2216_v46, %v2215_v5 }
 0x2a1   : > { %v2131_v51 = vsel %vm2129_vm12, %v2130_v6, %v2126_v26  ;;  %v10102_v9 = vsel %vm10038_vm3, %v9816_v44, %v2622_v17  ;;  %v2197_v24 = vor.u32 8388608, %v2196_v27  ;;  %v10105_v4 = vsub.s32 32, %v9810_v1 }
 0x2a2   : > { %v2132_v21 = vadd.s32 %v2131_v51, %v2127_v30  ;;  %v2220_v61 = vor.u32 %v2219_v2, %v2218_v32  ;;  %v10108_v53 = vadd.s32 1, %v9989_v47  ;;  %v2627_v52 = vmul.f32 %v10102_v9, %v10102_v9 }
 0x2a3   : > { %v10112_v33 = vand.u32 3, %v2643_v35  ;;  %v2208_v62 = vor.u32 %v2207_v57, %v2206_v8  ;;  %vm2221_vm13 = vcmp.lt.s32.totalorder %v9994_v38, 1  ;;  %vm2224_vm14 = vcmp.lt.s32.totalorder %v9994_v38, 4 }
 0x2a4   : > { %v2133_v43 = vadd.s32 536870912, %v2132_v21  ;;  %v2628_v13 = vmul.f32 -0.001358992, %v2627_v52  ;;  %v2635_v41 = vmul.f32 -0.00019511016, %v2627_v52  ;;  %v2233_v47 = vsel %vm2221_vm13, %v10089_v16, %v2214_v48 }
 0x2a5   : > { %v2230_v60 = vsel %vm2224_vm14, %v2217_v40, 920167782  ;;  %vm2223_vm15 = vcmp.lt.s32.totalorder %v9994_v38, 3  ;;  %v2234_v14 = vsel %vm2224_vm14, %v2220_v61, 1326507024  ;;  %v10124_v15 = vshll.u32 %v2197_v24, 8 }
 0x2a6   : > { %v2134_v11 = vshrl.u32 %v2133_v43, 30  ;;  %v2629_v7 = vadd.f32 0.041655596, %v2628_v13  ;;  %v2636_v35 = vadd.f32 0.008332121, %v2635_v41  ;;  %vm2036_vm0 = vcmp.lt.s32.totalorder %v9776_v56, 0 }
 0x2a7   : > { %vm2222_vm1 = vcmp.lt.s32.totalorder %v9994_v38, 2  ;;  %v2235_v30 = vsel %vm2223_vm15, %v2217_v40, %v2234_v14  ;;  %v2229_v26 = vsel %vm2221_vm13, %v2208_v62, %v10089_v16  ;;  %v2231_v27 = vsel %vm2223_vm15, %v2214_v48, %v2230_v60 }
 0x2a8   : > { %v2135_v28 = vshll.u32 %v2134_v11, 30  ;;  %v2236_v58 = vsel %vm2222_vm1, %v2233_v47, %v2235_v30  ;;  %v2630_v8 = vmul.f32 %v2629_v7, %v2627_v52  ;;  %v2637_v37 = vmul.f32 %v2636_v35, %v2627_v52 }
 0x2a9   : > { %v2128_v23 = vadd.s32 %v2123_v45, %v10057_v19  ;;  %v2205_v46 = vshrl.u32 %v15063_v18, %v10001_v29  ;;  %v2238_v6 = vand.u32 65535, %v10124_v15  ;;  %v2240_v63 = vand.u32 65535, %v2236_v58 }
 0x2aa   : > { %v10140_v50 = vsub.s32 %v2132_v21, %v2135_v28  ;;  %v2241_v5 = vshrl.u32 %v2236_v58, 16  ;;  %v2631_v57 = vadd.f32 -0.4999988, %v2630_v8  ;;  %v2638_v32 = vadd.f32 -0.16666654, %v2637_v37 }
 0x2ab   : > { %v2158_v2 = vsub.s32 4, %v2134_v11  ;;  %v2232_v17 = vsel %vm2222_vm1, %v2229_v26, %v2231_v27  ;;  %vm2646_vm2 = vcmp.eq.s32.totalorder %v10112_v33, 0  ;;  %vm2649_vm3 = vcmp.eq.s32.totalorder %v10112_v33, 2 }
 0x2ac   : > { %vm2137_vm4 = vcmp.lt.s32.totalorder %v10140_v50, 0  ;;  %v2138_v29 = vsub.s32 0, %v10140_v50  ;;  %v2239_v19 = vshrl.u32 %v10124_v15, 16  ;;  %v2243_v45 = vmul.u32 %v2241_v5, %v2238_v6 }
 0x2ad   : > { %v2632_v51 = vmul.f32 %v2631_v57, %v2627_v52  ;;  %v2639_v40 = vmul.f32 %v2638_v32, %v2627_v52  ;;  %vm2645_vm5 = vcmp.lt.s32.totalorder %v10112_v33, 2  ;;  %v2225_v21 = vsel %vm2221_vm13, %v2205_v46, %v2208_v62 }
 0x2ae   : > { %v2226_v24 = vsel %vm2224_vm14, %v2214_v48, 2102212464  ;;  %vm2642_vm7 = vweird.f32 %v9816_v44  ;;  %v2139_v61 = vsel %vm2137_vm4, %v2138_v29, %v10140_v50  ;;  %v2244_v43 = vmul.u32 %v2240_v63, %v2239_v19 }
 0x2af   : > { %v2246_v13 = vshll.u32 %v2243_v45, 16  ;;  %v2263_v41 = vshrl.u32 %v2232_v17, 16  ;;  %v2633_v60 = vadd.f32 1.0, %v2632_v51  ;;  %v2640_v47 = vadd.f32 1.0, %v2639_v40 }
 0x2b0   : > { %v2140_v14 = vclz %v2139_v61  ;;  %v2242_v7 = vmul.u32 %v2240_v63, %v2238_v6  ;;  %v2159_v52 = vsel %vm2036_vm0, %v2158_v2, %v2134_v11  ;;  %v2227_v62 = vsel %vm2223_vm15, %v10089_v16, %v2226_v24 }
 0x2b1   : > { %v2245_v35 = vmul.u32 %v2241_v5, %v2239_v19  ;;  %v2262_v48 = vand.u32 65535, %v2232_v17  ;;  %v2641_v30 = vmul.f32 %v2640_v47, %v10102_v9  ;;  %v2650_v28 = vxor.u32 2147483648, %v2633_v60 }
 0x2b2   : > { %v8412_v26 = vadd.s32 4294967294, %v2140_v14  ;;  %vm2250_vm8 = vc.u32 %v2242_v7, %v2246_v13  ;;  %vm10165_vm9 = vcmp.le.f32.partialorder %v2034_v55, 0.7853982  ;;  %v2248_v58 = vshll.u32 %v2244_v43, 16 }
 0x2b3   : > { %v2251_v11 = vsel %vm2250_vm8, 1, %v15066_v0  ;;  %v2252_v8 = vadd.s32 %v2246_v13, %v2242_v7  ;;  %v2265_v37 = vmul.u32 %v2263_v41, %v2238_v6  ;;  %v2647_v46 = vxor.u32 2147483648, %v2641_v30 }
 0x2b4   : > { %vm8413_vm10 = vcmp.lt.s32.totalorder %v8412_v26, 0  ;;  %v2247_v16 = vshrl.u32 %v2243_v45, 16  ;;  %v2253_v63 = vadd.s32 %v2251_v11, %v2245_v35  ;;  %v2264_v9 = vmul.u32 %v2262_v48, %v2238_v6 }
 0x2b5   : > { %v2143_v5 = vsel %vm8413_vm10, 0, %v8412_v26  ;;  %vm2254_vm11 = vc.u32 %v2252_v8, %v2248_v58  ;;  %v2266_v57 = vmul.u32 %v2262_v48, %v2239_v19  ;;  %v2648_v32 = vsel %vm2646_vm2, %v2633_v60, %v2647_v46 }
 0x2b6   : > { %v2651_v55 = vsel %vm2649_vm3, %v2650_v28, %v2641_v30  ;;  %v2144_v2 = vsub.s32 32, %v2143_v5  ;;  %v2148_v17 = vsub.s32 4294967266, %v2143_v5  ;;  %v2145_v51 = vshll.u32 %v10140_v50, %v2143_v5 }
 0x2b7   : > { %v2652_v29 = vsel %vm2645_vm5, %v2648_v32, %v2651_v55  ;;  %v2255_v45 = vsel %vm2254_vm11, 1, %v15066_v0  ;;  %v2268_v40 = vshll.u32 %v2265_v37, 16  ;;  %v2267_v60 = vmul.u32 %v2263_v41, %v2239_v19 }
 0x2b8   : > { %v2653_v6 = vsel %vm2642_vm7, nan, %v2652_v29  ;;  %v2146_v24 = vshrl.u32 %v2128_v23, %v2144_v2  ;;  %v2149_v61 = vadd.s32 127, %v2148_v17  ;;  %v2257_v13 = vadd.s32 %v2255_v45, %v2253_v63 }
 0x2b9   : > { %2728 = vmatpush.msra.mxu3 %v2653_v6  ;;  %v2270_v47 = vshll.u32 %v2266_v57, 16  ;;  %vm2272_vm12 = vc.u32 %v2264_v9, %v2268_v40  ;;  %v2274_v14 = vadd.s32 %v2268_v40, %v2264_v9  ;;  %vm1890_vm13 = vcmp.gt.s32.totalorder %v10108_v53, 0 }
 0x2ba   : > { %v2147_v7 = vor.u32 %v2146_v24, %v2145_v51  ;;  %v2150_v35 = vshll.u32 %v2149_v61, 23  ;;  %v2258_v33 = vadd.s32 %v2257_v13, %v2247_v16  ;;  %v2273_v48 = vsel %vm2272_vm12, 1, %v15066_v0 }
 0x2bb   : > { %v2249_v50 = vshrl.u32 %v2244_v43, 16  ;;  %v2275_v30 = vadd.s32 %v2273_v48, %v2267_v60  ;;  %vm2276_vm14 = vc.u32 %v2274_v14, %v2270_v47  ;;  %v1572_v44 = vand.u32 2139095040, %v9986_v10 }
 0x2bc   : > { %v2151_v23 = vor.u32 4788187, %v2150_v35  ;;  %v2161_v28 = vsel %vm10165_vm9, 0, %v2159_v52  ;;  %v2277_v19 = vsel %vm2276_vm14, 1, %v15066_v0  ;;  %v2228_v41 = vsel %vm2222_vm1, %v2225_v21, %v2227_v62 }
 0x2bd   : > { %v10188_v26 = vadd.s32 %v2258_v33, %v2249_v50  ;;  %v2269_v58 = vshrl.u32 %v2265_v37, 16  ;;  %v2279_v11 = vadd.s32 %v2277_v19, %v2275_v30  ;;  %v10191_v8 = vsel %vm1890_vm13, %v10108_v53, 0 }
 0x2be   : > { %v2152_v43 = vand.u32 2147483647, %v2151_v23  ;;  %v2154_v46 = vcvt.s32.f32 %v2147_v7  ;;  %v1724_v16 = vand.u32 2147483647, %v9770_v59  ;;  %v2178_v63 = vadd.s32 3, %v2161_v28 }
 0x2bf   : > { %v2271_v5 = vshrl.u32 %v2266_v57, 16  ;;  %v10194_v9 = vadd.s32 %v2274_v14, %v2270_v47  ;;  %v2280_v52 = vadd.s32 %v2279_v11, %v2269_v58  ;;  %v2282_v38 = vmul.u32 %v10124_v15, %v2228_v41 }
 0x2c0   : > { %v2155_v32 = vmul.f32 %v2154_v46, %v2152_v43  ;;  %v1742_v21 = vshrl.u32 %v15061_v20, %v10105_v4  ;;  %v1745_v62 = vshrl.u32 %v15059_v25, %v10105_v4  ;;  %v1741_v37 = vshll.u32 %v15063_v18, %v9810_v1 }
 0x2c1   : > { %v2281_v53 = vadd.s32 %v2280_v52, %v2271_v5  ;;  %vm2284_vm15 = vc.u32 %v10188_v26, %v10194_v9  ;;  %v1748_v57 = vshrl.u32 %v15057_v31, %v10105_v4  ;;  %v1731_v15 = vand.u32 8388607, %v1724_v16 }
 0x2c2   : > { %v2156_v55 = vxor.u32 2147483648, %v2155_v32  ;;  %v1744_v2 = vshll.u32 %v15061_v20, %v9810_v1  ;;  %v1747_v17 = vshll.u32 %v15059_v25, %v9810_v1  ;;  %v10213_v51 = vor.u32 %v1742_v21, %v1741_v37 }
 0x2c3   : > { %v2285_v29 = vadd.s32 1, %v2281_v53  ;;  %v1750_v45 = vshll.u32 %v15057_v31, %v9810_v1  ;;  %v1751_v40 = vshrl.u32 %v15055_v36, %v10105_v4  ;;  %v1753_v61 = vshll.u32 %v15055_v36, %v9810_v1 }
 0x2c4   : > { %v2157_v6 = vsel %vm2036_vm0, %v2156_v55, %v2155_v32  ;;  %v10221_v24 = vor.u32 %v1745_v62, %v1744_v2  ;;  %v1754_v13 = vshrl.u32 %v15053_v42, %v10105_v4  ;;  %v1749_v14 = vor.u32 %v1748_v57, %v1747_v17 }
 0x2c5   : > { %v10230_v60 = vsel %vm10165_vm9, %v9776_v56, %v2157_v6  ;;  %v2286_v47 = vsel %vm2284_vm15, %v2285_v29, %v2281_v53  ;;  %v1752_v7 = vor.u32 %v1751_v40, %v1750_v45  ;;  %vm1759_vm0 = vcmp.lt.s32.totalorder %v9796_v3, 4 }
 0x2c6   : > { %v2162_v35 = vmul.f32 %v10230_v60, %v10230_v60  ;;  %v2287_v33 = vadd.s32 %v2286_v47, %v2282_v38  ;;  %v1755_v48 = vor.u32 %v1754_v13, %v1753_v61  ;;  %v10239_v1 = vand.u32 31, %v10191_v8 }
 0x2c7   : > { %v1732_v50 = vor.u32 8388608, %v1731_v15  ;;  %vm1756_vm1 = vcmp.lt.s32.totalorder %v9796_v3, 1  ;;  %v1765_v27 = vsel %vm1759_vm0, %v1752_v7, 920167782  ;;  %vm1758_vm2 = vcmp.lt.s32.totalorder %v9796_v3, 3 }
 0x2c8   : > { %v2163_v30 = vmul.f32 -0.001358992, %v2162_v35  ;;  %v2170_v23 = vmul.f32 -0.00019511016, %v2162_v35  ;;  %v2288_v28 = vadd.s32 536870912, %v2287_v33  ;;  %v10245_v19 = vand.u32 3, %v2178_v63 }
 0x2c9   : > { %v1764_v41 = vsel %vm1756_vm1, %v10213_v51, %v10221_v24  ;;  %v1766_v58 = vsel %vm1758_vm2, %v1749_v14, %v1765_v27  ;;  %v1769_v11 = vsel %vm1759_vm0, %v1755_v48, 1326507024  ;;  %v1768_v52 = vsel %vm1756_vm1, %v10221_v24, %v1749_v14 }
 0x2ca   : > { %v2164_v43 = vadd.f32 0.041655596, %v2163_v30  ;;  %v2171_v46 = vadd.f32 0.008332121, %v2170_v23  ;;  %v2289_v5 = vshrl.u32 %v2288_v28, 30  ;;  %v10259_v63 = vsub.s32 32, %v10239_v1 }
 0x2cb   : > { %vm2191_vm3 = vcmp.lt.s32.totalorder %v9798_v22, 0  ;;  %v1770_v32 = vsel %vm1758_vm2, %v1752_v7, %v1769_v11  ;;  %v10264_v38 = vshll.u32 %v1732_v50, 8  ;;  %vm1757_vm4 = vcmp.lt.s32.totalorder %v9796_v3, 2 }
 0x2cc   : > { %v2165_v21 = vmul.f32 %v2164_v43, %v2162_v35  ;;  %v2172_v62 = vmul.f32 %v2171_v46, %v2162_v35  ;;  %v2290_v53 = vshll.u32 %v2289_v5, 30  ;;  %vm2184_vm5 = vcmp.eq.s32.totalorder %v10245_v19, 2 }
 0x2cd   : > { %v1740_v37 = vshrl.u32 %v15063_v18, %v10105_v4  ;;  %v1761_v57 = vsel %vm1759_vm0, %v1749_v14, 2102212464  ;;  %v10274_v55 = vsel %vm1757_vm4, %v1764_v41, %v1766_v58  ;;  %v1771_v15 = vsel %vm1757_vm4, %v1768_v52, %v1770_v32 }
 0x2ce   : > { %v2166_v2 = vadd.f32 -0.4999988, %v2165_v21  ;;  %v2173_v17 = vadd.f32 -0.16666654, %v2172_v62  ;;  %v10278_v29 = vsub.s32 %v2287_v33, %v2290_v53  ;;  %v2313_v45 = vsub.s32 4, %v2289_v5 }
 0x2cf   : > { %vm2181_vm7 = vcmp.eq.s32.totalorder %v10245_v19, 0  ;;  %v1773_v40 = vand.u32 65535, %v10264_v38  ;;  %v1774_v4 = vshrl.u32 %v10264_v38, 16  ;;  %v1775_v6 = vand.u32 65535, %v1771_v15 }
 0x2d0   : > { %v1776_v61 = vshrl.u32 %v1771_v15, 16  ;;  %v2167_v13 = vmul.f32 %v2166_v2, %v2162_v35  ;;  %v2174_v47 = vmul.f32 %v2173_v17, %v2162_v35  ;;  %vm2180_vm8 = vcmp.lt.s32.totalorder %v10245_v19, 2 }
 0x2d1   : > { %vm2292_vm9 = vcmp.lt.s32.totalorder %v10278_v29, 0  ;;  %v2293_v14 = vsub.s32 0, %v10278_v29  ;;  %vm2177_vm10 = vweird.f32 %v9776_v56  ;;  %v2283_v7 = vadd.s32 %v10194_v9, %v10188_v26 }
 0x2d2   : > { %v1778_v33 = vmul.u32 %v1776_v61, %v1773_v40  ;;  %v1779_v48 = vmul.u32 %v1775_v6, %v1774_v4  ;;  %v1797_v50 = vand.u32 65535, %v10274_v55  ;;  %v2168_v27 = vadd.f32 1.0, %v2167_v13 }
 0x2d3   : > { %v2175_v30 = vadd.f32 1.0, %v2174_v47  ;;  %v2294_v23 = vsel %vm2292_vm9, %v2293_v14, %v10278_v29  ;;  %v1760_v35 = vsel %vm1756_vm1, %v1740_v37, %v10213_v51  ;;  %v1762_v41 = vsel %vm1758_vm2, %v10221_v24, %v1761_v57 }
 0x2d4   : > { %v2295_v28 = vclz %v2294_v23  ;;  %v1781_v58 = vshll.u32 %v1778_v33, 16  ;;  %v1798_v26 = vshrl.u32 %v10274_v55, 16  ;;  %v2185_v11 = vxor.u32 2147483648, %v2168_v27 }
 0x2d5   : > { %v2176_v9 = vmul.f32 %v2175_v30, %v10230_v60  ;;  %v2314_v43 = vsel %vm2191_vm3, %v2313_v45, %v2289_v5  ;;  %v1777_v46 = vmul.u32 %v1775_v6, %v1773_v40  ;;  %v1780_v32 = vmul.u32 %v1776_v61, %v1774_v4 }
 0x2d6   : > { %v8415_v52 = vadd.s32 4294967294, %v2295_v28  ;;  %v1783_v21 = vshll.u32 %v1779_v48, 16  ;;  %v1799_v62 = vmul.u32 %v1797_v50, %v1773_v40  ;;  %v1800_v57 = vmul.u32 %v1798_v26, %v1773_v40 }
 0x2d7   : > { %v2182_v51 = vxor.u32 2147483648, %v2176_v9  ;;  %v2186_v53 = vsel %vm2184_vm5, %v2185_v11, %v2176_v9  ;;  %vm1785_vm11 = vc.u32 %v1777_v46, %v1781_v58  ;;  %v1787_v24 = vadd.s32 %v1781_v58, %v1777_v46 }
 0x2d8   : > { %vm8416_vm12 = vcmp.lt.s32.totalorder %v8415_v52, 0  ;;  %v1786_v37 = vsel %vm1785_vm11, 1, %v15066_v0  ;;  %v1801_v60 = vmul.u32 %v1797_v50, %v1774_v4  ;;  %v1782_v6 = vshrl.u32 %v1778_v33, 16 }
 0x2d9   : > { %v2183_v55 = vsel %vm2181_vm7, %v2168_v27, %v2182_v51  ;;  %v2298_v5 = vsel %vm8416_vm12, 0, %v8415_v52  ;;  %v1788_v15 = vadd.s32 %v1786_v37, %v1780_v32  ;;  %vm1789_vm13 = vc.u32 %v1787_v24, %v1783_v21 }
 0x2da   : > { %v2187_v2 = vsel %vm2180_vm8, %v2183_v55, %v2186_v53  ;;  %v2299_v17 = vsub.s32 32, %v2298_v5  ;;  %v2303_v45 = vsub.s32 4294967266, %v2298_v5  ;;  %v1784_v13 = vshrl.u32 %v1779_v48, 16 }
 0x2db   : > { %v2188_v61 = vsel %vm2177_vm10, nan, %v2187_v2  ;;  %v1790_v47 = vsel %vm1789_vm13, 1, %v15066_v0  ;;  %v1803_v40 = vshll.u32 %v1800_v57, 16  ;;  %v2300_v14 = vshll.u32 %v10278_v29, %v2298_v5 }
 0x2dc   : > { %2700 = vmatpush.msra.mxu2 %v2188_v61  ;;  %v2301_v50 = vshrl.u32 %v2283_v7, %v2299_v17  ;;  %v2304_v27 = vadd.s32 127, %v2303_v45  ;;  %v1792_v30 = vadd.s32 %v1790_v47, %v1788_v15  ;;  %v1802_v23 = vmul.u32 %v1798_v26, %v1774_v4 }
 0x2dd   : > { %v1805_v28 = vshll.u32 %v1801_v60, 16  ;;  %vm1807_vm14 = vc.u32 %v1799_v62, %v1803_v40  ;;  %v1809_v19 = vadd.s32 %v1803_v40, %v1799_v62  ;;  %vm10315_vm15 = vcmp.le.f32.partialorder %v2189_v12, 0.7853982 }
 0x2de   : > { %v2302_v58 = vor.u32 %v2301_v50, %v2300_v14  ;;  %v2305_v9 = vshll.u32 %v2304_v27, 23  ;;  %v1793_v33 = vadd.s32 %v1792_v30, %v1782_v6  ;;  %v1808_v56 = vsel %vm1807_vm14, 1, %v15066_v0 }
 0x2df   : > { %v1763_v29 = vsel %vm1757_vm4, %v1760_v35, %v1762_v41  ;;  %v1810_v7 = vadd.s32 %v1808_v56, %v1802_v23  ;;  %vm1811_vm0 = vc.u32 %v1809_v19, %v1805_v28  ;;  %v2316_v26 = vsel %vm10315_vm15, 0, %v2314_v43 }
 0x2e0   : > { %v2306_v4 = vor.u32 4788187, %v2305_v9  ;;  %v10323_v11 = vadd.s32 %v1793_v33, %v1784_v13  ;;  %v1812_v46 = vsel %vm1811_vm0, 1, %v15066_v0  ;;  %v1573_v52 = vshrl.u32 %v1572_v44, 23 }
 0x2e1   : > { %v1804_v12 = vshrl.u32 %v1800_v57, 16  ;;  %v1814_v32 = vadd.s32 %v1812_v46, %v1810_v7  ;;  %v1879_v21 = vand.u32 2147483647, %v9833_v39  ;;  %v10330_v3 = vshrl.u32 %v10191_v8, 5 }
 0x2e2   : > { %v2307_v35 = vand.u32 2147483647, %v2306_v4  ;;  %v2309_v41 = vcvt.s32.f32 %v2302_v58  ;;  %v10332_v62 = vadd.s32 %v1809_v19, %v1805_v28  ;;  %v2333_v51 = vadd.s32 3, %v2316_v26 }
 0x2e3   : > { %v1806_v43 = vshrl.u32 %v1801_v60, 16  ;;  %v1815_v53 = vadd.s32 %v1814_v32, %v1804_v12  ;;  %v1817_v24 = vmul.u32 %v10264_v38, %v1763_v29  ;;  %v1897_v44 = vshrl.u32 %v15061_v20, %v10259_v63 }
 0x2e4   : > { %v2310_v37 = vmul.f32 %v2309_v41, %v2307_v35  ;;  %vm1819_vm1 = vc.u32 %v10323_v11, %v10332_v62  ;;  %v1900_v8 = vshrl.u32 %v15059_v25, %v10259_v63  ;;  %v1886_v55 = vand.u32 8388607, %v1879_v21 }
 0x2e5   : > { %v1816_v57 = vadd.s32 %v1815_v53, %v1806_v43  ;;  %v1896_v60 = vshll.u32 %v15063_v18, %v10239_v1  ;;  %v1903_v38 = vshrl.u32 %v15057_v31, %v10259_v63  ;;  %v1899_v15 = vshll.u32 %v15061_v20, %v10239_v1 }
 0x2e6   : > { %v2311_v5 = vxor.u32 2147483648, %v2310_v37  ;;  %v1905_v2 = vshll.u32 %v15057_v31, %v10239_v1  ;;  %v1906_v17 = vshrl.u32 %v15055_v36, %v10259_v63  ;;  %v1902_v6 = vshll.u32 %v15059_v25, %v10239_v1 }
 0x2e7   : > { %v1820_v45 = vadd.s32 1, %v1816_v57  ;;  %v1908_v61 = vshll.u32 %v15055_v36, %v10239_v1  ;;  %v1909_v13 = vshrl.u32 %v15053_v42, %v10259_v63  ;;  %v10361_v40 = vor.u32 %v1897_v44, %v1896_v60 }
 0x2e8   : > { %v2312_v47 = vsel %vm2191_vm3, %v2311_v5, %v2310_v37  ;;  %v10363_v14 = vor.u32 %v1900_v8, %v1899_v15  ;;  %v1907_v50 = vor.u32 %v1906_v17, %v1905_v2  ;;  %v1904_v30 = vor.u32 %v1903_v38, %v1902_v6 }
 0x2e9   : > { %v10368_v27 = vsel %vm10315_vm15, %v9798_v22, %v2312_v47  ;;  %v1821_v1 = vsel %vm1819_vm1, %v1820_v45, %v1816_v57  ;;  %v1910_v23 = vor.u32 %v1909_v13, %v1908_v61  ;;  %v1887_v58 = vor.u32 8388608, %v1886_v55 }
 0x2ea   : > { %v2317_v28 = vmul.f32 %v10368_v27, %v10368_v27  ;;  %v1822_v19 = vadd.s32 %v1821_v1, %v1817_v24  ;;  %vm1914_vm2 = vcmp.lt.s32.totalorder %v10330_v3, 4  ;;  %v8402_v9 = vadd.s32 4294967169, %v1573_v52 }
 0x2eb   : > { %v10376_v33 = vand.u32 3, %v2333_v51  ;;  %vm1911_vm3 = vcmp.lt.s32.totalorder %v10330_v3, 1  ;;  %v1920_v56 = vsel %vm1914_vm2, %v1907_v50, 920167782  ;;  %vm1913_vm4 = vcmp.lt.s32.totalorder %v10330_v3, 3 }
 0x2ec   : > { %v2318_v48 = vmul.f32 -0.001358992, %v2317_v28  ;;  %v2325_v29 = vmul.f32 -0.00019511016, %v2317_v28  ;;  %v1823_v7 = vadd.s32 536870912, %v1822_v19  ;;  %v1919_v4 = vsel %vm1911_vm3, %v10361_v40, %v10363_v14 }
 0x2ed   : > { %v1921_v26 = vsel %vm1913_vm4, %v1904_v30, %v1920_v56  ;;  %v1923_v46 = vsel %vm1911_vm3, %v10363_v14, %v1904_v30  ;;  %v1924_v52 = vsel %vm1914_vm2, %v1910_v23, 1326507024  ;;  %v10395_v41 = vshll.u32 %v1887_v58, 8 }
 0x2ee   : > { %v2319_v12 = vadd.f32 0.041655596, %v2318_v48  ;;  %v2326_v32 = vadd.f32 0.008332121, %v2325_v29  ;;  %v10393_v35 = vshrl.u32 %v1823_v7, 30  ;;  %vm1912_vm5 = vcmp.lt.s32.totalorder %v10330_v3, 2 }
 0x2ef   : > { %v1925_v51 = vsel %vm1913_vm4, %v1907_v50, %v1924_v52  ;;  %v10403_v37 = vsel %vm1912_vm5, %v1919_v4, %v1921_v26  ;;  %v10406_v44 = vsub.s32 32, %v9792_v49  ;;  %v10408_v8 = vadd.s32 1, %v8402_v9 }
 0x2f0   : > { %v2320_v43 = vmul.f32 %v2319_v12, %v2317_v28  ;;  %v2327_v53 = vmul.f32 %v2326_v32, %v2317_v28  ;;  %v1825_v24 = vshll.u32 %v10393_v35, 30  ;;  %v1895_v57 = vshrl.u32 %v15063_v18, %v10259_v63 }
 0x2f1   : > { %v1926_v55 = vsel %vm1912_vm5, %v1923_v46, %v1925_v51  ;;  %vm2339_vm7 = vcmp.eq.s32.totalorder %v10376_v33, 2  ;;  %v1928_v15 = vand.u32 65535, %v10395_v41  ;;  %vm2336_vm8 = vcmp.eq.s32.totalorder %v10376_v33, 0 }
 0x2f2   : > { %v2321_v60 = vadd.f32 -0.4999988, %v2320_v43  ;;  %v2328_v38 = vadd.f32 -0.16666654, %v2327_v53  ;;  %v10415_v5 = vsub.s32 %v1822_v19, %v1825_v24  ;;  %v1929_v2 = vshrl.u32 %v10395_v41, 16 }
 0x2f3   : > { %v1930_v17 = vand.u32 65535, %v1926_v55  ;;  %v1931_v45 = vshrl.u32 %v1926_v55, 16  ;;  %v1953_v6 = vshrl.u32 %v10403_v37, 16  ;;  %vm2335_vm9 = vcmp.lt.s32.totalorder %v10376_v33, 2 }
 0x2f4   : > { %v2322_v63 = vmul.f32 %v2321_v60, %v2317_v28  ;;  %v2329_v61 = vmul.f32 %v2328_v38, %v2317_v28  ;;  %vm1827_vm10 = vcmp.lt.s32.totalorder %v10415_v5, 0  ;;  %v1828_v13 = vsub.s32 0, %v10415_v5 }
 0x2f5   : > { %vm2332_vm11 = vweird.f32 %v9798_v22  ;;  %vm1726_vm12 = vcmp.lt.s32.totalorder %v9770_v59, 0  ;;  %v1818_v47 = vadd.s32 %v10332_v62, %v10323_v11  ;;  %v1916_v50 = vsel %vm1914_vm2, %v1904_v30, 2102212464 }
 0x2f6   : > { %v1933_v1 = vmul.u32 %v1931_v45, %v1928_v15  ;;  %v1952_v23 = vand.u32 65535, %v10403_v37  ;;  %v2323_v28 = vadd.f32 1.0, %v2322_v63  ;;  %v2330_v19 = vadd.f32 1.0, %v2329_v61 }
 0x2f7   : > { %v1829_v58 = vsel %vm1827_vm10, %v1828_v13, %v10415_v5  ;;  %v1934_v9 = vmul.u32 %v1930_v17, %v1929_v2  ;;  %v1915_v48 = vsel %vm1911_vm3, %v1895_v57, %v10361_v40  ;;  %v1955_v7 = vmul.u32 %v1953_v6, %v1928_v15 }
 0x2f8   : > { %v1830_v56 = vclz %v1829_v58  ;;  %v1936_v29 = vshll.u32 %v1933_v1, 16  ;;  %v2331_v11 = vmul.f32 %v2330_v19, %v10368_v27  ;;  %v2340_v62 = vxor.u32 2147483648, %v2323_v28 }
 0x2f9   : > { %v1917_v30 = vsel %vm1913_vm4, %v10363_v14, %v1916_v50  ;;  %v1932_v4 = vmul.u32 %v1930_v17, %v1928_v15  ;;  %vm10441_vm13 = vcmp.le.f32.partialorder %v1724_v16, 0.7853982  ;;  %v1848_v52 = vsub.s32 4, %v10393_v35 }
 0x2fa   : > { %v8406_v46 = vadd.s32 4294967294, %v1830_v56  ;;  %v1935_v40 = vmul.u32 %v1931_v45, %v1929_v2  ;;  %v1956_v12 = vmul.u32 %v1952_v23, %v1929_v2  ;;  %v2337_v32 = vxor.u32 2147483648, %v2331_v11 }
 0x2fb   : > { %v1938_v51 = vshll.u32 %v1934_v9, 16  ;;  %vm1940_vm14 = vc.u32 %v1932_v4, %v1936_v29  ;;  %v1942_v27 = vadd.s32 %v1936_v29, %v1932_v4  ;;  %v2341_v43 = vsel %vm2339_vm7, %v2340_v62, %v2331_v11 }
 0x2fc   : > { %vm8407_vm15 = vcmp.lt.s32.totalorder %v8406_v46, 0  ;;  %v1941_v14 = vsel %vm1940_vm14, 1, %v15066_v0  ;;  %v1958_v53 = vshll.u32 %v1955_v7, 16  ;;  %v2338_v16 = vsel %vm2336_vm8, %v2323_v28, %v2337_v32 }
 0x2fd   : > { %v1833_v24 = vsel %vm8407_vm15, 0, %v8406_v46  ;;  %v1943_v37 = vadd.s32 %v1941_v14, %v1935_v40  ;;  %vm1944_vm0 = vc.u32 %v1942_v27, %v1938_v51  ;;  %v2342_v57 = vsel %vm2335_vm9, %v2338_v16, %v2341_v43 }
 0x2fe   : > { %v1834_v55 = vsub.s32 32, %v1833_v24  ;;  %v1838_v60 = vsub.s32 4294967266, %v1833_v24  ;;  %v1954_v38 = vmul.u32 %v1952_v23, %v1928_v15  ;;  %v2343_v17 = vsel %vm2332_vm11, nan, %v2342_v57 }
 0x2ff   : > { %v1849_v45 = vsel %vm1726_vm12, %v1848_v52, %v10393_v35  ;;  %v1937_v63 = vshrl.u32 %v1933_v1, 16  ;;  %v1945_v61 = vsel %vm1944_vm0, 1, %v15066_v0  ;;  %2729 = vmatpush.msra.mxu3 %v2343_v17  ;;  %v1835_v13 = vshll.u32 %v10415_v5, %v1833_v24 }
 0x300   : > { %v1836_v50 = vshrl.u32 %v1818_v47, %v1834_v55  ;;  %v1839_v28 = vadd.s32 127, %v1838_v60  ;;  %v1947_v33 = vadd.s32 %v1945_v61, %v1943_v37  ;;  %v1957_v19 = vmul.u32 %v1953_v6, %v1929_v2 }
 0x301   : > { %v1960_v58 = vshll.u32 %v1956_v12, 16  ;;  %vm1962_vm1 = vc.u32 %v1954_v38, %v1958_v53  ;;  %v1964_v15 = vadd.s32 %v1958_v53, %v1954_v38  ;;  %v1851_v35 = vsel %vm10441_vm13, 0, %v1849_v45 }
 0x302   : > { %v1837_v23 = vor.u32 %v1836_v50, %v1835_v13  ;;  %v1840_v22 = vshll.u32 %v1839_v28, 23  ;;  %v1948_v56 = vadd.s32 %v1947_v33, %v1937_v63  ;;  %v1963_v29 = vsel %vm1962_vm1, 1, %v15066_v0 }
 0x303   : > { %v1939_v1 = vshrl.u32 %v1934_v9, 16  ;;  %v1965_v11 = vadd.s32 %v1963_v29, %v1957_v19  ;;  %vm1966_vm2 = vc.u32 %v1964_v15, %v1960_v58  ;;  %v1918_v5 = vsel %vm1912_vm5, %v1915_v48, %v1917_v30 }
 0x304   : > { %v1841_v62 = vor.u32 4788187, %v1840_v22  ;;  %v1967_v2 = vsel %vm1966_vm2, 1, %v15066_v0  ;;  %v1414_v6 = vand.u32 2147483647, %v9768_v54  ;;  %v10468_v47 = vshrl.u32 %v9787_v34, 5 }
 0x305   : > { %v10470_v4 = vadd.s32 %v1948_v56, %v1939_v1  ;;  %v1959_v46 = vshrl.u32 %v1955_v7, 16  ;;  %v1969_v52 = vadd.s32 %v1967_v2, %v1965_v11  ;;  %vm1580_vm3 = vcmp.gt.s32.totalorder %v10408_v8, 0 }
 0x306   : > { %v1842_v9 = vand.u32 2147483647, %v1841_v62  ;;  %v1844_v40 = vcvt.s32.f32 %v1837_v23  ;;  %v1868_v32 = vadd.s32 3, %v1851_v35  ;;  %v1961_v51 = vshrl.u32 %v1956_v12, 16 }
 0x307   : > { %v10473_v27 = vadd.s32 %v1964_v15, %v1960_v58  ;;  %v1970_v3 = vadd.s32 %v1969_v52, %v1959_v46  ;;  %v1972_v48 = vmul.u32 %v10395_v41, %v1918_v5  ;;  %v1421_v34 = vand.u32 8388607, %v1414_v6 }
 0x308   : > { %v1845_v30 = vmul.f32 %v1844_v40, %v1842_v9  ;;  %v1432_v43 = vshrl.u32 %v15061_v20, %v10406_v44  ;;  %v1435_v7 = vshrl.u32 %v15059_v25, %v10406_v44  ;;  %v1431_v12 = vshll.u32 %v15063_v18, %v9792_v49 }
 0x309   : > { %v1971_v14 = vadd.s32 %v1970_v3, %v1961_v51  ;;  %vm1974_vm4 = vc.u32 %v10470_v4, %v10473_v27  ;;  %v1438_v41 = vshrl.u32 %v15057_v31, %v10406_v44  ;;  %v1434_v16 = vshll.u32 %v15061_v20, %v9792_v49 }
 0x30a   : > { %v1846_v53 = vxor.u32 2147483648, %v1845_v30  ;;  %v1440_v24 = vshll.u32 %v15057_v31, %v9792_v49  ;;  %v1441_v37 = vshrl.u32 %v15055_v36, %v10406_v44  ;;  %v1437_v55 = vshll.u32 %v15059_v25, %v9792_v49 }
 0x30b   : > { %v1975_v57 = vadd.s32 1, %v1971_v14  ;;  %v1443_v60 = vshll.u32 %v15055_v36, %v9792_v49  ;;  %v1444_v38 = vshrl.u32 %v15053_v42, %v10406_v44  ;;  %v10502_v45 = vor.u32 %v1432_v43, %v1431_v12 }
 0x30c   : > { %v1847_v17 = vsel %vm1726_vm12, %v1846_v53, %v1845_v30  ;;  %v10504_v63 = vor.u32 %v1435_v7, %v1434_v16  ;;  %v1442_v61 = vor.u32 %v1441_v37, %v1440_v24  ;;  %v1439_v49 = vor.u32 %v1438_v41, %v1437_v55 }
 0x30d   : > { %v1850_v13 = vsel %vm10441_vm13, %v9770_v59, %v1847_v17  ;;  %v1976_v50 = vsel %vm1974_vm4, %v1975_v57, %v1971_v14  ;;  %v1445_v28 = vor.u32 %v1444_v38, %v1443_v60  ;;  %v1422_v58 = vor.u32 8388608, %v1421_v34 }
 0x30e   : > { %v1852_v33 = vmul.f32 %v1850_v13, %v1850_v13  ;;  %v1977_v19 = vadd.s32 %v1976_v50, %v1972_v48  ;;  %vm1449_vm5 = vcmp.lt.s32.totalorder %v10468_v47, 4  ;;  %v1581_v15 = vsel %vm1580_vm3, %v10408_v8, 0 }
 0x30f   : > { %v10516_v23 = vand.u32 3, %v1868_v32  ;;  %vm1446_vm7 = vcmp.lt.s32.totalorder %v10468_v47, 1  ;;  %v1455_v26 = vsel %vm1449_vm5, %v1442_v61, 920167782  ;;  %vm1448_vm8 = vcmp.lt.s32.totalorder %v10468_v47, 3 }
 0x310   : > { %v1853_v22 = vmul.f32 -0.001358992, %v1852_v33  ;;  %v1860_v56 = vmul.f32 -0.00019511016, %v1852_v33  ;;  %v1978_v29 = vadd.s32 536870912, %v1977_v19  ;;  %v1454_v35 = vsel %vm1446_vm7, %v10502_v45, %v10504_v63 }
 0x311   : > { %v1456_v8 = vsel %vm1448_vm8, %v1439_v49, %v1455_v26  ;;  %v1458_v1 = vsel %vm1446_vm7, %v10504_v63, %v1439_v49  ;;  %v1459_v11 = vsel %vm1449_vm5, %v1445_v28, 1326507024  ;;  %v10535_v46 = vshll.u32 %v1422_v58, 8 }
 0x312   : > { %v1854_v62 = vadd.f32 0.041655596, %v1853_v22  ;;  %v1861_v5 = vadd.f32 0.008332121, %v1860_v56  ;;  %v10533_v2 = vshrl.u32 %v1978_v29, 30  ;;  %vm1447_vm9 = vcmp.lt.s32.totalorder %v10468_v47, 2 }
 0x313   : > { %v1460_v52 = vsel %vm1448_vm8, %v1442_v61, %v1459_v11  ;;  %v10543_v51 = vsel %vm1447_vm9, %v1454_v35, %v1456_v8  ;;  %v10545_v3 = vshrl.u32 %v1581_v15, 5  ;;  %v10547_v48 = vand.u32 31, %v1581_v15 }
 0x314   : > { %v1855_v9 = vmul.f32 %v1854_v62, %v1852_v33  ;;  %v1862_v40 = vmul.f32 %v1861_v5, %v1852_v33  ;;  %v1980_v32 = vshll.u32 %v10533_v2, 30  ;;  %v1461_v30 = vsel %vm1447_vm9, %v1458_v1, %v1460_v52 }
 0x315   : > { %vm1874_vm10 = vcmp.eq.s32.totalorder %v10516_v23, 2  ;;  %v1463_v14 = vand.u32 65535, %v10535_v46  ;;  %vm1871_vm11 = vcmp.eq.s32.totalorder %v10516_v23, 0  ;;  %v1464_v12 = vshrl.u32 %v10535_v46, 16 }
 0x316   : > { %v1856_v34 = vadd.f32 -0.4999988, %v1855_v9  ;;  %v1863_v43 = vadd.f32 -0.16666654, %v1862_v40  ;;  %v10552_v7 = vsub.s32 %v1977_v19, %v1980_v32  ;;  %v1465_v41 = vand.u32 65535, %v1461_v30 }
 0x317   : > { %v1466_v53 = vshrl.u32 %v1461_v30, 16  ;;  %v1488_v16 = vshrl.u32 %v10543_v51, 16  ;;  %vm1870_vm12 = vcmp.lt.s32.totalorder %v10516_v23, 2  ;;  %vm1867_vm14 = vweird.f32 %v9770_v59 }
 0x318   : > { %v1857_v24 = vmul.f32 %v1856_v34, %v1852_v33  ;;  %v1864_v37 = vmul.f32 %v1863_v43, %v1852_v33  ;;  %vm1982_vm13 = vcmp.lt.s32.totalorder %v10552_v7, 0  ;;  %v1983_v57 = vsub.s32 0, %v10552_v7 }
 0x319   : > { %v1430_v55 = vshrl.u32 %v15063_v18, %v10406_v44  ;;  %v1451_v60 = vsel %vm1449_vm5, %v1439_v49, 2102212464  ;;  %v1468_v38 = vmul.u32 %v1466_v53, %v1463_v14  ;;  %v1487_v17 = vand.u32 65535, %v10543_v51 }
 0x31a   : > { %v1858_v61 = vadd.f32 1.0, %v1857_v24  ;;  %v1865_v50 = vadd.f32 1.0, %v1864_v37  ;;  %v1984_v28 = vsel %vm1982_vm13, %v1983_v57, %v10552_v7  ;;  %v1469_v33 = vmul.u32 %v1465_v41, %v1464_v12 }
 0x31b   : > { %v1973_v19 = vadd.s32 %v10473_v27, %v10470_v4  ;;  %v1985_v58 = vclz %v1984_v28  ;;  %v1471_v15 = vshll.u32 %v1468_v38, 16  ;;  %v1490_v26 = vmul.u32 %v1488_v16, %v1463_v14 }
 0x31c   : > { %v1866_v22 = vmul.f32 %v1865_v50, %v1850_v13  ;;  %v1875_v56 = vxor.u32 2147483648, %v1858_v61  ;;  %v1450_v44 = vsel %vm1446_vm7, %v1430_v55, %v10502_v45  ;;  %v1467_v49 = vmul.u32 %v1465_v41, %v1463_v14 }
 0x31d   : > { %v8409_v29 = vadd.s32 4294967294, %v1985_v58  ;;  %v1452_v35 = vsel %vm1448_vm8, %v10504_v63, %v1451_v60  ;;  %v1470_v8 = vmul.u32 %v1466_v53, %v1464_v12  ;;  %v1491_v1 = vmul.u32 %v1487_v17, %v1464_v12 }
 0x31e   : > { %v1872_v11 = vxor.u32 2147483648, %v1866_v22  ;;  %v1473_v62 = vshll.u32 %v1469_v33, 16  ;;  %vm1475_vm15 = vc.u32 %v1467_v49, %v1471_v15  ;;  %v1477_v4 = vadd.s32 %v1471_v15, %v1467_v49 }
 0x31f   : > { %v1876_v27 = vsel %vm1874_vm10, %v1875_v56, %v1866_v22  ;;  %vm8410_vm0 = vcmp.lt.s32.totalorder %v8409_v29, 0  ;;  %v1476_v13 = vsel %vm1475_vm15, 1, %v15066_v0  ;;  %v1493_v5 = vshll.u32 %v1490_v26, 16 }
 0x320   : > { %v1873_v45 = vsel %vm1871_vm11, %v1858_v61, %v1872_v11  ;;  %v1988_v52 = vsel %vm8410_vm0, 0, %v8409_v29  ;;  %v1478_v9 = vadd.s32 %v1476_v13, %v1470_v8  ;;  %vm1479_vm1 = vc.u32 %v1477_v4, %v1473_v62 }
 0x321   : > { %v1877_v63 = vsel %vm1870_vm12, %v1873_v45, %v1876_v27  ;;  %v1989_v40 = vsub.s32 32, %v1988_v52  ;;  %v1993_v32 = vsub.s32 4294967266, %v1988_v52  ;;  %v2003_v51 = vsub.s32 4, %v10533_v2 }
 0x322   : > { %v1878_v30 = vsel %vm1867_vm14, nan, %v1877_v63  ;;  %v1472_v34 = vshrl.u32 %v1468_v38, 16  ;;  %v1480_v43 = vsel %vm1479_vm1, 1, %v15066_v0  ;;  %v1489_v41 = vmul.u32 %v1487_v17, %v1463_v14 }
 0x323   : > { %2701 = vmatpush.msra.mxu2 %v1878_v30  ;;  %v1990_v53 = vshll.u32 %v10552_v7, %v1988_v52  ;;  %v1991_v24 = vshrl.u32 %v1973_v19, %v1989_v40  ;;  %v1994_v37 = vadd.s32 127, %v1993_v32  ;;  %v1482_v57 = vadd.s32 %v1480_v43, %v1478_v9 }
 0x324   : > { %v1492_v55 = vmul.u32 %v1488_v16, %v1464_v12  ;;  %v1495_v23 = vshll.u32 %v1491_v1, 16  ;;  %vm1497_vm2 = vc.u32 %v1489_v41, %v1493_v5  ;;  %v1499_v60 = vadd.s32 %v1493_v5, %v1489_v41 }
 0x325   : > { %v1992_v61 = vor.u32 %v1991_v24, %v1990_v53  ;;  %v1995_v50 = vshll.u32 %v1994_v37, 23  ;;  %v1483_v28 = vadd.s32 %v1482_v57, %v1472_v34  ;;  %v1498_v59 = vsel %vm1497_vm2, 1, %v15066_v0 }
 0x326   : > { %v10590_v38 = vsub.s32 32, %v10547_v48  ;;  %v1474_v58 = vshrl.u32 %v1469_v33, 16  ;;  %v1500_v14 = vadd.s32 %v1498_v59, %v1492_v55  ;;  %vm1501_vm3 = vc.u32 %v1499_v60, %v1495_v23 }
 0x327   : > { %v1996_v17 = vor.u32 4788187, %v1995_v50  ;;  %v1453_v7 = vsel %vm1447_vm9, %v1450_v44, %v1452_v35  ;;  %v1502_v12 = vsel %vm1501_vm3, 1, %v15066_v0  ;;  %v1569_v16 = vand.u32 2147483647, %v9986_v10 }
 0x328   : > { %vm1881_vm4 = vcmp.lt.s32.totalorder %v9833_v39, 0  ;;  %v10597_v19 = vadd.s32 %v1483_v28, %v1474_v58  ;;  %v1494_v15 = vshrl.u32 %v1490_v26, 16  ;;  %v1504_v22 = vadd.s32 %v1502_v12, %v1500_v14 }
 0x329   : > { %vm10601_vm5 = vcmp.le.f32.partialorder %v1879_v21, 0.7853982  ;;  %v1997_v56 = vand.u32 2147483647, %v1996_v17  ;;  %v1999_v49 = vcvt.s32.f32 %v1992_v61  ;;  %v2004_v47 = vsel %vm1881_vm4, %v2003_v51, %v10533_v2 }
 0x32a   : > { %v1496_v44 = vshrl.u32 %v1491_v1, 16  ;;  %v10608_v29 = vadd.s32 %v1499_v60, %v1495_v23  ;;  %v1505_v35 = vadd.s32 %v1504_v22, %v1494_v15  ;;  %v1507_v8 = vmul.u32 %v10535_v46, %v1453_v7 }
 0x32b   : > { %v2000_v26 = vmul.f32 %v1999_v49, %v1997_v56  ;;  %v1576_v11 = vand.u32 8388607, %v1569_v16  ;;  %v1590_v21 = vshrl.u32 %v15059_v25, %v10590_v38  ;;  %v1593_v62 = vshrl.u32 %v15057_v31, %v10590_v38 }
 0x32c   : > { %v1506_v4 = vadd.s32 %v1505_v35, %v1496_v44  ;;  %vm1509_vm7 = vc.u32 %v10597_v19, %v10608_v29  ;;  %v1595_v2 = vshll.u32 %v15057_v31, %v10547_v48  ;;  %v1596_v46 = vshrl.u32 %v15055_v36, %v10590_v38 }
 0x32d   : > { %v2001_v1 = vxor.u32 2147483648, %v2000_v26  ;;  %v1587_v27 = vshrl.u32 %v15061_v20, %v10590_v38  ;;  %v1589_v13 = vshll.u32 %v15061_v20, %v10547_v48  ;;  %v1592_v5 = vshll.u32 %v15059_v25, %v10547_v48 }
 0x32e   : > { %v1510_v45 = vadd.s32 1, %v1506_v4  ;;  %v1597_v52 = vor.u32 %v1596_v46, %v1595_v2  ;;  %v1598_v9 = vshll.u32 %v15055_v36, %v10547_v48  ;;  %v1599_v63 = vshrl.u32 %v15053_v42, %v10590_v38 }
 0x32f   : > { %v2002_v40 = vsel %vm1881_vm4, %v2001_v1, %v2000_v26  ;;  %v1586_v32 = vshll.u32 %v15063_v18, %v10547_v48  ;;  %v10637_v51 = vor.u32 %v1590_v21, %v1589_v13  ;;  %v10639_v30 = vor.u32 %v1593_v62, %v1592_v5 }
 0x330   : > { %v2005_v34 = vsel %vm10601_vm5, %v9833_v39, %v2002_v40  ;;  %v1511_v43 = vsel %vm1509_vm7, %v1510_v45, %v1506_v4  ;;  %v1577_v41 = vor.u32 8388608, %v1576_v11  ;;  %v1600_v53 = vor.u32 %v1599_v63, %v1598_v9 }
 0x331   : > { %v2007_v24 = vmul.f32 %v2005_v34, %v2005_v34  ;;  %v1512_v37 = vadd.s32 %v1511_v43, %v1507_v8  ;;  %v10647_v57 = vor.u32 %v1587_v27, %v1586_v32  ;;  %vm1604_vm8 = vcmp.lt.s32.totalorder %v10545_v3, 4 }
 0x332   : > { %vm1601_vm9 = vcmp.lt.s32.totalorder %v10545_v3, 1  ;;  %vm1603_vm10 = vcmp.lt.s32.totalorder %v10545_v3, 3  ;;  %v1610_v48 = vsel %vm1604_vm8, %v1597_v52, 920167782  ;;  %v1614_v55 = vsel %vm1604_vm8, %v1600_v53, 1326507024 }
 0x333   : > { %v2008_v23 = vmul.f32 -0.001358992, %v2007_v24  ;;  %v2015_v60 = vmul.f32 -0.00019511016, %v2007_v24  ;;  %v1513_v61 = vadd.s32 536870912, %v1512_v37  ;;  %v1613_v50 = vsel %vm1601_vm9, %v10637_v51, %v10639_v30 }
 0x334   : > { %v2006_v28 = vsel %vm10601_vm5, 0, %v2004_v47  ;;  %v1615_v59 = vsel %vm1603_vm10, %v1597_v52, %v1614_v55  ;;  %v10664_v58 = vshll.u32 %v1577_v41, 8  ;;  %vm1602_vm11 = vcmp.lt.s32.totalorder %v10545_v3, 2 }
 0x335   : > { %v2009_v14 = vadd.f32 0.041655596, %v2008_v23  ;;  %v2016_v17 = vadd.f32 0.008332121, %v2015_v60  ;;  %v10666_v7 = vshrl.u32 %v1513_v61, 30  ;;  %v1609_v12 = vsel %vm1601_vm9, %v10647_v57, %v10637_v51 }
 0x336   : > { %v1611_v15 = vsel %vm1603_vm10, %v10639_v30, %v1610_v48  ;;  %v1616_v22 = vsel %vm1602_vm11, %v1613_v50, %v1615_v59  ;;  %v2023_v49 = vadd.s32 3, %v2006_v28  ;;  %v1618_v44 = vand.u32 65535, %v10664_v58 }
 0x337   : > { %v2010_v33 = vmul.f32 %v2009_v14, %v2007_v24  ;;  %v2017_v56 = vmul.f32 %v2016_v17, %v2007_v24  ;;  %v1515_v47 = vshll.u32 %v10666_v7, 30  ;;  %v1619_v35 = vshrl.u32 %v10664_v58, 16 }
 0x338   : > { %v1620_v8 = vand.u32 65535, %v1616_v22  ;;  %v1621_v26 = vshrl.u32 %v1616_v22, 16  ;;  %v1612_v4 = vsel %vm1602_vm11, %v1609_v12, %v1611_v15  ;;  %v2024_v5 = vand.u32 3, %v2023_v49 }
 0x339   : > { %v2011_v11 = vadd.f32 -0.4999988, %v2010_v33  ;;  %v2018_v21 = vadd.f32 -0.16666654, %v2017_v56  ;;  %v1516_v62 = vsub.s32 %v1512_v37, %v1515_v47  ;;  %v1642_v9 = vand.u32 65535, %v1612_v4 }
 0x33a   : > { %v1623_v2 = vmul.u32 %v1621_v26, %v1618_v44  ;;  %v10683_v46 = vmul.u32 %v1620_v8, %v1619_v35  ;;  %v1622_v45 = vmul.u32 %v1620_v8, %v1618_v44  ;;  %v1643_v43 = vshrl.u32 %v1612_v4, 16 }
 0x33b   : > { %v2012_v1 = vmul.f32 %v2011_v11, %v2007_v24  ;;  %v2019_v27 = vmul.f32 %v2018_v21, %v2007_v24  ;;  %vm1517_vm12 = vcmp.lt.s32.totalorder %v1516_v62, 0  ;;  %v1518_v13 = vsub.s32 0, %v1516_v62 }
 0x33c   : > { %v1626_v52 = vshll.u32 %v1623_v2, 16  ;;  %v1625_v53 = vmul.u32 %v1621_v26, %v1619_v35  ;;  %v1628_v37 = vshll.u32 %v10683_v46, 16  ;;  %vm2022_vm14 = vweird.f32 %v9833_v39 }
 0x33d   : > { %v2013_v63 = vadd.f32 1.0, %v2012_v1  ;;  %v2020_v40 = vadd.f32 1.0, %v2019_v27  ;;  %v1519_v32 = vsel %vm1517_vm12, %v1518_v13, %v1516_v62  ;;  %vm2025_vm15 = vcmp.lt.s32.totalorder %v2024_v5, 2 }
 0x33e   : > { %v1520_v41 = vclz %v1519_v32  ;;  %vm1630_vm13 = vc.u32 %v1622_v45, %v1626_v52  ;;  %v1632_v24 = vadd.s32 %v1626_v52, %v1622_v45  ;;  %vm2026_vm0 = vcmp.eq.s32.totalorder %v2024_v5, 0 }
 0x33f   : > { %v2021_v48 = vmul.f32 %v2020_v40, %v2005_v34  ;;  %v2030_v55 = vxor.u32 2147483648, %v2013_v63  ;;  %v1631_v23 = vsel %vm1630_vm13, 1, %v15066_v0  ;;  %vm2029_vm1 = vcmp.eq.s32.totalorder %v2024_v5, 2 }
 0x340   : > { %v8400_v60 = vadd.s32 4294967294, %v1520_v41  ;;  %v1633_v50 = vadd.s32 %v1631_v23, %v1625_v53  ;;  %vm1634_vm2 = vc.u32 %v1632_v24, %v1628_v37  ;;  %v1508_v28 = vadd.s32 %v10608_v29, %v10597_v19 }
 0x341   : > { %v2027_v61 = vxor.u32 2147483648, %v2021_v48  ;;  %v1635_v59 = vsel %vm1634_vm2, 1, %v15066_v0  ;;  %v1645_v34 = vmul.u32 %v1643_v43, %v1618_v44  ;;  %v2031_v17 = vsel %vm2029_vm1, %v2030_v55, %v2021_v48 }
 0x342   : > { %vm8401_vm3 = vcmp.lt.s32.totalorder %v8400_v60, 0  ;;  %v1646_v15 = vmul.u32 %v1642_v9, %v1619_v35  ;;  %v1637_v49 = vadd.s32 %v1635_v59, %v1633_v50  ;;  %v1644_v8 = vmul.u32 %v1642_v9, %v1618_v44 }
 0x343   : > { %v2028_v14 = vsel %vm2026_vm0, %v2013_v63, %v2027_v61  ;;  %v1523_v12 = vsel %vm8401_vm3, 0, %v8400_v60  ;;  %v1648_v26 = vshll.u32 %v1645_v34, 16  ;;  %v1627_v21 = vshrl.u32 %v1623_v2, 16  ;;  %v2656_v60 = vld [vmem:[#allocation2 + $0x28] sm:$0xff] }
 0x344   : > { %v2032_v22 = vsel %vm2025_vm15, %v2028_v14, %v2031_v17  ;;  %v1524_v33 = vsub.s32 32, %v1523_v12  ;;  %v1528_v56 = vsub.s32 4294967266, %v1523_v12  ;;  %v1525_v11 = vshll.u32 %v1516_v62, %v1523_v12 }
 0x345   : > { %v2033_v47 = vsel %vm2022_vm14, nan, %v2032_v22  ;;  %v1647_v4 = vmul.u32 %v1643_v43, %v1619_v35  ;;  %v1650_v1 = vshll.u32 %v1646_v15, 16  ;;  %vm1652_vm4 = vc.u32 %v1644_v8, %v1648_v26 }
 0x346   : > { %2730 = vmatpush.msra.mxu3 %v2033_v47  ;;  %v1526_v19 = vshrl.u32 %v1508_v28, %v1524_v33  ;;  %v1529_v29 = vadd.s32 127, %v1528_v56  ;;  %v1654_v27 = vadd.s32 %v1648_v26, %v1644_v8  ;;  %v1638_v45 = vadd.s32 %v1637_v49, %v1627_v21 }
 0x347   : > { %v1653_v52 = vsel %vm1652_vm4, 1, %v15066_v0  ;;  %v1585_v39 = vshrl.u32 %v15063_v18, %v10590_v38  ;;  %v1606_v44 = vsel %vm1604_vm8, %v10639_v30, 2102212464  ;;  %v1629_v35 = vshrl.u32 %v10683_v46, 16 }
 0x348   : > { %v1527_v13 = vor.u32 %v1526_v19, %v1525_v11  ;;  %v1530_v5 = vshll.u32 %v1529_v29, 23  ;;  %v1655_v62 = vadd.s32 %v1653_v52, %v1647_v4  ;;  %vm1656_vm5 = vc.u32 %v1654_v27, %v1650_v1 }
 0x349   : > { %v1657_v2 = vsel %vm1656_vm5, 1, %v15066_v0  ;;  %v1605_v63 = vsel %vm1601_vm9, %v1585_v39, %v10647_v57  ;;  %v1649_v40 = vshrl.u32 %v1645_v34, 16  ;;  %v1607_v38 = vsel %vm1603_vm10, %v10637_v51, %v1606_v44 }
 0x34a   : > { %v1531_v9 = vor.u32 4788187, %v1530_v5  ;;  %v1659_v32 = vadd.s32 %v1657_v2, %v1655_v62  ;;  %v1534_v41 = vcvt.s32.f32 %v1527_v13  ;;  %v1639_v30 = vadd.s32 %v1638_v45, %v1629_v35 }
 0x34b   : > { %v1651_v53 = vshrl.u32 %v1646_v15, 16  ;;  %v1658_v55 = vadd.s32 %v1654_v27, %v1650_v1  ;;  %v1608_v46 = vsel %vm1602_vm11, %v1605_v63, %v1607_v38  ;;  %vm1416_vm8 = vcmp.lt.s32.totalorder %v9768_v54, 0 }
 0x34c   : > { %v1532_v43 = vand.u32 2147483647, %v1531_v9  ;;  %v1660_v37 = vadd.s32 %v1659_v32, %v1649_v40  ;;  %vm10712_vm9 = vcmp.le.f32.partialorder %v1414_v6, 0.7853982  ;;  %v1662_v61 = vmul.u32 %v10664_v58, %v1608_v46  ;;  %v2655_v46 = vld [vmem:[#allocation2 + $0x20] sm:$0xff] }
 0x34d   : > { %vm1664_vm7 = vc.u32 %v1639_v30, %v1658_v55  ;;  %v1538_v50 = vsub.s32 4, %v10666_v7  ;;  %vm1557_vm11 = vweird.f32 %v9768_v54  ;;  %v1663_v63 = vadd.s32 %v1658_v55, %v1639_v30 }
 0x34e   : > { %v1535_v48 = vmul.f32 %v1534_v41, %v1532_v43  ;;  %v1661_v23 = vadd.s32 %v1660_v37, %v1651_v53  ;;  %vm1571_vm0 = vcmp.lt.s32.totalorder %v9986_v10, 0  ;;  %vm10729_vm1 = vcmp.le.f32.partialorder %v1569_v16, 0.7853982 }
 0x34f   : > { %v1539_v6 = vsel %vm1416_vm8, %v1538_v50, %v10666_v7  ;;  %vm1712_vm5 = vweird.f32 %v9986_v10 }
 0x350   : > { %v1536_v24 = vxor.u32 2147483648, %v1535_v48  ;;  %v1665_v57 = vadd.s32 1, %v1661_v23  ;;  %v1541_v58 = vsel %vm10712_vm9, 0, %v1539_v6 }
 0x351   : > { %v1558_v19 = vadd.s32 3, %v1541_v58 }
 0x352   : > { %v1537_v51 = vsel %vm1416_vm8, %v1536_v24, %v1535_v48  ;;  %v1666_v28 = vsel %vm1664_vm7, %v1665_v57, %v1661_v23 }
 0x353   : > { %v1540_v3 = vsel %vm10712_vm9, %v9768_v54, %v1537_v51  ;;  %v1667_v34 = vadd.s32 %v1666_v28, %v1662_v61  ;;  %v1559_v13 = vand.u32 3, %v1558_v19 }
 0x354   : > { %v1542_v59 = vmul.f32 %v1540_v3, %v1540_v3 }
 0x355   : > { %v1668_v12 = vadd.s32 536870912, %v1667_v34  ;;  %vm1561_vm12 = vcmp.eq.s32.totalorder %v1559_v13, 0  ;;  %vm1564_vm13 = vcmp.eq.s32.totalorder %v1559_v13, 2  ;;  %vm1560_vm15 = vcmp.lt.s32.totalorder %v1559_v13, 2  ;;  %v2673_v13 = vpop.permute.xlu1 %2672 }
 0x356   : > { %v1543_v14 = vmul.f32 -0.001358992, %v1542_v59  ;;  %v1550_v17 = vmul.f32 -0.00019511016, %v1542_v59 }
 0x357   : > { %v1669_v33 = vshrl.u32 %v1668_v12, 30 }
 0x358   : > { %v1544_v15 = vadd.f32 0.041655596, %v1543_v14  ;;  %v1551_v22 = vadd.f32 0.008332121, %v1550_v17  ;;  %v2657_v14 = vld [vmem:[#allocation2 + $0x30] sm:$0xff] }
 0x359   : > { %v1670_v47 = vshll.u32 %v1669_v33, 30  ;;  %v1693_v61 = vsub.s32 4, %v1669_v33 }
 0x35a   : > { %v1545_v56 = vmul.f32 %v1544_v15, %v1542_v59  ;;  %v1552_v49 = vmul.f32 %v1551_v22, %v1542_v59 }
 0x35b   : > { %v1671_v11 = vsub.s32 %v1667_v34, %v1670_v47  ;;  %v1694_v34 = vsel %vm1571_vm0, %v1693_v61, %v1669_v33 }
 0x35c   : > { %v1546_v8 = vadd.f32 -0.4999988, %v1545_v56  ;;  %v1553_v26 = vadd.f32 -0.16666654, %v1552_v49  ;;  %v1696_v16 = vsel %vm10729_vm1, 0, %v1694_v34 }
 0x35d   : > { %vm1672_vm10 = vcmp.lt.s32.totalorder %v1671_v11, 0  ;;  %v1673_v4 = vsub.s32 0, %v1671_v11  ;;  %v1713_v56 = vadd.s32 3, %v1696_v16 }
 0x35e   : > { %v1547_v29 = vmul.f32 %v1546_v8, %v1542_v59  ;;  %v1554_v21 = vmul.f32 %v1553_v26, %v1542_v59  ;;  %v2658_v8 = vld [vmem:[#allocation2 + $0x38] sm:$0xff] }
 0x35f   : > { %v1674_v7 = vsel %vm1672_vm10, %v1673_v4, %v1671_v11  ;;  %v1714_v19 = vand.u32 3, %v1713_v56 }
 0x360   : > { %v1548_v1 = vadd.f32 1.0, %v1547_v29  ;;  %v1555_v27 = vadd.f32 1.0, %v1554_v21  ;;  %v1675_v5 = vclz %v1674_v7 }
 0x361   : > { %vm1716_vm2 = vcmp.eq.s32.totalorder %v1714_v19, 0  ;;  %vm1719_vm3 = vcmp.eq.s32.totalorder %v1714_v19, 2  ;;  %vm1715_vm4 = vcmp.lt.s32.totalorder %v1714_v19, 2 }
 0x362   : > { %v1556_v45 = vmul.f32 %v1555_v27, %v1540_v3  ;;  %v1565_v52 = vxor.u32 2147483648, %v1548_v1  ;;  %v8403_v39 = vadd.s32 4294967294, %v1675_v5 }
 0x364   : > { %v1562_v44 = vxor.u32 2147483648, %v1556_v45  ;;  %vm8404_vm14 = vcmp.lt.s32.totalorder %v8403_v39, 0  ;;  %v1566_v9 = vsel %vm1564_vm13, %v1565_v52, %v1556_v45  ;;  %v2661_v45 = vpop.permute.xlu1 %2660 }
 0x365   : > { %v1678_v35 = vsel %vm8404_vm14, 0, %v8403_v39 }
 0x366   : > { %v1563_v62 = vsel %vm1561_vm12, %v1548_v1, %v1562_v44  ;;  %v1679_v40 = vsub.s32 32, %v1678_v35  ;;  %v1683_v32 = vsub.s32 4294967266, %v1678_v35  ;;  %v1680_v41 = vshll.u32 %v1671_v11, %v1678_v35  ;;  %v2665_v44 = vpop.permute.xlu0 %2664 }
 0x367   : > { %v1567_v2 = vsel %vm1560_vm15, %v1563_v62, %v1566_v9 }
 0x368   : > { %v1568_v43 = vsel %vm1557_vm11, nan, %v1567_v2  ;;  %v1681_v38 = vshrl.u32 %v1663_v63, %v1679_v40  ;;  %v1684_v53 = vadd.s32 127, %v1683_v32  ;;  %v2669_v63 = vpop.permute.xlu2 %2668 }
 0x369   : > { %2702 = vmatpush.msra.mxu2 %v1568_v43 }
 0x36a   : > { %v1682_v37 = vor.u32 %v1681_v38, %v1680_v41  ;;  %v1685_v48 = vshll.u32 %v1684_v53, 23  ;;  %8423 = vmatmul.msk.f32.vlgmr.msra.gmra.mxu2 %vm1303_vm6, %v2655_v46 }
 0x36c   : > { %v1686_v54 = vor.u32 4788187, %v1685_v48  ;;  %v1689_v24 = vcvt.s32.f32 %v1682_v37 }
 0x36e   : > { %v1687_v23 = vand.u32 2147483647, %v1686_v54 }
 0x370   : > { %v1690_v57 = vmul.f32 %v1689_v24, %v1687_v23 }
 0x372   : > { %v1691_v51 = vxor.u32 2147483648, %v1690_v57  ;;  %8424 = vmatmul.msk.f32.gmra.mxu2 %vm1303_vm6, %v2656_v60 }
 0x374   : > { %v1692_v55 = vsel %vm1571_vm0, %v1691_v51, %v1690_v57 }
 0x375   : > { %v1695_v50 = vsel %vm10729_vm1, %v9986_v10, %v1692_v55 }
 0x376   : > { %v1697_v3 = vmul.f32 %v1695_v50, %v1695_v50 }
 0x378   : > { %v1698_v28 = vmul.f32 -0.001358992, %v1697_v3  ;;  %v1705_v59 = vmul.f32 -0.00019511016, %v1697_v3 }
 0x37a   : > { %v1699_v17 = vadd.f32 0.041655596, %v1698_v28  ;;  %v1706_v12 = vadd.f32 0.008332121, %v1705_v59  ;;  %8425 = vmatmul.msk.f32.gmra.mxu2 %vm1303_vm6, %v2657_v14 }
 0x37c   : > { %v1700_v6 = vmul.f32 %v1699_v17, %v1697_v3  ;;  %v1707_v15 = vmul.f32 %v1706_v12, %v1697_v3 }
 0x37e   : > { %v1701_v22 = vadd.f32 -0.4999988, %v1700_v6  ;;  %v1708_v58 = vadd.f32 -0.16666654, %v1707_v15 }
 0x380   : > { %v1702_v49 = vmul.f32 %v1701_v22, %v1697_v3  ;;  %v1709_v47 = vmul.f32 %v1708_v58, %v1697_v3 }
 0x382   : > { %v1703_v26 = vadd.f32 1.0, %v1702_v49  ;;  %v1710_v11 = vadd.f32 1.0, %v1709_v47  ;;  %8426 = vmatmul.msk.f32.gmra.mxu2 %vm1303_vm6, %v2658_v8 }
 0x384   : > { %v1711_v33 = vmul.f32 %v1710_v11, %v1695_v50  ;;  %v1720_v29 = vxor.u32 2147483648, %v1703_v26 }
 0x386   : > { %v1717_v21 = vxor.u32 2147483648, %v1711_v33  ;;  %v1721_v1 = vsel %vm1719_vm3, %v1720_v29, %v1711_v33 }
 0x388   : > { %v1718_v4 = vsel %vm1716_vm2, %v1703_v26, %v1717_v21 }
 0x389   : > { %v1722_v27 = vsel %vm1715_vm4, %v1718_v4, %v1721_v1 }
 0x38a   : > { %v1723_v7 = vsel %vm1712_vm5, nan, %v1722_v27 }
 0x38b   : > { %2731 = vmatpush.msra.mxu3 %v1723_v7 }
 0x38c   : > { %8427 = vmatmul.msk.f32.vlgmr.msra.gmra.mxu3 %vm1303_vm6, %v2655_v46 }
 0x394   : > { %8428 = vmatmul.msk.f32.gmra.mxu3 %vm1303_vm6, %v2656_v60 }
 0x39c   : > { %8429 = vmatmul.msk.f32.gmra.mxu3 %vm1303_vm6, %v2657_v14 }
 0x3a4   : > { %8430 = vmatmul.msk.f32.gmra.mxu3 %vm1303_vm6, %v2658_v8 }
 0x3ed   : > { %v2704_v5 = vpop.f32.mrf.mxu2 }
 0x3ee   : > { %v2705_v52 = vadd.f32 %v2704_v5, %v2661_v45 }
 0x3f0   : > { %v2745_v39 = vmul.f32 30.0, %v2705_v52 }
 0x3f2   : > { %8675 = vtanh.f32 %v2745_v39 }
 0x3f5   : > { %v2707_v62 = vpop.f32.mrf.mxu2 }
 0x3f6   : > { %v2708_v9 = vadd.f32 %v2707_v62, %v2665_v44 }
 0x3f8   : > { %v2747_v35 = vmul.f32 30.0, %v2708_v9  ;;  %v8676_v2 = vpop.eup %8675 }
 0x3f9   : > { %v2761_v41 = vmul.f32 10.0, %v8676_v2 }
 0x3fa   : > { %8677 = vtanh.f32 %v2747_v35 }
 0x3fb   : > { %v2769_v48 = vadd.f32 30.0, %v2761_v41 }
 0x3fd   : > { %v2710_v40 = vpop.f32.mrf.mxu2  ;;  %v10746_v30 = vmul.f32 %v2769_v48, %v2705_v52 }
 0x3fe   : > { %v2711_v32 = vadd.f32 %v2710_v40, %v2669_v63 }
 0x3ff   : > { %v2788_v34 = vand.u32 2139095040, %v10746_v30 }
 0x400   : > { %v2749_v38 = vmul.f32 30.0, %v2711_v32  ;;  %v8678_v37 = vpop.eup %8677 }
 0x401   : > { %v2763_v23 = vmul.f32 10.0, %v8678_v37  ;;  %v2789_v58 = vshrl.u32 %v2788_v34, 23 }
 0x402   : > { %8679 = vtanh.f32 %v2749_v38 }
 0x403   : > { %v2771_v3 = vadd.f32 30.0, %v2763_v23  ;;  %v8431_v19 = vadd.s32 4294967169, %v2789_v58 }
 0x405   : > { %v2713_v24 = vpop.f32.mrf.mxu2  ;;  %v10751_v12 = vmul.f32 %v2771_v3, %v2708_v9  ;;  %v2795_v5 = vadd.s32 1, %v8431_v19 }
 0x406   : > { %v2714_v60 = vadd.f32 %v2713_v24, %v2673_v13 }
 0x407   : > { %v3098_v49 = vand.u32 2139095040, %v10751_v12  ;;  %vm2796_vm7 = vcmp.gt.s32.totalorder %v2795_v5, 0 }
 0x408   : > { %v8680_v51 = vpop.eup %8679  ;;  %v2751_v28 = vmul.f32 30.0, %v2714_v60 }
 0x409   : > { %v2765_v61 = vmul.f32 10.0, %v8680_v51  ;;  %v3099_v21 = vshrl.u32 %v3098_v49, 23 }
 0x40b   : > { %v2773_v59 = vadd.f32 30.0, %v2765_v61  ;;  %v8437_v39 = vadd.s32 4294967169, %v3099_v21 }
 0x40d   : > { %v10749_v14 = vmul.f32 %v2773_v59, %v2711_v32 }
 0x40f   : > { %v2733_v10 = vpop.f32.mrf.mxu3  ;;  %v3408_v15 = vand.u32 2139095040, %v10749_v14 }
 0x410   : > { %v2734_v53 = vadd.f32 %v2733_v10, %v2661_v45 }
 0x411   : > { %v3409_v11 = vshrl.u32 %v3408_v15, 23 }
 0x412   : > { %v2746_v46 = vmul.f32 30.0, %v2734_v53 }
 0x413   : > { %v8443_v7 = vadd.s32 4294967169, %v3409_v11 }
 0x414   : > { %8681 = vtanh.f32 %v2746_v46  ;;  %v10768_v46 = vsel %vm2796_vm7, %v2795_v5, 0 }
 0x415   : > { %v3415_v35 = vadd.s32 1, %v8443_v7 }
 0x417   : > { %v2736_v43 = vpop.f32.mrf.mxu3  ;;  %vm3416_vm8 = vcmp.gt.s32.totalorder %v3415_v35, 0 }
 0x418   : > { %v2737_v54 = vadd.f32 %v2736_v43, %v2665_v44  ;;  %v3105_v43 = vadd.s32 1, %v8437_v39 }
 0x41a   : > { %v2748_v55 = vmul.f32 30.0, %v2737_v54  ;;  %v8682_v16 = vpop.eup %8681  ;;  %vm3106_vm9 = vcmp.gt.s32.totalorder %v3105_v43, 0 }
 0x41b   : > { %v2762_v56 = vmul.f32 10.0, %v8682_v16  ;;  %v10779_v16 = vsel %vm3106_vm9, %v3105_v43, 0 }
 0x41c   : > { %8683 = vtanh.f32 %v2748_v55 }
 0x41d   : > { %8685 = vtanh.f32 %v2751_v28  ;;  %v2770_v29 = vadd.f32 30.0, %v2762_v56  ;;  %v10775_v28 = vand.u32 31, %v10768_v46 }
 0x41f   : > { %v2739_v57 = vpop.f32.mrf.mxu3  ;;  %v10757_v52 = vmul.f32 %v2770_v29, %v2734_v53 }
 0x420   : > { %v2740_v50 = vadd.f32 %v2739_v57, %v2669_v63 }
 0x421   : > { %v2943_v32 = vand.u32 2139095040, %v10757_v52 }
 0x422   : > { %v2750_v17 = vmul.f32 30.0, %v2740_v50  ;;  %v8684_v8 = vpop.eup %8683 }
 0x423   : > { %v8686_v26 = vpop.eup %8685  ;;  %v2764_v4 = vmul.f32 10.0, %v8684_v8  ;;  %v2944_v57 = vshrl.u32 %v2943_v32, 23 }
 0x424   : > { %8687 = vtanh.f32 %v2750_v17  ;;  %v2767_v33 = vmul.f32 10.0, %v8686_v26 }
 0x425   : > { %v2772_v44 = vadd.f32 30.0, %v2764_v4  ;;  %v10777_v17 = vadd.s32 4294967169, %v2944_v57 }
 0x426   : > { %v2775_v27 = vadd.f32 30.0, %v2767_v33 }
 0x427   : > { %v2742_v6 = vpop.f32.mrf.mxu3  ;;  %v10762_v41 = vmul.f32 %v2772_v44, %v2737_v54  ;;  %v3417_v54 = vsel %vm3416_vm8, %v3415_v35, 0 }
 0x428   : > { %v2743_v22 = vadd.f32 %v2742_v6, %v2673_v13  ;;  %v10755_v13 = vmul.f32 %v2775_v27, %v2714_v60  ;;  %v10783_v15 = vshrl.u32 %v3417_v54, 5 }
 0x429   : > { %v3253_v60 = vand.u32 2139095040, %v10762_v41 }
 0x42a   : > { %v2752_v47 = vmul.f32 30.0, %v2743_v22  ;;  %v8688_v1 = vpop.eup %8687  ;;  %v3718_v9 = vand.u32 2139095040, %v10755_v13  ;;  %v3715_v2 = vand.u32 2147483647, %v10755_v13 }
 0x42b   : > { %v2766_v62 = vmul.f32 10.0, %v8688_v1  ;;  %v10781_v6 = vshrl.u32 %v3253_v60, 23 }
 0x42c   : > { %8689 = vtanh.f32 %v2752_v47  ;;  %v3719_v63 = vshrl.u32 %v3718_v9, 23  ;;  %v3722_v48 = vand.u32 8388607, %v3715_v2 }
 0x42d   : > { %v2774_v38 = vadd.f32 30.0, %v2766_v62 }
 0x42e   : > { %v8449_v53 = vadd.s32 4294967169, %v3719_v63  ;;  %v3723_v61 = vor.u32 8388608, %v3722_v48 }
 0x42f   : > { %v10772_v51 = vmul.f32 %v2774_v38, %v2740_v50 }
 0x430   : > { %v3725_v23 = vadd.s32 1, %v8449_v53  ;;  %v10786_v56 = vshll.u32 %v3723_v61, 8 }
 0x431   : > { %v3563_v50 = vand.u32 2139095040, %v10772_v51 }
 0x432   : > { %v8690_v45 = vpop.eup %8689  ;;  %vm3726_vm10 = vcmp.gt.s32.totalorder %v3725_v23, 0  ;;  %v3765_v57 = vshrl.u32 %v10786_v56, 16 }
 0x433   : > { %v2768_v10 = vmul.f32 10.0, %v8690_v45  ;;  %v3727_v3 = vsel %vm3726_vm10, %v3725_v23, 0  ;;  %v3564_v27 = vshrl.u32 %v3563_v50, 23  ;;  %v3764_v45 = vand.u32 65535, %v10786_v56 }
 0x434   : > { %v3729_v59 = vand.u32 31, %v3727_v3  ;;  %v3728_v49 = vshrl.u32 %v3727_v3, 5 }
 0x435   : > { %v2776_v40 = vadd.f32 30.0, %v2768_v10 }
 0x436   : > { %v3732_v47 = vshll.u32 %v15063_v18, %v3729_v59  ;;  %v3735_v8 = vshll.u32 %v15061_v20, %v3729_v59  ;;  %v3738_v26 = vshll.u32 %v15059_v25, %v3729_v59  ;;  %v3741_v33 = vshll.u32 %v15057_v31, %v3729_v59 }
 0x437   : > { %v10764_v37 = vmul.f32 %v2776_v40, %v2743_v22  ;;  %v3730_v22 = vsub.s32 32, %v3729_v59  ;;  %v3744_v4 = vshll.u32 %v15055_v36, %v3729_v59  ;;  %vm3747_vm12 = vcmp.lt.s32.totalorder %v3728_v49, 1 }
 0x438   : > { %vm3749_vm13 = vcmp.lt.s32.totalorder %v3728_v49, 3  ;;  %vm3750_vm14 = vcmp.lt.s32.totalorder %v3728_v49, 4  ;;  %vm3748_vm15 = vcmp.lt.s32.totalorder %v3728_v49, 2  ;;  %v10805_v59 = vand.u32 31, %v3417_v54 }
 0x439   : > { %v3873_v24 = vand.u32 2139095040, %v10764_v37  ;;  %v3733_v11 = vshrl.u32 %v15061_v20, %v3730_v22  ;;  %v3736_v19 = vshrl.u32 %v15059_v25, %v3730_v22  ;;  %v3739_v29 = vshrl.u32 %v15057_v31, %v3730_v22 }
 0x43a   : > { %v3742_v21 = vshrl.u32 %v15055_v36, %v3730_v22  ;;  %v3745_v1 = vshrl.u32 %v15053_v42, %v3730_v22  ;;  %v3731_v10 = vshrl.u32 %v15063_v18, %v3730_v22 }
 0x43b   : > { %v3874_v55 = vshrl.u32 %v3873_v24, 23  ;;  %v3734_v7 = vor.u32 %v3733_v11, %v3732_v47  ;;  %v3737_v5 = vor.u32 %v3736_v19, %v3735_v8  ;;  %v3740_v44 = vor.u32 %v3739_v29, %v3738_v26 }
 0x43c   : > { %v3743_v62 = vor.u32 %v3742_v21, %v3741_v33  ;;  %v3746_v9 = vor.u32 %v3745_v1, %v3744_v4  ;;  %v3870_v29 = vand.u32 2147483647, %v10764_v37 }
 0x43d   : > { %v8452_v34 = vadd.s32 4294967169, %v3874_v55  ;;  %v3752_v35 = vsel %vm3750_vm14, %v3740_v44, 2102212464  ;;  %v3755_v63 = vsel %vm3747_vm12, %v3734_v7, %v3737_v5  ;;  %v3759_v32 = vsel %vm3747_vm12, %v3737_v5, %v3740_v44 }
 0x43e   : > { %v3756_v40 = vsel %vm3750_vm14, %v3743_v62, 920167782  ;;  %v3760_v53 = vsel %vm3750_vm14, %v3746_v9, 1326507024  ;;  %v3751_v48 = vsel %vm3747_vm12, %v3731_v10, %v3734_v7  ;;  %v3753_v60 = vsel %vm3749_vm13, %v3737_v5, %v3752_v35 }
 0x43f   : > { %v3880_v58 = vadd.s32 1, %v8452_v34  ;;  %v3757_v38 = vsel %vm3749_vm13, %v3740_v44, %v3756_v40  ;;  %v3761_v24 = vsel %vm3749_vm13, %v3743_v62, %v3760_v53  ;;  %v8446_v34 = vadd.s32 4294967169, %v3564_v27 }
 0x440   : > { %v3758_v23 = vsel %vm3748_vm15, %v3755_v63, %v3757_v38  ;;  %v3762_v55 = vsel %vm3748_vm15, %v3759_v32, %v3761_v24  ;;  %v10813_v11 = vsel %vm3748_vm15, %v3751_v48, %v3753_v60 }
 0x441   : > { %vm3881_vm11 = vcmp.gt.s32.totalorder %v3880_v58, 0  ;;  %v3788_v61 = vand.u32 65535, %v3758_v23  ;;  %v3789_v3 = vshrl.u32 %v3758_v23, 16  ;;  %v3766_v50 = vand.u32 65535, %v3762_v55 }
 0x442   : > { %v3882_v39 = vsel %vm3881_vm11, %v3880_v58, 0  ;;  %v3767_v22 = vshrl.u32 %v3762_v55, 16  ;;  %vm3717_vm11 = vcmp.lt.s32.totalorder %v10755_v13, 0 }
 0x443   : > { %v10800_v43 = vand.u32 31, %v3882_v39  ;;  %v10807_v58 = vshrl.u32 %v3882_v39, 5  ;;  %v3791_v8 = vmul.u32 %v3789_v3, %v3764_v45  ;;  %v3792_v26 = vmul.u32 %v3788_v61, %v3765_v57 }
 0x444   : > { %v3769_v19 = vmul.u32 %v3767_v22, %v3764_v45  ;;  %v3770_v33 = vmul.u32 %v3766_v50, %v3765_v57  ;;  %v3768_v21 = vmul.u32 %v3766_v50, %v3764_v45  ;;  %v3790_v54 = vmul.u32 %v3788_v61, %v3764_v45 }
 0x445   : > { %v10810_v47 = vsub.s32 32, %v10800_v43  ;;  %v3793_v4 = vmul.u32 %v3789_v3, %v3765_v57  ;;  %v3794_v1 = vshll.u32 %v3791_v8, 16  ;;  %v3771_v27 = vmul.u32 %v3767_v22, %v3765_v57 }
 0x446   : > { %v3772_v7 = vshll.u32 %v3769_v19, 16  ;;  %v3795_v5 = vshrl.u32 %v3791_v8, 16  ;;  %v3796_v39 = vshll.u32 %v3792_v26, 16  ;;  %v3773_v44 = vshrl.u32 %v3769_v19, 16 }
 0x447   : > { %v3797_v62 = vshrl.u32 %v3792_v26, 16  ;;  %vm3798_vm0 = vc.u32 %v3790_v54, %v3794_v1  ;;  %v3800_v9 = vadd.s32 %v3794_v1, %v3790_v54  ;;  %v3774_v10 = vshll.u32 %v3770_v33, 16 }
 0x448   : > { %vm3776_vm1 = vc.u32 %v3768_v21, %v3772_v7  ;;  %v3778_v49 = vadd.s32 %v3772_v7, %v3768_v21  ;;  %v3799_v35 = vsel %vm3798_vm0, 1, %v15066_v0  ;;  %v3877_v45 = vand.u32 8388607, %v3870_v29 }
 0x449   : > { %v3777_v63 = vsel %vm3776_vm1, 1, %v15066_v0  ;;  %v3801_v40 = vadd.s32 %v3799_v35, %v3793_v4  ;;  %vm3802_vm2 = vc.u32 %v3800_v9, %v3796_v39  ;;  %v3887_v53 = vshll.u32 %v15063_v18, %v10800_v43 }
 0x44a   : > { %v3779_v32 = vadd.s32 %v3777_v63, %v3771_v27  ;;  %vm3780_vm3 = vc.u32 %v3778_v49, %v3774_v10  ;;  %v3803_v38 = vsel %vm3802_vm2, 1, %v15066_v0  ;;  %v3888_v24 = vshrl.u32 %v15061_v20, %v10810_v47 }
 0x44b   : > { %v3781_v48 = vsel %vm3780_vm3, 1, %v15066_v0  ;;  %v3805_v23 = vadd.s32 %v3803_v38, %v3801_v40  ;;  %v3890_v57 = vshll.u32 %v15061_v20, %v10800_v43  ;;  %v3891_v55 = vshrl.u32 %v15059_v25, %v10810_v47 }
 0x44c   : > { %v3783_v60 = vadd.s32 %v3781_v48, %v3779_v32  ;;  %v3893_v61 = vshll.u32 %v15059_v25, %v10800_v43  ;;  %v3894_v3 = vshrl.u32 %v15057_v31, %v10810_v47  ;;  %v3775_v50 = vshrl.u32 %v3770_v33, 16 }
 0x44d   : > { %v3806_v22 = vadd.s32 %v3805_v23, %v3795_v5  ;;  %v3896_v8 = vshll.u32 %v15057_v31, %v10800_v43  ;;  %v3897_v26 = vshrl.u32 %v15055_v36, %v10810_v47  ;;  %v3889_v21 = vor.u32 %v3888_v24, %v3887_v53 }
 0x44e   : > { %v3784_v19 = vadd.s32 %v3783_v60, %v3773_v44  ;;  %v3892_v54 = vor.u32 %v3891_v55, %v3890_v57  ;;  %v3895_v4 = vor.u32 %v3894_v3, %v3893_v61  ;;  %v3899_v7 = vshll.u32 %v15055_v36, %v10800_v43 }
 0x44f   : > { %v3807_v1 = vadd.s32 %v3806_v22, %v3797_v62  ;;  %v3898_v27 = vor.u32 %v3897_v26, %v3896_v8  ;;  %v3900_v10 = vshrl.u32 %v15053_v42, %v10810_v47  ;;  %v3570_v33 = vadd.s32 1, %v8446_v34 }
 0x450   : > { %v3785_v5 = vadd.s32 %v3784_v19, %v3775_v50  ;;  %v3804_v49 = vadd.s32 %v3800_v9, %v3796_v39  ;;  %v3878_v35 = vor.u32 8388608, %v3877_v45  ;;  %v3808_v63 = vmul.u32 %v10786_v56, %v10813_v11 }
 0x451   : > { %v3811_v40 = vadd.s32 1, %v3807_v1  ;;  %v3901_v44 = vor.u32 %v3900_v10, %v3899_v7  ;;  %vm3902_vm4 = vcmp.lt.s32.totalorder %v10807_v58, 1  ;;  %vm3903_vm7 = vcmp.lt.s32.totalorder %v10807_v58, 2 }
 0x452   : > { %vm3810_vm5 = vc.u32 %v3785_v5, %v3804_v49  ;;  %vm3905_vm8 = vcmp.lt.s32.totalorder %v10807_v58, 4  ;;  %v3910_v43 = vsel %vm3902_vm4, %v3889_v21, %v3892_v54  ;;  %vm3904_vm9 = vcmp.lt.s32.totalorder %v10807_v58, 3 }
 0x453   : > { %v3812_v62 = vsel %vm3810_vm5, %v3811_v40, %v3807_v1  ;;  %v3911_v34 = vsel %vm3905_vm8, %v3898_v27, 920167782  ;;  %v3914_v56 = vsel %vm3902_vm4, %v3892_v54, %v3895_v4  ;;  %v3915_v9 = vsel %vm3905_vm8, %v3901_v44, 1326507024 }
 0x454   : > { %v3813_v11 = vadd.s32 %v3812_v62, %v3808_v63  ;;  %v3912_v39 = vsel %vm3904_vm9, %v3895_v4, %v3911_v34  ;;  %v10858_v45 = vshll.u32 %v3878_v35, 8  ;;  %v10861_v32 = vsub.s32 32, %v10805_v59 }
 0x455   : > { %v3913_v38 = vsel %vm3903_vm7, %v3910_v43, %v3912_v39  ;;  %v3916_v53 = vsel %vm3904_vm9, %v3898_v27, %v3915_v9  ;;  %v15051_v48 = vand.u32 2147483647, %v10749_v14  ;;  %vm3571_vm10 = vcmp.gt.s32.totalorder %v3570_v33, 0 }
 0x456   : > { %v3814_v23 = vadd.s32 536870912, %v3813_v11  ;;  %v3917_v24 = vsel %vm3903_vm7, %v3914_v56, %v3916_v53  ;;  %v3919_v57 = vand.u32 65535, %v10858_v45  ;;  %v3920_v60 = vshrl.u32 %v10858_v45, 16 }
 0x457   : > { %v3921_v55 = vand.u32 65535, %v3917_v24  ;;  %v3922_v61 = vshrl.u32 %v3917_v24, 16  ;;  %v3944_v3 = vshrl.u32 %v3913_v38, 16  ;;  %v3886_v22 = vshrl.u32 %v15063_v18, %v10810_v47 }
 0x458   : > { %v3815_v50 = vshrl.u32 %v3814_v23, 30  ;;  %v3907_v8 = vsel %vm3905_vm8, %v3895_v4, 2102212464  ;;  %v3943_v26 = vand.u32 65535, %v3913_v38  ;;  %v10876_v19 = vsel %vm3571_vm10, %v3570_v33, 0 }
 0x459   : > { %v3924_v1 = vmul.u32 %v3922_v61, %v3919_v57  ;;  %v3925_v27 = vmul.u32 %v3921_v55, %v3920_v60  ;;  %v10880_v7 = vand.u32 8388607, %v15051_v48  ;;  %v10882_v10 = vadd.s32 %v3804_v49, %v3785_v5 }
 0x45a   : > { %v3816_v35 = vshll.u32 %v3815_v50, 30  ;;  %v3906_v63 = vsel %vm3902_vm4, %v3886_v22, %v3889_v21  ;;  %v3946_v40 = vmul.u32 %v3944_v3, %v3919_v57  ;;  %v3908_v47 = vsel %vm3904_vm9, %v3892_v54, %v3907_v8 }
 0x45b   : > { %v3923_v4 = vmul.u32 %v3921_v55, %v3919_v57  ;;  %v3927_v33 = vshll.u32 %v3924_v1, 16  ;;  %v3423_v44 = vshrl.u32 %v15061_v20, %v10861_v32  ;;  %v3839_v62 = vsub.s32 4, %v3815_v50 }
 0x45c   : > { %v3817_v43 = vsub.s32 %v3813_v11, %v3816_v35  ;;  %v3926_v34 = vmul.u32 %v3922_v61, %v3920_v60  ;;  %v3947_v5 = vmul.u32 %v3943_v26, %v3920_v60  ;;  %v3929_v49 = vshll.u32 %v3925_v27, 16 }
 0x45d   : > { %vm3931_vm12 = vc.u32 %v3923_v4, %v3927_v33  ;;  %v3933_v56 = vadd.s32 %v3927_v33, %v3923_v4  ;;  %v3949_v39 = vshll.u32 %v3946_v40, 16  ;;  %v3945_v38 = vmul.u32 %v3943_v26, %v3919_v57 }
 0x45e   : > { %vm3818_vm13 = vcmp.lt.s32.totalorder %v3817_v43, 0  ;;  %v3819_v21 = vsub.s32 0, %v3817_v43  ;;  %v3932_v9 = vsel %vm3931_vm12, 1, %v15066_v0  ;;  %v3948_v54 = vmul.u32 %v3944_v3, %v3920_v60 }
 0x45f   : > { %v3934_v53 = vadd.s32 %v3932_v9, %v3926_v34  ;;  %vm3935_vm14 = vc.u32 %v3933_v56, %v3929_v49  ;;  %v3951_v23 = vshll.u32 %v3947_v5, 16  ;;  %vm3953_vm15 = vc.u32 %v3945_v38, %v3949_v39 }
 0x460   : > { %v3820_v24 = vsel %vm3818_vm13, %v3819_v21, %v3817_v43  ;;  %v3936_v55 = vsel %vm3935_vm14, 1, %v15066_v0  ;;  %v3955_v11 = vadd.s32 %v3949_v39, %v3945_v38  ;;  %v3928_v22 = vshrl.u32 %v3924_v1, 16 }
 0x461   : > { %v3821_v61 = vclz %v3820_v24  ;;  %v3938_v8 = vadd.s32 %v3936_v55, %v3934_v53  ;;  %v3954_v35 = vsel %vm3953_vm15, 1, %v15066_v0  ;;  %v3909_v4 = vsel %vm3903_vm7, %v3906_v63, %v3908_v47 }
 0x462   : > { %v3956_v33 = vadd.s32 %v3954_v35, %v3948_v54  ;;  %vm3957_vm0 = vc.u32 %v3955_v11, %v3951_v23  ;;  %v3422_v57 = vshll.u32 %v15063_v18, %v10805_v59  ;;  %vm10900_vm1 = vcmp.le.f32.partialorder %v3715_v2, 0.7853982 }
 0x463   : > { %v8450_v3 = vadd.s32 4294967294, %v3821_v61  ;;  %v3930_v26 = vshrl.u32 %v3925_v27, 16  ;;  %v3939_v1 = vadd.s32 %v3938_v8, %v3928_v22  ;;  %v3958_v34 = vsel %vm3957_vm0, 1, %v15066_v0 }
 0x464   : > { %v3840_v58 = vsel %vm3717_vm11, %v3839_v62, %v3815_v50  ;;  %v3950_v63 = vshrl.u32 %v3946_v40, 16  ;;  %v3960_v47 = vadd.s32 %v3958_v34, %v3956_v33  ;;  %v3426_v49 = vshrl.u32 %v15059_v25, %v10861_v32 }
 0x465   : > { %vm8451_vm2 = vcmp.lt.s32.totalorder %v8450_v3, 0  ;;  %v10909_v56 = vadd.s32 %v3939_v1, %v3930_v26  ;;  %v3952_v2 = vshrl.u32 %v3947_v5, 16  ;;  %v10911_v39 = vor.u32 %v3423_v44, %v3422_v57 }
 0x466   : > { %v3824_v21 = vsel %vm8451_vm2, 0, %v8450_v3  ;;  %v3961_v9 = vadd.s32 %v3960_v47, %v3950_v63  ;;  %v3425_v27 = vshll.u32 %v15061_v20, %v10805_v59  ;;  %v3432_v38 = vshrl.u32 %v15055_v36, %v10861_v32 }
 0x467   : > { %v3825_v50 = vsub.s32 32, %v3824_v21  ;;  %v3829_v40 = vsub.s32 4294967266, %v3824_v21  ;;  %v10917_v62 = vadd.s32 %v3955_v11, %v3951_v23  ;;  %v3429_v53 = vshrl.u32 %v15057_v31, %v10861_v32 }
 0x468   : > { %v3962_v54 = vadd.s32 %v3961_v9, %v3952_v2  ;;  %v10921_v24 = vor.u32 %v3426_v49, %v3425_v27  ;;  %v3428_v44 = vshll.u32 %v15059_v25, %v10805_v59  ;;  %v3431_v5 = vshll.u32 %v15057_v31, %v10805_v59 }
 0x469   : > { %v3826_v55 = vshll.u32 %v3817_v43, %v3824_v21  ;;  %v3827_v61 = vshrl.u32 %v10882_v10, %v3825_v50  ;;  %v3830_v22 = vadd.s32 127, %v3829_v40  ;;  %vm3965_vm3 = vc.u32 %v10909_v56, %v10917_v62 }
 0x46a   : > { %v3966_v23 = vadd.s32 1, %v3962_v54  ;;  %v3433_v11 = vor.u32 %v3432_v38, %v3431_v5  ;;  %v3434_v8 = vshll.u32 %v15055_v36, %v10805_v59  ;;  %v3435_v35 = vshrl.u32 %v15053_v42, %v10861_v32 }
 0x46b   : > { %v3828_v33 = vor.u32 %v3827_v61, %v3826_v55  ;;  %v3831_v57 = vshll.u32 %v3830_v22, 23  ;;  %v3963_v3 = vmul.u32 %v10858_v45, %v3909_v4  ;;  %v10935_v26 = vor.u32 %v3429_v53, %v3428_v44 }
 0x46c   : > { %v3842_v10 = vsel %vm10900_vm1, 0, %v3840_v58  ;;  %v3967_v43 = vsel %vm3965_vm3, %v3966_v23, %v3962_v54  ;;  %v3413_v1 = vor.u32 8388608, %v10880_v7  ;;  %v3436_v34 = vor.u32 %v3435_v35, %v3434_v8 }
 0x46d   : > { %v3832_v63 = vor.u32 4788187, %v3831_v57  ;;  %v3968_v47 = vadd.s32 %v3967_v43, %v3963_v3  ;;  %vm3437_vm4 = vcmp.lt.s32.totalorder %v10783_v15, 1  ;;  %vm3440_vm5 = vcmp.lt.s32.totalorder %v10783_v15, 4 }
 0x46e   : > { %v3835_v59 = vcvt.s32.f32 %v3828_v33  ;;  %vm3439_vm7 = vcmp.lt.s32.totalorder %v10783_v15, 3  ;;  %v3445_v45 = vsel %vm3437_vm4, %v10911_v39, %v10921_v24  ;;  %v3446_v4 = vsel %vm3440_vm5, %v3433_v11, 920167782 }
 0x46f   : > { %v3833_v58 = vand.u32 2147483647, %v3832_v63  ;;  %v3969_v7 = vadd.s32 536870912, %v3968_v47  ;;  %v3447_v49 = vsel %vm3439_vm7, %v10935_v26, %v3446_v4  ;;  %v3449_v2 = vsel %vm3437_vm4, %v10921_v24, %v10935_v26 }
 0x470   : > { %v10957_v21 = vshrl.u32 %v10779_v16, 5  ;;  %v10960_v9 = vand.u32 31, %v10876_v19  ;;  %v3450_v27 = vsel %vm3440_vm5, %v3436_v34, 1326507024  ;;  %v10964_v38 = vshll.u32 %v3413_v1, 8 }
 0x471   : > { %v3836_v50 = vmul.f32 %v3835_v59, %v3833_v58  ;;  %v3970_v40 = vshrl.u32 %v3969_v7, 30  ;;  %vm3438_vm8 = vcmp.lt.s32.totalorder %v10783_v15, 2  ;;  %v3451_v53 = vsel %vm3439_vm7, %v3433_v11, %v3450_v27 }
 0x472   : > { %v10970_v54 = vand.u32 31, %v10779_v16  ;;  %v3859_v44 = vadd.s32 3, %v3842_v10  ;;  %v3448_v5 = vsel %vm3438_vm8, %v3445_v45, %v3447_v49  ;;  %v3452_v55 = vsel %vm3438_vm8, %v3449_v2, %v3451_v53 }
 0x473   : > { %v10977_v61 = vadd.s32 4294967169, %v10781_v6  ;;  %v3837_v22 = vxor.u32 2147483648, %v3836_v50  ;;  %v3971_v23 = vshll.u32 %v3970_v40, 30  ;;  %v3456_v8 = vand.u32 65535, %v3452_v55 }
 0x474   : > { %v10980_v35 = vsub.s32 32, %v10960_v9  ;;  %v3454_v11 = vand.u32 65535, %v10964_v38  ;;  %v3455_v16 = vshrl.u32 %v10964_v38, 16  ;;  %v3457_v33 = vshrl.u32 %v3452_v55, 16 }
 0x475   : > { %v3838_v57 = vsel %vm3717_vm11, %v3837_v22, %v3836_v50  ;;  %vm3872_vm9 = vcmp.lt.s32.totalorder %v10764_v37, 0  ;;  %v10987_v3 = vsub.s32 %v3968_v47, %v3971_v23  ;;  %v10991_v6 = vshrl.u32 %v15063_v18, %v10861_v32 }
 0x476   : > { %v3479_v10 = vshrl.u32 %v3448_v5, 16  ;;  %v10996_v43 = vsel %vm10900_vm1, %v10755_v13, %v3838_v57  ;;  %v10998_v1 = vand.u32 3, %v3859_v44  ;;  %v3459_v34 = vmul.u32 %v3457_v33, %v3454_v11 }
 0x477   : > { %v11000_v63 = vmul.u32 %v3456_v8, %v3455_v16  ;;  %v3843_v59 = vmul.f32 %v10996_v43, %v10996_v43  ;;  %v3964_v47 = vadd.s32 %v10917_v62, %v10909_v56  ;;  %vm3973_vm10 = vcmp.lt.s32.totalorder %v10987_v3, 0 }
 0x478   : > { %v3974_v32 = vsub.s32 0, %v10987_v3  ;;  %v3994_v45 = vsub.s32 4, %v3970_v40  ;;  %v3458_v4 = vmul.u32 %v3456_v8, %v3454_v11  ;;  %v3462_v60 = vshll.u32 %v3459_v34, 16 }
 0x479   : > { %v3478_v58 = vand.u32 65535, %v3448_v5  ;;  %v3844_v7 = vmul.f32 -0.001358992, %v3843_v59  ;;  %v3851_v49 = vmul.f32 -0.00019511016, %v3843_v59  ;;  %v11009_v27 = vmul.u32 %v3479_v10, %v3454_v11 }
 0x47a   : > { %v3975_v2 = vsel %vm3973_vm10, %v3974_v32, %v10987_v3  ;;  %v3464_v53 = vshll.u32 %v11000_v63, 16  ;;  %vm3466_vm11 = vc.u32 %v3458_v4, %v3462_v60  ;;  %v3468_v44 = vadd.s32 %v3462_v60, %v3458_v4 }
 0x47b   : > { %v3976_v50 = vclz %v3975_v2  ;;  %v3845_v56 = vadd.f32 0.041655596, %v3844_v7  ;;  %v3852_v62 = vadd.f32 0.008332121, %v3851_v49  ;;  %v3442_v55 = vsel %vm3440_vm5, %v10935_v26, 2102212464 }
 0x47c   : > { %v3461_v22 = vmul.u32 %v3457_v33, %v3455_v16  ;;  %v3467_v5 = vsel %vm3466_vm11, 1, %v15066_v0  ;;  %vm3470_vm12 = vc.u32 %v3468_v44, %v3464_v53  ;;  %v3482_v8 = vmul.u32 %v3478_v58, %v3455_v16 }
 0x47d   : > { %v8453_v23 = vadd.s32 4294967294, %v3976_v50  ;;  %v3846_v57 = vmul.f32 %v3845_v56, %v3843_v59  ;;  %v3853_v32 = vmul.f32 %v3852_v62, %v3843_v59  ;;  %v3471_v2 = vsel %vm3470_vm12, 1, %v15066_v0 }
 0x47e   : > { %v3469_v48 = vadd.s32 %v3467_v5, %v3461_v22  ;;  %vm11019_vm13 = vcmp.le.f32.partialorder %v3870_v29, 0.7853982  ;;  %v3995_v26 = vsel %vm3872_vm9, %v3994_v45, %v3970_v40  ;;  %v3480_v33 = vmul.u32 %v3478_v58, %v3454_v11 }
 0x47f   : > { %vm8454_vm14 = vcmp.lt.s32.totalorder %v8453_v23, 0  ;;  %v3484_v60 = vshll.u32 %v11009_v27, 16  ;;  %v3847_v7 = vadd.f32 -0.4999988, %v3846_v57  ;;  %v3854_v49 = vadd.f32 -0.16666654, %v3853_v32 }
 0x480   : > { %v3979_v50 = vsel %vm8454_vm14, 0, %v8453_v23  ;;  %v3473_v53 = vadd.s32 %v3471_v2, %v3469_v48  ;;  %vm3862_vm15 = vcmp.eq.s32.totalorder %v10998_v1, 0  ;;  %vm3865_vm0 = vcmp.eq.s32.totalorder %v10998_v1, 2 }
 0x481   : > { %v3980_v44 = vsub.s32 32, %v3979_v50  ;;  %v3984_v29 = vsub.s32 4294967266, %v3979_v50  ;;  %v3463_v56 = vshrl.u32 %v3459_v34, 16  ;;  %v3483_v62 = vmul.u32 %v3479_v10, %v3455_v16 }
 0x482   : > { %v3848_v22 = vmul.f32 %v3847_v7, %v3843_v59  ;;  %v3855_v5 = vmul.f32 %v3854_v49, %v3843_v59  ;;  %vm3861_vm1 = vcmp.lt.s32.totalorder %v10998_v1, 2  ;;  %v3981_v40 = vshll.u32 %v10987_v3, %v3979_v50 }
 0x483   : > { %v3486_v11 = vshll.u32 %v3482_v8, 16  ;;  %vm3858_vm2 = vweird.f32 %v10755_v13  ;;  %v3982_v45 = vshrl.u32 %v3964_v47, %v3980_v44  ;;  %v3985_v58 = vadd.s32 127, %v3984_v29 }
 0x484   : > { %vm3488_vm3 = vc.u32 %v3480_v33, %v3484_v60  ;;  %v3490_v48 = vadd.s32 %v3484_v60, %v3480_v33  ;;  %v3849_v23 = vadd.f32 1.0, %v3848_v22  ;;  %v3856_v57 = vadd.f32 1.0, %v3855_v5 }
 0x485   : > { %v3474_v32 = vadd.s32 %v3473_v53, %v3463_v56  ;;  %v3489_v2 = vsel %vm3488_vm3, 1, %v15066_v0  ;;  %v3983_v34 = vor.u32 %v3982_v45, %v3981_v40  ;;  %v3986_v16 = vshll.u32 %v3985_v58, 23 }
 0x486   : > { %v3491_v10 = vadd.s32 %v3489_v2, %v3483_v62  ;;  %vm3492_vm5 = vc.u32 %v3490_v48, %v3486_v11  ;;  %v3857_v59 = vmul.f32 %v3856_v57, %v10996_v43  ;;  %v3866_v7 = vxor.u32 2147483648, %v3849_v23 }
 0x487   : > { %v3465_v3 = vshrl.u32 %v11000_v63, 16  ;;  %v3493_v49 = vsel %vm3492_vm5, 1, %v15066_v0  ;;  %v3987_v47 = vor.u32 4788187, %v3986_v16  ;;  %v3441_v33 = vsel %vm3437_vm4, %v10991_v6, %v10911_v39 }
 0x488   : > { %v3485_v60 = vshrl.u32 %v11009_v27, 16  ;;  %v3495_v50 = vadd.s32 %v3493_v49, %v3491_v10  ;;  %v3863_v53 = vxor.u32 2147483648, %v3857_v59  ;;  %v3997_v44 = vsel %vm11019_vm13, 0, %v3995_v26 }
 0x489   : > { %v3443_v43 = vsel %vm3439_vm7, %v10921_v24, %v3442_v55  ;;  %v11045_v63 = vadd.s32 %v3474_v32, %v3465_v3  ;;  %v3988_v29 = vand.u32 2147483647, %v3987_v47  ;;  %v3990_v56 = vcvt.s32.f32 %v3983_v34 }
 0x48a   : > { %v3487_v62 = vshrl.u32 %v3482_v8, 16  ;;  %v3496_v22 = vadd.s32 %v3495_v50, %v3485_v60  ;;  %v3864_v39 = vsel %vm3862_vm15, %v3849_v23, %v3863_v53  ;;  %v3867_v6 = vsel %vm3865_vm0, %v3866_v7, %v3857_v59 }
 0x48b   : > { %v11051_v27 = vadd.s32 %v3490_v48, %v3486_v11  ;;  %v3560_v26 = vand.u32 2147483647, %v10772_v51  ;;  %v3868_v5 = vsel %vm3861_vm1, %v3864_v39, %v3867_v6  ;;  %v3991_v24 = vmul.f32 %v3990_v56, %v3988_v29 }
 0x48c   : > { %v3444_v55 = vsel %vm3438_vm8, %v3441_v33, %v3443_v43  ;;  %v3497_v40 = vadd.s32 %v3496_v22, %v3487_v62  ;;  %v11059_v8 = vsub.s32 32, %v10970_v54  ;;  %v3260_v45 = vadd.s32 1, %v10977_v61 }
 0x48d   : > { %v3869_v58 = vsel %vm3858_vm2, nan, %v3868_v5  ;;  %vm3500_vm4 = vc.u32 %v11045_v63, %v11051_v27  ;;  %v11067_v11 = vshrl.u32 %v10876_v19, 5  ;;  %v3992_v1 = vxor.u32 2147483648, %v3991_v24 }
 0x48e   : > { %4129 = vmatpush.msrb.mxu2 %v3869_v58  ;;  %v4014_v48 = vadd.s32 3, %v3997_v44  ;;  %v3501_v15 = vadd.s32 1, %v3497_v40  ;;  %v3498_v23 = vmul.u32 %v10964_v38, %v3444_v55  ;;  %v3567_v57 = vand.u32 8388607, %v3560_v26 }
 0x48f   : > { %v3578_v61 = vshrl.u32 %v15061_v20, %v10980_v35  ;;  %v3581_v13 = vshrl.u32 %v15059_v25, %v10980_v35  ;;  %v3993_v32 = vsel %vm3872_vm9, %v3992_v1, %v3991_v24  ;;  %v3584_v2 = vshrl.u32 %v15057_v31, %v10980_v35 }
 0x490   : > { %v3502_v19 = vsel %vm3500_vm4, %v3501_v15, %v3497_v40  ;;  %v3587_v34 = vshrl.u32 %v15055_v36, %v10980_v35  ;;  %v11085_v38 = vsel %vm11019_vm13, %v10764_v37, %v3993_v32  ;;  %v3580_v10 = vshll.u32 %v15061_v20, %v10960_v9 }
 0x491   : > { %v3503_v16 = vadd.s32 %v3502_v19, %v3498_v23  ;;  %v3586_v59 = vshll.u32 %v15057_v31, %v10960_v9  ;;  %v3998_v7 = vmul.f32 %v11085_v38, %v11085_v38  ;;  %v3583_v3 = vshll.u32 %v15059_v25, %v10960_v9 }
 0x492   : > { %v3589_v49 = vshll.u32 %v15055_v36, %v10960_v9  ;;  %v3590_v4 = vshrl.u32 %v15053_v42, %v10980_v35  ;;  %v3577_v33 = vshll.u32 %v15063_v18, %v10960_v9  ;;  %v11101_v60 = vor.u32 %v3581_v13, %v3580_v10 }
 0x493   : > { %v3504_v47 = vadd.s32 536870912, %v3503_v16  ;;  %v3588_v50 = vor.u32 %v3587_v34, %v3586_v59  ;;  %v3999_v53 = vmul.f32 -0.001358992, %v3998_v7  ;;  %v4006_v44 = vmul.f32 -0.00019511016, %v3998_v7 }
 0x494   : > { %v3585_v43 = vor.u32 %v3584_v2, %v3583_v3  ;;  %v3591_v29 = vor.u32 %v3590_v4, %v3589_v49  ;;  %vm3261_vm7 = vcmp.gt.s32.totalorder %v3260_v45, 0  ;;  %v11103_v56 = vand.u32 3, %v4014_v48 }
 0x495   : > { %v11105_v62 = vshrl.u32 %v3504_v47, 30  ;;  %v3568_v22 = vor.u32 8388608, %v3567_v57  ;;  %v4000_v39 = vadd.f32 0.041655596, %v3999_v53  ;;  %v4007_v6 = vadd.f32 0.008332121, %v4006_v44 }
 0x496   : > { %v11107_v5 = vor.u32 %v3578_v61, %v3577_v33  ;;  %vm3595_vm8 = vcmp.lt.s32.totalorder %v11067_v11, 4  ;;  %vm3592_vm9 = vcmp.lt.s32.totalorder %v11067_v11, 1  ;;  %vm3594_vm10 = vcmp.lt.s32.totalorder %v11067_v11, 3 }
 0x497   : > { %v3506_v9 = vshll.u32 %v11105_v62, 30  ;;  %v3601_v24 = vsel %vm3595_vm8, %v3588_v50, 920167782  ;;  %v4001_v55 = vmul.f32 %v4000_v39, %v3998_v7  ;;  %v4008_v40 = vmul.f32 %v4007_v6, %v3998_v7 }
 0x498   : > { %v3604_v58 = vsel %vm3592_vm9, %v11101_v60, %v3585_v43  ;;  %v3605_v1 = vsel %vm3595_vm8, %v3591_v29, 1326507024  ;;  %vm3593_vm11 = vcmp.lt.s32.totalorder %v11067_v11, 2  ;;  %v11125_v23 = vshll.u32 %v3568_v22, 8 }
 0x499   : > { %v11120_v48 = vsub.s32 %v3503_v16, %v3506_v9  ;;  %v3606_v15 = vsel %vm3594_vm10, %v3588_v50, %v3605_v1  ;;  %v11128_v57 = vsel %vm3261_vm7, %v3260_v45, 0  ;;  %v4002_v61 = vadd.f32 -0.4999988, %v4001_v55 }
 0x49a   : > { %v4009_v13 = vadd.f32 -0.16666654, %v4008_v40  ;;  %v3607_v32 = vsel %vm3593_vm11, %v3604_v58, %v3606_v15  ;;  %vm4017_vm12 = vcmp.eq.s32.totalorder %v11103_v56, 0  ;;  %v3600_v2 = vsel %vm3592_vm9, %v11107_v5, %v11101_v60 }
 0x49b   : > { %vm3508_vm13 = vcmp.lt.s32.totalorder %v11120_v48, 0  ;;  %v3509_v19 = vsub.s32 0, %v11120_v48  ;;  %v3602_v45 = vsel %vm3594_vm10, %v3585_v43, %v3601_v24  ;;  %v4003_v34 = vmul.f32 %v4002_v61, %v3998_v7 }
 0x49c   : > { %v4010_v16 = vmul.f32 %v4009_v13, %v3998_v7  ;;  %vm4016_vm14 = vcmp.lt.s32.totalorder %v11103_v56, 2  ;;  %vm4020_vm15 = vcmp.eq.s32.totalorder %v11103_v56, 2  ;;  %v3611_v10 = vand.u32 65535, %v3607_v32 }
 0x49d   : > { %vm4013_vm0 = vweird.f32 %v10764_v37  ;;  %v3510_v59 = vsel %vm3508_vm13, %v3509_v19, %v11120_v48  ;;  %v3609_v3 = vand.u32 65535, %v11125_v23  ;;  %v3610_v49 = vshrl.u32 %v11125_v23, 16 }
 0x49e   : > { %v3612_v4 = vshrl.u32 %v3607_v32, 16  ;;  %v4004_v47 = vadd.f32 1.0, %v4003_v34  ;;  %v4011_v33 = vadd.f32 1.0, %v4010_v16  ;;  %vm3407_vm1 = vcmp.lt.s32.totalorder %v10749_v14, 0 }
 0x49f   : > { %v3511_v50 = vclz %v3510_v59  ;;  %v3603_v7 = vsel %vm3593_vm11, %v3600_v2, %v3602_v45  ;;  %v3499_v53 = vadd.s32 %v11051_v27, %v11045_v63  ;;  %v3576_v44 = vshrl.u32 %v15063_v18, %v10980_v35 }
 0x4a0   : > { %v3614_v29 = vmul.u32 %v3612_v4, %v3609_v3  ;;  %v3615_v22 = vmul.u32 %v3611_v10, %v3610_v49  ;;  %v4012_v39 = vmul.f32 %v4011_v33, %v11085_v38  ;;  %v4021_v6 = vxor.u32 2147483648, %v4004_v47 }
 0x4a1   : > { %v8444_v9 = vadd.s32 4294967294, %v3511_v50  ;;  %v3597_v24 = vsel %vm3595_vm8, %v3585_v43, 2102212464  ;;  %v15158_v55 = vand.u32 2147483647, %v10749_v14  ;;  %v3529_v63 = vsub.s32 4, %v11105_v62 }
 0x4a2   : > { %v3613_v27 = vmul.u32 %v3611_v10, %v3609_v3  ;;  %v3617_v58 = vshll.u32 %v3614_v29, 16  ;;  %v3633_v35 = vand.u32 65535, %v3603_v7  ;;  %v4018_v1 = vxor.u32 2147483648, %v4012_v39 }
 0x4a3   : > { %vm11159_vm2 = vcmp.le.f32.partialorder %v15158_v55, 0.7853982  ;;  %vm8445_vm3 = vcmp.lt.s32.totalorder %v8444_v9, 0  ;;  %v3616_v15 = vmul.u32 %v3612_v4, %v3610_v49  ;;  %v3634_v38 = vshrl.u32 %v3603_v7, 16 }
 0x4a4   : > { %v3514_v61 = vsel %vm8445_vm3, 0, %v8444_v9  ;;  %v3619_v13 = vshll.u32 %v3615_v22, 16  ;;  %vm3621_vm5 = vc.u32 %v3613_v27, %v3617_v58  ;;  %v3623_v32 = vadd.s32 %v3617_v58, %v3613_v27 }
 0x4a5   : > { %v4019_v43 = vsel %vm4017_vm12, %v4004_v47, %v4018_v1  ;;  %v4022_v19 = vsel %vm4020_vm15, %v4021_v6, %v4012_v39  ;;  %v3515_v2 = vsub.s32 32, %v3514_v61  ;;  %v3519_v45 = vsub.s32 4294967266, %v3514_v61 }
 0x4a6   : > { %v4023_v34 = vsel %vm4016_vm14, %v4019_v43, %v4022_v19  ;;  %v3516_v16 = vshll.u32 %v11120_v48, %v3514_v61  ;;  %v3622_v10 = vsel %vm3621_vm5, 1, %v15066_v0  ;;  %vm3625_vm4 = vc.u32 %v3623_v32, %v3619_v13 }
 0x4a7   : > { %v4024_v59 = vsel %vm4013_vm0, nan, %v4023_v34  ;;  %v3517_v4 = vshrl.u32 %v3499_v53, %v3515_v2  ;;  %v3520_v33 = vadd.s32 127, %v3519_v45  ;;  %v3624_v50 = vadd.s32 %v3622_v10, %v3616_v15 }
 0x4a8   : > { %4158 = vmatpush.msrb.mxu3 %v4024_v59  ;;  %v3530_v47 = vsel %vm3407_vm1, %v3529_v63, %v11105_v62  ;;  %v3626_v7 = vsel %vm3625_vm4, 1, %v15066_v0  ;;  %v3636_v56 = vmul.u32 %v3634_v38, %v3609_v3  ;;  %v3637_v39 = vmul.u32 %v3633_v35, %v3610_v49 }
 0x4a9   : > { %v3518_v6 = vor.u32 %v3517_v4, %v3516_v16  ;;  %v3521_v48 = vshll.u32 %v3520_v33, 23  ;;  %v3618_v9 = vshrl.u32 %v3614_v29, 16  ;;  %v3628_v55 = vadd.s32 %v3626_v7, %v3624_v50 }
 0x4aa   : > { %v3596_v37 = vsel %vm3592_vm9, %v3576_v44, %v11107_v5  ;;  %v3598_v53 = vsel %vm3594_vm10, %v11101_v60, %v3597_v24  ;;  %v3635_v27 = vmul.u32 %v3633_v35, %v3609_v3  ;;  %v3639_v58 = vshll.u32 %v3636_v56, 16 }
 0x4ab   : > { %v3522_v1 = vor.u32 4788187, %v3521_v48  ;;  %v3532_v62 = vsel %vm11159_vm2, 0, %v3530_v47  ;;  %v3620_v63 = vshrl.u32 %v3615_v22, 16  ;;  %v3629_v15 = vadd.s32 %v3628_v55, %v3618_v9 }
 0x4ac   : > { %v3638_v61 = vmul.u32 %v3634_v38, %v3610_v49  ;;  %v3641_v13 = vshll.u32 %v3637_v39, 16  ;;  %vm3643_vm7 = vc.u32 %v3635_v27, %v3639_v58  ;;  %v3645_v29 = vadd.s32 %v3639_v58, %v3635_v27 }
 0x4ad   : > { %v3523_v32 = vand.u32 2147483647, %v3522_v1  ;;  %v3525_v43 = vcvt.s32.f32 %v3518_v6  ;;  %v3644_v5 = vsel %vm3643_vm7, 1, %v15066_v0  ;;  %v3095_v44 = vand.u32 2147483647, %v10751_v12 }
 0x4ae   : > { %v3599_v60 = vsel %vm3593_vm11, %v3596_v37, %v3598_v53  ;;  %v11190_v3 = vadd.s32 %v3629_v15, %v3620_v63  ;;  %v3646_v24 = vadd.s32 %v3644_v5, %v3638_v61  ;;  %vm3647_vm8 = vc.u32 %v3645_v29, %v3641_v13 }
 0x4af   : > { %v11193_v22 = vshrl.u32 %v11128_v57, 5  ;;  %v11196_v49 = vand.u32 31, %v11128_v57  ;;  %v3526_v35 = vmul.f32 %v3525_v43, %v3523_v32  ;;  %v3648_v38 = vsel %vm3647_vm8, 1, %v15066_v0 }
 0x4b0   : > { %v3549_v19 = vadd.s32 3, %v3532_v62  ;;  %v3640_v2 = vshrl.u32 %v3636_v56, 16  ;;  %v11199_v45 = vadd.s32 %v3645_v29, %v3641_v13  ;;  %v3650_v34 = vadd.s32 %v3648_v38, %v3646_v24 }
 0x4b1   : > { %v3527_v11 = vxor.u32 2147483648, %v3526_v35  ;;  %v3642_v16 = vshrl.u32 %v3637_v39, 16  ;;  %v3653_v10 = vmul.u32 %v11125_v23, %v3599_v60  ;;  %v3102_v59 = vand.u32 8388607, %v3095_v44 }
 0x4b2   : > { %v3651_v4 = vadd.s32 %v3650_v34, %v3640_v2  ;;  %vm3655_vm9 = vc.u32 %v11190_v3, %v11199_v45  ;;  %v3116_v57 = vshrl.u32 %v15059_v25, %v11059_v8  ;;  %v3119_v33 = vshrl.u32 %v15057_v31, %v11059_v8 }
 0x4b3   : > { %v3528_v50 = vsel %vm3407_vm1, %v3527_v11, %v3526_v35  ;;  %v3113_v47 = vshrl.u32 %v15061_v20, %v11059_v8  ;;  %v3121_v23 = vshll.u32 %v15057_v31, %v10970_v54  ;;  %v3122_v7 = vshrl.u32 %v15055_v36, %v11059_v8 }
 0x4b4   : > { %v3531_v56 = vsel %vm11159_vm2, %v10749_v14, %v3528_v50  ;;  %v3652_v39 = vadd.s32 %v3651_v4, %v3642_v16  ;;  %v3115_v6 = vshll.u32 %v15061_v20, %v10970_v54  ;;  %v3118_v48 = vshll.u32 %v15059_v25, %v10970_v54 }
 0x4b5   : > { %v3533_v9 = vmul.f32 %v3531_v56, %v3531_v56  ;;  %v3123_v55 = vor.u32 %v3122_v7, %v3121_v23  ;;  %v3124_v37 = vshll.u32 %v15055_v36, %v10970_v54  ;;  %v3125_v53 = vshrl.u32 %v15053_v42, %v11059_v8 }
 0x4b6   : > { %v3656_v27 = vadd.s32 1, %v3652_v39  ;;  %v3112_v40 = vshll.u32 %v15063_v18, %v10970_v54  ;;  %v11231_v58 = vor.u32 %v3116_v57, %v3115_v6  ;;  %v11233_v1 = vor.u32 %v3119_v33, %v3118_v48 }
 0x4b7   : > { %v3534_v62 = vmul.f32 -0.001358992, %v3533_v9  ;;  %v3541_v63 = vmul.f32 -0.00019511016, %v3533_v9  ;;  %v3103_v15 = vor.u32 8388608, %v3102_v59  ;;  %v3126_v61 = vor.u32 %v3125_v53, %v3124_v37 }
 0x4b8   : > { %v3657_v13 = vsel %vm3655_vm9, %v3656_v27, %v3652_v39  ;;  %v11238_v29 = vor.u32 %v3113_v47, %v3112_v40  ;;  %vm3127_vm10 = vcmp.lt.s32.totalorder %v10957_v21, 1  ;;  %vm3130_vm11 = vcmp.lt.s32.totalorder %v10957_v21, 4 }
 0x4b9   : > { %v3535_v32 = vadd.f32 0.041655596, %v3534_v62  ;;  %v3542_v54 = vadd.f32 0.008332121, %v3541_v63  ;;  %v3658_v43 = vadd.s32 %v3657_v13, %v3653_v10  ;;  %v3136_v5 = vsel %vm3130_vm11, %v3123_v55, 920167782 }
 0x4ba   : > { %v3550_v60 = vand.u32 3, %v3549_v19  ;;  %vm3128_vm12 = vcmp.lt.s32.totalorder %v10957_v21, 2  ;;  %v3139_v24 = vsel %vm3127_vm10, %v11231_v58, %v11233_v1  ;;  %v3140_v35 = vsel %vm3130_vm11, %v3126_v61, 1326507024 }
 0x4bb   : > { %v3536_v38 = vmul.f32 %v3535_v32, %v3533_v9  ;;  %v3543_v2 = vmul.f32 %v3542_v54, %v3533_v9  ;;  %v3659_v34 = vadd.s32 536870912, %v3658_v43  ;;  %vm3129_vm13 = vcmp.lt.s32.totalorder %v10957_v21, 3 }
 0x4bc   : > { %v3135_v19 = vsel %vm3127_vm10, %v11238_v29, %v11231_v58  ;;  %v3137_v11 = vsel %vm3129_vm13, %v11233_v1, %v3136_v5  ;;  %v3141_v16 = vsel %vm3129_vm13, %v3123_v55, %v3140_v35  ;;  %v11261_v10 = vshll.u32 %v3103_v15, 8 }
 0x4bd   : > { %v3537_v59 = vadd.f32 -0.4999988, %v3536_v38  ;;  %v3544_v4 = vadd.f32 -0.16666654, %v3543_v2  ;;  %v11263_v57 = vshrl.u32 %v3659_v34, 30  ;;  %v3142_v33 = vsel %vm3128_vm12, %v3139_v24, %v3141_v16 }
 0x4be   : > { %v3144_v50 = vand.u32 65535, %v11261_v10  ;;  %v3145_v47 = vshrl.u32 %v11261_v10, 16  ;;  %v3146_v23 = vand.u32 65535, %v3142_v33  ;;  %v3147_v7 = vshrl.u32 %v3142_v33, 16 }
 0x4bf   : > { %v3538_v39 = vmul.f32 %v3537_v59, %v3533_v9  ;;  %v3545_v6 = vmul.f32 %v3544_v4, %v3533_v9  ;;  %v3661_v48 = vshll.u32 %v11263_v57, 30  ;;  %v3138_v55 = vsel %vm3128_vm12, %v3135_v19, %v3137_v11 }
 0x4c0   : > { %v11273_v37 = vsub.s32 32, %v11196_v49  ;;  %vm3548_vm14 = vweird.f32 %v10749_v14  ;;  %v3149_v53 = vmul.u32 %v3147_v7, %v3144_v50  ;;  %v3150_v27 = vmul.u32 %v3146_v23, %v3145_v47 }
 0x4c1   : > { %v3539_v40 = vadd.f32 1.0, %v3538_v39  ;;  %v3546_v62 = vadd.f32 1.0, %v3545_v6  ;;  %vm3551_vm15 = vcmp.lt.s32.totalorder %v3550_v60, 2  ;;  %v3662_v63 = vsub.s32 %v3658_v43, %v3661_v48 }
 0x4c2   : > { %vm3552_vm0 = vcmp.eq.s32.totalorder %v3550_v60, 0  ;;  %v3148_v15 = vmul.u32 %v3146_v23, %v3144_v50  ;;  %v3152_v61 = vshll.u32 %v3149_v53, 16  ;;  %v3169_v9 = vshrl.u32 %v3138_v55, 16 }
 0x4c3   : > { %v3547_v13 = vmul.f32 %v3546_v62, %v3531_v56  ;;  %v3556_v32 = vxor.u32 2147483648, %v3539_v40  ;;  %vm3663_vm1 = vcmp.lt.s32.totalorder %v3662_v63, 0  ;;  %v3664_v54 = vsub.s32 0, %v3662_v63 }
 0x4c4   : > { %v3151_v5 = vmul.u32 %v3147_v7, %v3145_v47  ;;  %v3154_v24 = vshll.u32 %v3150_v27, 16  ;;  %vm3156_vm2 = vc.u32 %v3148_v15, %v3152_v61  ;;  %v3158_v35 = vadd.s32 %v3152_v61, %v3148_v15 }
 0x4c5   : > { %v3553_v38 = vxor.u32 2147483648, %v3547_v13  ;;  %v3665_v2 = vsel %vm3663_vm1, %v3664_v54, %v3662_v63  ;;  %v3157_v34 = vsel %vm3156_vm2, 1, %v15066_v0  ;;  %v3168_v19 = vand.u32 65535, %v3138_v55 }
 0x4c6   : > { %vm3555_vm3 = vcmp.eq.s32.totalorder %v3550_v60, 2  ;;  %vm3562_vm5 = vcmp.lt.s32.totalorder %v10772_v51, 0  ;;  %v3666_v43 = vclz %v3665_v2  ;;  %v3159_v11 = vadd.s32 %v3157_v34, %v3151_v5 }
 0x4c7   : > { %vm3160_vm4 = vc.u32 %v3158_v35, %v3154_v24  ;;  %v3554_v56 = vsel %vm3552_vm0, %v3539_v40, %v3553_v38  ;;  %v3557_v16 = vsel %vm3555_vm3, %v3556_v32, %v3547_v13  ;;  %v3171_v4 = vmul.u32 %v3169_v9, %v3144_v50 }
 0x4c8   : > { %v3161_v59 = vsel %vm3160_vm4, 1, %v15066_v0  ;;  %v3558_v33 = vsel %vm3551_vm15, %v3554_v56, %v3557_v16  ;;  %v3654_v23 = vadd.s32 %v11199_v45, %v11190_v3  ;;  %v8447_v7 = vadd.s32 4294967294, %v3666_v43 }
 0x4c9   : > { %v3111_v39 = vshrl.u32 %v15063_v18, %v11059_v8  ;;  %v3559_v6 = vsel %vm3548_vm14, nan, %v3558_v33  ;;  %v3153_v48 = vshrl.u32 %v3149_v53, 16  ;;  %v3163_v55 = vadd.s32 %v3161_v59, %v3159_v11 }
 0x4ca   : > { %v3172_v62 = vmul.u32 %v3168_v19, %v3145_v47  ;;  %4130 = vmatpush.msrb.mxu2 %v3559_v6  ;;  %vm8448_vm7 = vcmp.lt.s32.totalorder %v8447_v7, 0  ;;  %v3170_v40 = vmul.u32 %v3168_v19, %v3144_v50  ;;  %v3174_v15 = vshll.u32 %v3171_v4, 16 }
 0x4cb   : > { %v3131_v60 = vsel %vm3127_vm10, %v3111_v39, %v11238_v29  ;;  %v3669_v61 = vsel %vm8448_vm7, 0, %v8447_v7  ;;  %v3684_v3 = vsub.s32 4, %v11263_v57  ;;  %v3132_v8 = vsel %vm3130_vm11, %v11233_v1, 2102212464 }
 0x4cc   : > { %v3164_v14 = vadd.s32 %v3163_v55, %v3153_v48  ;;  %v3670_v45 = vsub.s32 32, %v3669_v61  ;;  %v3674_v53 = vsub.s32 4294967266, %v3669_v61  ;;  %v3173_v13 = vmul.u32 %v3169_v9, %v3145_v47 }
 0x4cd   : > { %vm3178_vm8 = vc.u32 %v3170_v40, %v3174_v15  ;;  %v3155_v32 = vshrl.u32 %v3150_v27, 16  ;;  %v3176_v54 = vshll.u32 %v3172_v62, 16  ;;  %v3180_v24 = vadd.s32 %v3174_v15, %v3170_v40 }
 0x4ce   : > { %v3179_v5 = vsel %vm3178_vm8, 1, %v15066_v0  ;;  %v3671_v29 = vshll.u32 %v3662_v63, %v3669_v61  ;;  %v3672_v50 = vshrl.u32 %v3654_v23, %v3670_v45  ;;  %v3675_v35 = vadd.s32 127, %v3674_v53 }
 0x4cf   : > { %v3181_v38 = vadd.s32 %v3179_v5, %v3173_v13  ;;  %v3685_v2 = vsel %vm3562_vm5, %v3684_v3, %v11263_v57  ;;  %v3133_v1 = vsel %vm3129_vm13, %v11231_v58, %v3132_v8  ;;  %v11301_v34 = vadd.s32 %v3164_v14, %v3155_v32 }
 0x4d0   : > { %vm3182_vm9 = vc.u32 %v3180_v24, %v3176_v54  ;;  %v3673_v47 = vor.u32 %v3672_v50, %v3671_v29  ;;  %v3676_v27 = vshll.u32 %v3675_v35, 23  ;;  %v3250_v63 = vand.u32 2147483647, %v10762_v41 }
 0x4d1   : > { %v3183_v9 = vsel %vm3182_vm9, 1, %v15066_v0  ;;  %vm11307_vm10 = vcmp.le.f32.partialorder %v3560_v26, 0.7853982  ;;  %v3175_v57 = vshrl.u32 %v3171_v4, 16  ;;  %v11311_v43 = vadd.s32 %v3180_v24, %v3176_v54 }
 0x4d2   : > { %v3185_v11 = vadd.s32 %v3183_v9, %v3181_v38  ;;  %v3677_v58 = vor.u32 4788187, %v3676_v27  ;;  %v3687_v56 = vsel %vm11307_vm10, 0, %v3685_v2  ;;  %v3134_v16 = vsel %vm3128_vm12, %v3131_v60, %v3133_v1 }
 0x4d3   : > { %v3177_v59 = vshrl.u32 %v3172_v62, 16  ;;  %v3680_v33 = vcvt.s32.f32 %v3673_v47  ;;  %vm3190_vm11 = vc.u32 %v11301_v34, %v11311_v43  ;;  %v3271_v26 = vshrl.u32 %v15059_v25, %v11273_v37 }
 0x4d4   : > { %v3186_v23 = vadd.s32 %v3185_v11, %v3175_v57  ;;  %v3678_v4 = vand.u32 2147483647, %v3677_v58  ;;  %v3257_v7 = vand.u32 8388607, %v3250_v63  ;;  %v3270_v39 = vshll.u32 %v15061_v20, %v11196_v49 }
 0x4d5   : > { %v3274_v21 = vshrl.u32 %v15057_v31, %v11273_v37  ;;  %v3267_v48 = vshll.u32 %v15063_v18, %v11196_v49  ;;  %v3268_v55 = vshrl.u32 %v15061_v20, %v11273_v37  ;;  %v3273_v62 = vshll.u32 %v15059_v25, %v11196_v49 }
 0x4d6   : > { %v3187_v6 = vadd.s32 %v3186_v23, %v3177_v59  ;;  %v3681_v60 = vmul.f32 %v3680_v33, %v3678_v4  ;;  %v11333_v40 = vor.u32 %v3271_v26, %v3270_v39  ;;  %v3276_v15 = vshll.u32 %v15057_v31, %v11196_v49 }
 0x4d7   : > { %v3277_v61 = vshrl.u32 %v15055_v36, %v11273_v37  ;;  %v3275_v8 = vor.u32 %v3274_v21, %v3273_v62  ;;  %v3279_v14 = vshll.u32 %v15055_v36, %v11196_v49  ;;  %v3280_v45 = vshrl.u32 %v15053_v42, %v11273_v37 }
 0x4d8   : > { %v3191_v3 = vadd.s32 1, %v3187_v6  ;;  %v11344_v53 = vadd.s32 1, %v10777_v17  ;;  %v3682_v13 = vxor.u32 2147483648, %v3681_v60  ;;  %v3188_v32 = vmul.u32 %v11261_v10, %v3134_v16 }
 0x4d9   : > { %v3258_v54 = vor.u32 8388608, %v3257_v7  ;;  %v11350_v24 = vor.u32 %v3268_v55, %v3267_v48  ;;  %v3278_v29 = vor.u32 %v3277_v61, %v3276_v15  ;;  %v3281_v50 = vor.u32 %v3280_v45, %v3279_v14 }
 0x4da   : > { %v3192_v5 = vsel %vm3190_vm11, %v3191_v3, %v3187_v6  ;;  %v3683_v49 = vsel %vm3562_vm5, %v3682_v13, %v3681_v60  ;;  %v3704_v35 = vadd.s32 3, %v3687_v56  ;;  %vm3282_vm12 = vcmp.lt.s32.totalorder %v11193_v22, 1 }
 0x4db   : > { %v3193_v38 = vadd.s32 %v3192_v5, %v3188_v32  ;;  %v11358_v17 = vsel %vm11307_vm10, %v10772_v51, %v3683_v49  ;;  %vm3283_vm13 = vcmp.lt.s32.totalorder %v11193_v22, 2  ;;  %vm3285_vm14 = vcmp.lt.s32.totalorder %v11193_v22, 4 }
 0x4dc   : > { %v3294_v10 = vsel %vm3282_vm12, %v11333_v40, %v3275_v8  ;;  %v3688_v2 = vmul.f32 %v11358_v17, %v11358_v17  ;;  %vm3284_vm15 = vcmp.lt.s32.totalorder %v11193_v22, 3  ;;  %v3295_v47 = vsel %vm3285_vm14, %v3281_v50, 1326507024 }
 0x4dd   : > { %v3194_v1 = vadd.s32 536870912, %v3193_v38  ;;  %v3290_v27 = vsel %vm3282_vm12, %v11350_v24, %v11333_v40  ;;  %v3291_v9 = vsel %vm3285_vm14, %v3278_v29, 920167782  ;;  %v3296_v19 = vsel %vm3284_vm15, %v3278_v29, %v3295_v47 }
 0x4de   : > { %v11378_v57 = vshll.u32 %v3258_v54, 8  ;;  %v3689_v11 = vmul.f32 -0.001358992, %v3688_v2  ;;  %v3696_v58 = vmul.f32 -0.00019511016, %v3688_v2  ;;  %v3297_v16 = vsel %vm3283_vm13, %v3294_v10, %v3296_v19 }
 0x4df   : > { %v3195_v56 = vshrl.u32 %v3194_v1, 30  ;;  %v3301_v23 = vand.u32 65535, %v3297_v16  ;;  %v3302_v26 = vshrl.u32 %v3297_v16, 16  ;;  %v3292_v21 = vsel %vm3284_vm15, %v3275_v8, %v3291_v9 }
 0x4e0   : > { %v11383_v59 = vand.u32 65535, %v11378_v57  ;;  %v11386_v33 = vshrl.u32 %v11378_v57, 16  ;;  %v3690_v4 = vadd.f32 0.041655596, %v3689_v11  ;;  %v3697_v7 = vadd.f32 0.008332121, %v3696_v58 }
 0x4e1   : > { %v3196_v39 = vshll.u32 %v3195_v56, 30  ;;  %v3705_v6 = vand.u32 3, %v3704_v35  ;;  %vm3097_vm0 = vcmp.lt.s32.totalorder %v10751_v12, 0  ;;  %vm11397_vm1 = vcmp.le.f32.partialorder %v3095_v44, 0.7853982 }
 0x4e2   : > { %v3304_v48 = vmul.u32 %v3302_v26, %v11383_v59  ;;  %v11393_v55 = vmul.u32 %v3301_v23, %v11386_v33  ;;  %v3691_v62 = vmul.f32 %v3690_v4, %v3688_v2  ;;  %v3698_v60 = vmul.f32 %v3697_v7, %v3688_v2 }
 0x4e3   : > { %v11401_v61 = vsub.s32 %v3193_v38, %v3196_v39  ;;  %v3287_v3 = vsel %vm3285_vm14, %v3275_v8, 2102212464  ;;  %v3219_v14 = vsub.s32 4, %v3195_v56  ;;  %v3293_v45 = vsel %vm3283_vm13, %v3290_v27, %v3292_v21 }
 0x4e4   : > { %v3303_v13 = vmul.u32 %v3301_v23, %v11383_v59  ;;  %v3307_v32 = vshll.u32 %v3304_v48, 16  ;;  %v3692_v54 = vadd.f32 -0.4999988, %v3691_v62  ;;  %v3699_v5 = vadd.f32 -0.16666654, %v3698_v60 }
 0x4e5   : > { %vm3198_vm2 = vcmp.lt.s32.totalorder %v11401_v61, 0  ;;  %v3199_v44 = vsub.s32 0, %v11401_v61  ;;  %vm3707_vm3 = vcmp.eq.s32.totalorder %v3705_v6, 0  ;;  %v3306_v29 = vmul.u32 %v3302_v26, %v11386_v33 }
 0x4e6   : > { %v3309_v50 = vshll.u32 %v11393_v55, 16  ;;  %vm3311_vm5 = vc.u32 %v3303_v13, %v3307_v32  ;;  %v3313_v8 = vadd.s32 %v3307_v32, %v3303_v13  ;;  %v3693_v49 = vmul.f32 %v3692_v54, %v3688_v2 }
 0x4e7   : > { %v3700_v35 = vmul.f32 %v3699_v5, %v3688_v2  ;;  %vm3706_vm4 = vcmp.lt.s32.totalorder %v3705_v6, 2  ;;  %v3200_v38 = vsel %vm3198_vm2, %v3199_v44, %v11401_v61  ;;  %v3312_v10 = vsel %vm3311_vm5, 1, %v15066_v0 }
 0x4e8   : > { %vm3703_vm7 = vweird.f32 %v10772_v51  ;;  %v3201_v1 = vclz %v3200_v38  ;;  %v3220_v47 = vsel %vm3097_vm0, %v3219_v14, %v3195_v56  ;;  %v3314_v27 = vadd.s32 %v3312_v10, %v3306_v29 }
 0x4e9   : > { %vm3315_vm8 = vc.u32 %v3313_v8, %v3309_v50  ;;  %v3694_v9 = vadd.f32 1.0, %v3693_v49  ;;  %v3701_v19 = vadd.f32 1.0, %v3700_v35  ;;  %v3323_v58 = vand.u32 65535, %v3293_v45 }
 0x4ea   : > { %v3316_v11 = vsel %vm3315_vm8, 1, %v15066_v0  ;;  %vm3710_vm9 = vcmp.eq.s32.totalorder %v3705_v6, 2  ;;  %v3189_v2 = vadd.s32 %v11311_v43, %v11301_v34  ;;  %v8438_v16 = vadd.s32 4294967294, %v3201_v1 }
 0x4eb   : > { %v3266_v23 = vshrl.u32 %v15063_v18, %v11273_v37  ;;  %v3702_v26 = vmul.f32 %v3701_v19, %v11358_v17  ;;  %v3711_v4 = vxor.u32 2147483648, %v3694_v9  ;;  %v3318_v7 = vadd.s32 %v3316_v11, %v3314_v27 }
 0x4ec   : > { %v3324_v56 = vshrl.u32 %v3293_v45, 16  ;;  %vm8439_vm10 = vcmp.lt.s32.totalorder %v8438_v16, 0  ;;  %v3222_v39 = vsel %vm11397_vm1, 0, %v3220_v47  ;;  %v3288_v34 = vsel %vm3284_vm15, %v11333_v40, %v3287_v3 }
 0x4ed   : > { %v3286_v21 = vsel %vm3282_vm12, %v3266_v23, %v11350_v24  ;;  %v3708_v43 = vxor.u32 2147483648, %v3702_v26  ;;  %v3204_v62 = vsel %vm8439_vm10, 0, %v8438_v16  ;;  %v3308_v37 = vshrl.u32 %v3304_v48, 16 }
 0x4ee   : > { %v3327_v17 = vmul.u32 %v3323_v58, %v11386_v33  ;;  %v3205_v60 = vsub.s32 32, %v3204_v62  ;;  %v3209_v14 = vsub.s32 4294967266, %v3204_v62  ;;  %v3325_v45 = vmul.u32 %v3323_v58, %v11383_v59 }
 0x4ef   : > { %v3326_v13 = vmul.u32 %v3324_v56, %v11383_v59  ;;  %v3709_v32 = vsel %vm3707_vm3, %v3694_v9, %v3708_v43  ;;  %v3712_v54 = vsel %vm3710_vm9, %v3711_v4, %v3702_v26  ;;  %v3206_v24 = vshll.u32 %v11401_v61, %v3204_v62 }
 0x4f0   : > { %v3319_v5 = vadd.s32 %v3318_v7, %v3308_v37  ;;  %v3713_v40 = vsel %vm3706_vm4, %v3709_v32, %v3712_v54  ;;  %v3207_v3 = vshrl.u32 %v3189_v2, %v3205_v60  ;;  %v3210_v44 = vadd.s32 127, %v3209_v14 }
 0x4f1   : > { %v3329_v48 = vshll.u32 %v3326_v13, 16  ;;  %v3714_v29 = vsel %vm3703_vm7, nan, %v3713_v40  ;;  %v3310_v50 = vshrl.u32 %v11393_v55, 16  ;;  %v3328_v8 = vmul.u32 %v3324_v56, %v11386_v33 }
 0x4f2   : > { %v3331_v59 = vshll.u32 %v3327_v17, 16  ;;  %4159 = vmatpush.msrb.mxu3 %v3714_v29  ;;  %v3208_v49 = vor.u32 %v3207_v3, %v3206_v24  ;;  %v3211_v35 = vshll.u32 %v3210_v44, 23  ;;  %v11443_v61 = vshrl.u32 %v10768_v46, 5 }
 0x4f3   : > { %vm3333_vm11 = vc.u32 %v3325_v45, %v3329_v48  ;;  %v3335_v38 = vadd.s32 %v3329_v48, %v3325_v45  ;;  %v11446_v6 = vsub.s32 32, %v10775_v28  ;;  %v2785_v51 = vand.u32 2147483647, %v10746_v30 }
 0x4f4   : > { %v3334_v10 = vsel %vm3333_vm11, 1, %v15066_v0  ;;  %vm2951_vm12 = vcmp.gt.s32.totalorder %v11344_v53, 0  ;;  %v3212_v55 = vor.u32 4788187, %v3211_v35  ;;  %v11451_v33 = vadd.s32 %v3319_v5, %v3310_v50 }
 0x4f5   : > { %v3336_v1 = vadd.s32 %v3334_v10, %v3328_v8  ;;  %vm3337_vm14 = vc.u32 %v3335_v38, %v3331_v59  ;;  %v3239_v47 = vadd.s32 3, %v3222_v39  ;;  %v3289_v27 = vsel %vm3283_vm13, %v3286_v21, %v3288_v34 }
 0x4f6   : > { %v3330_v46 = vshrl.u32 %v3326_v13, 16  ;;  %v3338_v9 = vsel %vm3337_vm14, 1, %v15066_v0  ;;  %v3213_v19 = vand.u32 2147483647, %v3212_v55  ;;  %v3215_v11 = vcvt.s32.f32 %v3208_v49 }
 0x4f7   : > { %v11456_v58 = vadd.s32 %v3335_v38, %v3331_v59  ;;  %v3340_v2 = vadd.s32 %v3338_v9, %v3336_v1  ;;  %v3332_v16 = vshrl.u32 %v3327_v17, 16  ;;  %v2792_v23 = vand.u32 8388607, %v2785_v51 }
 0x4f8   : > { %v2803_v26 = vshrl.u32 %v15061_v20, %v11446_v6  ;;  %v2806_v4 = vshrl.u32 %v15059_v25, %v11446_v6  ;;  %v3216_v22 = vmul.f32 %v3215_v11, %v3213_v19  ;;  %v2802_v56 = vshll.u32 %v15063_v18, %v10775_v28 }
 0x4f9   : > { %v3341_v7 = vadd.s32 %v3340_v2, %v3330_v46  ;;  %vm3345_vm13 = vc.u32 %v11451_v33, %v11456_v58  ;;  %v2805_v39 = vshll.u32 %v15061_v20, %v10775_v28  ;;  %v2809_v21 = vshrl.u32 %v15057_v31, %v11446_v6 }
 0x4fa   : > { %v2811_v34 = vshll.u32 %v15057_v31, %v10775_v28  ;;  %v2812_v43 = vshrl.u32 %v15055_v36, %v11446_v6  ;;  %v3217_v62 = vxor.u32 2147483648, %v3216_v22  ;;  %v2808_v17 = vshll.u32 %v15059_v25, %v10775_v28 }
 0x4fb   : > { %v3342_v37 = vadd.s32 %v3341_v7, %v3332_v16  ;;  %v2815_v60 = vshrl.u32 %v15053_v42, %v11446_v6  ;;  %v2804_v14 = vor.u32 %v2803_v26, %v2802_v56  ;;  %v2807_v45 = vor.u32 %v2806_v4, %v2805_v39 }
 0x4fc   : > { %v2813_v13 = vor.u32 %v2812_v43, %v2811_v34  ;;  %v2814_v32 = vshll.u32 %v15055_v36, %v10775_v28  ;;  %v3218_v54 = vsel %vm3097_vm0, %v3217_v62, %v3216_v22  ;;  %v3343_v24 = vmul.u32 %v11378_v57, %v3289_v27 }
 0x4fd   : > { %v3346_v5 = vadd.s32 1, %v3342_v37  ;;  %v2810_v40 = vor.u32 %v2809_v21, %v2808_v17  ;;  %v3221_v3 = vsel %vm11397_vm1, %v10751_v12, %v3218_v54  ;;  %v2793_v44 = vor.u32 8388608, %v2792_v23 }
 0x4fe   : > { %v2816_v48 = vor.u32 %v2815_v60, %v2814_v32  ;;  %vm2820_vm15 = vcmp.lt.s32.totalorder %v11443_v61, 4  ;;  %v3223_v29 = vmul.f32 %v3221_v3, %v3221_v3  ;;  %vm2817_vm2 = vcmp.lt.s32.totalorder %v11443_v61, 1 }
 0x4ff   : > { %v3347_v28 = vsel %vm3345_vm13, %v3346_v5, %v3342_v37  ;;  %v2826_v57 = vsel %vm2820_vm15, %v2813_v13, 920167782  ;;  %v11498_v50 = vsel %vm2951_vm12, %v11344_v53, 0  ;;  %vm2819_vm0 = vcmp.lt.s32.totalorder %v11443_v61, 3 }
 0x500   : > { %v3348_v15 = vadd.s32 %v3347_v28, %v3343_v24  ;;  %v2825_v8 = vsel %vm2817_vm2, %v2804_v14, %v2807_v45  ;;  %v3224_v59 = vmul.f32 -0.001358992, %v3223_v29  ;;  %v3231_v49 = vmul.f32 -0.00019511016, %v3223_v29 }
 0x501   : > { %v2827_v35 = vsel %vm2819_vm0, %v2810_v40, %v2826_v57  ;;  %v2829_v38 = vsel %vm2817_vm2, %v2807_v45, %v2810_v40  ;;  %v11507_v10 = vand.u32 3, %v3239_v47  ;;  %v2830_v53 = vsel %vm2820_vm15, %v2816_v48, 1326507024 }
 0x502   : > { %v3349_v55 = vadd.s32 536870912, %v3348_v15  ;;  %v11511_v1 = vshll.u32 %v2793_v44, 8  ;;  %v3225_v27 = vadd.f32 0.041655596, %v3224_v59  ;;  %v3232_v46 = vadd.f32 0.008332121, %v3231_v49 }
 0x503   : > { %vm2818_vm1 = vcmp.lt.s32.totalorder %v11443_v61, 2  ;;  %v2831_v9 = vsel %vm2819_vm0, %v2813_v13, %v2830_v53  ;;  %v2801_v7 = vshrl.u32 %v15063_v18, %v11446_v6  ;;  %v2822_v56 = vsel %vm2820_vm15, %v2810_v40, 2102212464 }
 0x504   : > { %v11516_v19 = vshrl.u32 %v3349_v55, 30  ;;  %v11520_v11 = vsel %vm2818_vm1, %v2825_v8, %v2827_v35  ;;  %v2832_v47 = vsel %vm2818_vm1, %v2829_v38, %v2831_v9  ;;  %v2834_v2 = vand.u32 65535, %v11511_v1 }
 0x505   : > { %v3226_v16 = vmul.f32 %v3225_v27, %v3223_v29  ;;  %v3233_v23 = vmul.f32 %v3232_v46, %v3223_v29  ;;  %v2836_v26 = vand.u32 65535, %v2832_v47  ;;  %v2837_v4 = vshrl.u32 %v2832_v47, 16 }
 0x506   : > { %v3351_v22 = vshll.u32 %v11516_v19, 30  ;;  %v2835_v39 = vshrl.u32 %v11511_v1, 16  ;;  %v2859_v62 = vshrl.u32 %v11520_v11, 16  ;;  %v11533_v37 = vand.u32 31, %v11498_v50 }
 0x507   : > { %v3227_v21 = vadd.f32 -0.4999988, %v3226_v16  ;;  %v3234_v34 = vadd.f32 -0.16666654, %v3233_v23  ;;  %v2839_v43 = vmul.u32 %v2837_v4, %v2834_v2  ;;  %v2821_v60 = vsel %vm2817_vm2, %v2801_v7, %v2804_v14 }
 0x508   : > { %v11535_v17 = vsub.s32 %v3348_v15, %v3351_v22  ;;  %v2840_v13 = vmul.u32 %v2836_v26, %v2835_v39  ;;  %vm3241_vm3 = vcmp.lt.s32.totalorder %v11507_v10, 2  ;;  %v2823_v54 = vsel %vm2819_vm0, %v2807_v45, %v2822_v56 }
 0x509   : > { %v3228_v6 = vmul.f32 %v3227_v21, %v3223_v29  ;;  %v3235_v32 = vmul.f32 %v3234_v34, %v3223_v29  ;;  %v2842_v24 = vshll.u32 %v2839_v43, 16  ;;  %vm3238_vm5 = vweird.f32 %v10751_v12 }
 0x50a   : > { %vm3353_vm4 = vcmp.lt.s32.totalorder %v11535_v17, 0  ;;  %v3354_v5 = vsub.s32 0, %v11535_v17  ;;  %v2838_v40 = vmul.u32 %v2836_v26, %v2834_v2  ;;  %v2858_v44 = vand.u32 65535, %v11520_v11 }
 0x50b   : > { %v3229_v48 = vadd.f32 1.0, %v3228_v6  ;;  %v3236_v14 = vadd.f32 1.0, %v3235_v32  ;;  %v2841_v28 = vmul.u32 %v2837_v4, %v2835_v39  ;;  %v2861_v57 = vmul.u32 %v2859_v62, %v2834_v2 }
 0x50c   : > { %v3355_v29 = vsel %vm3353_vm4, %v3354_v5, %v11535_v17  ;;  %v2844_v15 = vshll.u32 %v2840_v13, 16  ;;  %vm2846_vm7 = vc.u32 %v2838_v40, %v2842_v24  ;;  %v2848_v8 = vadd.s32 %v2842_v24, %v2838_v40 }
 0x50d   : > { %v3237_v45 = vmul.f32 %v3236_v14, %v3221_v3  ;;  %v3246_v59 = vxor.u32 2147483648, %v3229_v48  ;;  %v3356_v49 = vclz %v3355_v29  ;;  %v2847_v35 = vsel %vm2846_vm7, 1, %v15066_v0 }
 0x50e   : > { %vm3242_vm8 = vcmp.eq.s32.totalorder %v11507_v10, 0  ;;  %vm3245_vm9 = vcmp.eq.s32.totalorder %v11507_v10, 2  ;;  %v3344_v38 = vadd.s32 %v11456_v58, %v11451_v33  ;;  %v2849_v55 = vadd.s32 %v2847_v35, %v2841_v28 }
 0x50f   : > { %v3243_v53 = vxor.u32 2147483648, %v3237_v45  ;;  %v8441_v27 = vadd.s32 4294967294, %v3356_v49  ;;  %v11554_v46 = vsel %vm2818_vm1, %v2821_v60, %v2823_v54  ;;  %vm2850_vm10 = vc.u32 %v2848_v8, %v2844_v15 }
 0x510   : > { %v2851_v3 = vsel %vm2850_vm10, 1, %v15066_v0  ;;  %v2860_v9 = vmul.u32 %v2858_v44, %v2834_v2  ;;  %v2862_v11 = vmul.u32 %v2858_v44, %v2835_v39  ;;  %v2864_v47 = vshll.u32 %v2861_v57, 16 }
 0x511   : > { %v3244_v16 = vsel %vm3242_vm8, %v3229_v48, %v3243_v53  ;;  %v3247_v23 = vsel %vm3245_vm9, %v3246_v59, %v3237_v45  ;;  %vm8442_vm11 = vcmp.lt.s32.totalorder %v8441_v27, 0  ;;  %v2853_v26 = vadd.s32 %v2851_v3, %v2849_v55 }
 0x512   : > { %v3248_v33 = vsel %vm3241_vm3, %v3244_v16, %v3247_v23  ;;  %v3359_v58 = vsel %vm8442_vm11, 0, %v8441_v27  ;;  %v2843_v4 = vshrl.u32 %v2839_v43, 16  ;;  %v2845_v22 = vshrl.u32 %v2840_v13, 16 }
 0x513   : > { %v3249_v61 = vsel %vm3238_vm5, nan, %v3248_v33  ;;  %v3360_v7 = vsub.s32 32, %v3359_v58  ;;  %v3364_v56 = vsub.s32 4294967266, %v3359_v58  ;;  %v2863_v21 = vmul.u32 %v2859_v62, %v2835_v39 }
 0x514   : > { %4131 = vmatpush.msrb.mxu2 %v3249_v61  ;;  %v2854_v2 = vadd.s32 %v2853_v26, %v2843_v4  ;;  %v2866_v34 = vshll.u32 %v2862_v11, 16  ;;  %vm2868_vm12 = vc.u32 %v2860_v9, %v2864_v47  ;;  %v2870_v60 = vadd.s32 %v2864_v47, %v2860_v9 }
 0x515   : > { %v3361_v6 = vshll.u32 %v11535_v17, %v3359_v58  ;;  %v3362_v32 = vshrl.u32 %v3344_v38, %v3360_v7  ;;  %v3365_v54 = vadd.s32 127, %v3364_v56  ;;  %v2869_v10 = vsel %vm2868_vm12, 1, %v15066_v0 }
 0x516   : > { %v3374_v43 = vsub.s32 4, %v11516_v19  ;;  %v11564_v13 = vadd.s32 %v2854_v2, %v2845_v22  ;;  %v2871_v12 = vadd.s32 %v2869_v10, %v2863_v21  ;;  %vm2872_vm14 = vc.u32 %v2870_v60, %v2866_v34 }
 0x517   : > { %v3363_v24 = vor.u32 %v3362_v32, %v3361_v6  ;;  %v3366_v5 = vshll.u32 %v3365_v54, 23  ;;  %v2873_v39 = vsel %vm2872_vm14, 1, %v15066_v0  ;;  %v2940_v62 = vand.u32 2147483647, %v10757_v52 }
 0x518   : > { %v11569_v40 = vshrl.u32 %v11498_v50, 5  ;;  %v11572_v17 = vsub.s32 32, %v11533_v37  ;;  %v2865_v44 = vshrl.u32 %v2861_v57, 16  ;;  %v2875_v48 = vadd.s32 %v2873_v39, %v2871_v12 }
 0x519   : > { %vm11576_vm13 = vcmp.le.f32.partialorder %v3250_v63, 0.7853982  ;;  %vm3252_vm15 = vcmp.lt.s32.totalorder %v10762_v41, 0  ;;  %v3367_v28 = vor.u32 4788187, %v3366_v5  ;;  %v11581_v29 = vadd.s32 %v2870_v60, %v2866_v34 }
 0x51a   : > { %v3375_v50 = vsel %vm3252_vm15, %v3374_v43, %v11516_v19  ;;  %v2867_v15 = vshrl.u32 %v2862_v11, 16  ;;  %v2876_v8 = vadd.s32 %v2875_v48, %v2865_v44  ;;  %v2878_v57 = vmul.u32 %v11511_v1, %v11554_v46 }
 0x51b   : > { %v3368_v45 = vand.u32 2147483647, %v3367_v28  ;;  %v3370_v59 = vcvt.s32.f32 %v3363_v24  ;;  %vm2880_vm2 = vc.u32 %v11564_v13, %v11581_v29  ;;  %v2947_v63 = vand.u32 8388607, %v2940_v62 }
 0x51c   : > { %v2877_v49 = vadd.s32 %v2876_v8, %v2867_v15  ;;  %v2958_v35 = vshrl.u32 %v15061_v20, %v11572_v17  ;;  %v2961_v19 = vshrl.u32 %v15059_v25, %v11572_v17  ;;  %v2964_v38 = vshrl.u32 %v15057_v31, %v11572_v17 }
 0x51d   : > { %v3371_v55 = vmul.f32 %v3370_v59, %v3368_v45  ;;  %v2960_v1 = vshll.u32 %v15061_v20, %v11533_v37  ;;  %v2966_v53 = vshll.u32 %v15057_v31, %v11533_v37  ;;  %v2967_v27 = vshrl.u32 %v15055_v36, %v11572_v17 }
 0x51e   : > { %v2881_v46 = vadd.s32 1, %v2877_v49  ;;  %v2963_v3 = vshll.u32 %v15059_v25, %v11533_v37  ;;  %v2969_v9 = vshll.u32 %v15055_v36, %v11533_v37  ;;  %v2970_v11 = vshrl.u32 %v15053_v42, %v11572_v17 }
 0x51f   : > { %v3372_v47 = vxor.u32 2147483648, %v3371_v55  ;;  %v2948_v16 = vor.u32 8388608, %v2947_v63  ;;  %v2957_v23 = vshll.u32 %v15063_v18, %v11533_v37  ;;  %v2968_v26 = vor.u32 %v2967_v27, %v2966_v53 }
 0x520   : > { %v2882_v33 = vsel %vm2880_vm2, %v2881_v46, %v2877_v49  ;;  %v11615_v58 = vor.u32 %v2961_v19, %v2960_v1  ;;  %v11617_v4 = vor.u32 %v2964_v38, %v2963_v3  ;;  %v2971_v22 = vor.u32 %v2970_v11, %v2969_v9 }
 0x521   : > { %v3373_v61 = vsel %vm3252_vm15, %v3372_v47, %v3371_v55  ;;  %v3377_v7 = vsel %vm11576_vm13, 0, %v3375_v50  ;;  %v2883_v56 = vadd.s32 %v2882_v33, %v2878_v57  ;;  %v11626_v21 = vor.u32 %v2958_v35, %v2957_v23 }
 0x522   : > { %v3376_v37 = vsel %vm11576_vm13, %v10762_v41, %v3373_v61  ;;  %vm2972_vm0 = vcmp.lt.s32.totalorder %v11569_v40, 1  ;;  %vm2975_vm1 = vcmp.lt.s32.totalorder %v11569_v40, 4  ;;  %vm2973_vm3 = vcmp.lt.s32.totalorder %v11569_v40, 2 }
 0x523   : > { %v3378_v2 = vmul.f32 %v3376_v37, %v3376_v37  ;;  %v2884_v34 = vadd.s32 536870912, %v2883_v56  ;;  %v2981_v60 = vsel %vm2975_vm1, %v2968_v26, 920167782  ;;  %vm2974_vm5 = vcmp.lt.s32.totalorder %v11569_v40, 3 }
 0x524   : > { %v2984_v6 = vsel %vm2972_vm0, %v11615_v58, %v11617_v4  ;;  %v2985_v32 = vsel %vm2975_vm1, %v2971_v22, 1326507024  ;;  %v11640_v54 = vshll.u32 %v2948_v16, 8  ;;  %v2980_v5 = vsel %vm2972_vm0, %v11626_v21, %v11615_v58 }
 0x525   : > { %v3379_v10 = vmul.f32 -0.001358992, %v3378_v2  ;;  %v3386_v43 = vmul.f32 -0.00019511016, %v3378_v2  ;;  %v11642_v12 = vshrl.u32 %v2884_v34, 30  ;;  %v2986_v24 = vsel %vm2974_vm5, %v2968_v26, %v2985_v32 }
 0x526   : > { %v2982_v39 = vsel %vm2974_vm5, %v11617_v4, %v2981_v60  ;;  %v2987_v44 = vsel %vm2973_vm3, %v2984_v6, %v2986_v24  ;;  %v3394_v28 = vadd.s32 3, %v3377_v7  ;;  %v2989_v15 = vand.u32 65535, %v11640_v54 }
 0x527   : > { %v3380_v48 = vadd.f32 0.041655596, %v3379_v10  ;;  %v3387_v14 = vadd.f32 0.008332121, %v3386_v43  ;;  %v2886_v50 = vshll.u32 %v11642_v12, 30  ;;  %v2990_v8 = vshrl.u32 %v11640_v54, 16 }
 0x528   : > { %v2991_v57 = vand.u32 65535, %v2987_v44  ;;  %v2992_v45 = vshrl.u32 %v2987_v44, 16  ;;  %v2983_v35 = vsel %vm2973_vm3, %v2980_v5, %v2982_v39  ;;  %v3395_v27 = vand.u32 3, %v3394_v28 }
 0x529   : > { %v3381_v59 = vmul.f32 %v3380_v48, %v3378_v2  ;;  %v3388_v63 = vmul.f32 %v3387_v14, %v3378_v2  ;;  %v2887_v49 = vsub.s32 %v2883_v56, %v2886_v50  ;;  %v3013_v9 = vand.u32 65535, %v2983_v35 }
 0x52a   : > { %v2994_v19 = vmul.u32 %v2992_v45, %v2989_v15  ;;  %v11660_v38 = vmul.u32 %v2991_v57, %v2990_v8  ;;  %v2993_v46 = vmul.u32 %v2991_v57, %v2989_v15  ;;  %v3014_v23 = vshrl.u32 %v2983_v35, 16 }
 0x52b   : > { %v3382_v55 = vadd.f32 -0.4999988, %v3381_v59  ;;  %v3389_v1 = vadd.f32 -0.16666654, %v3388_v63  ;;  %vm2888_vm4 = vcmp.lt.s32.totalorder %v2887_v49, 0  ;;  %v2889_v53 = vsub.s32 0, %v2887_v49 }
 0x52c   : > { %v2997_v3 = vshll.u32 %v2994_v19, 16  ;;  %v2996_v33 = vmul.u32 %v2992_v45, %v2990_v8  ;;  %v2999_v22 = vshll.u32 %v11660_v38, 16  ;;  %vm3393_vm8 = vweird.f32 %v10762_v41 }
 0x52d   : > { %v3383_v11 = vmul.f32 %v3382_v55, %v3378_v2  ;;  %v3390_v47 = vmul.f32 %v3389_v1, %v3378_v2  ;;  %v2890_v16 = vsel %vm2888_vm4, %v2889_v53, %v2887_v49  ;;  %vm3396_vm9 = vcmp.lt.s32.totalorder %v3395_v27, 2 }
 0x52e   : > { %v2891_v26 = vclz %v2890_v16  ;;  %vm3001_vm7 = vc.u32 %v2993_v46, %v2997_v3  ;;  %v3003_v34 = vadd.s32 %v2997_v3, %v2993_v46  ;;  %vm3397_vm10 = vcmp.eq.s32.totalorder %v3395_v27, 0 }
 0x52f   : > { %v3384_v61 = vadd.f32 1.0, %v3383_v11  ;;  %v3391_v7 = vadd.f32 1.0, %v3390_v47  ;;  %v3002_v56 = vsel %vm3001_vm7, 1, %v15066_v0  ;;  %vm3400_vm12 = vcmp.eq.s32.totalorder %v3395_v27, 2 }
 0x530   : > { %v8432_v60 = vadd.s32 4294967294, %v2891_v26  ;;  %v3004_v2 = vadd.s32 %v3002_v56, %v2996_v33  ;;  %vm3005_vm11 = vc.u32 %v3003_v34, %v2999_v22  ;;  %v3016_v43 = vmul.u32 %v3014_v23, %v2989_v15 }
 0x531   : > { %v3392_v6 = vmul.f32 %v3391_v7, %v3376_v37  ;;  %v3401_v32 = vxor.u32 2147483648, %v3384_v61  ;;  %v3006_v10 = vsel %vm3005_vm11, 1, %v15066_v0  ;;  %v2879_v5 = vadd.s32 %v11581_v29, %v11564_v13 }
 0x532   : > { %vm8433_vm14 = vcmp.lt.s32.totalorder %v8432_v60, 0  ;;  %v3017_v44 = vmul.u32 %v3013_v9, %v2990_v8  ;;  %v2998_v28 = vshrl.u32 %v2994_v19, 16  ;;  %v3015_v50 = vmul.u32 %v3013_v9, %v2989_v15 }
 0x533   : > { %v3398_v24 = vxor.u32 2147483648, %v3392_v6  ;;  %v2894_v39 = vsel %vm8433_vm14, 0, %v8432_v60  ;;  %v3402_v57 = vsel %vm3400_vm12, %v3401_v32, %v3392_v6  ;;  %v3008_v45 = vadd.s32 %v3006_v10, %v3004_v2 }
 0x534   : > { %v2895_v48 = vsub.s32 32, %v2894_v39  ;;  %v2899_v14 = vsub.s32 4294967266, %v2894_v39  ;;  %v3019_v59 = vshll.u32 %v3016_v43, 16  ;;  %v2896_v35 = vshll.u32 %v2887_v49, %v2894_v39 }
 0x535   : > { %v3399_v37 = vsel %vm3397_vm10, %v3384_v61, %v3398_v24  ;;  %v3018_v13 = vmul.u32 %v3014_v23, %v2990_v8  ;;  %v3021_v29 = vshll.u32 %v3017_v44, 16  ;;  %v3009_v9 = vadd.s32 %v3008_v45, %v2998_v28 }
 0x536   : > { %v3403_v63 = vsel %vm3396_vm9, %v3399_v37, %v3402_v57  ;;  %v2897_v55 = vshrl.u32 %v2879_v5, %v2895_v48  ;;  %v2900_v1 = vadd.s32 127, %v2899_v14  ;;  %vm3023_vm13 = vc.u32 %v3015_v50, %v3019_v59 }
 0x537   : > { %v3404_v53 = vsel %vm3393_vm8, nan, %v3403_v63  ;;  %v3024_v15 = vsel %vm3023_vm13, 1, %v15066_v0  ;;  %v3025_v3 = vadd.s32 %v3019_v59, %v3015_v50  ;;  %v2977_v49 = vsel %vm2975_vm1, %v11617_v4, 2102212464 }
 0x538   : > { %4160 = vmatpush.msrb.mxu3 %v3404_v53  ;;  %v2898_v46 = vor.u32 %v2897_v55, %v2896_v35  ;;  %v2901_v19 = vshll.u32 %v2900_v1, 23  ;;  %v3026_v11 = vadd.s32 %v3024_v15, %v3018_v13  ;;  %v2956_v41 = vshrl.u32 %v15063_v18, %v11572_v17 }
 0x539   : > { %vm3027_vm15 = vc.u32 %v3025_v3, %v3021_v29  ;;  %v3000_v8 = vshrl.u32 %v11660_v38, 16  ;;  %v3020_v26 = vshrl.u32 %v3016_v43, 16  ;;  %v2978_v4 = vsel %vm2974_vm5, %v11615_v58, %v2977_v49 }
 0x53a   : > { %v2902_v47 = vor.u32 4788187, %v2901_v19  ;;  %v3028_v27 = vsel %vm3027_vm15, 1, %v15066_v0  ;;  %v2905_v23 = vcvt.s32.f32 %v2898_v46  ;;  %v2976_v22 = vsel %vm2972_vm0, %v2956_v41, %v11626_v21 }
 0x53b   : > { %v3030_v33 = vadd.s32 %v3028_v27, %v3026_v11  ;;  %v3010_v61 = vadd.s32 %v3009_v9, %v3000_v8  ;;  %v3022_v56 = vshrl.u32 %v3017_v44, 16  ;;  %v3029_v34 = vadd.s32 %v3025_v3, %v3021_v29 }
 0x53c   : > { %v2903_v16 = vand.u32 2147483647, %v2902_v47  ;;  %v2979_v60 = vsel %vm2973_vm3, %v2976_v22, %v2978_v4  ;;  %vm2787_vm2 = vcmp.lt.s32.totalorder %v10746_v30, 0  ;;  %vm11691_vm0 = vcmp.le.f32.partialorder %v2785_v51, 0.7853982 }
 0x53d   : > { %v3031_v17 = vadd.s32 %v3030_v33, %v3020_v26  ;;  %vm3035_vm1 = vc.u32 %v3010_v61, %v3029_v34  ;;  %v2909_v2 = vsub.s32 4, %v11642_v12  ;;  %v3033_v40 = vmul.u32 %v11640_v54, %v2979_v60 }
 0x53e   : > { %v2906_v7 = vmul.f32 %v2905_v23, %v2903_v16  ;;  %vm2928_vm9 = vweird.f32 %v10746_v30  ;;  %v3034_v23 = vadd.s32 %v3029_v34, %v3010_v61  ;;  %v4027_v34 = vld [vmem:[#allocation2 + $0x48] sm:$0xff]  ;;  %vm2942_vm10 = vcmp.lt.s32.totalorder %v10757_v52, 0 }
 0x53f   : > { %v3032_v6 = vadd.s32 %v3031_v17, %v3022_v56  ;;  %v2910_v51 = vsel %vm2787_vm2, %v2909_v2, %v11642_v12  ;;  %vm11713_vm11 = vcmp.le.f32.partialorder %v2940_v62, 0.7853982  ;;  %vm3083_vm15 = vweird.f32 %v10757_v52 }
 0x540   : > { %v2907_v38 = vxor.u32 2147483648, %v2906_v7  ;;  %v2912_v37 = vsel %vm11691_vm0, 0, %v2910_v51 }
 0x541   : > { %v3036_v32 = vadd.s32 1, %v3032_v6  ;;  %v2929_v35 = vadd.s32 3, %v2912_v37 }
 0x542   : > { %v2908_v58 = vsel %vm2787_vm2, %v2907_v38, %v2906_v7  ;;  %v4026_v38 = vld [vmem:[#allocation2 + $0x40] sm:$0xff] }
 0x543   : > { %v2911_v10 = vsel %vm11691_vm0, %v10746_v30, %v2908_v58  ;;  %v3037_v24 = vsel %vm3035_vm1, %v3036_v32, %v3032_v6  ;;  %v2930_v46 = vand.u32 3, %v2929_v35  ;;  %v4031_v6 = vld [vmem:[#allocation2 + $0x60] sm:$0xff]  ;;  %v4029_v35 = vld [vmem:[#allocation2 + $0x58] sm:$0xff] }
 0x544   : > { %v2913_v43 = vmul.f32 %v2911_v10, %v2911_v10  ;;  %v3038_v5 = vadd.s32 %v3037_v24, %v3033_v40  ;;  %8455 = vmatmul.msk.f32.vlgmr.msrb.gmra.mxu0 %vm1303_vm6, %v4031_v6  ;;  %8459 = vmatmul.msk.f32.vlgmr.msrb.gmra.mxu1 %vm1303_vm6, %v4031_v6 }
 0x545   : > { %vm2932_vm5 = vcmp.eq.s32.totalorder %v2930_v46, 0  ;;  %vm2935_vm4 = vcmp.eq.s32.totalorder %v2930_v46, 2  ;;  %vm2931_vm7 = vcmp.lt.s32.totalorder %v2930_v46, 2 }
 0x546   : > { %v2914_v39 = vmul.f32 -0.001358992, %v2913_v43  ;;  %v2921_v44 = vmul.f32 -0.00019511016, %v2913_v43  ;;  %v3039_v48 = vadd.s32 536870912, %v3038_v5 }
 0x548   : > { %v2915_v14 = vadd.f32 0.041655596, %v2914_v39  ;;  %v2922_v28 = vadd.f32 0.008332121, %v2921_v44  ;;  %v11701_v50 = vshrl.u32 %v3039_v48, 30  ;;  %v4028_v44 = vld [vmem:[#allocation2 + $0x50] sm:$0xff] }
 0x54a   : > { %v2916_v57 = vmul.f32 %v2915_v14, %v2913_v43  ;;  %v2923_v45 = vmul.f32 %v2922_v28, %v2913_v43  ;;  %v3041_v59 = vshll.u32 %v11701_v50, 30  ;;  %v3064_v40 = vsub.s32 4, %v11701_v50 }
 0x54c   : > { %v2917_v54 = vadd.f32 -0.4999988, %v2916_v57  ;;  %v2924_v63 = vadd.f32 -0.16666654, %v2923_v45  ;;  %v3042_v55 = vsub.s32 %v3038_v5, %v3041_v59  ;;  %v3065_v39 = vsel %vm2942_vm10, %v3064_v40, %v11701_v50  ;;  %v4033_v57 = vld [vmem:[#allocation2 + $0x70] sm:$0xff] }
 0x54d   : > { %v3067_v14 = vsel %vm11713_vm11, 0, %v3065_v39 }
 0x54e   : > { %v2918_v1 = vmul.f32 %v2917_v54, %v2913_v43  ;;  %v2925_v53 = vmul.f32 %v2924_v63, %v2913_v43  ;;  %vm3043_vm3 = vcmp.lt.s32.totalorder %v3042_v55, 0  ;;  %v3044_v12 = vsub.s32 0, %v3042_v55 }
 0x54f   : > { %v3084_v54 = vadd.s32 3, %v3067_v14 }
 0x550   : > { %v2919_v13 = vadd.f32 1.0, %v2918_v1  ;;  %v2926_v29 = vadd.f32 1.0, %v2925_v53  ;;  %v3045_v19 = vsel %vm3043_vm3, %v3044_v12, %v3042_v55 }
 0x551   : > { %v3046_v9 = vclz %v3045_v19  ;;  %v3085_v53 = vand.u32 3, %v3084_v54 }
 0x552   : > { %v2927_v15 = vmul.f32 %v2926_v29, %v2911_v10  ;;  %v2936_v3 = vxor.u32 2147483648, %v2919_v13  ;;  %v4032_v10 = vld [vmem:[#allocation2 + $0x68] sm:$0xff]  ;;  %v4034_v29 = vld [vmem:[#allocation2 + $0x78] sm:$0xff] }
 0x553   : > { %v8435_v47 = vadd.s32 4294967294, %v3046_v9  ;;  %8456 = vmatmul.msk.f32.gmra.mxu0 %vm1303_vm6, %v4032_v10  ;;  %8460 = vmatmul.msk.f32.gmra.mxu1 %vm1303_vm6, %v4032_v10  ;;  %vm3087_vm12 = vcmp.eq.s32.totalorder %v3085_v53, 0  ;;  %vm3090_vm14 = vcmp.eq.s32.totalorder %v3085_v53, 2  ;;  %vm3086_vm13 = vcmp.lt.s32.totalorder %v3085_v53, 2 }
 0x554   : > { %v2933_v11 = vxor.u32 2147483648, %v2927_v15  ;;  %v2937_v41 = vsel %vm2935_vm4, %v2936_v3, %v2927_v15 }
 0x555   : > { %vm8436_vm8 = vcmp.lt.s32.totalorder %v8435_v47, 0 }
 0x556   : > { %v2934_v49 = vsel %vm2932_vm5, %v2919_v13, %v2933_v11  ;;  %v3049_v27 = vsel %vm8436_vm8, 0, %v8435_v47 }
 0x557   : > { %v2938_v8 = vsel %vm2931_vm7, %v2934_v49, %v2937_v41  ;;  %v3050_v26 = vsub.s32 32, %v3049_v27  ;;  %v3054_v33 = vsub.s32 4294967266, %v3049_v27  ;;  %v3051_v22 = vshll.u32 %v3042_v55, %v3049_v27 }
 0x558   : > { %v2939_v16 = vsel %vm2928_vm9, nan, %v2938_v8  ;;  %v4177_v8 = vpop.permute.xlu0 %4176 }
 0x559   : > { %4132 = vmatpush.msrb.mxu2 %v2939_v16  ;;  %v3052_v4 = vshrl.u32 %v3034_v23, %v3050_v26  ;;  %v3055_v7 = vadd.s32 127, %v3054_v33 }
 0x55a   : > { %8463 = vmatmul.msk.f32.vlgmr.msrb.gmra.mxu2 %vm1303_vm6, %v4026_v38 }
 0x55b   : > { %v3053_v56 = vor.u32 %v3052_v4, %v3051_v22  ;;  %v3056_v17 = vshll.u32 %v3055_v7, 23  ;;  %8457 = vmatmul.msk.f32.gmra.mxu0 %vm1303_vm6, %v4033_v57  ;;  %8461 = vmatmul.msk.f32.gmra.mxu1 %vm1303_vm6, %v4033_v57 }
 0x55d   : > { %v3057_v60 = vor.u32 4788187, %v3056_v17  ;;  %v3060_v21 = vcvt.s32.f32 %v3053_v56 }
 0x55f   : > { %v3058_v30 = vand.u32 2147483647, %v3057_v60 }
 0x561   : > { %v3061_v61 = vmul.f32 %v3060_v21, %v3058_v30 }
 0x562   : > { %8464 = vmatmul.msk.f32.gmra.mxu2 %vm1303_vm6, %v4027_v34 }
 0x563   : > { %v3062_v58 = vxor.u32 2147483648, %v3061_v61  ;;  %8458 = vmatmul.msk.f32.gmra.mxu0 %vm1303_vm6, %v4034_v29  ;;  %8462 = vmatmul.msk.f32.gmra.mxu1 %vm1303_vm6, %v4034_v29 }
 0x565   : > { %v3063_v2 = vsel %vm2942_vm10, %v3062_v58, %v3061_v61  ;;  %v4185_v61 = vpop.permute.xlu1 %4184 }
 0x566   : > { %v3066_v43 = vsel %vm11713_vm11, %v10757_v52, %v3063_v2  ;;  %v4189_v52 = vpop.permute.xlu2 %4188 }
 0x567   : > { %v3068_v24 = vmul.f32 %v3066_v43, %v3066_v43 }
 0x569   : > { %v3069_v5 = vmul.f32 -0.001358992, %v3068_v24  ;;  %v3076_v62 = vmul.f32 -0.00019511016, %v3068_v24 }
 0x56a   : > { %8465 = vmatmul.msk.f32.gmra.mxu2 %vm1303_vm6, %v4028_v44 }
 0x56b   : > { %v3070_v51 = vadd.f32 0.041655596, %v3069_v5  ;;  %v3077_v48 = vadd.f32 0.008332121, %v3076_v62 }
 0x56d   : > { %v3071_v28 = vmul.f32 %v3070_v51, %v3068_v24  ;;  %v3078_v37 = vmul.f32 %v3077_v48, %v3068_v24 }
 0x56e   : > { %v4181_v17 = vpop.permute.xlu2 %4180 }
 0x56f   : > { %v3072_v45 = vadd.f32 -0.4999988, %v3071_v28  ;;  %v3079_v59 = vadd.f32 -0.16666654, %v3078_v37 }
 0x571   : > { %v3073_v63 = vmul.f32 %v3072_v45, %v3068_v24  ;;  %v3080_v50 = vmul.f32 %v3079_v59, %v3068_v24 }
 0x572   : > { %8466 = vmatmul.msk.f32.gmra.mxu2 %vm1303_vm6, %v4029_v35 }
 0x573   : > { %v3074_v55 = vadd.f32 1.0, %v3073_v63  ;;  %v3081_v1 = vadd.f32 1.0, %v3080_v50 }
 0x575   : > { %v3082_v12 = vmul.f32 %v3081_v1, %v3066_v43  ;;  %v3091_v13 = vxor.u32 2147483648, %v3074_v55 }
 0x577   : > { %v3088_v46 = vxor.u32 2147483648, %v3082_v12  ;;  %v3092_v15 = vsel %vm3090_vm14, %v3091_v13, %v3082_v12 }
 0x579   : > { %v3089_v19 = vsel %vm3087_vm12, %v3074_v55, %v3088_v46 }
 0x57a   : > { %v3093_v3 = vsel %vm3086_vm13, %v3089_v19, %v3092_v15 }
 0x57b   : > { %v3094_v9 = vsel %vm3083_vm15, nan, %v3093_v3 }
 0x57c   : > { %4161 = vmatpush.msrb.mxu3 %v3094_v9 }
 0x57d   : > { %8467 = vmatmul.msk.f32.vlgmr.msrb.gmra.mxu3 %vm1303_vm6, %v4026_v38 }
 0x585   : > { %8468 = vmatmul.msk.f32.gmra.mxu3 %vm1303_vm6, %v4027_v34 }
 0x58d   : > { %8469 = vmatmul.msk.f32.gmra.mxu3 %vm1303_vm6, %v4028_v44 }
 0x595   : > { %8470 = vmatmul.msk.f32.gmra.mxu3 %vm1303_vm6, %v4029_v35 }
 0x5c1   : > { %v4064_v11 = vpop.f32.mrf.mxu0  ;;  %v4093_v41 = vpop.f32.mrf.mxu1 }
 0x5d0   : > { %v4067_v33 = vpop.f32.mrf.mxu0  ;;  %v4096_v22 = vpop.f32.mrf.mxu1 }
 0x5d8   : > { %v4070_v30 = vpop.f32.mrf.mxu0  ;;  %v4099_v10 = vpop.f32.mrf.mxu1 }
 0x5dd   : > { %v4134_v47 = vpop.f32.mrf.mxu2 }
 0x5de   : > { %v4135_v49 = vadd.f32 %v4134_v47, %v4064_v11 }
 0x5e0   : > { %v4191_v27 = vadd.f32 %v4177_v8, %v4135_v49  ;;  %v4073_v44 = vpop.f32.mrf.mxu0  ;;  %v4102_v35 = vpop.f32.mrf.mxu1 }
 0x5e2   : > { %v4199_v16 = vmul.f32 30.0, %v4191_v27 }
 0x5e4   : > { %8691 = vtanh.f32 %v4199_v16 }
 0x5e5   : > { %v4137_v4 = vpop.f32.mrf.mxu2 }
 0x5e6   : > { %v4138_v7 = vadd.f32 %v4137_v4, %v4067_v33 }
 0x5e8   : > { %v4193_v6 = vadd.f32 %v4181_v17, %v4138_v7 }
 0x5ea   : > { %v8692_v38 = vpop.eup %8691  ;;  %v4201_v58 = vmul.f32 30.0, %v4193_v6 }
 0x5eb   : > { %v4215_v2 = vmul.f32 10.0, %v8692_v38 }
 0x5ec   : > { %8693 = vtanh.f32 %v4201_v58 }
 0x5ed   : > { %v4140_v21 = vpop.f32.mrf.mxu2  ;;  %v4223_v5 = vadd.f32 30.0, %v4215_v2 }
 0x5ee   : > { %v4141_v32 = vadd.f32 %v4140_v21, %v4070_v30 }
 0x5ef   : > { %v11740_v57 = vmul.f32 %v4223_v5, %v4191_v27 }
 0x5f0   : > { %v4195_v43 = vadd.f32 %v4185_v61, %v4141_v32 }
 0x5f1   : > { %v4242_v12 = vand.u32 2139095040, %v11740_v57 }
 0x5f2   : > { %v4203_v24 = vmul.f32 30.0, %v4195_v43  ;;  %v8694_v48 = vpop.eup %8693 }
 0x5f3   : > { %v4217_v45 = vmul.f32 10.0, %v8694_v48  ;;  %v4243_v11 = vshrl.u32 %v4242_v12, 23 }
 0x5f5   : > { %v4143_v51 = vpop.f32.mrf.mxu2  ;;  %v4225_v50 = vadd.f32 30.0, %v4217_v45 }
 0x5f6   : > { %v4144_v28 = vadd.f32 %v4143_v51, %v4073_v44 }
 0x5f7   : > { %v11744_v13 = vmul.f32 %v4225_v50, %v4193_v6 }
 0x5f8   : > { %v4197_v54 = vadd.f32 %v4189_v52, %v4144_v28 }
 0x5f9   : > { %v4552_v3 = vand.u32 2139095040, %v11744_v13 }
 0x5fa   : > { %v4205_v1 = vmul.f32 30.0, %v4197_v54 }
 0x5fb   : > { %v4553_v27 = vshrl.u32 %v4552_v3, 23 }
 0x600   : > { %v4163_v23 = vpop.f32.mrf.mxu3 }
 0x601   : > { %v4164_v26 = vadd.f32 %v4163_v23, %v4093_v41 }
 0x603   : > { %v11738_v37 = vadd.f32 %v4177_v8, %v4164_v26  ;;  %v8471_v26 = vadd.s32 4294967169, %v4243_v11 }
 0x605   : > { %v4200_v53 = vmul.f32 30.0, %v11738_v37 }
 0x608   : > { %v4166_v56 = vpop.f32.mrf.mxu3 }
 0x609   : > { %v4167_v60 = vadd.f32 %v4166_v56, %v4096_v22 }
 0x60b   : > { %v4194_v34 = vadd.f32 %v4181_v17, %v4167_v60  ;;  %v8477_v17 = vadd.s32 4294967169, %v4553_v27  ;;  %v4249_v60 = vadd.s32 1, %v8471_v26 }
 0x60d   : > { %v4202_v40 = vmul.f32 30.0, %v4194_v34  ;;  %v4559_v32 = vadd.s32 1, %v8477_v17  ;;  %vm4250_vm2 = vcmp.gt.s32.totalorder %v4249_v60, 0 }
 0x60f   : > { %8695 = vtanh.f32 %v4202_v40  ;;  %vm4560_vm1 = vcmp.gt.s32.totalorder %v4559_v32, 0 }
 0x610   : > { %v4169_v62 = vpop.f32.mrf.mxu3  ;;  %8697 = vtanh.f32 %v4203_v24 }
 0x611   : > { %v4170_v39 = vadd.f32 %v4169_v62, %v4099_v10 }
 0x613   : > { %v4196_v14 = vadd.f32 %v4185_v61, %v4170_v39 }
 0x615   : > { %v4204_v59 = vmul.f32 30.0, %v4196_v14  ;;  %v8696_v63 = vpop.eup %8695 }
 0x616   : > { %v8698_v55 = vpop.eup %8697  ;;  %v4218_v46 = vmul.f32 10.0, %v8696_v63 }
 0x617   : > { %8699 = vtanh.f32 %v4204_v59  ;;  %v4219_v19 = vmul.f32 10.0, %v8698_v55  ;;  %v4561_v59 = vsel %vm4560_vm1, %v4559_v32, 0 }
 0x618   : > { %v4172_v29 = vpop.f32.mrf.mxu3  ;;  %8701 = vtanh.f32 %v4205_v1  ;;  %v4226_v49 = vadd.f32 30.0, %v4218_v46 }
 0x619   : > { %v4173_v15 = vadd.f32 %v4172_v29, %v4102_v35  ;;  %8703 = vtanh.f32 %v4200_v53  ;;  %v4227_v41 = vadd.f32 30.0, %v4219_v19 }
 0x61a   : > { %v11747_v22 = vmul.f32 %v4226_v49, %v4194_v34 }
 0x61b   : > { %v4198_v9 = vadd.f32 %v4189_v52, %v4173_v15  ;;  %v11749_v7 = vmul.f32 %v4227_v41, %v4195_v43 }
 0x61c   : > { %v4707_v61 = vand.u32 2139095040, %v11747_v22 }
 0x61d   : > { %v8700_v47 = vpop.eup %8699  ;;  %v4206_v8 = vmul.f32 30.0, %v4198_v9  ;;  %v4862_v58 = vand.u32 2139095040, %v11749_v7 }
 0x61e   : > { %v8702_v16 = vpop.eup %8701  ;;  %v4220_v23 = vmul.f32 10.0, %v8700_v47  ;;  %v4708_v24 = vshrl.u32 %v4707_v61, 23 }
 0x61f   : > { %8705 = vtanh.f32 %v4206_v8  ;;  %v4221_v33 = vmul.f32 10.0, %v8702_v16  ;;  %v8704_v56 = vpop.eup %8703  ;;  %v4863_v5 = vshrl.u32 %v4862_v58, 23 }
 0x620   : > { %v4228_v4 = vadd.f32 30.0, %v4220_v23  ;;  %v4216_v21 = vmul.f32 10.0, %v8704_v56 }
 0x621   : > { %v4229_v52 = vadd.f32 30.0, %v4221_v33  ;;  %v8483_v50 = vadd.s32 4294967169, %v4863_v5 }
 0x622   : > { %v11751_v38 = vmul.f32 %v4228_v4, %v4196_v14  ;;  %v4224_v43 = vadd.f32 30.0, %v4216_v21  ;;  %v11762_v14 = vsel %vm4250_vm2, %v4249_v60, 0 }
 0x623   : > { %v11753_v6 = vmul.f32 %v4229_v52, %v4197_v54  ;;  %v8480_v54 = vadd.s32 4294967169, %v4708_v24  ;;  %v11771_v12 = vand.u32 31, %v11762_v14  ;;  %v4869_v3 = vadd.s32 1, %v8483_v50 }
 0x624   : > { %v5017_v34 = vand.u32 2139095040, %v11751_v38  ;;  %v11765_v45 = vmul.f32 %v4224_v43, %v11738_v37  ;;  %v11774_v37 = vshrl.u32 %v4561_v59, 5 }
 0x625   : > { %v8706_v30 = vpop.eup %8705  ;;  %v5172_v2 = vand.u32 2139095040, %v11753_v6  ;;  %v5169_v51 = vand.u32 2147483647, %v11753_v6  ;;  %v4714_v19 = vadd.s32 1, %v8480_v54  ;;  %vm4870_vm7 = vcmp.gt.s32.totalorder %v4869_v3, 0 }
 0x626   : > { %v4222_v10 = vmul.f32 10.0, %v8706_v30  ;;  %v5018_v39 = vshrl.u32 %v5017_v34, 23 }
 0x627   : > { %v5173_v40 = vshrl.u32 %v5172_v2, 23  ;;  %v5176_v55 = vand.u32 8388607, %v5169_v51  ;;  %vm4715_vm5 = vcmp.gt.s32.totalorder %v4714_v19, 0 }
 0x628   : > { %v4230_v62 = vadd.f32 30.0, %v4222_v10  ;;  %v8486_v35 = vadd.s32 4294967169, %v5018_v39  ;;  %v11808_v5 = vsel %vm4715_vm5, %v4714_v19, 0 }
 0x629   : > { %v8489_v44 = vadd.s32 4294967169, %v5173_v40  ;;  %v5177_v47 = vor.u32 8388608, %v5176_v55  ;;  %v11799_v40 = vand.u32 31, %v4561_v59 }
 0x62a   : > { %v11760_v48 = vmul.f32 %v4230_v62, %v4198_v9  ;;  %v5024_v9 = vadd.s32 1, %v8486_v35  ;;  %v11810_v62 = vsel %vm4870_vm7, %v4869_v3, 0 }
 0x62b   : > { %v5179_v28 = vadd.s32 1, %v8489_v44  ;;  %v11793_v34 = vshll.u32 %v5177_v47, 8 }
 0x62c   : > { %v5327_v63 = vand.u32 2139095040, %v11760_v48  ;;  %vm5025_vm8 = vcmp.gt.s32.totalorder %v5024_v9, 0 }
 0x62d   : > { %vm5180_vm0 = vcmp.gt.s32.totalorder %v5179_v28, 0  ;;  %v11812_v39 = vsel %vm5025_vm8, %v5024_v9, 0  ;;  %v5218_v35 = vand.u32 65535, %v11793_v34  ;;  %v5219_v55 = vshrl.u32 %v11793_v34, 16 }
 0x62e   : > { %v5181_v1 = vsel %vm5180_vm0, %v5179_v28, 0  ;;  %v5328_v53 = vshrl.u32 %v5327_v63, 23  ;;  %v11834_v3 = vand.u32 31, %v11812_v39  ;;  %vm5171_vm0 = vcmp.lt.s32.totalorder %v11753_v6, 0 }
 0x62f   : > { %v5183_v29 = vand.u32 31, %v5181_v1  ;;  %v11776_v49 = vshrl.u32 %v5181_v1, 5 }
 0x630   : > { %v8492_v15 = vadd.s32 4294967169, %v5328_v53  ;;  %v11828_v53 = vsub.s32 32, %v11799_v40 }
 0x631   : > { %v5184_v11 = vsub.s32 32, %v5183_v29  ;;  %v5195_v41 = vshll.u32 %v15057_v31, %v5183_v29  ;;  %v5198_v8 = vshll.u32 %v15055_v36, %v5183_v29  ;;  %v5186_v26 = vshll.u32 %v15063_v18, %v5183_v29 }
 0x632   : > { %v5334_v27 = vadd.s32 1, %v8492_v15  ;;  %v5189_v4 = vshll.u32 %v15061_v20, %v5183_v29  ;;  %v5192_v17 = vshll.u32 %v15059_v25, %v5183_v29  ;;  %vm5204_vm4 = vcmp.lt.s32.totalorder %v11776_v49, 4 }
 0x633   : > { %v5196_v16 = vshrl.u32 %v15055_v36, %v5184_v11  ;;  %v5199_v23 = vshrl.u32 %v15053_v42, %v5184_v11  ;;  %v5187_v33 = vshrl.u32 %v15061_v20, %v5184_v11  ;;  %v5190_v56 = vshrl.u32 %v15059_v25, %v5184_v11 }
 0x634   : > { %v5193_v52 = vshrl.u32 %v15057_v31, %v5184_v11  ;;  %vm5335_vm3 = vcmp.gt.s32.totalorder %v5334_v27, 0  ;;  %vm5201_vm9 = vcmp.lt.s32.totalorder %v11776_v49, 1  ;;  %vm5203_vm10 = vcmp.lt.s32.totalorder %v11776_v49, 3 }
 0x635   : > { %v5197_v60 = vor.u32 %v5196_v16, %v5195_v41  ;;  %v5200_v30 = vor.u32 %v5199_v23, %v5198_v8  ;;  %v5188_v21 = vor.u32 %v5187_v33, %v5186_v26  ;;  %v11789_v61 = vor.u32 %v5190_v56, %v5189_v4 }
 0x636   : > { %v5194_v58 = vor.u32 %v5193_v52, %v5192_v17  ;;  %v5336_v10 = vsel %vm5335_vm3, %v5334_v27, 0  ;;  %vm5202_vm11 = vcmp.lt.s32.totalorder %v11776_v49, 2  ;;  %v11831_v29 = vand.u32 31, %v11810_v62 }
 0x637   : > { %v5210_v32 = vsel %vm5204_vm4, %v5197_v60, 920167782  ;;  %v5214_v2 = vsel %vm5204_vm4, %v5200_v30, 1326507024  ;;  %v5209_v43 = vsel %vm5201_vm9, %v5188_v21, %v11789_v61  ;;  %v11816_v28 = vand.u32 31, %v5336_v10 }
 0x638   : > { %v5211_v24 = vsel %vm5203_vm10, %v5194_v58, %v5210_v32  ;;  %v5213_v59 = vsel %vm5201_vm9, %v11789_v61, %v5194_v58  ;;  %v5215_v54 = vsel %vm5203_vm10, %v5197_v60, %v5214_v2  ;;  %v5185_v9 = vshrl.u32 %v15063_v18, %v5184_v11 }
 0x639   : > { %v5212_v44 = vsel %vm5202_vm11, %v5209_v43, %v5211_v24  ;;  %v5216_v50 = vsel %vm5202_vm11, %v5213_v59, %v5215_v54  ;;  %v11837_v8 = vshrl.u32 %v5336_v10, 5  ;;  %v11840_v27 = vsub.s32 32, %v11816_v28 }
 0x63a   : > { %v5242_v63 = vand.u32 65535, %v5212_v44  ;;  %v5243_v1 = vshrl.u32 %v5212_v44, 16  ;;  %v5220_v19 = vand.u32 65535, %v5216_v50  ;;  %v5221_v15 = vshrl.u32 %v5216_v50, 16 }
 0x63b   : > { %v5350_v26 = vshll.u32 %v15057_v31, %v11816_v28  ;;  %v5205_v33 = vsel %vm5201_vm9, %v5185_v9, %v5188_v21  ;;  %v5206_v11 = vsel %vm5204_vm4, %v5194_v58, 2102212464  ;;  %v5351_v21 = vshrl.u32 %v15055_v36, %v11840_v27 }
 0x63c   : > { %v5245_v47 = vmul.u32 %v5243_v1, %v5218_v35  ;;  %v5246_v41 = vmul.u32 %v5242_v63, %v5219_v55  ;;  %v5223_v16 = vmul.u32 %v5221_v15, %v5218_v35  ;;  %v5224_v23 = vmul.u32 %v5220_v19, %v5219_v55 }
 0x63d   : > { %v5244_v4 = vmul.u32 %v5242_v63, %v5218_v35  ;;  %v5222_v17 = vmul.u32 %v5220_v19, %v5218_v35  ;;  %v5247_v60 = vmul.u32 %v5243_v1, %v5219_v55  ;;  %v5225_v30 = vmul.u32 %v5221_v15, %v5219_v55 }
 0x63e   : > { %v5248_v56 = vshll.u32 %v5245_v47, 16  ;;  %v5226_v52 = vshll.u32 %v5223_v16, 16  ;;  %v5250_v32 = vshll.u32 %v5246_v41, 16  ;;  %v5228_v10 = vshll.u32 %v5224_v23, 16 }
 0x63f   : > { %v5354_v58 = vshrl.u32 %v15053_v42, %v11840_v27  ;;  %v5249_v35 = vshrl.u32 %v5245_v47, 16  ;;  %v15065_v1 = vand.u32 2147483647, %v11760_v48  ;;  %v5207_v19 = vsel %vm5203_vm10, %v11789_v61, %v5206_v11 }
 0x640   : > { %vm5252_vm12 = vc.u32 %v5244_v4, %v5248_v56  ;;  %v5254_v2 = vadd.s32 %v5248_v56, %v5244_v4  ;;  %vm5230_vm14 = vc.u32 %v5222_v17, %v5226_v52  ;;  %v5232_v43 = vadd.s32 %v5226_v52, %v5222_v17 }
 0x641   : > { %v5253_v24 = vsel %vm5252_vm12, 1, %v15066_v0  ;;  %v5231_v44 = vsel %vm5230_vm14, 1, %v15066_v0  ;;  %v5227_v15 = vshrl.u32 %v5223_v16, 16  ;;  %v15052_v4 = vand.u32 2147483647, %v11749_v7 }
 0x642   : > { %v5255_v59 = vadd.s32 %v5253_v24, %v5247_v60  ;;  %vm5256_vm13 = vc.u32 %v5254_v2, %v5250_v32  ;;  %v5233_v54 = vadd.s32 %v5231_v44, %v5225_v30  ;;  %vm5234_vm15 = vc.u32 %v5232_v43, %v5228_v10 }
 0x643   : > { %v5257_v63 = vsel %vm5256_vm13, 1, %v15066_v0  ;;  %v5235_v50 = vsel %vm5234_vm15, 1, %v15066_v0  ;;  %v5353_v56 = vshll.u32 %v15055_v36, %v11816_v28  ;;  %v5251_v17 = vshrl.u32 %v5246_v41, 16 }
 0x644   : > { %v5259_v55 = vadd.s32 %v5257_v63, %v5255_v59  ;;  %v5237_v9 = vadd.s32 %v5235_v50, %v5233_v54  ;;  %v5331_v60 = vand.u32 8388607, %v15065_v1  ;;  %v4874_v47 = vsub.s32 32, %v11831_v29 }
 0x645   : > { %v11866_v30 = vor.u32 %v5351_v21, %v5350_v26  ;;  %v5229_v10 = vshrl.u32 %v5224_v23, 16  ;;  %v5355_v24 = vor.u32 %v5354_v58, %v5353_v56  ;;  %v5208_v61 = vsel %vm5202_vm11, %v5205_v33, %v5207_v19 }
 0x646   : > { %v5260_v52 = vadd.s32 %v5259_v55, %v5249_v35  ;;  %v5238_v43 = vadd.s32 %v5237_v9, %v5227_v15  ;;  %v5332_v11 = vor.u32 8388608, %v5331_v60  ;;  %v11871_v44 = vshrl.u32 %v11810_v62, 5 }
 0x647   : > { %v5258_v59 = vadd.s32 %v5254_v2, %v5250_v32  ;;  %v11875_v54 = vand.u32 8388607, %v15052_v4  ;;  %v11878_v26 = vshrl.u32 %v11812_v39, 5  ;;  %v11881_v23 = vsub.s32 32, %v11834_v3 }
 0x648   : > { %v5261_v16 = vadd.s32 %v5260_v52, %v5251_v17  ;;  %v5239_v41 = vadd.s32 %v5238_v43, %v5229_v10  ;;  %vm5359_vm2 = vcmp.lt.s32.totalorder %v11837_v8, 4  ;;  %v5262_v33 = vmul.u32 %v11793_v34, %v5208_v61 }
 0x649   : > { %v5365_v62 = vsel %vm5359_vm2, %v11866_v30, 920167782  ;;  %v4877_v32 = vshrl.u32 %v15061_v20, %v4874_v47  ;;  %v5369_v2 = vsel %vm5359_vm2, %v5355_v24, 1326507024  ;;  %v11891_v21 = vshll.u32 %v5332_v11, 8 }
 0x64a   : > { %v5265_v49 = vadd.s32 1, %v5261_v16  ;;  %vm5264_vm1 = vc.u32 %v5239_v41, %v5258_v59  ;;  %v4880_v58 = vshrl.u32 %v15059_v25, %v4874_v47  ;;  %v4876_v35 = vshll.u32 %v15063_v18, %v11831_v29 }
 0x64b   : > { %v4879_v34 = vshll.u32 %v15061_v20, %v11831_v29  ;;  %v4882_v55 = vshll.u32 %v15059_v25, %v11831_v29  ;;  %v4883_v19 = vshrl.u32 %v15057_v31, %v4874_v47  ;;  %v4885_v15 = vshll.u32 %v15057_v31, %v11831_v29 }
 0x64c   : > { %v5266_v39 = vsel %vm5264_vm1, %v5265_v49, %v5261_v16  ;;  %v4886_v9 = vshrl.u32 %v15055_v36, %v4874_v47  ;;  %v11905_v56 = vadd.s32 %v5258_v59, %v5239_v41  ;;  %v11908_v52 = vshrl.u32 %v15063_v18, %v4874_v47 }
 0x64d   : > { %v5267_v63 = vadd.s32 %v5266_v39, %v5262_v33  ;;  %v11910_v60 = vor.u32 %v4877_v32, %v4876_v35  ;;  %v5341_v10 = vshll.u32 %v15063_v18, %v11816_v28  ;;  %v5373_v43 = vand.u32 65535, %v11891_v21 }
 0x64e   : > { %v5374_v24 = vshrl.u32 %v11891_v21, 16  ;;  %v11916_v61 = vor.u32 %v4880_v58, %v4879_v34  ;;  %v5342_v11 = vshrl.u32 %v15061_v20, %v11840_v27  ;;  %v5344_v41 = vshll.u32 %v15061_v20, %v11816_v28 }
 0x64f   : > { %v5268_v17 = vadd.s32 536870912, %v5267_v63  ;;  %v5345_v59 = vshrl.u32 %v15059_v25, %v11840_v27  ;;  %v5347_v49 = vshll.u32 %v15059_v25, %v11816_v28  ;;  %v5348_v33 = vshrl.u32 %v15057_v31, %v11840_v27 }
 0x650   : > { %v11929_v32 = vor.u32 %v4883_v19, %v4882_v55  ;;  %v11931_v39 = vor.u32 %v4886_v9, %v4885_v15  ;;  %v5343_v35 = vor.u32 %v5342_v11, %v5341_v10  ;;  %vm5356_vm3 = vcmp.lt.s32.totalorder %v11837_v8, 1 }
 0x651   : > { %v5269_v16 = vshrl.u32 %v5268_v17, 30  ;;  %v5346_v34 = vor.u32 %v5345_v59, %v5344_v41  ;;  %v11935_v17 = vshll.u32 %v15055_v36, %v11831_v29  ;;  %v5349_v46 = vor.u32 %v5348_v33, %v5347_v49 }
 0x652   : > { %v11939_v4 = vshrl.u32 %v15053_v42, %v4874_v47  ;;  %vm4891_vm5 = vcmp.lt.s32.totalorder %v11871_v44, 1  ;;  %vm5358_vm4 = vcmp.lt.s32.totalorder %v11837_v8, 3  ;;  %vm4893_vm7 = vcmp.lt.s32.totalorder %v11871_v44, 3 }
 0x653   : > { %v5270_v58 = vshll.u32 %v5269_v16, 30  ;;  %v5364_v55 = vsel %vm5356_vm3, %v5343_v35, %v5346_v34  ;;  %vm5357_vm8 = vcmp.lt.s32.totalorder %v11837_v8, 2  ;;  %v5366_v29 = vsel %vm5358_vm4, %v5349_v46, %v5365_v62 }
 0x654   : > { %v5368_v47 = vsel %vm5356_vm3, %v5346_v34, %v5349_v46  ;;  %vm4894_vm9 = vcmp.lt.s32.totalorder %v11871_v44, 4  ;;  %v5293_v19 = vsub.s32 4, %v5269_v16  ;;  %v5367_v15 = vsel %vm5357_vm8, %v5364_v55, %v5366_v29 }
 0x655   : > { %v11942_v28 = vsub.s32 %v5267_v63, %v5270_v58  ;;  %v5370_v9 = vsel %vm5358_vm4, %v11866_v30, %v5369_v2  ;;  %v5397_v10 = vand.u32 65535, %v5367_v15  ;;  %v5398_v11 = vshrl.u32 %v5367_v15, 16 }
 0x656   : > { %v4890_v62 = vor.u32 %v11939_v4, %v11935_v17  ;;  %v5340_v59 = vshrl.u32 %v15063_v18, %v11840_v27  ;;  %v5371_v49 = vsel %vm5357_vm8, %v5368_v47, %v5370_v9  ;;  %v4899_v33 = vsel %vm4891_vm5, %v11910_v60, %v11916_v61 }
 0x657   : > { %vm5272_vm10 = vcmp.lt.s32.totalorder %v11942_v28, 0  ;;  %v5273_v63 = vsub.s32 0, %v11942_v28  ;;  %v5361_v30 = vsel %vm5359_vm2, %v5349_v46, 2102212464  ;;  %v5375_v2 = vand.u32 65535, %v5371_v49 }
 0x658   : > { %v5376_v55 = vshrl.u32 %v5371_v49, 16  ;;  %v11976_v4 = vsel %vm5171_vm0, %v5293_v19, %v5269_v16  ;;  %v5400_v17 = vmul.u32 %v5398_v11, %v5373_v43  ;;  %v4900_v27 = vsel %vm4894_vm9, %v11931_v39, 920167782 }
 0x659   : > { %v5274_v41 = vsel %vm5272_vm10, %v5273_v63, %v11942_v28  ;;  %v4903_v29 = vsel %vm4891_vm5, %v11916_v61, %v11929_v32  ;;  %v5379_v15 = vmul.u32 %v5375_v2, %v5374_v24  ;;  %v5401_v46 = vmul.u32 %v5397_v10, %v5374_v24 }
 0x65a   : > { %v5275_v58 = vclz %v5274_v41  ;;  %v5378_v63 = vmul.u32 %v5376_v55, %v5373_v43  ;;  %vm4892_vm11 = vcmp.lt.s32.totalorder %v11871_v44, 2  ;;  %v5360_v16 = vsel %vm5356_vm3, %v5340_v59, %v5343_v35 }
 0x65b   : > { %v5362_v19 = vsel %vm5358_vm4, %v5346_v34, %v5361_v30  ;;  %v5399_v9 = vmul.u32 %v5397_v10, %v5373_v43  ;;  %v5403_v41 = vshll.u32 %v5400_v17, 16  ;;  %v5402_v42 = vmul.u32 %v5398_v11, %v5374_v24 }
 0x65c   : > { %v8490_v47 = vadd.s32 4294967294, %v5275_v58  ;;  %v5381_v49 = vshll.u32 %v5378_v63, 16  ;;  %v4901_v58 = vsel %vm4893_vm7, %v11929_v32, %v4900_v27  ;;  %v5377_v31 = vmul.u32 %v5375_v2, %v5373_v43 }
 0x65d   : > { %v5380_v25 = vmul.u32 %v5376_v55, %v5374_v24  ;;  %v5404_v20 = vshrl.u32 %v5400_v17, 16  ;;  %v5383_v50 = vshll.u32 %v5379_v15, 16  ;;  %v5405_v35 = vshll.u32 %v5401_v46, 16 }
 0x65e   : > { %vm8491_vm12 = vcmp.lt.s32.totalorder %v8490_v47, 0  ;;  %vm5385_vm14 = vc.u32 %v5377_v31, %v5381_v49  ;;  %v5387_v59 = vadd.s32 %v5381_v49, %v5377_v31  ;;  %vm5407_vm13 = vc.u32 %v5399_v9, %v5403_v41 }
 0x65f   : > { %v5278_v36 = vsel %vm8491_vm12, 0, %v8490_v47  ;;  %v5409_v34 = vadd.s32 %v5403_v41, %v5399_v9  ;;  %v5382_v0 = vshrl.u32 %v5378_v63, 16  ;;  %vm11997_vm15 = vcmp.le.f32.partialorder %v5169_v51, 0.7853982 }
 0x660   : > { %v5279_v18 = vsub.s32 32, %v5278_v36  ;;  %v5283_v1 = vsub.s32 4294967266, %v5278_v36  ;;  %v5280_v10 = vshll.u32 %v11942_v28, %v5278_v36  ;;  %v5384_v24 = vshrl.u32 %v5379_v15, 16 }
 0x661   : > { %v15173_v2 = vmov 0   ;;  %vm5389_vm2 = vc.u32 %v5387_v59, %v5383_v50  ;;  %vm5411_vm1 = vc.u32 %v5409_v34, %v5405_v35  ;;  %v4902_v51 = vsel %vm4892_vm11, %v4899_v33, %v4901_v58 }
 0x662   : > { %v5281_v11 = vshrl.u32 %v11905_v56, %v5279_v18  ;;  %v5284_v30 = vadd.s32 127, %v5283_v1  ;;  %v5386_v55 = vsel %vm5385_vm14, 1, %v15173_v2  ;;  %v5408_v31 = vsel %vm5407_vm13, 1, %v15173_v2 }
 0x663   : > { %v5388_v47 = vadd.s32 %v5386_v55, %v5380_v25  ;;  %v5390_v36 = vsel %vm5389_vm2, 1, %v15173_v2  ;;  %v5406_v18 = vshrl.u32 %v5401_v46, 16  ;;  %v5410_v1 = vadd.s32 %v5408_v31, %v5402_v42 }
 0x664   : > { %v5282_v17 = vor.u32 %v5281_v11, %v5280_v10  ;;  %v5285_v27 = vshll.u32 %v5284_v30, 23  ;;  %v5412_v63 = vsel %vm5411_vm1, 1, %v15173_v2  ;;  %v12007_v15 = vadd.s32 %v5409_v34, %v5405_v35 }
 0x665   : > { %v5392_v28 = vadd.s32 %v5390_v36, %v5388_v47  ;;  %v5414_v9 = vadd.s32 %v5412_v63, %v5410_v1  ;;  %v4904_v41 = vsel %vm4894_vm9, %v4890_v62, 1326507024  ;;  %v15174_v25 = vor.u32 8388608, %v11875_v54 }
 0x666   : > { %v5286_v56 = vor.u32 4788187, %v5285_v27  ;;  %v5289_v50 = vcvt.s32.f32 %v5282_v17  ;;  %v4905_v33 = vsel %vm4893_vm7, %v11931_v39, %v4904_v41  ;;  %v4933_v58 = vshrl.u32 %v4902_v51, 16 }
 0x667   : > { %v12013_v49 = vshll.u32 %v15174_v25, 8  ;;  %v5393_v46 = vadd.s32 %v5392_v28, %v5382_v0  ;;  %v5415_v59 = vadd.s32 %v5414_v9, %v5404_v20  ;;  %v4906_v35 = vsel %vm4892_vm11, %v4903_v29, %v4905_v33 }
 0x668   : > { %v5287_v42 = vand.u32 2147483647, %v5286_v56  ;;  %v4932_v10 = vand.u32 65535, %v4902_v51  ;;  %v4910_v54 = vand.u32 65535, %v4906_v35  ;;  %v4911_v30 = vshrl.u32 %v4906_v35, 16 }
 0x669   : > { %v4908_v34 = vand.u32 65535, %v12013_v49  ;;  %v12021_v62 = vadd.s32 %v5393_v46, %v5384_v24  ;;  %v5363_v0 = vsel %vm5357_vm8, %v5360_v16, %v5362_v19  ;;  %v5416_v55 = vadd.s32 %v5415_v59, %v5406_v18 }
 0x66a   : > { %v5290_v11 = vmul.f32 %v5289_v50, %v5287_v42  ;;  %v4909_v31 = vshrl.u32 %v12013_v49, 16  ;;  %v5296_v29 = vsel %vm11997_vm15, 0, %v11976_v4  ;;  %v4896_v24 = vsel %vm4894_vm9, %v11929_v32, 2102212464 }
 0x66b   : > { %v12026_v39 = vmul.u32 %v4933_v58, %v4908_v34  ;;  %vm5419_vm3 = vc.u32 %v12021_v62, %v12007_v15  ;;  %v5420_v17 = vadd.s32 1, %v5416_v55  ;;  %v4913_v8 = vmul.u32 %v4911_v30, %v4908_v34 }
 0x66c   : > { %v5291_v20 = vxor.u32 2147483648, %v5290_v11  ;;  %v4914_v16 = vmul.u32 %v4910_v54, %v4909_v31  ;;  %v12036_v19 = vmul.u32 %v4932_v10, %v4909_v31  ;;  %v5417_v47 = vmul.u32 %v11891_v21, %v5363_v0 }
 0x66d   : > { %v4912_v36 = vmul.u32 %v4910_v54, %v4908_v34  ;;  %v4934_v18 = vmul.u32 %v4932_v10, %v4908_v34  ;;  %v5421_v1 = vsel %vm5419_vm3, %v5420_v17, %v5416_v55  ;;  %v4916_v51 = vshll.u32 %v4913_v8, 16 }
 0x66e   : > { %v5292_v27 = vsel %vm5171_vm0, %v5291_v20, %v5290_v11  ;;  %v4938_v32 = vshll.u32 %v12026_v39, 16  ;;  %v5422_v28 = vadd.s32 %v5421_v1, %v5417_v47  ;;  %v4915_v63 = vmul.u32 %v4911_v30, %v4909_v31 }
 0x66f   : > { %v5295_v4 = vsel %vm11997_vm15, %v11753_v6, %v5292_v27  ;;  %v4937_v50 = vmul.u32 %v4933_v58, %v4909_v31  ;;  %v4918_v9 = vshll.u32 %v4914_v16, 16  ;;  %vm4920_vm4 = vc.u32 %v4912_v36, %v4916_v51 }
 0x670   : > { %v5297_v56 = vmul.f32 %v5295_v4, %v5295_v4  ;;  %v4922_v41 = vadd.s32 %v4916_v51, %v4912_v36  ;;  %v4940_v25 = vshll.u32 %v12036_v19, 16  ;;  %v5423_v46 = vadd.s32 536870912, %v5422_v28 }
 0x671   : > { %v4921_v33 = vsel %vm4920_vm4, 1, %v15173_v2  ;;  %vm4942_vm8 = vc.u32 %v4934_v18, %v4938_v32  ;;  %v4944_v59 = vadd.s32 %v4938_v32, %v4934_v18  ;;  %v4917_v58 = vshrl.u32 %v4913_v8, 16 }
 0x672   : > { %v5298_v21 = vmul.f32 -0.001358992, %v5297_v56  ;;  %v5305_v42 = vmul.f32 -0.00019511016, %v5297_v56  ;;  %v4923_v43 = vadd.s32 %v4921_v33, %v4915_v63  ;;  %vm4924_vm0 = vc.u32 %v4922_v41, %v4918_v9 }
 0x673   : > { %v5424_v10 = vshrl.u32 %v5423_v46, 30  ;;  %v4925_v11 = vsel %vm4924_vm0, 1, %v15173_v2  ;;  %v4943_v30 = vsel %vm4942_vm8, 1, %v15173_v2  ;;  %vm4946_vm9 = vc.u32 %v4944_v59, %v4940_v25 }
 0x674   : > { %v5299_v35 = vadd.f32 0.041655596, %v5298_v21  ;;  %v5306_v34 = vadd.f32 0.008332121, %v5305_v42  ;;  %v4927_v54 = vadd.s32 %v4925_v11, %v4923_v43  ;;  %v4895_v20 = vsel %vm4891_vm5, %v11908_v52, %v11910_v60 }
 0x675   : > { %v5425_v31 = vshll.u32 %v5424_v10, 30  ;;  %v5313_v17 = vadd.s32 3, %v5296_v29  ;;  %v4945_v47 = vadd.s32 %v4943_v30, %v4937_v50  ;;  %v4947_v36 = vsel %vm4946_vm9, 1, %v15173_v2 }
 0x676   : > { %v5300_v0 = vmul.f32 %v5299_v35, %v5297_v56  ;;  %v5307_v55 = vmul.f32 %v5306_v34, %v5297_v56  ;;  %v4928_v27 = vadd.s32 %v4927_v54, %v4917_v58  ;;  %v4897_v51 = vsel %vm4893_vm7, %v11916_v61, %v4896_v24 }
 0x677   : > { %v5426_v8 = vsub.s32 %v5422_v28, %v5425_v31  ;;  %v5448_v32 = vsub.s32 4, %v5424_v10  ;;  %v4919_v63 = vshrl.u32 %v4914_v16, 16  ;;  %v4939_v9 = vshrl.u32 %v12026_v39, 16 }
 0x678   : > { %v5301_v18 = vadd.f32 -0.4999988, %v5300_v0  ;;  %v5308_v1 = vadd.f32 -0.16666654, %v5307_v55  ;;  %v4949_v41 = vadd.s32 %v4947_v36, %v4945_v47  ;;  %vm5312_vm10 = vweird.f32 %v11753_v6 }
 0x679   : > { %vm5427_vm5 = vcmp.lt.s32.totalorder %v5426_v8, 0  ;;  %v5428_v52 = vsub.s32 0, %v5426_v8  ;;  %v5314_v60 = vand.u32 3, %v5313_v17  ;;  %v12059_v29 = vadd.s32 %v4928_v27, %v4919_v63 }
 0x67a   : > { %v5302_v21 = vmul.f32 %v5301_v18, %v5297_v56  ;;  %v5309_v42 = vmul.f32 %v5308_v1, %v5297_v56  ;;  %v4941_v28 = vshrl.u32 %v12036_v19, 16  ;;  %v4950_v50 = vadd.s32 %v4949_v41, %v4939_v9 }
 0x67b   : > { %vm5326_vm7 = vcmp.lt.s32.totalorder %v11760_v48, 0  ;;  %v5429_v61 = vsel %vm5427_vm5, %v5428_v52, %v5426_v8  ;;  %v15175_v39 = vand.u32 2147483647, %v11760_v48  ;;  %v12069_v56 = vadd.s32 %v4944_v59, %v4940_v25 }
 0x67c   : > { %v5303_v46 = vadd.f32 1.0, %v5302_v21  ;;  %v5310_v33 = vadd.f32 1.0, %v5309_v42  ;;  %v5430_v16 = vclz %v5429_v61  ;;  %v4951_v43 = vadd.s32 %v4950_v50, %v4941_v28 }
 0x67d   : > { %vm12065_vm12 = vcmp.le.f32.partialorder %v15175_v39, 0.7853982  ;;  %v5449_v19 = vsel %vm5326_vm7, %v5448_v32, %v5424_v10  ;;  %v4898_v11 = vsel %vm4892_vm11, %v4895_v20, %v4897_v51  ;;  %vm5315_vm14 = vcmp.lt.s32.totalorder %v5314_v60, 2 }
 0x67e   : > { %v5311_v35 = vmul.f32 %v5310_v33, %v5295_v4  ;;  %v5320_v34 = vxor.u32 2147483648, %v5303_v46  ;;  %vm5316_vm13 = vcmp.eq.s32.totalorder %v5314_v60, 0  ;;  %v8493_v58 = vadd.s32 4294967294, %v5430_v16 }
 0x67f   : > { %vm4954_vm15 = vc.u32 %v12059_v29, %v12069_v56  ;;  %vm5319_vm2 = vcmp.eq.s32.totalorder %v5314_v60, 2  ;;  %v5418_v25 = vadd.s32 %v12007_v15, %v12021_v62  ;;  %v4955_v59 = vadd.s32 1, %v4951_v43 }
 0x680   : > { %v5317_v54 = vxor.u32 2147483648, %v5311_v35  ;;  %vm8494_vm1 = vcmp.lt.s32.totalorder %v8493_v58, 0  ;;  %v5451_v4 = vsel %vm12065_vm12, 0, %v5449_v19  ;;  %v4952_v10 = vmul.u32 %v12013_v49, %v4898_v11 }
 0x681   : > { %v5014_v44 = vand.u32 2147483647, %v11751_v38  ;;  %v5321_v0 = vsel %vm5319_vm2, %v5320_v34, %v5311_v35  ;;  %v5433_v55 = vsel %vm8494_vm1, 0, %v8493_v58  ;;  %v4956_v31 = vsel %vm4954_vm15, %v4955_v59, %v4951_v43 }
 0x682   : > { %v5318_v30 = vsel %vm5316_vm13, %v5303_v46, %v5317_v54  ;;  %v5434_v17 = vsub.s32 32, %v5433_v55  ;;  %v5438_v27 = vsub.s32 4294967266, %v5433_v55  ;;  %v15178_v47 = vmov 683565275  }
 0x683   : > { %v5322_v20 = vsel %vm5315_vm14, %v5318_v30, %v5321_v0  ;;  %v5031_v15 = vshll.u32 %v15178_v47, %v11834_v3  ;;  %v4957_v36 = vadd.s32 %v4956_v31, %v4952_v10  ;;  %v15179_v18 = vmov 2475754826  }
 0x684   : > { %v5323_v62 = vsel %vm5312_vm10, nan, %v5322_v20  ;;  %v5032_v49 = vshrl.u32 %v15179_v18, %v11881_v23  ;;  %v15180_v1 = vmov 2131351028   ;;  %v5435_v32 = vshll.u32 %v5426_v8, %v5433_v55 }
 0x685   : > { %v5035_v51 = vshrl.u32 %v15180_v1, %v11881_v23  ;;  %5524 = vmatpush.msra.mxu0 %v5323_v62  ;;  %v5436_v63 = vshrl.u32 %v5418_v25, %v5434_v17  ;;  %v5439_v9 = vadd.s32 127, %v5438_v27  ;;  %v15181_v41 = vmov 2102212464  }
 0x686   : > { %v5038_v21 = vshrl.u32 %v15181_v41, %v11881_v23  ;;  %v4958_v42 = vadd.s32 536870912, %v4957_v36  ;;  %v5034_v52 = vshll.u32 %v15179_v18, %v11834_v3  ;;  %v5040_v6 = vshll.u32 %v15181_v41, %v11834_v3 }
 0x687   : > { %v15182_v60 = vmov 920167782   ;;  %v5437_v50 = vor.u32 %v5436_v63, %v5435_v32  ;;  %v5440_v46 = vshll.u32 %v5439_v9, 23  ;;  %v5037_v8 = vshll.u32 %v15180_v1, %v11834_v3 }
 0x688   : > { %v5041_v28 = vshrl.u32 %v15182_v60, %v11881_v23  ;;  %v15183_v33 = vmov 1326507024   ;;  %v4959_v39 = vshrl.u32 %v4958_v42, 30  ;;  %v5021_v16 = vand.u32 8388607, %v5014_v44 }
 0x689   : > { %v5044_v61 = vshrl.u32 %v15183_v33, %v11881_v23  ;;  %v5033_v43 = vor.u32 %v5032_v49, %v5031_v15  ;;  %v5441_v34 = vor.u32 4788187, %v5440_v46  ;;  %v5036_v19 = vor.u32 %v5035_v51, %v5034_v52 }
 0x68a   : > { %v5042_v35 = vor.u32 %v5041_v28, %v5040_v6  ;;  %v5039_v11 = vor.u32 %v5038_v21, %v5037_v8  ;;  %v5043_v58 = vshll.u32 %v15182_v60, %v11834_v3  ;;  %v5468_v54 = vadd.s32 3, %v5451_v4 }
 0x68b   : > { %vm4861_vm11 = vcmp.lt.s32.totalorder %v11749_v7, 0  ;;  %v4960_v25 = vshll.u32 %v4959_v39, 30  ;;  %vm5049_vm3 = vcmp.lt.s32.totalorder %v11878_v26, 4  ;;  %v5442_v59 = vand.u32 2147483647, %v5441_v34 }
 0x68c   : > { %v5444_v10 = vcvt.s32.f32 %v5437_v50  ;;  %v5045_v30 = vor.u32 %v5044_v61, %v5043_v58  ;;  %v5055_v0 = vsel %vm5049_vm3, %v5042_v35, 920167782  ;;  %v15184_v55 = vand.u32 2147483647, %v11749_v7 }
 0x68d   : > { %v12118_v20 = vsub.s32 %v4957_v36, %v4960_v25  ;;  %v5022_v3 = vor.u32 8388608, %v5021_v16  ;;  %vm5046_vm0 = vcmp.lt.s32.totalorder %v11878_v26, 1  ;;  %vm5048_vm8 = vcmp.lt.s32.totalorder %v11878_v26, 3 }
 0x68e   : > { %vm12114_vm4 = vcmp.le.f32.partialorder %v15184_v55, 0.7853982  ;;  %v5445_v4 = vmul.f32 %v5444_v10, %v5442_v59  ;;  %v4953_v17 = vadd.s32 %v12069_v56, %v12059_v29  ;;  %v5054_v27 = vsel %vm5046_vm0, %v5033_v43, %v5036_v19 }
 0x68f   : > { %v5056_v15 = vsel %vm5048_vm8, %v5039_v11, %v5055_v0  ;;  %vm4962_vm9 = vcmp.lt.s32.totalorder %v12118_v20, 0  ;;  %v4963_v62 = vsub.s32 0, %v12118_v20  ;;  %v4983_v36 = vsub.s32 4, %v4959_v39 }
 0x690   : > { %v5058_v49 = vsel %vm5046_vm0, %v5036_v19, %v5039_v11  ;;  %v5446_v51 = vxor.u32 2147483648, %v5445_v4  ;;  %v5030_v32 = vshrl.u32 %v15178_v47, %v11881_v23  ;;  %vm5047_vm5 = vcmp.lt.s32.totalorder %v11878_v26, 2 }
 0x691   : > { %v5059_v29 = vsel %vm5049_vm3, %v5045_v30, 1326507024  ;;  %v4964_v56 = vsel %vm4962_vm9, %v4963_v62, %v12118_v20  ;;  %v12140_v63 = vsel %vm5047_vm5, %v5054_v27, %v5056_v15  ;;  %v12144_v21 = vshll.u32 %v5022_v3, 8 }
 0x692   : > { %v5060_v9 = vsel %vm5048_vm8, %v5042_v35, %v5059_v29  ;;  %v5447_v42 = vsel %vm5326_vm7, %v5446_v51, %v5445_v4  ;;  %v4965_v23 = vclz %v4964_v56  ;;  %v5051_v52 = vsel %vm5049_vm3, %v5039_v11, 2102212464 }
 0x693   : > { %v5061_v6 = vsel %vm5047_vm5, %v5058_v49, %v5060_v9  ;;  %v12155_v28 = vsel %vm12065_vm12, %v11760_v48, %v5447_v42  ;;  %v12157_v50 = vand.u32 3, %v5468_v54  ;;  %v12161_v46 = vsel %vm4861_vm11, %v4983_v36, %v4959_v39 }
 0x694   : > { %v12165_v8 = vsel %vm5046_vm0, %v5030_v32, %v5033_v43  ;;  %v5452_v61 = vmul.f32 %v12155_v28, %v12155_v28  ;;  %v8484_v16 = vadd.s32 4294967294, %v4965_v23  ;;  %v5065_v35 = vand.u32 65535, %v5061_v6 }
 0x695   : > { %v5088_v34 = vshrl.u32 %v12140_v63, 16  ;;  %v12172_v24 = vsel %vm5048_vm8, %v5036_v19, %v5051_v52  ;;  %v5063_v11 = vand.u32 65535, %v12144_v21  ;;  %v5064_v39 = vshrl.u32 %v12144_v21, 16 }
 0x696   : > { %v5066_v58 = vshrl.u32 %v5061_v6, 16  ;;  %v5453_v54 = vmul.f32 -0.001358992, %v5452_v61  ;;  %v5460_v25 = vmul.f32 -0.00019511016, %v5452_v61  ;;  %vm8485_vm10 = vcmp.lt.s32.totalorder %v8484_v16, 0 }
 0x697   : > { %v4986_v43 = vsel %vm12114_vm4, 0, %v12161_v46  ;;  %v4968_v59 = vsel %vm8485_vm10, 0, %v8484_v16  ;;  %v12179_v30 = vmul.u32 %v5065_v35, %v5064_v39  ;;  %v5087_v0 = vand.u32 65535, %v12140_v63 }
 0x698   : > { %v5068_v10 = vmul.u32 %v5066_v58, %v5063_v11  ;;  %v5454_v19 = vadd.f32 0.041655596, %v5453_v54  ;;  %v5461_v55 = vadd.f32 0.008332121, %v5460_v25  ;;  %v4969_v3 = vsub.s32 32, %v4968_v59 }
 0x699   : > { %v12182_v4 = vmul.u32 %v5088_v34, %v5063_v11  ;;  %v4973_v27 = vsub.s32 4294967266, %v4968_v59  ;;  %v5067_v15 = vmul.u32 %v5065_v35, %v5063_v11  ;;  %v5070_v62 = vmul.u32 %v5066_v58, %v5064_v39 }
 0x69a   : > { %v5071_v36 = vshll.u32 %v5068_v10, 16  ;;  %v5455_v49 = vmul.f32 %v5454_v19, %v5452_v61  ;;  %v5462_v51 = vmul.f32 %v5461_v55, %v5452_v61  ;;  %v4970_v32 = vshll.u32 %v12118_v20, %v4968_v59 }
 0x69b   : > { %v4971_v29 = vshrl.u32 %v4953_v17, %v4969_v3  ;;  %v4974_v56 = vadd.s32 127, %v4973_v27  ;;  %v5073_v9 = vshll.u32 %v12179_v30, 16  ;;  %vm5471_vm12 = vcmp.eq.s32.totalorder %v12157_v50, 0 }
 0x69c   : > { %vm5075_vm7 = vc.u32 %v5067_v15, %v5071_v36  ;;  %v5077_v42 = vadd.s32 %v5071_v36, %v5067_v15  ;;  %v5456_v63 = vadd.f32 -0.4999988, %v5455_v49  ;;  %v5463_v23 = vadd.f32 -0.16666654, %v5462_v51 }
 0x69d   : > { %v4972_v52 = vor.u32 %v4971_v29, %v4970_v32  ;;  %v5076_v6 = vsel %vm5075_vm7, 1, %v15173_v2  ;;  %v4975_v46 = vshll.u32 %v4974_v56, 23  ;;  %v5091_v35 = vmul.u32 %v5087_v0, %v5064_v39 }
 0x69e   : > { %v5078_v16 = vadd.s32 %v5076_v6, %v5070_v62  ;;  %vm5079_vm14 = vc.u32 %v5077_v42, %v5073_v9  ;;  %v5457_v58 = vmul.f32 %v5456_v63, %v5452_v61  ;;  %v5464_v54 = vmul.f32 %v5463_v23, %v5452_v61 }
 0x69f   : > { %vm5470_vm13 = vcmp.lt.s32.totalorder %v12157_v50, 2  ;;  %v5080_v20 = vsel %vm5079_vm14, 1, %v15173_v2  ;;  %v5089_v17 = vmul.u32 %v5087_v0, %v5063_v11  ;;  %vm5467_vm15 = vweird.f32 %v11760_v48 }
 0x6a0   : > { %v4976_v25 = vor.u32 4788187, %v4975_v46  ;;  %v5072_v59 = vshrl.u32 %v5068_v10, 16  ;;  %v5082_v19 = vadd.s32 %v5080_v20, %v5078_v16  ;;  %v5093_v55 = vshll.u32 %v12182_v4, 16 }
 0x6a1   : > { %v5458_v3 = vadd.f32 1.0, %v5457_v58  ;;  %v5465_v27 = vadd.f32 1.0, %v5464_v54  ;;  %v4979_v15 = vcvt.s32.f32 %v4972_v52  ;;  %v5092_v62 = vmul.u32 %v5088_v34, %v5064_v39 }
 0x6a2   : > { %v4977_v36 = vand.u32 2147483647, %v4976_v25  ;;  %v5095_v49 = vshll.u32 %v5091_v35, 16  ;;  %vm5097_vm2 = vc.u32 %v5089_v17, %v5093_v55  ;;  %v5099_v61 = vadd.s32 %v5093_v55, %v5089_v17 }
 0x6a3   : > { %v5466_v51 = vmul.f32 %v5465_v27, %v12155_v28  ;;  %v5475_v32 = vxor.u32 2147483648, %v5458_v3  ;;  %v5083_v29 = vadd.s32 %v5082_v19, %v5072_v59  ;;  %v5098_v11 = vsel %vm5097_vm2, 1, %v15173_v2 }
 0x6a4   : > { %vm5474_vm1 = vcmp.eq.s32.totalorder %v12157_v50, 2  ;;  %v4980_v10 = vmul.f32 %v4979_v15, %v4977_v36  ;;  %v5100_v0 = vadd.s32 %v5098_v11, %v5092_v62  ;;  %vm5101_vm3 = vc.u32 %v5099_v61, %v5095_v49 }
 0x6a5   : > { %v5472_v56 = vxor.u32 2147483648, %v5466_v51  ;;  %v5053_v34 = vsel %vm5047_vm5, %v12165_v8, %v12172_v24  ;;  %v5074_v39 = vshrl.u32 %v12179_v30, 16  ;;  %v5102_v9 = vsel %vm5101_vm3, 1, %v15173_v2 }
 0x6a6   : > { %v4981_v28 = vxor.u32 2147483648, %v4980_v10  ;;  %v5003_v42 = vadd.s32 3, %v4986_v43  ;;  %v5094_v63 = vshrl.u32 %v12182_v4, 16  ;;  %v5104_v23 = vadd.s32 %v5102_v9, %v5100_v0 }
 0x6a7   : > { %v5473_v52 = vsel %vm5471_vm12, %v5458_v3, %v5472_v56  ;;  %v5476_v6 = vsel %vm5474_vm1, %v5475_v32, %v5466_v51  ;;  %v12204_v46 = vadd.s32 %v5083_v29, %v5074_v39  ;;  %v4549_v16 = vand.u32 2147483647, %v11744_v13 }
 0x6a8   : > { %v5477_v26 = vsel %vm5470_vm13, %v5473_v52, %v5476_v6  ;;  %v4982_v8 = vsel %vm4861_vm11, %v4981_v28, %v4980_v10  ;;  %v5096_v24 = vshrl.u32 %v5091_v35, 16  ;;  %v5105_v30 = vadd.s32 %v5104_v23, %v5094_v63 }
 0x6a9   : > { %v12212_v43 = vand.u32 31, %v11808_v5  ;;  %v5478_v4 = vsel %vm5467_vm15, nan, %v5477_v26  ;;  %v4985_v58 = vsel %vm12114_vm4, %v11749_v7, %v4982_v8  ;;  %v12219_v54 = vadd.s32 %v5099_v61, %v5095_v49 }
 0x6aa   : > { %5553 = vmatpush.msra.mxu1 %v5478_v4  ;;  %v4987_v50 = vmul.f32 %v4985_v58, %v4985_v58  ;;  %v12221_v20 = vand.u32 3, %v5003_v42  ;;  %v5106_v17 = vadd.s32 %v5105_v30, %v5096_v24  ;;  %v5107_v35 = vmul.u32 %v12144_v21, %v5053_v34 }
 0x6ab   : > { %vm5109_vm11 = vc.u32 %v12204_v46, %v12219_v54  ;;  %v4556_v48 = vand.u32 8388607, %v4549_v16  ;;  %v4566_v25 = vshll.u32 %v15178_v47, %v11799_v40  ;;  %v4570_v31 = vshrl.u32 %v15180_v1, %v11828_v53 }
 0x6ac   : > { %v4988_v59 = vmul.f32 -0.001358992, %v4987_v50  ;;  %v4995_v19 = vmul.f32 -0.00019511016, %v4987_v50  ;;  %v5110_v55 = vadd.s32 1, %v5106_v17  ;;  %v4573_v3 = vshrl.u32 %v15181_v41, %v11828_v53 }
 0x6ad   : > { %v4567_v21 = vshrl.u32 %v15179_v18, %v11828_v53  ;;  %v4569_v27 = vshll.u32 %v15179_v18, %v11799_v40  ;;  %v4575_v15 = vshll.u32 %v15181_v41, %v11799_v40  ;;  %v4576_v62 = vshrl.u32 %v15182_v60, %v11828_v53 }
 0x6ae   : > { %v4989_v36 = vadd.f32 0.041655596, %v4988_v59  ;;  %v4996_v49 = vadd.f32 0.008332121, %v4995_v19  ;;  %v5111_v61 = vsel %vm5109_vm11, %v5110_v55, %v5106_v17  ;;  %v4572_v51 = vshll.u32 %v15180_v1, %v11799_v40 }
 0x6af   : > { %v5112_v32 = vadd.s32 %v5111_v61, %v5107_v35  ;;  %v4577_v29 = vor.u32 %v4576_v62, %v4575_v15  ;;  %v4578_v11 = vshll.u32 %v15182_v60, %v11799_v40  ;;  %v4579_v10 = vshrl.u32 %v15183_v33, %v11828_v53 }
 0x6b0   : > { %v4990_v0 = vmul.f32 %v4989_v36, %v4987_v50  ;;  %v4997_v56 = vmul.f32 %v4996_v49, %v4987_v50  ;;  %v4571_v34 = vor.u32 %v4570_v31, %v4569_v27  ;;  %v4574_v39 = vor.u32 %v4573_v3, %v4572_v51 }
 0x6b1   : > { %v12249_v9 = vsub.s32 32, %v12212_v43  ;;  %v5113_v28 = vadd.s32 536870912, %v5112_v32  ;;  %v4568_v42 = vor.u32 %v4567_v21, %v4566_v25  ;;  %v4580_v63 = vor.u32 %v4579_v10, %v4578_v11 }
 0x6b2   : > { %v4991_v23 = vadd.f32 -0.4999988, %v4990_v0  ;;  %v4998_v52 = vadd.f32 -0.16666654, %v4997_v56  ;;  %v4557_v6 = vor.u32 8388608, %v4556_v48  ;;  %vm4584_vm4 = vcmp.lt.s32.totalorder %v11774_v37, 4 }
 0x6b3   : > { %v5114_v26 = vshrl.u32 %v5113_v28, 30  ;;  %vm4581_vm0 = vcmp.lt.s32.totalorder %v11774_v37, 1  ;;  %vm4582_vm8 = vcmp.lt.s32.totalorder %v11774_v37, 2  ;;  %v4590_v40 = vsel %vm4584_vm4, %v4577_v29, 920167782 }
 0x6b4   : > { %v4992_v8 = vmul.f32 %v4991_v23, %v4987_v50  ;;  %v4999_v24 = vmul.f32 %v4998_v52, %v4987_v50  ;;  %vm5005_vm9 = vcmp.lt.s32.totalorder %v12221_v20, 2  ;;  %vm4583_vm5 = vcmp.lt.s32.totalorder %v11774_v37, 3 }
 0x6b5   : > { %v4593_v30 = vsel %vm4581_vm0, %v4571_v34, %v4574_v39  ;;  %vm5002_vm10 = vweird.f32 %v11749_v7  ;;  %v5115_v4 = vshll.u32 %v5114_v26, 30  ;;  %v4589_v17 = vsel %vm4581_vm0, %v4568_v42, %v4571_v34 }
 0x6b6   : > { %v4591_v35 = vsel %vm4583_vm5, %v4574_v39, %v4590_v40  ;;  %v4594_v48 = vsel %vm4584_vm4, %v4580_v63, 1326507024  ;;  %v4993_v50 = vadd.f32 1.0, %v4992_v8  ;;  %v5000_v25 = vadd.f32 1.0, %v4999_v24 }
 0x6b7   : > { %v4595_v31 = vsel %vm4583_vm5, %v4577_v29, %v4594_v48  ;;  %v12269_v59 = vshll.u32 %v4557_v6, 8  ;;  %vm5006_vm7 = vcmp.eq.s32.totalorder %v12221_v20, 0  ;;  %vm5009_vm12 = vcmp.eq.s32.totalorder %v12221_v20, 2 }
 0x6b8   : > { %v5116_v19 = vsub.s32 %v5112_v32, %v5115_v4  ;;  %v4596_v55 = vsel %vm4582_vm8, %v4593_v30, %v4595_v31  ;;  %v5001_v3 = vmul.f32 %v5000_v25, %v4985_v58  ;;  %v5010_v21 = vxor.u32 2147483648, %v4993_v50 }
 0x6b9   : > { %v4565_v27 = vshrl.u32 %v15178_v47, %v11828_v53  ;;  %v4592_v15 = vsel %vm4582_vm8, %v4589_v17, %v4591_v35  ;;  %v5138_v36 = vsub.s32 4, %v5114_v26  ;;  %v4586_v49 = vsel %vm4584_vm4, %v4574_v39, 2102212464 }
 0x6ba   : > { %vm5117_vm14 = vcmp.lt.s32.totalorder %v5116_v19, 0  ;;  %v5118_v62 = vsub.s32 0, %v5116_v19  ;;  %v5007_v61 = vxor.u32 2147483648, %v5001_v3  ;;  %v4598_v51 = vand.u32 65535, %v12269_v59 }
 0x6bb   : > { %v4600_v32 = vand.u32 65535, %v4596_v55  ;;  %v4601_v29 = vshrl.u32 %v4596_v55, 16  ;;  %v4599_v58 = vshrl.u32 %v12269_v59, 16  ;;  %v4622_v10 = vand.u32 65535, %v4592_v15 }
 0x6bc   : > { %v5119_v11 = vsel %vm5117_vm14, %v5118_v62, %v5116_v19  ;;  %v4623_v0 = vshrl.u32 %v4592_v15, 16  ;;  %v5008_v53 = vsel %vm5006_vm7, %v4993_v50, %v5007_v61  ;;  %v5011_v56 = vsel %vm5009_vm12, %v5010_v21, %v5001_v3 }
 0x6bd   : > { %v5120_v28 = vclz %v5119_v11  ;;  %v4603_v63 = vmul.u32 %v4601_v29, %v4598_v51  ;;  %v5012_v39 = vsel %vm5005_vm9, %v5008_v53, %v5011_v56  ;;  %vm12291_vm13 = vcmp.le.f32.partialorder %v5014_v44, 0.7853982 }
 0x6be   : > { %vm5016_vm15 = vcmp.lt.s32.totalorder %v11751_v38, 0  ;;  %v5108_v52 = vadd.s32 %v12219_v54, %v12204_v46  ;;  %v4585_v6 = vsel %vm4581_vm0, %v4565_v27, %v4568_v42  ;;  %v5013_v40 = vsel %vm5002_vm10, nan, %v5012_v39 }
 0x6bf   : > { %v8487_v8 = vadd.s32 4294967294, %v5120_v28  ;;  %v4587_v20 = vsel %vm4583_vm5, %v4571_v34, %v4586_v49  ;;  %v4604_v24 = vmul.u32 %v4600_v32, %v4599_v58  ;;  %5525 = vmatpush.msra.mxu0 %v5013_v40  ;;  %v5139_v44 = vsel %vm5016_vm15, %v5138_v36, %v5114_v26 }
 0x6c0   : > { %v4602_v30 = vmul.u32 %v4600_v32, %v4598_v51  ;;  %v4606_v4 = vshll.u32 %v4603_v63, 16  ;;  %v4625_v17 = vmul.u32 %v4623_v0, %v4598_v51  ;;  %v4605_v46 = vmul.u32 %v4601_v29, %v4599_v58 }
 0x6c1   : > { %vm8488_vm2 = vcmp.lt.s32.totalorder %v8487_v8, 0  ;;  %v4608_v54 = vshll.u32 %v4604_v24, 16  ;;  %v4626_v35 = vmul.u32 %v4622_v10, %v4599_v58  ;;  %v4624_v31 = vmul.u32 %v4622_v10, %v4598_v51 }
 0x6c2   : > { %v5123_v42 = vsel %vm8488_vm2, 0, %v8487_v8  ;;  %vm4610_vm1 = vc.u32 %v4602_v30, %v4606_v4  ;;  %v4612_v7 = vadd.s32 %v4606_v4, %v4602_v30  ;;  %v4628_v48 = vshll.u32 %v4625_v17, 16 }
 0x6c3   : > { %v5124_v50 = vsub.s32 32, %v5123_v42  ;;  %v5128_v25 = vsub.s32 4294967266, %v5123_v42  ;;  %v4611_v34 = vsel %vm4610_vm1, 1, %v15173_v2  ;;  %v4607_v55 = vshrl.u32 %v4603_v63, 16 }
 0x6c4   : > { %v4613_v3 = vadd.s32 %v4611_v34, %v4605_v46  ;;  %vm4614_vm3 = vc.u32 %v4612_v7, %v4608_v54  ;;  %v4627_v26 = vmul.u32 %v4623_v0, %v4599_v58  ;;  %v5125_v21 = vshll.u32 %v5116_v19, %v5123_v42 }
 0x6c5   : > { %v5126_v27 = vshrl.u32 %v5108_v52, %v5124_v50  ;;  %v5129_v15 = vadd.s32 127, %v5128_v25  ;;  %v4615_v62 = vsel %vm4614_vm3, 1, %v15173_v2  ;;  %v4630_v49 = vshll.u32 %v4626_v35, 16 }
 0x6c6   : > { %v4617_v36 = vadd.s32 %v4615_v62, %v4613_v3  ;;  %vm4632_vm11 = vc.u32 %v4624_v31, %v4628_v48  ;;  %v4634_v61 = vadd.s32 %v4628_v48, %v4624_v31  ;;  %v5141_v11 = vsel %vm12291_vm13, 0, %v5139_v44 }
 0x6c7   : > { %v5127_v32 = vor.u32 %v5126_v27, %v5125_v21  ;;  %v5130_v29 = vshll.u32 %v5129_v15, 23  ;;  %v4633_v51 = vsel %vm4632_vm11, 1, %v15173_v2  ;;  %v4609_v10 = vshrl.u32 %v4604_v24, 16 }
 0x6c8   : > { %v4618_v53 = vadd.s32 %v4617_v36, %v4607_v55  ;;  %v4635_v56 = vadd.s32 %v4633_v51, %v4627_v26  ;;  %vm4636_vm4 = vc.u32 %v4634_v61, %v4630_v49  ;;  %v4588_v58 = vsel %vm4582_vm8, %v4585_v6, %v4587_v20 }
 0x6c9   : > { %v5131_v19 = vor.u32 4788187, %v5130_v29  ;;  %v4637_v0 = vsel %vm4636_vm4, 1, %v15173_v2  ;;  %v4704_v28 = vand.u32 2147483647, %v11747_v22  ;;  %v15189_v63 = vand.u32 2139095040, %v11765_v45 }
 0x6ca   : > { %v12317_v52 = vadd.s32 %v4618_v53, %v4609_v10  ;;  %v4629_v40 = vshrl.u32 %v4625_v17, 16  ;;  %v4639_v8 = vadd.s32 %v4637_v0, %v4635_v56  ;;  %v12320_v24 = vshrl.u32 %v11808_v5, 5 }
 0x6cb   : > { %v4398_v39 = vshrl.u32 %v15189_v63, 23  ;;  %v5132_v44 = vand.u32 2147483647, %v5131_v19  ;;  %v5134_v30 = vcvt.s32.f32 %v5127_v32  ;;  %v5158_v4 = vadd.s32 3, %v5141_v11 }
 0x6cc   : > { %v4631_v46 = vshrl.u32 %v4626_v35, 16  ;;  %v12322_v37 = vadd.s32 %v4634_v61, %v4630_v49  ;;  %v4640_v6 = vadd.s32 %v4639_v8, %v4629_v40  ;;  %v4642_v20 = vmul.u32 %v12269_v59, %v4588_v58 }
 0x6cd   : > { %v5135_v54 = vmul.f32 %v5134_v30, %v5132_v44  ;;  %v4711_v42 = vand.u32 8388607, %v4704_v28  ;;  %v4722_v17 = vshrl.u32 %v15179_v18, %v12249_v9  ;;  %v4725_v5 = vshrl.u32 %v15180_v1, %v12249_v9 }
 0x6ce   : > { %v4641_v7 = vadd.s32 %v4640_v6, %v4631_v46  ;;  %vm4644_vm0 = vc.u32 %v12317_v52, %v12322_v37  ;;  %v4721_v35 = vshll.u32 %v15178_v47, %v12212_v43  ;;  %v4728_v59 = vshrl.u32 %v15181_v41, %v12249_v9 }
 0x6cf   : > { %v5136_v48 = vxor.u32 2147483648, %v5135_v54  ;;  %v4724_v50 = vshll.u32 %v15179_v18, %v12212_v43  ;;  %v4730_v25 = vshll.u32 %v15181_v41, %v12212_v43  ;;  %v4731_v34 = vshrl.u32 %v15182_v60, %v12249_v9 }
 0x6d0   : > { %v4645_v31 = vadd.s32 1, %v4641_v7  ;;  %v4727_v55 = vshll.u32 %v15180_v1, %v12212_v43  ;;  %v4733_v3 = vshll.u32 %v15182_v60, %v12212_v43  ;;  %v4734_v26 = vshrl.u32 %v15183_v33, %v12249_v9 }
 0x6d1   : > { %v5137_v21 = vsel %vm5016_vm15, %v5136_v48, %v5135_v54  ;;  %v12351_v27 = vor.u32 %v4722_v17, %v4721_v35  ;;  %v12353_v15 = vor.u32 %v4725_v5, %v4724_v50  ;;  %v4732_v62 = vor.u32 %v4731_v34, %v4730_v25 }
 0x6d2   : > { %v12358_v36 = vsel %vm12291_vm13, %v11751_v38, %v5137_v21  ;;  %v4646_v43 = vsel %vm4644_vm0, %v4645_v31, %v4641_v7  ;;  %v4729_v49 = vor.u32 %v4728_v59, %v4727_v55  ;;  %v4735_v61 = vor.u32 %v4734_v26, %v4733_v3 }
 0x6d3   : > { %v5142_v32 = vmul.f32 %v12358_v36, %v12358_v36  ;;  %v4647_v29 = vadd.s32 %v4646_v43, %v4642_v20  ;;  %v4712_v11 = vor.u32 8388608, %v4711_v42  ;;  %vm4739_vm8 = vcmp.lt.s32.totalorder %v12320_v24, 4 }
 0x6d4   : > { %v8474_v51 = vadd.s32 4294967169, %v4398_v39  ;;  %v12366_v10 = vand.u32 3, %v5158_v4  ;;  %vm4736_vm9 = vcmp.lt.s32.totalorder %v12320_v24, 1  ;;  %v4745_v23 = vsel %vm4739_vm8, %v4732_v62, 920167782 }
 0x6d5   : > { %v5143_v53 = vmul.f32 -0.001358992, %v5142_v32  ;;  %v5150_v56 = vmul.f32 -0.00019511016, %v5142_v32  ;;  %v4648_v19 = vadd.s32 536870912, %v4647_v29  ;;  %vm4738_vm5 = vcmp.lt.s32.totalorder %v12320_v24, 3 }
 0x6d6   : > { %v4744_v58 = vsel %vm4736_vm9, %v12351_v27, %v12353_v15  ;;  %v4746_v0 = vsel %vm4738_vm5, %v4729_v49, %v4745_v23  ;;  %v4748_v63 = vsel %vm4736_vm9, %v12353_v15, %v4729_v49  ;;  %v4749_v39 = vsel %vm4739_vm8, %v4735_v61, 1326507024 }
 0x6d7   : > { %v5144_v40 = vadd.f32 0.041655596, %v5143_v53  ;;  %v5151_v8 = vadd.f32 0.008332121, %v5150_v56  ;;  %v12383_v44 = vshrl.u32 %v4648_v19, 30  ;;  %v12385_v30 = vshll.u32 %v4712_v11, 8 }
 0x6d8   : > { %vm4737_vm10 = vcmp.lt.s32.totalorder %v12320_v24, 2  ;;  %v4750_v4 = vsel %vm4738_vm5, %v4732_v62, %v4749_v39  ;;  %v12396_v42 = vsub.s32 32, %v11771_v12  ;;  %v12398_v17 = vadd.s32 1, %v8474_v51 }
 0x6d9   : > { %v5145_v46 = vmul.f32 %v5144_v40, %v5142_v32  ;;  %v5152_v6 = vmul.f32 %v5151_v8, %v5142_v32  ;;  %v4650_v20 = vshll.u32 %v12383_v44, 30  ;;  %v12393_v54 = vsel %vm4737_vm10, %v4744_v58, %v4746_v0 }
 0x6da   : > { %v4720_v5 = vshrl.u32 %v15178_v47, %v12249_v9  ;;  %v4751_v7 = vsel %vm4737_vm10, %v4748_v63, %v4750_v4  ;;  %vm5164_vm7 = vcmp.eq.s32.totalorder %v12366_v10, 2  ;;  %v4753_v50 = vand.u32 65535, %v12385_v30 }
 0x6db   : > { %v5146_v35 = vadd.f32 -0.4999988, %v5145_v46  ;;  %v5153_v59 = vadd.f32 -0.16666654, %v5152_v6  ;;  %v12405_v48 = vsub.s32 %v4647_v29, %v4650_v20  ;;  %vm5161_vm12 = vcmp.eq.s32.totalorder %v12366_v10, 0 }
 0x6dc   : > { %v4754_v25 = vshrl.u32 %v12385_v30, 16  ;;  %v4755_v34 = vand.u32 65535, %v4751_v7  ;;  %v4756_v31 = vshrl.u32 %v4751_v7, 16  ;;  %v4778_v55 = vshrl.u32 %v12393_v54, 16 }
 0x6dd   : > { %v5147_v9 = vmul.f32 %v5146_v35, %v5142_v32  ;;  %v5154_v3 = vmul.f32 %v5153_v59, %v5142_v32  ;;  %vm5160_vm14 = vcmp.lt.s32.totalorder %v12366_v10, 2  ;;  %vm4652_vm13 = vcmp.lt.s32.totalorder %v12405_v48, 0 }
 0x6de   : > { %v4653_v26 = vsub.s32 0, %v12405_v48  ;;  %vm5157_vm15 = vweird.f32 %v11751_v38  ;;  %vm4551_vm2 = vcmp.lt.s32.totalorder %v11744_v13, 0  ;;  %v4643_v21 = vadd.s32 %v12322_v37, %v12317_v52 }
 0x6df   : > { %v4741_v62 = vsel %vm4739_vm8, %v4729_v49, 2102212464  ;;  %v4758_v43 = vmul.u32 %v4756_v31, %v4753_v50  ;;  %v4777_v61 = vand.u32 65535, %v12393_v54  ;;  %v5148_v32 = vadd.f32 1.0, %v5147_v9 }
 0x6e0   : > { %v5155_v29 = vadd.f32 1.0, %v5154_v3  ;;  %v4654_v11 = vsel %vm4652_vm13, %v4653_v26, %v12405_v48  ;;  %v4759_v51 = vmul.u32 %v4755_v34, %v4754_v25  ;;  %v4740_v53 = vsel %vm4736_vm9, %v4720_v5, %v12351_v27 }
 0x6e1   : > { %v4655_v23 = vclz %v4654_v11  ;;  %v4761_v56 = vshll.u32 %v4758_v43, 16  ;;  %v4780_v19 = vmul.u32 %v4778_v55, %v4753_v50  ;;  %v5165_v37 = vxor.u32 2147483648, %v5148_v32 }
 0x6e2   : > { %v5156_v52 = vmul.f32 %v5155_v29, %v12358_v36  ;;  %v4742_v49 = vsel %vm4738_vm5, %v12353_v15, %v4741_v62  ;;  %v4757_v58 = vmul.u32 %v4755_v34, %v4753_v50  ;;  %vm12431_vm1 = vcmp.le.f32.partialorder %v4549_v16, 0.7853982 }
 0x6e3   : > { %v8478_v63 = vadd.s32 4294967294, %v4655_v23  ;;  %v4673_v39 = vsub.s32 4, %v12383_v44  ;;  %v4760_v27 = vmul.u32 %v4756_v31, %v4754_v25  ;;  %v4781_v40 = vmul.u32 %v4777_v61, %v4754_v25 }
 0x6e4   : > { %v5162_v8 = vxor.u32 2147483648, %v5156_v52  ;;  %v4763_v4 = vshll.u32 %v4759_v51, 16  ;;  %vm4765_vm3 = vc.u32 %v4757_v58, %v4761_v56  ;;  %v4767_v36 = vadd.s32 %v4761_v56, %v4757_v58 }
 0x6e5   : > { %v5166_v46 = vsel %vm5164_vm7, %v5165_v37, %v5156_v52  ;;  %vm8479_vm11 = vcmp.lt.s32.totalorder %v8478_v63, 0  ;;  %v4766_v15 = vsel %vm4765_vm3, 1, %v15173_v2  ;;  %v4783_v6 = vshll.u32 %v4780_v19, 16 }
 0x6e6   : > { %v5163_v16 = vsel %vm5161_vm12, %v5148_v32, %v5162_v8  ;;  %v4658_v20 = vsel %vm8479_vm11, 0, %v8478_v63  ;;  %v4768_v54 = vadd.s32 %v4766_v15, %v4760_v27  ;;  %vm4769_vm4 = vc.u32 %v4767_v36, %v4763_v4 }
 0x6e7   : > { %v5167_v5 = vsel %vm5160_vm14, %v5163_v16, %v5166_v46  ;;  %v4659_v7 = vsub.s32 32, %v4658_v20  ;;  %v4663_v35 = vsub.s32 4294967266, %v4658_v20  ;;  %v4779_v59 = vmul.u32 %v4777_v61, %v4753_v50 }
 0x6e8   : > { %v5168_v34 = vsel %vm5157_vm15, nan, %v5167_v5  ;;  %v4674_v31 = vsel %vm4551_vm2, %v4673_v39, %v12383_v44  ;;  %v4762_v9 = vshrl.u32 %v4758_v43, 16  ;;  %v4770_v3 = vsel %vm4769_vm4, 1, %v15173_v2 }
 0x6e9   : > { %5554 = vmatpush.msra.mxu1 %v5168_v34  ;;  %v4660_v26 = vshll.u32 %v12405_v48, %v4658_v20  ;;  %v4661_v62 = vshrl.u32 %v4643_v21, %v4659_v7  ;;  %v4664_v32 = vadd.s32 127, %v4663_v35  ;;  %v4772_v10 = vadd.s32 %v4770_v3, %v4768_v54 }
 0x6ea   : > { %v4782_v29 = vmul.u32 %v4778_v55, %v4754_v25  ;;  %v4785_v11 = vshll.u32 %v4781_v40, 16  ;;  %vm4787_vm0 = vc.u32 %v4779_v59, %v4783_v6  ;;  %v4789_v50 = vadd.s32 %v4783_v6, %v4779_v59 }
 0x6eb   : > { %v4662_v61 = vor.u32 %v4661_v62, %v4660_v26  ;;  %v4665_v38 = vshll.u32 %v4664_v32, 23  ;;  %v4773_v23 = vadd.s32 %v4772_v10, %v4762_v9  ;;  %v4788_v56 = vsel %vm4787_vm0, 1, %v15173_v2 }
 0x6ec   : > { %v4676_v44 = vsel %vm12431_vm1, 0, %v4674_v31  ;;  %v4764_v43 = vshrl.u32 %v4759_v51, 16  ;;  %v4790_v52 = vadd.s32 %v4788_v56, %v4782_v29  ;;  %vm4791_vm8 = vc.u32 %v4789_v50, %v4785_v11 }
 0x6ed   : > { %v4666_v37 = vor.u32 4788187, %v4665_v38  ;;  %v4743_v48 = vsel %vm4737_vm10, %v4740_v53, %v4742_v49  ;;  %v4792_v25 = vsel %vm4791_vm8, 1, %v15173_v2  ;;  %v4239_v55 = vand.u32 2147483647, %v11740_v57 }
 0x6ee   : > { %v12458_v21 = vshrl.u32 %v11762_v14, 5  ;;  %v12460_v58 = vadd.s32 %v4773_v23, %v4764_v43  ;;  %v4784_v63 = vshrl.u32 %v4780_v19, 16  ;;  %v4794_v39 = vadd.s32 %v4792_v25, %v4790_v52 }
 0x6ef   : > { %vm4405_vm9 = vcmp.gt.s32.totalorder %v12398_v17, 0  ;;  %v4667_v51 = vand.u32 2147483647, %v4666_v37  ;;  %v4669_v27 = vcvt.s32.f32 %v4662_v61  ;;  %v4693_v8 = vadd.s32 3, %v4676_v44 }
 0x6f0   : > { %v4786_v4 = vshrl.u32 %v4781_v40, 16  ;;  %v12463_v36 = vadd.s32 %v4789_v50, %v4785_v11  ;;  %v4795_v24 = vadd.s32 %v4794_v39, %v4784_v63  ;;  %v4797_v53 = vmul.u32 %v12385_v30, %v4743_v48 }
 0x6f1   : > { %v4670_v49 = vmul.f32 %v4669_v27, %v4667_v51  ;;  %v4246_v14 = vand.u32 8388607, %v4239_v55  ;;  %v4257_v46 = vshrl.u32 %v15179_v18, %v12396_v42  ;;  %v4260_v19 = vshrl.u32 %v15180_v1, %v12396_v42 }
 0x6f2   : > { %v4796_v15 = vadd.s32 %v4795_v24, %v4786_v4  ;;  %vm4799_vm5 = vc.u32 %v12460_v58, %v12463_v36  ;;  %v4256_v40 = vshll.u32 %v15178_v47, %v11771_v12  ;;  %v4263_v30 = vshrl.u32 %v15181_v41, %v12396_v42 }
 0x6f3   : > { %v4671_v6 = vxor.u32 2147483648, %v4670_v49  ;;  %v4259_v16 = vshll.u32 %v15179_v18, %v11771_v12  ;;  %v4265_v20 = vshll.u32 %v15181_v41, %v11771_v12  ;;  %v4266_v54 = vshrl.u32 %v15182_v60, %v12396_v42 }
 0x6f4   : > { %v4800_v5 = vadd.s32 1, %v4796_v15  ;;  %v4262_v7 = vshll.u32 %v15180_v1, %v11771_v12  ;;  %v4268_v35 = vshll.u32 %v15182_v60, %v11771_v12  ;;  %v4269_v59 = vshrl.u32 %v15183_v33, %v12396_v42 }
 0x6f5   : > { %v4672_v34 = vsel %vm4551_vm2, %v4671_v6, %v4670_v49  ;;  %v12492_v31 = vor.u32 %v4257_v46, %v4256_v40  ;;  %v12494_v9 = vor.u32 %v4260_v19, %v4259_v16  ;;  %v4267_v3 = vor.u32 %v4266_v54, %v4265_v20 }
 0x6f6   : > { %v4675_v26 = vsel %vm12431_vm1, %v11744_v13, %v4672_v34  ;;  %v4801_v62 = vsel %vm4799_vm5, %v4800_v5, %v4796_v15  ;;  %v4264_v12 = vor.u32 %v4263_v30, %v4262_v7  ;;  %v4270_v32 = vor.u32 %v4269_v59, %v4268_v35 }
 0x6f7   : > { %v4677_v10 = vmul.f32 %v4675_v26, %v4675_v26  ;;  %v4802_v29 = vadd.s32 %v4801_v62, %v4797_v53  ;;  %v4247_v11 = vor.u32 8388608, %v4246_v14  ;;  %vm4274_vm10 = vcmp.lt.s32.totalorder %v12458_v21, 4 }
 0x6f8   : > { %v4406_v50 = vsel %vm4405_vm9, %v12398_v17, 0  ;;  %v12506_v61 = vand.u32 3, %v4693_v8  ;;  %vm4271_vm7 = vcmp.lt.s32.totalorder %v12458_v21, 1  ;;  %v4280_v0 = vsel %vm4274_vm10, %v4267_v3, 920167782 }
 0x6f9   : > { %v4678_v38 = vmul.f32 -0.001358992, %v4677_v10  ;;  %v4685_v23 = vmul.f32 -0.00019511016, %v4677_v10  ;;  %v4803_v56 = vadd.s32 536870912, %v4802_v29  ;;  %vm4273_vm12 = vcmp.lt.s32.totalorder %v12458_v21, 3 }
 0x6fa   : > { %v4279_v44 = vsel %vm4271_vm7, %v12492_v31, %v12494_v9  ;;  %v4281_v17 = vsel %vm4273_vm12, %v4264_v12, %v4280_v0  ;;  %v4283_v43 = vsel %vm4271_vm7, %v12494_v9, %v4264_v12  ;;  %v4284_v52 = vsel %vm4274_vm10, %v4270_v32, 1326507024 }
 0x6fb   : > { %v4679_v37 = vadd.f32 0.041655596, %v4678_v38  ;;  %v4686_v48 = vadd.f32 0.008332121, %v4685_v23  ;;  %v12523_v25 = vshrl.u32 %v4803_v56, 30  ;;  %v12525_v63 = vshll.u32 %v4247_v11, 8 }
 0x6fc   : > { %vm4272_vm14 = vcmp.lt.s32.totalorder %v12458_v21, 2  ;;  %v4285_v39 = vsel %vm4273_vm12, %v4267_v3, %v4284_v52  ;;  %v12535_v24 = vshrl.u32 %v4406_v50, 5  ;;  %v12537_v53 = vand.u32 31, %v4406_v50 }
 0x6fd   : > { %v4680_v51 = vmul.f32 %v4679_v37, %v4677_v10  ;;  %v4687_v27 = vmul.f32 %v4686_v48, %v4677_v10  ;;  %v4805_v8 = vshll.u32 %v12523_v25, 30  ;;  %v12533_v4 = vsel %vm4272_vm14, %v4279_v44, %v4281_v17 }
 0x6fe   : > { %v4286_v49 = vsel %vm4272_vm14, %v4283_v43, %v4285_v39  ;;  %vm4699_vm13 = vcmp.eq.s32.totalorder %v12506_v61, 2  ;;  %v4288_v15 = vand.u32 65535, %v12525_v63  ;;  %vm4696_vm15 = vcmp.eq.s32.totalorder %v12506_v61, 0 }
 0x6ff   : > { %v4681_v14 = vadd.f32 -0.4999988, %v4680_v51  ;;  %v4688_v46 = vadd.f32 -0.16666654, %v4687_v27  ;;  %v12542_v19 = vsub.s32 %v4802_v29, %v4805_v8  ;;  %v4289_v40 = vshrl.u32 %v12525_v63, 16 }
 0x700   : > { %v4290_v30 = vand.u32 65535, %v4286_v49  ;;  %v4291_v6 = vshrl.u32 %v4286_v49, 16  ;;  %v4313_v16 = vshrl.u32 %v12533_v4, 16  ;;  %vm4695_vm2 = vcmp.lt.s32.totalorder %v12506_v61, 2 }
 0x701   : > { %v4682_v20 = vmul.f32 %v4681_v14, %v4677_v10  ;;  %v4689_v54 = vmul.f32 %v4688_v46, %v4677_v10  ;;  %vm4807_vm1 = vcmp.lt.s32.totalorder %v12542_v19, 0  ;;  %v4808_v5 = vsub.s32 0, %v12542_v19 }
 0x702   : > { %vm4692_vm3 = vweird.f32 %v11744_v13  ;;  %v4255_v7 = vshrl.u32 %v15178_v47, %v12396_v42  ;;  %v4276_v35 = vsel %vm4274_vm10, %v4264_v12, 2102212464  ;;  %v4293_v59 = vmul.u32 %v4291_v6, %v4288_v15 }
 0x703   : > { %v4312_v34 = vand.u32 65535, %v12533_v4  ;;  %v4683_v3 = vadd.f32 1.0, %v4682_v20  ;;  %v4690_v62 = vadd.f32 1.0, %v4689_v54  ;;  %v4809_v32 = vsel %vm4807_vm1, %v4808_v5, %v12542_v19 }
 0x704   : > { %v4294_v10 = vmul.u32 %v4290_v30, %v4289_v40  ;;  %v4798_v29 = vadd.s32 %v12463_v36, %v12460_v58  ;;  %v4810_v11 = vclz %v4809_v32  ;;  %v4296_v50 = vshll.u32 %v4293_v59, 16 }
 0x705   : > { %v4315_v0 = vmul.u32 %v4313_v16, %v4288_v15  ;;  %v4691_v38 = vmul.f32 %v4690_v62, %v4675_v26  ;;  %v4700_v23 = vxor.u32 2147483648, %v4683_v3  ;;  %v4275_v42 = vsel %vm4271_vm7, %v4255_v7, %v12492_v31 }
 0x706   : > { %v4292_v12 = vmul.u32 %v4290_v30, %v4288_v15  ;;  %v8481_v56 = vadd.s32 4294967294, %v4810_v11  ;;  %v4277_v44 = vsel %vm4273_vm12, %v12494_v9, %v4276_v35  ;;  %v4295_v17 = vmul.u32 %v4291_v6, %v4289_v40 }
 0x707   : > { %v4316_v43 = vmul.u32 %v4312_v34, %v4289_v40  ;;  %v4697_v52 = vxor.u32 2147483648, %v4691_v38  ;;  %v4298_v37 = vshll.u32 %v4294_v10, 16  ;;  %v4701_v36 = vsel %vm4699_vm13, %v4700_v23, %v4691_v38 }
 0x708   : > { %vm4300_vm11 = vc.u32 %v4292_v12, %v4296_v50  ;;  %v4302_v58 = vadd.s32 %v4296_v50, %v4292_v12  ;;  %vm8482_vm4 = vcmp.lt.s32.totalorder %v8481_v56, 0  ;;  %v4318_v48 = vshll.u32 %v4315_v0, 16 }
 0x709   : > { %v4301_v26 = vsel %vm4300_vm11, 1, %v15173_v2  ;;  %v4698_v31 = vsel %vm4696_vm15, %v4683_v3, %v4697_v52  ;;  %v4813_v39 = vsel %vm8482_vm4, 0, %v8481_v56  ;;  %v4828_v4 = vsub.s32 4, %v12523_v25 }
 0x70a   : > { %v4303_v51 = vadd.s32 %v4301_v26, %v4295_v17  ;;  %vm4304_vm0 = vc.u32 %v4302_v58, %v4298_v37  ;;  %v4702_v9 = vsel %vm4695_vm2, %v4698_v31, %v4701_v36  ;;  %v4814_v27 = vsub.s32 32, %v4813_v39 }
 0x70b   : > { %v4818_v8 = vsub.s32 4294967266, %v4813_v39  ;;  %v4703_v49 = vsel %vm4692_vm3, nan, %v4702_v9  ;;  %v4297_v14 = vshrl.u32 %v4293_v59, 16  ;;  %v4305_v46 = vsel %vm4304_vm0, 1, %v15173_v2 }
 0x70c   : > { %v4314_v30 = vmul.u32 %v4312_v34, %v4288_v15  ;;  %5526 = vmatpush.msra.mxu0 %v4703_v49  ;;  %v4815_v6 = vshll.u32 %v12542_v19, %v4813_v39  ;;  %v4816_v20 = vshrl.u32 %v4798_v29, %v4814_v27  ;;  %v4307_v5 = vadd.s32 %v4305_v46, %v4303_v51 }
 0x70d   : > { %v4819_v54 = vadd.s32 127, %v4818_v8  ;;  %v4317_v7 = vmul.u32 %v4313_v16, %v4289_v40  ;;  %v4320_v61 = vshll.u32 %v4316_v43, 16  ;;  %v12580_v59 = vsub.s32 32, %v12537_v53 }
 0x70e   : > { %vm4322_vm8 = vc.u32 %v4314_v30, %v4318_v48  ;;  %v4324_v35 = vadd.s32 %v4318_v48, %v4314_v30  ;;  %v4817_v3 = vor.u32 %v4816_v20, %v4815_v6  ;;  %v4308_v32 = vadd.s32 %v4307_v5, %v4297_v14 }
 0x70f   : > { %v4820_v62 = vshll.u32 %v4819_v54, 23  ;;  %v4323_v13 = vsel %vm4322_vm8, 1, %v15173_v2  ;;  %v4299_v11 = vshrl.u32 %v4294_v10, 16  ;;  %v4278_v19 = vsel %vm4272_vm14, %v4275_v42, %v4277_v44 }
 0x710   : > { %v4325_v15 = vadd.s32 %v4323_v13, %v4317_v7  ;;  %vm4326_vm9 = vc.u32 %v4324_v35, %v4320_v61  ;;  %v4394_v16 = vand.u32 2147483647, %v11765_v45  ;;  %vm4706_vm5 = vcmp.lt.s32.totalorder %v11747_v22, 0 }
 0x711   : > { %v4821_v34 = vor.u32 4788187, %v4820_v62  ;;  %v4327_v40 = vsel %vm4326_vm9, 1, %v15173_v2  ;;  %v12587_v29 = vadd.s32 %v4308_v32, %v4299_v11  ;;  %v4319_v50 = vshrl.u32 %v4315_v0, 16 }
 0x712   : > { %v4329_v38 = vadd.s32 %v4327_v40, %v4325_v15  ;;  %vm12591_vm10 = vcmp.le.f32.partialorder %v4704_v28, 0.7853982  ;;  %v4824_v12 = vcvt.s32.f32 %v4817_v3  ;;  %v4829_v21 = vsel %vm4706_vm5, %v4828_v4, %v12523_v25 }
 0x713   : > { %v4822_v23 = vand.u32 2147483647, %v4821_v34  ;;  %v4321_v42 = vshrl.u32 %v4316_v43, 16  ;;  %v12598_v56 = vadd.s32 %v4324_v35, %v4320_v61  ;;  %v4332_v17 = vmul.u32 %v12525_v63, %v4278_v19 }
 0x714   : > { %v4330_v44 = vadd.s32 %v4329_v38, %v4319_v50  ;;  %v4401_v52 = vand.u32 8388607, %v4394_v16  ;;  %v4415_v28 = vshrl.u32 %v15180_v1, %v12580_v59  ;;  %v4418_v37 = vshrl.u32 %v15181_v41, %v12580_v59 }
 0x715   : > { %v4825_v0 = vmul.f32 %v4824_v12, %v4822_v23  ;;  %vm4334_vm7 = vc.u32 %v12587_v29, %v12598_v56  ;;  %v4420_v25 = vshll.u32 %v15181_v41, %v12537_v53  ;;  %v4421_v63 = vshrl.u32 %v15182_v60, %v12580_v59 }
 0x716   : > { %v4331_v58 = vadd.s32 %v4330_v44, %v4321_v42  ;;  %v4412_v36 = vshrl.u32 %v15179_v18, %v12580_v59  ;;  %v4414_v26 = vshll.u32 %v15179_v18, %v12537_v53  ;;  %v4417_v48 = vshll.u32 %v15180_v1, %v12537_v53 }
 0x717   : > { %v4826_v43 = vxor.u32 2147483648, %v4825_v0  ;;  %v4422_v39 = vor.u32 %v4421_v63, %v4420_v25  ;;  %v4423_v51 = vshll.u32 %v15182_v60, %v12537_v53  ;;  %v4424_v9 = vshrl.u32 %v15183_v33, %v12580_v59 }
 0x718   : > { %v4335_v31 = vadd.s32 1, %v4331_v58  ;;  %v4411_v8 = vshll.u32 %v15178_v47, %v12537_v53  ;;  %v12627_v4 = vor.u32 %v4415_v28, %v4414_v26  ;;  %v12629_v49 = vor.u32 %v4418_v37, %v4417_v48 }
 0x719   : > { %v4827_v27 = vsel %vm4706_vm5, %v4826_v43, %v4825_v0  ;;  %v4402_v30 = vor.u32 8388608, %v4401_v52  ;;  %v4425_v6 = vor.u32 %v4424_v9, %v4423_v51  ;;  %vm4429_vm12 = vcmp.lt.s32.totalorder %v12535_v24, 4 }
 0x71a   : > { %v4830_v14 = vsel %vm12591_vm10, %v11747_v22, %v4827_v27  ;;  %v4336_v46 = vsel %vm4334_vm7, %v4335_v31, %v4331_v58  ;;  %v12637_v5 = vor.u32 %v4412_v36, %v4411_v8  ;;  %vm4426_vm14 = vcmp.lt.s32.totalorder %v12535_v24, 1 }
 0x71b   : > { %v4832_v20 = vmul.f32 %v4830_v14, %v4830_v14  ;;  %v4337_v54 = vadd.s32 %v4336_v46, %v4332_v17  ;;  %vm4428_vm13 = vcmp.lt.s32.totalorder %v12535_v24, 3  ;;  %v4435_v53 = vsel %vm4429_vm12, %v4422_v39, 920167782 }
 0x71c   : > { %v4439_v7 = vsel %vm4429_vm12, %v4425_v6, 1326507024  ;;  %v4438_v62 = vsel %vm4426_vm14, %v12627_v4, %v12629_v49  ;;  %v4831_v32 = vsel %vm12591_vm10, 0, %v4829_v21  ;;  %v12654_v11 = vshll.u32 %v4402_v30, 8 }
 0x71d   : > { %v4833_v61 = vmul.f32 -0.001358992, %v4832_v20  ;;  %v4840_v35 = vmul.f32 -0.00019511016, %v4832_v20  ;;  %v4338_v3 = vadd.s32 536870912, %v4337_v54  ;;  %v4440_v13 = vsel %vm4428_vm13, %v4422_v39, %v4439_v7 }
 0x71e   : > { %vm4427_vm15 = vcmp.lt.s32.totalorder %v12535_v24, 2  ;;  %v4434_v40 = vsel %vm4426_vm14, %v12637_v5, %v12627_v4  ;;  %v4436_v50 = vsel %vm4428_vm13, %v12629_v49, %v4435_v53  ;;  %v4848_v12 = vadd.s32 3, %v4831_v32 }
 0x71f   : > { %v4834_v15 = vadd.f32 0.041655596, %v4833_v61  ;;  %v4841_v34 = vadd.f32 0.008332121, %v4840_v35  ;;  %v12656_v19 = vshrl.u32 %v4338_v3, 30  ;;  %v4441_v38 = vsel %vm4427_vm15, %v4438_v62, %v4440_v13 }
 0x720   : > { %v4443_v42 = vand.u32 65535, %v12654_v11  ;;  %v4444_v44 = vshrl.u32 %v12654_v11, 16  ;;  %v4445_v17 = vand.u32 65535, %v4441_v38  ;;  %v4446_v0 = vshrl.u32 %v4441_v38, 16 }
 0x721   : > { %v4835_v10 = vmul.f32 %v4834_v15, %v4832_v20  ;;  %v4842_v23 = vmul.f32 %v4841_v34, %v4832_v20  ;;  %v4340_v21 = vshll.u32 %v12656_v19, 30  ;;  %v4437_v58 = vsel %vm4427_vm15, %v4434_v40, %v4436_v50 }
 0x722   : > { %v4448_v25 = vmul.u32 %v4446_v0, %v4443_v42  ;;  %v12673_v63 = vmul.u32 %v4445_v17, %v4444_v44  ;;  %v4849_v48 = vand.u32 3, %v4848_v12  ;;  %v4447_v31 = vmul.u32 %v4445_v17, %v4443_v42 }
 0x723   : > { %v4836_v52 = vadd.f32 -0.4999988, %v4835_v10  ;;  %v4843_v28 = vadd.f32 -0.16666654, %v4842_v23  ;;  %v4341_v37 = vsub.s32 %v4337_v54, %v4340_v21  ;;  %v4467_v51 = vand.u32 65535, %v4437_v58 }
 0x724   : > { %v4451_v39 = vshll.u32 %v4448_v25, 16  ;;  %v4468_v46 = vshrl.u32 %v4437_v58, 16  ;;  %v4450_v6 = vmul.u32 %v4446_v0, %v4444_v44  ;;  %v4453_v54 = vshll.u32 %v12673_v63, 16 }
 0x725   : > { %v4837_v43 = vmul.f32 %v4836_v52, %v4832_v20  ;;  %v4844_v36 = vmul.f32 %v4843_v28, %v4832_v20  ;;  %vm4342_vm2 = vcmp.lt.s32.totalorder %v4341_v37, 0  ;;  %v4343_v26 = vsub.s32 0, %v4341_v37 }
 0x726   : > { %vm4455_vm1 = vc.u32 %v4447_v31, %v4451_v39  ;;  %v4457_v20 = vadd.s32 %v4451_v39, %v4447_v31  ;;  %vm4847_vm3 = vweird.f32 %v11747_v22  ;;  %vm4850_vm11 = vcmp.lt.s32.totalorder %v4849_v48, 2 }
 0x727   : > { %v4838_v9 = vadd.f32 1.0, %v4837_v43  ;;  %v4845_v27 = vadd.f32 1.0, %v4844_v36  ;;  %v4344_v8 = vsel %vm4342_vm2, %v4343_v26, %v4341_v37  ;;  %v4456_v61 = vsel %vm4455_vm1, 1, %v15173_v2 }
 0x728   : > { %v4345_v30 = vclz %v4344_v8  ;;  %vm4851_vm4 = vcmp.eq.s32.totalorder %v4849_v48, 0  ;;  %vm4854_vm0 = vcmp.eq.s32.totalorder %v4849_v48, 2  ;;  %v4458_v62 = vadd.s32 %v4456_v61, %v4450_v6 }
 0x729   : > { %v4846_v53 = vmul.f32 %v4845_v27, %v4830_v14  ;;  %v4855_v7 = vxor.u32 2147483648, %v4838_v9  ;;  %vm4459_vm8 = vc.u32 %v4457_v20, %v4453_v54  ;;  %v4333_v32 = vadd.s32 %v12598_v56, %v12587_v29 }
 0x72a   : > { %v8472_v35 = vadd.s32 4294967294, %v4345_v30  ;;  %v4460_v13 = vsel %vm4459_vm8, 1, %v15173_v2  ;;  %v4470_v14 = vmul.u32 %v4468_v46, %v4443_v42  ;;  %v4471_v50 = vmul.u32 %v4467_v51, %v4444_v44 }
 0x72b   : > { %v4852_v3 = vxor.u32 2147483648, %v4846_v53  ;;  %v4856_v34 = vsel %vm4854_vm0, %v4855_v7, %v4846_v53  ;;  %v4462_v12 = vadd.s32 %v4460_v13, %v4458_v62  ;;  %v4469_v17 = vmul.u32 %v4467_v51, %v4443_v42 }
 0x72c   : > { %vm8473_vm9 = vcmp.lt.s32.totalorder %v8472_v35, 0  ;;  %v4473_v0 = vshll.u32 %v4470_v14, 16  ;;  %v4452_v28 = vshrl.u32 %v4448_v25, 16  ;;  %v4472_v58 = vmul.u32 %v4468_v46, %v4444_v44 }
 0x72d   : > { %v4853_v15 = vsel %vm4851_vm4, %v4838_v9, %v4852_v3  ;;  %v4348_v40 = vsel %vm8473_vm9, 0, %v8472_v35  ;;  %v4475_v43 = vshll.u32 %v4471_v50, 16  ;;  %v4410_v22 = vshrl.u32 %v15178_v47, %v12580_v59  ;;  %v5481_v35 = vld [vmem:[#allocation2 + $0x88] sm:$0xff] }
 0x72e   : > { %v4857_v38 = vsel %vm4850_vm11, %v4853_v15, %v4856_v34  ;;  %v4349_v10 = vsub.s32 32, %v4348_v40  ;;  %v4353_v23 = vsub.s32 4294967266, %v4348_v40  ;;  %v4350_v52 = vshll.u32 %v4341_v37, %v4348_v40 }
 0x72f   : > { %v4858_v21 = vsel %vm4847_vm3, nan, %v4857_v38  ;;  %vm4477_vm5 = vc.u32 %v4469_v17, %v4473_v0  ;;  %v4479_v36 = vadd.s32 %v4473_v0, %v4469_v17  ;;  %v4463_v31 = vadd.s32 %v4462_v12, %v4452_v28 }
 0x730   : > { %5555 = vmatpush.msra.mxu1 %v4858_v21  ;;  %v4351_v29 = vshrl.u32 %v4333_v32, %v4349_v10  ;;  %v4354_v56 = vadd.s32 127, %v4353_v23  ;;  %v4478_v39 = vsel %vm4477_vm5, 1, %v15173_v2  ;;  %v4431_v42 = vsel %vm4429_vm12, %v12629_v49, 2102212464 }
 0x731   : > { %v4480_v37 = vadd.s32 %v4478_v39, %v4472_v58  ;;  %vm4481_vm10 = vc.u32 %v4479_v36, %v4475_v43  ;;  %v4454_v44 = vshrl.u32 %v12673_v63, 16  ;;  %v4430_v9 = vsel %vm4426_vm14, %v4410_v22, %v12637_v5 }
 0x732   : > { %v4352_v26 = vor.u32 %v4351_v29, %v4350_v52  ;;  %v4355_v48 = vshll.u32 %v4354_v56, 23  ;;  %v4482_v25 = vsel %vm4481_vm10, 1, %v15173_v2  ;;  %v4474_v27 = vshrl.u32 %v4470_v14, 16 }
 0x733   : > { %v4484_v8 = vadd.s32 %v4482_v25, %v4480_v37  ;;  %v4432_v59 = vsel %vm4428_vm13, %v12627_v4, %v4431_v42  ;;  %v4464_v49 = vadd.s32 %v4463_v31, %v4454_v44  ;;  %v4476_v6 = vshrl.u32 %v4471_v50, 16 }
 0x734   : > { %v4356_v51 = vor.u32 4788187, %v4355_v48  ;;  %v4359_v30 = vcvt.s32.f32 %v4352_v26  ;;  %v4483_v7 = vadd.s32 %v4479_v36, %v4475_v43  ;;  %v4433_v63 = vsel %vm4427_vm15, %v4430_v9, %v4432_v59 }
 0x735   : > { %v4485_v54 = vadd.s32 %v4484_v8, %v4474_v27  ;;  %vm4241_vm12 = vcmp.lt.s32.totalorder %v11740_v57, 0  ;;  %vm12702_vm14 = vcmp.le.f32.partialorder %v4239_v55, 0.7853982  ;;  %v4487_v3 = vmul.u32 %v12654_v11, %v4433_v63  ;;  %v5480_v63 = vld [vmem:[#allocation2 + $0x80] sm:$0xff] }
 0x736   : > { %v4357_v46 = vand.u32 2147483647, %v4356_v51  ;;  %vm4489_vm7 = vc.u32 %v4464_v49, %v4483_v7  ;;  %v4363_v62 = vsub.s32 4, %v12656_v19  ;;  %vm4382_vm15 = vweird.f32 %v11740_v57 }
 0x737   : > { %v4486_v61 = vadd.s32 %v4485_v54, %v4476_v6  ;;  %v4488_v9 = vadd.s32 %v4483_v7, %v4464_v49  ;;  %vm4396_vm4 = vcmp.lt.s32.totalorder %v11765_v45, 0  ;;  %vm12722_vm0 = vcmp.le.f32.partialorder %v4394_v16, 0.7853982  ;;  %v8739_v16 = vld [vmem:[%s15048_s3 + $0x18] sm:$0xff] }
 0x738   : > { %v4360_v53 = vmul.f32 %v4359_v30, %v4357_v46  ;;  %v4364_v55 = vsel %vm4241_vm12, %v4363_v62, %v12656_v19  ;;  %vm4537_vm10 = vweird.f32 %v11765_v45 }
 0x739   : > { %v4490_v5 = vadd.s32 1, %v4486_v61  ;;  %v4366_v11 = vsel %vm12702_vm14, 0, %v4364_v55 }
 0x73a   : > { %v4361_v20 = vxor.u32 2147483648, %v4360_v53  ;;  %v4383_v29 = vadd.s32 3, %v4366_v11 }
 0x73b   : > { %v4491_v32 = vsel %vm4489_vm7, %v4490_v5, %v4486_v61 }
 0x73c   : > { %v4362_v4 = vsel %vm4241_vm12, %v4361_v20, %v4360_v53  ;;  %v4492_v14 = vadd.s32 %v4491_v32, %v4487_v3  ;;  %v4384_v26 = vand.u32 3, %v4383_v29 }
 0x73d   : > { %v4365_v24 = vsel %vm12702_vm14, %v11740_v57, %v4362_v4 }
 0x73e   : > { %v4367_v13 = vmul.f32 %v4365_v24, %v4365_v24  ;;  %v4493_v40 = vadd.s32 536870912, %v4492_v14  ;;  %vm4386_vm2 = vcmp.eq.s32.totalorder %v4384_v26, 0  ;;  %vm4389_vm1 = vcmp.eq.s32.totalorder %v4384_v26, 2 }
 0x73f   : > { %vm4385_vm11 = vcmp.lt.s32.totalorder %v4384_v26, 2 }
 0x740   : > { %v4368_v15 = vmul.f32 -0.001358992, %v4367_v13  ;;  %v4375_v34 = vmul.f32 -0.00019511016, %v4367_v13  ;;  %v12712_v10 = vshrl.u32 %v4493_v40, 30  ;;  %v5482_v40 = vld [vmem:[#allocation2 + $0x90] sm:$0xff] }
 0x742   : > { %v4369_v50 = vadd.f32 0.041655596, %v4368_v15  ;;  %v4376_v38 = vadd.f32 0.008332121, %v4375_v34  ;;  %v4495_v21 = vshll.u32 %v12712_v10, 30  ;;  %v4518_v3 = vsub.s32 4, %v12712_v10 }
 0x744   : > { %v4370_v23 = vmul.f32 %v4369_v50, %v4367_v13  ;;  %v4377_v12 = vmul.f32 %v4376_v38, %v4367_v13  ;;  %v4496_v52 = vsub.s32 %v4492_v14, %v4495_v21  ;;  %v4519_v34 = vsel %vm4396_vm4, %v4518_v3, %v12712_v10  ;;  %v8742_v10 = vld [vmem:[%s15048_s3] sm:$0xff] }
 0x745   : > { %v4521_v38 = vsel %vm12722_vm0, 0, %v4519_v34 }
 0x746   : > { %v4371_v17 = vadd.f32 -0.4999988, %v4370_v23  ;;  %v4378_v0 = vadd.f32 -0.16666654, %v4377_v12  ;;  %vm4497_vm13 = vcmp.lt.s32.totalorder %v4496_v52, 0  ;;  %v4498_v58 = vsub.s32 0, %v4496_v52 }
 0x748   : > { %v4372_v56 = vmul.f32 %v4371_v17, %v4367_v13  ;;  %v4379_v28 = vmul.f32 %v4378_v0, %v4367_v13  ;;  %v4499_v36 = vsel %vm4497_vm13, %v4498_v58, %v4496_v52  ;;  %v8740_v13 = vld [vmem:[%s15048_s3 + $0x10] sm:$0xff]  ;;  %v8741_v17 = vld [vmem:[%s15048_s3 + $0x8] sm:$0xff]  ;;  %v4538_v0 = vadd.s32 3, %v4521_v38 }
 0x749   : > { %v4500_v48 = vclz %v4499_v36 }
 0x74a   : > { %v4373_v19 = vadd.f32 1.0, %v4372_v56  ;;  %v4380_v43 = vadd.f32 1.0, %v4379_v28  ;;  %v5483_v56 = vld [vmem:[#allocation2 + $0x98] sm:$0xff] }
 0x74b   : > { %v8475_v22 = vadd.s32 4294967294, %v4500_v48 }
 0x74c   : > { %v4381_v31 = vmul.f32 %v4380_v43, %v4365_v24  ;;  %v4390_v39 = vxor.u32 2147483648, %v4373_v19  ;;  %v8857_v24 = vmov 3  }
 0x74d   : > { %vm8476_vm3 = vcmp.lt.s32.totalorder %v8475_v22, 0  ;;  %8652 = vset.pattern.permute.xlu1 %v8857_v24  ;;  %8653 = vset.pattern.permute.xlu2 %v8857_v24 }
 0x74e   : > { %v4387_v42 = vxor.u32 2147483648, %v4381_v31  ;;  %v4391_v51 = vsel %vm4389_vm1, %v4390_v39, %v4381_v31  ;;  %v4503_v44 = vsel %vm8476_vm3, 0, %v8475_v22  ;;  %5497 = vperm.xlu1 %8652, %v8739_v16   ;;  %5493 = vperm.xlu2 %8653, %v8740_v13  }
 0x74f   : > { %v4504_v27 = vsub.s32 32, %v4503_v44  ;;  %v4508_v8 = vsub.s32 4294967266, %v4503_v44  ;;  %v4505_v30 = vshll.u32 %v4496_v52, %v4503_v44 }
 0x750   : > { %v4388_v37 = vsel %vm4386_vm2, %v4373_v19, %v4387_v42  ;;  %v4539_v19 = vand.u32 3, %v4538_v0 }
 0x751   : > { %v4392_v25 = vsel %vm4385_vm11, %v4388_v37, %v4391_v51  ;;  %v4506_v59 = vshrl.u32 %v4488_v9, %v4504_v27  ;;  %v4509_v6 = vadd.s32 127, %v4508_v8 }
 0x752   : > { %v4393_v46 = vsel %vm4382_vm15, nan, %v4392_v25  ;;  %vm4541_vm8 = vcmp.eq.s32.totalorder %v4539_v19, 0  ;;  %vm4544_vm9 = vcmp.eq.s32.totalorder %v4539_v19, 2  ;;  %vm4540_vm5 = vcmp.lt.s32.totalorder %v4539_v19, 2 }
 0x753   : > { %5527 = vmatpush.msra.mxu0 %v4393_v46  ;;  %v4507_v54 = vor.u32 %v4506_v59, %v4505_v30  ;;  %v4510_v53 = vshll.u32 %v4509_v6, 23 }
 0x754   : > { %8495 = vmatmul.msk.f32.vlgmr.msra.gmra.mxu0 %vm1303_vm6, %v5480_v63 }
 0x755   : > { %v4511_v57 = vor.u32 4788187, %v4510_v53  ;;  %v4514_v20 = vcvt.s32.f32 %v4507_v54 }
 0x756   : > { %5489 = vperm.xlu1 %8652, %v8741_v17   ;;  %5485 = vperm.xlu2 %8653, %v8742_v10  }
 0x757   : > { %v4512_v61 = vand.u32 2147483647, %v4511_v57 }
 0x759   : > { %v4515_v5 = vmul.f32 %v4514_v20, %v4512_v61 }
 0x75b   : > { %v4516_v4 = vxor.u32 2147483648, %v4515_v5 }
 0x75c   : > { %8496 = vmatmul.msk.f32.gmra.mxu0 %vm1303_vm6, %v5481_v35 }
 0x75d   : > { %v4517_v7 = vsel %vm4396_vm4, %v4516_v4, %v4515_v5 }
 0x75e   : > { %v4520_v62 = vsel %vm12722_vm0, %v11765_v45, %v4517_v7 }
 0x75f   : > { %v4522_v32 = vmul.f32 %v4520_v62, %v4520_v62 }
 0x761   : > { %v4523_v14 = vmul.f32 -0.001358992, %v4522_v32  ;;  %v4530_v15 = vmul.f32 -0.00019511016, %v4522_v32 }
 0x763   : > { %v4524_v55 = vadd.f32 0.041655596, %v4523_v14  ;;  %v4531_v50 = vadd.f32 0.008332121, %v4530_v15 }
 0x764   : > { %8497 = vmatmul.msk.f32.gmra.mxu0 %vm1303_vm6, %v5482_v40 }
 0x765   : > { %v4525_v11 = vmul.f32 %v4524_v55, %v4522_v32  ;;  %v4532_v23 = vmul.f32 %v4531_v50, %v4522_v32 }
 0x767   : > { %v4526_v12 = vadd.f32 -0.4999988, %v4525_v11  ;;  %v4533_v21 = vadd.f32 -0.16666654, %v4532_v23 }
 0x769   : > { %v4527_v52 = vmul.f32 %v4526_v12, %v4522_v32  ;;  %v4534_v29 = vmul.f32 %v4533_v21, %v4522_v32 }
 0x76b   : > { %v4528_v28 = vadd.f32 1.0, %v4527_v52  ;;  %v4535_v58 = vadd.f32 1.0, %v4534_v29 }
 0x76c   : > { %8498 = vmatmul.msk.f32.gmra.mxu0 %vm1303_vm6, %v5483_v56 }
 0x76d   : > { %v4536_v43 = vmul.f32 %v4535_v58, %v4520_v62  ;;  %v4545_v36 = vxor.u32 2147483648, %v4528_v28 }
 0x76f   : > { %v4542_v26 = vxor.u32 2147483648, %v4536_v43  ;;  %v4546_v31 = vsel %vm4544_vm9, %v4545_v36, %v4536_v43 }
 0x771   : > { %v4543_v48 = vsel %vm4541_vm8, %v4528_v28, %v4542_v26 }
 0x772   : > { %v4547_v39 = vsel %vm4540_vm5, %v4543_v48, %v4546_v31 }
 0x773   : > { %v4548_v22 = vsel %vm4537_vm10, nan, %v4547_v39 }
 0x774   : > { %5556 = vmatpush.msra.mxu1 %v4548_v22 }
 0x775   : > { %8499 = vmatmul.msk.f32.vlgmr.msra.gmra.mxu1 %vm1303_vm6, %v5480_v63 }
 0x77d   : > { %8500 = vmatmul.msk.f32.gmra.mxu1 %vm1303_vm6, %v5481_v35 }
 0x785   : > { %8501 = vmatmul.msk.f32.gmra.mxu1 %vm1303_vm6, %v5482_v40 }
 0x78d   : > { %8502 = vmatmul.msk.f32.gmra.mxu1 %vm1303_vm6, %v5483_v56 }
 0x7a8   : > { %v5494_v42 = vpop.permute.xlu2 %5493 }
 0x7b0   : > { %v5486_v37 = vpop.permute.xlu2 %5485 }
 0x7c0   : > { %v12757_v9 = vpop.permute.xlu1 %5497 }
 0x7c8   : > { %v5490_v59 = vpop.permute.xlu1 %5489 }
 0x7d1   : > { %v5529_v51 = vpop.f32.mrf.mxu0 }
 0x7d2   : > { %v5530_v44 = vadd.f32 %v5529_v51, %v5486_v37 }
 0x7d4   : > { %v5570_v25 = vmul.f32 30.0, %v5530_v44 }
 0x7d6   : > { %8707 = vtanh.f32 %v5570_v25 }
 0x7d9   : > { %v5532_v6 = vpop.f32.mrf.mxu0 }
 0x7da   : > { %v5533_v53 = vadd.f32 %v5532_v6, %v5490_v59 }
 0x7dc   : > { %v8708_v45 = vpop.eup %8707  ;;  %v5572_v63 = vmul.f32 30.0, %v5533_v53 }
 0x7dd   : > { %v5586_v8 = vmul.f32 10.0, %v8708_v45 }
 0x7df   : > { %v5594_v54 = vadd.f32 30.0, %v5586_v8 }
 0x7e1   : > { %v12759_v57 = vmul.f32 %v5594_v54, %v5530_v44  ;;  %v5535_v49 = vpop.f32.mrf.mxu0 }
 0x7e2   : > { %v5536_v3 = vadd.f32 %v5535_v49, %v5494_v42 }
 0x7e3   : > { %15198 = vst [vmem:[#allocation8_spill] sm:$0xff] %v12759_v57  ;;  %v5613_v35 = vand.u32 2139095040, %v12759_v57 }
 0x7e4   : > { %v5574_v16 = vmul.f32 30.0, %v5536_v3 }
 0x7e5   : > { %v5614_v24 = vshrl.u32 %v5613_v35, 23 }
 0x7e7   : > { %v8503_v34 = vadd.s32 4294967169, %v5614_v24 }
 0x7e9   : > { %v5620_v10 = vadd.s32 1, %v8503_v34  ;;  %v5538_v19 = vpop.f32.mrf.mxu0 }
 0x7ea   : > { %v5539_v26 = vadd.f32 %v5538_v19, %v12757_v9 }
 0x7eb   : > { %vm5621_vm7 = vcmp.gt.s32.totalorder %v5620_v10, 0 }
 0x7ec   : > { %v5576_v39 = vmul.f32 30.0, %v5539_v26 }
 0x7f2   : > { %v5558_v27 = vpop.f32.mrf.mxu1 }
 0x7f3   : > { %v5559_v46 = vadd.f32 %v5558_v27, %v5486_v37  ;;  %v5622_v37 = vsel %vm5621_vm7, %v5620_v10, 0 }
 0x7f4   : > { %v12776_v8 = vand.u32 31, %v5622_v37 }
 0x7f5   : > { %v5571_v30 = vmul.f32 30.0, %v5559_v46 }
 0x7f6   : > { %15203 = vst [vmem:[#allocation13_spill] sm:$0xff] %v12776_v8  ;;  %v5636_v34 = vshll.u32 %v15181_v41, %v12776_v8 }
 0x7f7   : > { %8709 = vtanh.f32 %v5571_v30 }
 0x7f8   : > { %8711 = vtanh.f32 %v5572_v63 }
 0x7fa   : > { %v5561_v61 = vpop.f32.mrf.mxu1 }
 0x7fb   : > { %v5562_v20 = vadd.f32 %v5561_v61, %v5490_v59  ;;  %v12779_v61 = vsub.s32 32, %v12776_v8 }
 0x7fd   : > { %v5573_v5 = vmul.f32 30.0, %v5562_v20  ;;  %v8710_v4 = vpop.eup %8709  ;;  %15204 = vst [vmem:[#allocation14_spill] sm:$0xff] %v12779_v61 }
 0x7fe   : > { %v8712_v7 = vpop.eup %8711  ;;  %v5587_v32 = vmul.f32 10.0, %v8710_v4  ;;  %v12785_v4 = vshrl.u32 %v5622_v37, 5 }
 0x7ff   : > { %8713 = vtanh.f32 %v5573_v5  ;;  %v5588_v62 = vmul.f32 10.0, %v8712_v7 }
 0x800   : > { %8715 = vtanh.f32 %v5574_v16  ;;  %v5595_v40 = vadd.f32 30.0, %v5587_v32  ;;  %15206 = vst [vmem:[#allocation16_spill] sm:$0xff] %v12785_v4  ;;  %v12795_v16 = vshrl.u32 %v15183_v33, %v12779_v61  ;;  %vm5645_vm2 = vcmp.lt.s32.totalorder %v12785_v4, 4 }
 0x801   : > { %v5596_v13 = vadd.f32 30.0, %v5588_v62  ;;  %v5637_v62 = vshrl.u32 %v15182_v60, %v12779_v61 }
 0x802   : > { %v5564_v50 = vpop.f32.mrf.mxu1  ;;  %v12765_v0 = vmul.f32 %v5595_v40, %v5559_v46  ;;  %15208 = vst [vmem:[#allocation18_spill] sm:$0xff] %v12795_v16 }
 0x803   : > { %v12762_v15 = vmul.f32 %v5596_v13, %v5533_v53  ;;  %v5565_v11 = vadd.f32 %v5564_v50, %v5494_v42 }
 0x804   : > { %15200 = vst [vmem:[#allocation10_spill] sm:$0xff] %v12765_v0  ;;  %v5768_v43 = vand.u32 2139095040, %v12765_v0 }
 0x805   : > { %v8714_v14 = vpop.eup %8713  ;;  %15199 = vst [vmem:[#allocation9_spill] sm:$0xff] %v12762_v15  ;;  %v5923_v38 = vand.u32 2139095040, %v12762_v15  ;;  %v5575_v21 = vmul.f32 30.0, %v5565_v11 }
 0x806   : > { %v5589_v55 = vmul.f32 10.0, %v8714_v14  ;;  %v8716_v17 = vpop.eup %8715  ;;  %v5769_v51 = vshrl.u32 %v5768_v43, 23 }
 0x807   : > { %v5924_v12 = vshrl.u32 %v5923_v38, 23  ;;  %v5590_v56 = vmul.f32 10.0, %v8716_v17  ;;  %8717 = vtanh.f32 %v5575_v21 }
 0x808   : > { %v5597_v23 = vadd.f32 30.0, %v5589_v55  ;;  %8719 = vtanh.f32 %v5576_v39  ;;  %v8506_v6 = vadd.s32 4294967169, %v5769_v51  ;;  %v12801_v55 = vshll.u32 %v15182_v60, %v12776_v8 }
 0x809   : > { %v8509_v29 = vadd.s32 4294967169, %v5924_v12  ;;  %v5598_v58 = vadd.f32 30.0, %v5590_v56 }
 0x80a   : > { %v12767_v52 = vmul.f32 %v5597_v23, %v5562_v20  ;;  %v5567_v22 = vpop.f32.mrf.mxu1  ;;  %v5775_v7 = vadd.s32 1, %v8506_v6  ;;  %15209 = vst [vmem:[#allocation19_spill] sm:$0xff] %v12801_v55 }
 0x80b   : > { %v5930_v36 = vadd.s32 1, %v8509_v29  ;;  %v12772_v31 = vmul.f32 %v5598_v58, %v5536_v3  ;;  %v5568_v27 = vadd.f32 %v5567_v22, %v12757_v9 }
 0x80c   : > { %15201 = vst [vmem:[#allocation11_spill] sm:$0xff] %v12767_v52  ;;  %v6078_v28 = vand.u32 2139095040, %v12767_v52  ;;  %vm5776_vm15 = vcmp.gt.s32.totalorder %v5775_v7, 0 }
 0x80d   : > { %15202 = vst [vmem:[#allocation12_spill] sm:$0xff] %v12772_v31  ;;  %v8718_v42 = vpop.eup %8717  ;;  %vm5931_vm12 = vcmp.gt.s32.totalorder %v5930_v36, 0  ;;  %v6233_v44 = vand.u32 2139095040, %v12772_v31  ;;  %v5577_v63 = vmul.f32 30.0, %v5568_v27 }
 0x80e   : > { %v6079_v48 = vshrl.u32 %v6078_v28, 23  ;;  %v5591_v45 = vmul.f32 10.0, %v8718_v42  ;;  %v5932_v46 = vsel %vm5931_vm12, %v5930_v36, 0  ;;  %v8720_v35 = vpop.eup %8719  ;;  %v12818_v28 = vsel %vm5776_vm15, %v5775_v7, 0 }
 0x80f   : > { %v6234_v30 = vshrl.u32 %v6233_v44, 23  ;;  %v12781_v20 = vand.u32 31, %v5932_v46  ;;  %v5592_v3 = vmul.f32 10.0, %v8720_v35  ;;  %8721 = vtanh.f32 %v5577_v63  ;;  %15211 = vst [vmem:[#allocation21_spill] sm:$0xff] %v12818_v28 }
 0x810   : > { %v8512_v25 = vadd.s32 4294967169, %v6079_v48  ;;  %v5599_v59 = vadd.f32 30.0, %v5591_v45  ;;  %v12820_v58 = vshrl.u32 %v5932_v46, 5  ;;  %v12841_v44 = vand.u32 31, %v12818_v28 }
 0x811   : > { %v8515_v53 = vadd.s32 4294967169, %v6234_v30  ;;  %15205 = vst [vmem:[#allocation15_spill] sm:$0xff] %v12781_v20  ;;  %v12791_v24 = vsub.s32 32, %v12781_v20  ;;  %v5600_v14 = vadd.f32 30.0, %v5592_v3  ;;  %v5946_v19 = vshll.u32 %v15181_v41, %v12781_v20 }
 0x812   : > { %v6085_v54 = vadd.s32 1, %v8512_v25  ;;  %v12783_v5 = vmul.f32 %v5599_v59, %v5565_v11  ;;  %v12805_v11 = vor.u32 %v5637_v62, %v5636_v34  ;;  %15214 = vst [vmem:[#allocation24_spill] sm:$0xff] %v12841_v44  ;;  %v12845_v25 = vshll.u32 %v15182_v60, %v12781_v20 }
 0x813   : > { %v6240_v9 = vadd.s32 1, %v8515_v53  ;;  %15207 = vst [vmem:[#allocation17_spill] sm:$0xff] %v12791_v24  ;;  %v12803_v38 = vmul.f32 %v5600_v14, %v5539_v26  ;;  %v5947_v23 = vshrl.u32 %v15182_v60, %v12791_v24  ;;  %v12826_v36 = vshrl.u32 %v15183_v33, %v12791_v24 }
 0x814   : > { %v6388_v49 = vand.u32 2139095040, %v12783_v5  ;;  %vm6086_vm14 = vcmp.gt.s32.totalorder %v6085_v54, 0  ;;  %15210 = vst [vmem:[#allocation20_spill] sm:$0xff] %v12805_v11  ;;  %v12833_v22 = vsel %vm5645_vm2, %v12805_v11, 920167782  ;;  %vm5955_vm1 = vcmp.lt.s32.totalorder %v12820_v58, 4 }
 0x815   : > { %vm6241_vm13 = vcmp.gt.s32.totalorder %v6240_v9, 0  ;;  %v6087_v40 = vsel %vm6086_vm14, %v6085_v54, 0  ;;  %v8722_v21 = vpop.eup %8721  ;;  %v6543_v29 = vand.u32 2139095040, %v12803_v38  ;;  %v15069_v56 = vand.u32 2147483647, %v12803_v38  ;;  %15212 = vst [vmem:[#allocation22_spill] sm:$0xff] %v12833_v22 }
 0x816   : > { %v6389_v32 = vshrl.u32 %v6388_v49, 23  ;;  %v6242_v13 = vsel %vm6241_vm13, %v6240_v9, 0  ;;  %v12814_v10 = vand.u32 31, %v6087_v40  ;;  %v5593_v43 = vmul.f32 10.0, %v8722_v21 }
 0x817   : > { %v12810_v12 = vand.u32 31, %v6242_v13  ;;  %v6544_v48 = vshrl.u32 %v6543_v29, 23  ;;  %v6547_v39 = vand.u32 8388607, %v15069_v56  ;;  %v12835_v42 = vor.u32 %v5947_v23, %v5946_v19 }
 0x818   : > { %v8518_v50 = vadd.s32 4294967169, %v6389_v32  ;;  %v5601_v51 = vadd.f32 30.0, %v5593_v43  ;;  %v12848_v45 = vsub.s32 32, %v12814_v10  ;;  %v12851_v30 = vshrl.u32 %v6087_v40, 5 }
 0x819   : > { %15213 = vst [vmem:[#allocation23_spill] sm:$0xff] %v12835_v42  ;;  %v12838_v37 = vsub.s32 32, %v12810_v12  ;;  %v8521_v46 = vadd.s32 4294967169, %v6544_v48  ;;  %v6548_v6 = vor.u32 8388608, %v6547_v39  ;;  %v12859_v53 = vshll.u32 %v15181_v41, %v12814_v10 }
 0x81a   : > { %v6395_v26 = vadd.s32 1, %v8518_v50  ;;  %15215 = vst [vmem:[#allocation25_spill] sm:$0xff] %v12848_v45  ;;  %v12853_v59 = vmul.f32 %v5601_v51, %v5568_v27  ;;  %v15068_v63 = vand.u32 2147483647, %v12772_v31  ;;  %v12865_v35 = vsel %vm5955_vm1, %v12835_v42, 920167782 }
 0x81b   : > { %15216 = vst [vmem:[#allocation26_spill] sm:$0xff] %v12851_v30  ;;  %v6257_v27 = vshrl.u32 %v15182_v60, %v12838_v37  ;;  %v6550_v9 = vadd.s32 1, %v8521_v46  ;;  %v12872_v7 = vshrl.u32 %v15182_v60, %v12848_v45  ;;  %v12876_v3 = vshrl.u32 %v15183_v33, %v12848_v45 }
 0x81c   : > { %vm6396_vm3 = vcmp.gt.s32.totalorder %v6395_v26, 0  ;;  %15217 = vst [vmem:[#allocation27_spill] sm:$0xff] %v12865_v35  ;;  %v6698_v49 = vand.u32 2139095040, %v12853_v59  ;;  %v6256_v62 = vshll.u32 %v15181_v41, %v12810_v12  ;;  %v12882_v32 = vshrl.u32 %v15183_v33, %v12838_v37 }
 0x81d   : > { %15218 = vst [vmem:[#allocation28_spill] sm:$0xff] %v12872_v7  ;;  %v6397_v14 = vsel %vm6396_vm3, %v6395_v26, 0  ;;  %vm6551_vm11 = vcmp.gt.s32.totalorder %v6550_v9, 0  ;;  %v12884_v40 = vshll.u32 %v6548_v6, 8  ;;  %v12886_v50 = vshrl.u32 %v6242_v13, 5 }
 0x81e   : > { %15219 = vst [vmem:[#allocation29_spill] sm:$0xff] %v12876_v3  ;;  %v6699_v34 = vshrl.u32 %v6698_v49, 23  ;;  %v12890_v23 = vshll.u32 %v15182_v60, %v12810_v12  ;;  %v6552_v21 = vsel %vm6551_vm11, %v6550_v9, 0  ;;  %v12894_v29 = vand.u32 8388607, %v15068_v63 }
 0x81f   : > { %v12896_v19 = vor.u32 %v6257_v27, %v6256_v62  ;;  %v12898_v43 = vshrl.u32 %v6552_v21, 5  ;;  %v6554_v26 = vand.u32 31, %v6552_v21  ;;  %v12902_v13 = vshrl.u32 %v6397_v14, 5 }
 0x820   : > { %v8524_v48 = vadd.s32 4294967169, %v6699_v34  ;;  %v12904_v51 = vand.u32 31, %v6397_v14  ;;  %v6589_v49 = vand.u32 65535, %v12884_v40  ;;  %v6590_v27 = vshrl.u32 %v12884_v40, 16 }
 0x821   : > { %v6555_v6 = vsub.s32 32, %v6554_v26  ;;  %v6566_v9 = vshll.u32 %v15181_v41, %v6554_v26  ;;  %v6569_v62 = vshll.u32 %v15182_v60, %v6554_v26  ;;  %vm6575_vm4 = vcmp.lt.s32.totalorder %v12898_v43, 4 }
 0x822   : > { %v6705_v34 = vadd.s32 1, %v8524_v48  ;;  %v6557_v21 = vshll.u32 %v15178_v47, %v6554_v26  ;;  %v6560_v54 = vshll.u32 %v15179_v18, %v6554_v26  ;;  %vm6265_vm0 = vcmp.lt.s32.totalorder %v12886_v50, 4 }
 0x823   : > { %v6567_v17 = vshrl.u32 %v15182_v60, %v6555_v6  ;;  %v6570_v14 = vshrl.u32 %v15183_v33, %v6555_v6  ;;  %v6558_v63 = vshrl.u32 %v15179_v18, %v6555_v6  ;;  %v6561_v56 = vshrl.u32 %v15180_v1, %v6555_v6 }
 0x824   : > { %vm6706_vm8 = vcmp.gt.s32.totalorder %v6705_v34, 0  ;;  %v6563_v39 = vshll.u32 %v15180_v1, %v6554_v26  ;;  %v6564_v46 = vshrl.u32 %v15181_v41, %v6555_v6  ;;  %v6556_v61 = vshrl.u32 %v15178_v47, %v6555_v6 }
 0x825   : > { %v6568_v48 = vor.u32 %v6567_v17, %v6566_v9  ;;  %v6571_v0 = vor.u32 %v6570_v14, %v6569_v62  ;;  %v6707_v22 = vsel %vm6706_vm8, %v6705_v34, 0  ;;  %v6559_v11 = vor.u32 %v6558_v63, %v6557_v21 }
 0x826   : > { %v12921_v8 = vand.u32 31, %v6707_v22  ;;  %v6562_v57 = vor.u32 %v6561_v56, %v6560_v54  ;;  %v6565_v28 = vor.u32 %v6564_v46, %v6563_v39  ;;  %v12928_v16 = vshrl.u32 %v6707_v22, 5 }
 0x827   : > { %v6581_v4 = vsel %vm6575_vm4, %v6568_v48, 920167782  ;;  %v6585_v55 = vsel %vm6575_vm4, %v6571_v0, 1326507024  ;;  %vm6572_vm9 = vcmp.lt.s32.totalorder %v12898_v43, 1  ;;  %vm6573_vm5 = vcmp.lt.s32.totalorder %v12898_v43, 2 }
 0x828   : > { %v12932_v17 = vsub.s32 32, %v12921_v8  ;;  %v6721_v63 = vshll.u32 %v15181_v41, %v12921_v8  ;;  %vm6574_vm10 = vcmp.lt.s32.totalorder %v12898_v43, 3  ;;  %v6724_v56 = vshll.u32 %v15182_v60, %v12921_v8 }
 0x829   : > { %v6577_v0 = vsel %vm6575_vm4, %v6565_v28, 2102212464  ;;  %v6580_v22 = vsel %vm6572_vm9, %v6559_v11, %v6562_v57  ;;  %v6582_v54 = vsel %vm6574_vm10, %v6565_v28, %v6581_v4  ;;  %v6576_v46 = vsel %vm6572_vm9, %v6556_v61, %v6559_v11 }
 0x82a   : > { %v6722_v26 = vshrl.u32 %v15182_v60, %v12932_v17  ;;  %v6725_v39 = vshrl.u32 %v15183_v33, %v12932_v17  ;;  %v6583_v6 = vsel %vm6573_vm5, %v6580_v22, %v6582_v54  ;;  %v6578_v9 = vsel %vm6574_vm10, %v6562_v57, %v6577_v0 }
 0x82b   : > { %v6584_v62 = vsel %vm6572_vm9, %v6562_v57, %v6565_v28  ;;  %v6586_v34 = vsel %vm6574_vm10, %v6568_v48, %v6585_v55  ;;  %v6613_v21 = vand.u32 65535, %v6583_v6  ;;  %v6614_v4 = vshrl.u32 %v6583_v6, 16 }
 0x82c   : > { %v6723_v14 = vor.u32 %v6722_v26, %v6721_v63  ;;  %v6726_v44 = vor.u32 %v6725_v39, %v6724_v56  ;;  %v6587_v45 = vsel %vm6573_vm5, %v6584_v62, %v6586_v34  ;;  %v12953_v52 = vsel %vm6265_vm0, %v12896_v19, 920167782 }
 0x82d   : > { %v6591_v35 = vand.u32 65535, %v6587_v45  ;;  %v6592_v61 = vshrl.u32 %v6587_v45, 16  ;;  %v6617_v11 = vmul.u32 %v6613_v21, %v6590_v27  ;;  %vm6730_vm7 = vcmp.lt.s32.totalorder %v12928_v16, 4 }
 0x82e   : > { %v12958_v57 = vsel %vm6573_vm5, %v6576_v46, %v6578_v9  ;;  %v6616_v55 = vmul.u32 %v6614_v4, %v6589_v49  ;;  %v15220_v28 = vand.u32 2147483647, %v12853_v59  ;;  %v6736_v63 = vsel %vm6730_vm7, %v6723_v14, 920167782 }
 0x82f   : > { %v6594_v56 = vmul.u32 %v6592_v61, %v6589_v49  ;;  %v6595_v0 = vmul.u32 %v6591_v35, %v6590_v27  ;;  %v6615_v22 = vmul.u32 %v6613_v21, %v6589_v49  ;;  %v6740_v45 = vsel %vm6730_vm7, %v6726_v44, 1326507024 }
 0x830   : > { %v6702_v48 = vand.u32 8388607, %v15220_v28  ;;  %v6593_v54 = vmul.u32 %v6591_v35, %v6589_v49  ;;  %v6618_v26 = vmul.u32 %v6614_v4, %v6590_v27  ;;  %v6619_v39 = vshll.u32 %v6616_v55, 16 }
 0x831   : > { %v6596_v6 = vmul.u32 %v6592_v61, %v6590_v27  ;;  %v6597_v43 = vshll.u32 %v6594_v56, 16  ;;  %v6620_v46 = vshrl.u32 %v6616_v55, 16  ;;  %v6621_v9 = vshll.u32 %v6617_v11, 16 }
 0x832   : > { %v6598_v62 = vshrl.u32 %v6594_v56, 16  ;;  %v6622_v34 = vshrl.u32 %v6617_v11, 16  ;;  %vm6623_vm12 = vc.u32 %v6615_v22, %v6619_v39  ;;  %v6625_v28 = vadd.s32 %v6619_v39, %v6615_v22 }
 0x833   : > { %v6599_v42 = vshll.u32 %v6595_v0, 16  ;;  %vm6601_vm14 = vc.u32 %v6593_v54, %v6597_v43  ;;  %v6603_v30 = vadd.s32 %v6597_v43, %v6593_v54  ;;  %v6624_v20 = vsel %vm6623_vm12, 1, %v15173_v2 }
 0x834   : > { %v6602_v21 = vsel %vm6601_vm14, 1, %v15173_v2  ;;  %v6626_v24 = vadd.s32 %v6624_v20, %v6618_v26  ;;  %vm6627_vm13 = vc.u32 %v6625_v28, %v6621_v9  ;;  %v6703_v44 = vor.u32 8388608, %v6702_v48 }
 0x835   : > { %v6604_v35 = vadd.s32 %v6602_v21, %v6596_v6  ;;  %vm6605_vm15 = vc.u32 %v6603_v30, %v6599_v42  ;;  %v6628_v49 = vsel %vm6627_vm13, 1, %v15173_v2  ;;  %v6712_v27 = vshll.u32 %v15178_v47, %v12921_v8 }
 0x836   : > { %v6606_v4 = vsel %vm6605_vm15, 1, %v15173_v2  ;;  %v6630_v61 = vadd.s32 %v6628_v49, %v6626_v24  ;;  %v6713_v11 = vshrl.u32 %v15179_v18, %v12932_v17  ;;  %v6715_v55 = vshll.u32 %v15179_v18, %v12921_v8 }
 0x837   : > { %v6608_v56 = vadd.s32 %v6606_v4, %v6604_v35  ;;  %v6716_v20 = vshrl.u32 %v15180_v1, %v12932_v17  ;;  %v6718_v42 = vshll.u32 %v15180_v1, %v12921_v8  ;;  %v6719_v30 = vshrl.u32 %v15181_v41, %v12932_v17 }
 0x838   : > { %v6600_v48 = vshrl.u32 %v6595_v0, 16  ;;  %v12982_v22 = vadd.s32 %v6625_v28, %v6621_v9  ;;  %v6631_v24 = vadd.s32 %v6630_v61, %v6620_v46  ;;  %v6714_v54 = vor.u32 %v6713_v11, %v6712_v27 }
 0x839   : > { %v6609_v26 = vadd.s32 %v6608_v56, %v6598_v62  ;;  %v6717_v39 = vor.u32 %v6716_v20, %v6715_v55  ;;  %v6720_v6 = vor.u32 %v6719_v30, %v6718_v42  ;;  %vm6729_vm3 = vcmp.lt.s32.totalorder %v12928_v16, 3 }
 0x83a   : > { %v6632_v43 = vadd.s32 %v6631_v24, %v6622_v34  ;;  %vm6727_vm11 = vcmp.lt.s32.totalorder %v12928_v16, 1  ;;  %v6741_v21 = vsel %vm6729_vm3, %v6723_v14, %v6740_v45  ;;  %v12988_v8 = vshll.u32 %v6703_v44, 8 }
 0x83b   : > { %v12990_v35 = vadd.s32 %v6609_v26, %v6600_v48  ;;  %vm6728_vm4 = vcmp.lt.s32.totalorder %v12928_v16, 2  ;;  %v6735_v0 = vsel %vm6727_vm11, %v6714_v54, %v6717_v39  ;;  %v6737_v46 = vsel %vm6729_vm3, %v6720_v6, %v6736_v63 }
 0x83c   : > { %v15221_v9 = vor.u32 %v12882_v32, %v12890_v23  ;;  %v6636_v14 = vadd.s32 1, %v6632_v43  ;;  %v6738_v45 = vsel %vm6728_vm4, %v6735_v0, %v6737_v46  ;;  %v6739_v34 = vsel %vm6727_vm11, %v6717_v39, %v6720_v6 }
 0x83d   : > { %v13009_v28 = vsub.s32 32, %v12904_v51  ;;  %v6633_v63 = vmul.u32 %v12884_v40, %v12958_v57  ;;  %vm6635_vm8 = vc.u32 %v12990_v35, %v12982_v22  ;;  %v6742_v32 = vsel %vm6728_vm4, %v6739_v34, %v6741_v21 }
 0x83e   : > { %v13002_v62 = vsel %vm6265_vm0, %v15221_v9, 1326507024  ;;  %v6637_v23 = vsel %vm6635_vm8, %v6636_v14, %v6632_v43  ;;  %v6744_v44 = vand.u32 65535, %v12988_v8  ;;  %v6745_v49 = vshrl.u32 %v12988_v8, 16 }
 0x83f   : > { %v6746_v27 = vand.u32 65535, %v6742_v32  ;;  %v6638_v4 = vadd.s32 %v6637_v23, %v6633_v63  ;;  %v6747_v61 = vshrl.u32 %v6742_v32, 16  ;;  %v6768_v11 = vand.u32 65535, %v6738_v45 }
 0x840   : > { %v6769_v55 = vshrl.u32 %v6738_v45, 16  ;;  %v6411_v56 = vshll.u32 %v15181_v41, %v12904_v51  ;;  %v13023_v40 = vshll.u32 %v15182_v60, %v12904_v51  ;;  %v6711_v57 = vshrl.u32 %v15178_v47, %v12932_v17 }
 0x841   : > { %v6639_v42 = vadd.s32 536870912, %v6638_v4  ;;  %v6732_v30 = vsel %vm6730_vm7, %v6720_v6, 2102212464  ;;  %v6749_v48 = vmul.u32 %v6747_v61, %v6744_v44  ;;  %v6750_v24 = vmul.u32 %v6746_v27, %v6745_v49 }
 0x842   : > { %v6412_v26 = vshrl.u32 %v15182_v60, %v13009_v28  ;;  %v6771_v43 = vmul.u32 %v6769_v55, %v6744_v44  ;;  %v6772_v21 = vmul.u32 %v6768_v11, %v6745_v49  ;;  %v6247_v0 = vshll.u32 %v15178_v47, %v12810_v12 }
 0x843   : > { %v13034_v46 = vshrl.u32 %v6639_v42, 30  ;;  %v6731_v17 = vsel %vm6727_vm11, %v6711_v57, %v6714_v54  ;;  %v6748_v9 = vmul.u32 %v6746_v27, %v6744_v44  ;;  %v6752_v14 = vshll.u32 %v6749_v48, 16 }
 0x844   : > { %v6733_v6 = vsel %vm6729_vm3, %v6717_v39, %v6732_v30  ;;  %v6751_v45 = vmul.u32 %v6747_v61, %v6745_v49  ;;  %v6770_v34 = vmul.u32 %v6768_v11, %v6744_v44  ;;  %v6774_v63 = vshll.u32 %v6771_v43, 16 }
 0x845   : > { %v6641_v32 = vshll.u32 %v13034_v46, 30  ;;  %v6754_v23 = vshll.u32 %v6750_v24, 16  ;;  %vm6756_vm9 = vc.u32 %v6748_v9, %v6752_v14  ;;  %v6758_v20 = vadd.s32 %v6752_v14, %v6748_v9 }
 0x846   : > { %v6757_v15 = vsel %vm6756_vm9, 1, %v15173_v2  ;;  %v6776_v42 = vshll.u32 %v6772_v21, 16  ;;  %vm6778_vm5 = vc.u32 %v6770_v34, %v6774_v63  ;;  %v6780_v31 = vadd.s32 %v6774_v63, %v6770_v34 }
 0x847   : > { %v6642_v3 = vsub.s32 %v6638_v4, %v6641_v32  ;;  %v6759_v54 = vadd.s32 %v6757_v15, %v6751_v45  ;;  %vm6760_vm10 = vc.u32 %v6758_v20, %v6754_v23  ;;  %v6248_v27 = vshrl.u32 %v15179_v18, %v12838_v37 }
 0x848   : > { %v6761_v39 = vsel %vm6760_vm10, 1, %v15173_v2  ;;  %v6773_v44 = vmul.u32 %v6769_v55, %v6745_v49  ;;  %v6779_v61 = vsel %vm6778_vm5, 1, %v15173_v2  ;;  %vm6782_vm7 = vc.u32 %v6780_v31, %v6776_v42 }
 0x849   : > { %vm6643_vm12 = vcmp.lt.s32.totalorder %v6642_v3, 0  ;;  %v6644_v11 = vsub.s32 0, %v6642_v3  ;;  %v6753_v57 = vshrl.u32 %v6749_v48, 16  ;;  %v6763_v30 = vadd.s32 %v6761_v39, %v6759_v54 }
 0x84a   : > { %v6755_v9 = vshrl.u32 %v6750_v24, 16  ;;  %v6775_v14 = vshrl.u32 %v6771_v43, 16  ;;  %v6781_v7 = vadd.s32 %v6779_v61, %v6773_v44  ;;  %v6783_v4 = vsel %vm6782_vm7, 1, %v15173_v2 }
 0x84b   : > { %v6645_v15 = vsel %vm6643_vm12, %v6644_v11, %v6642_v3  ;;  %v6764_v20 = vadd.s32 %v6763_v30, %v6753_v57  ;;  %v6250_v45 = vshll.u32 %v15179_v18, %v12810_v12  ;;  %v6251_v49 = vshrl.u32 %v15180_v1, %v12838_v37 }
 0x84c   : > { %v6646_v55 = vclz %v6645_v15  ;;  %v6785_v34 = vadd.s32 %v6783_v4, %v6781_v7  ;;  %v6253_v63 = vshll.u32 %v15180_v1, %v12810_v12  ;;  %v6254_v48 = vshrl.u32 %v15181_v41, %v12838_v37 }
 0x84d   : > { %v6734_v24 = vsel %vm6728_vm4, %v6731_v17, %v6733_v6  ;;  %v13057_v43 = vadd.s32 %v6764_v20, %v6755_v9  ;;  %v6777_v32 = vshrl.u32 %v6772_v21, 16  ;;  %v13059_v23 = vor.u32 %v6248_v27, %v6247_v0 }
 0x84e   : > { %v8522_v54 = vadd.s32 4294967294, %v6646_v55  ;;  %v6786_v39 = vadd.s32 %v6785_v34, %v6775_v14  ;;  %v13061_v44 = vor.u32 %v6251_v49, %v6250_v45  ;;  %v13063_v61 = vor.u32 %v6254_v48, %v6253_v63 }
 0x84f   : > { %v13065_v7 = vor.u32 %v6412_v26, %v6411_v56  ;;  %v6415_v12 = vshrl.u32 %v15183_v33, %v13009_v28  ;;  %v6634_v16 = vadd.s32 %v12982_v22, %v12990_v35  ;;  %v13071_v17 = vadd.s32 %v6780_v31, %v6776_v42 }
 0x850   : > { %vm8523_vm14 = vcmp.lt.s32.totalorder %v8522_v54, 0  ;;  %v6787_v21 = vadd.s32 %v6786_v39, %v6777_v32  ;;  %v6788_v0 = vmul.u32 %v12988_v8, %v6734_v24  ;;  %vm6262_vm13 = vcmp.lt.s32.totalorder %v12886_v50, 1 }
 0x851   : > { %v6649_v6 = vsel %vm8523_vm14, 0, %v8522_v54  ;;  %vm6790_vm15 = vc.u32 %v13057_v43, %v13071_v17  ;;  %vm6264_vm3 = vcmp.lt.s32.totalorder %v12886_v50, 3  ;;  %v6270_v56 = vsel %vm6262_vm13, %v13059_v23, %v13061_v44 }
 0x852   : > { %v6650_v22 = vsub.s32 32, %v6649_v6  ;;  %v6654_v31 = vsub.s32 4294967266, %v6649_v6  ;;  %v6791_v35 = vadd.s32 1, %v6787_v21  ;;  %v6272_v8 = vsel %vm6264_vm3, %v13063_v61, %v12953_v52 }
 0x853   : > { %v6664_v26 = vsub.s32 4, %v13034_v46  ;;  %vm6263_vm11 = vcmp.lt.s32.totalorder %v12886_v50, 2  ;;  %v6274_v42 = vsel %vm6262_vm13, %v13061_v44, %v13063_v61  ;;  %v6276_v27 = vsel %vm6264_vm3, %v12896_v19, %v13002_v62 }
 0x854   : > { %v6651_v11 = vshll.u32 %v6642_v3, %v6649_v6  ;;  %v6652_v57 = vshrl.u32 %v6634_v16, %v6650_v22  ;;  %v6655_v30 = vadd.s32 127, %v6654_v31  ;;  %v6792_v9 = vsel %vm6790_vm15, %v6791_v35, %v6787_v21 }
 0x855   : > { %v6793_v14 = vadd.s32 %v6792_v9, %v6788_v0  ;;  %v13098_v52 = vsel %vm6263_vm11, %v6270_v56, %v6272_v8  ;;  %v6277_v4 = vsel %vm6263_vm11, %v6274_v42, %v6276_v27  ;;  %v15222_v15 = vor.u32 8388608, %v12894_v29 }
 0x856   : > { %v6653_v45 = vor.u32 %v6652_v57, %v6651_v11  ;;  %v6656_v49 = vshll.u32 %v6655_v30, 23  ;;  %v6281_v55 = vand.u32 65535, %v6277_v4  ;;  %v6282_v19 = vshrl.u32 %v6277_v4, 16 }
 0x857   : > { %v13104_v20 = vshll.u32 %v15222_v15, 8  ;;  %vm6542_vm4 = vcmp.lt.s32.totalorder %v12803_v38, 0  ;;  %v15223_v3 = vand.u32 2147483647, %v12803_v38  ;;  %v6794_v34 = vadd.s32 536870912, %v6793_v14 }
 0x858   : > { %v6416_v48 = vor.u32 %v6415_v12, %v13023_v40  ;;  %v6657_v29 = vor.u32 4788187, %v6656_v49  ;;  %v6665_v24 = vsel %vm6542_vm4, %v6664_v26, %v13034_v46  ;;  %vm6420_vm9 = vcmp.lt.s32.totalorder %v12902_v13, 4 }
 0x859   : > { %vm13109_vm8 = vcmp.le.f32.partialorder %v15223_v3, 0.7853982  ;;  %v6279_v63 = vand.u32 65535, %v13104_v20  ;;  %v6280_v32 = vshrl.u32 %v13104_v20, 16  ;;  %v13120_v54 = vshrl.u32 %v6794_v34, 30 }
 0x85a   : > { %v6304_v16 = vshrl.u32 %v13098_v52, 16  ;;  %v13126_v21 = vsel %vm6420_vm9, %v13065_v7, 920167782  ;;  %v6658_v40 = vand.u32 2147483647, %v6657_v29  ;;  %v6660_v12 = vcvt.s32.f32 %v6653_v45 }
 0x85b   : > { %v6284_v39 = vmul.u32 %v6282_v19, %v6279_v63  ;;  %v6285_v0 = vmul.u32 %v6281_v55, %v6280_v32  ;;  %v6667_v46 = vsel %vm13109_vm8, 0, %v6665_v24  ;;  %v6796_v6 = vshll.u32 %v13120_v54, 30 }
 0x85c   : > { %v6283_v56 = vmul.u32 %v6281_v55, %v6279_v63  ;;  %v13133_v31 = vsel %vm6420_vm9, %v6416_v48, 1326507024  ;;  %v6661_v35 = vmul.f32 %v6660_v12, %v6658_v40  ;;  %v6286_v8 = vmul.u32 %v6282_v19, %v6280_v32 }
 0x85d   : > { %v6287_v22 = vshll.u32 %v6284_v39, 16  ;;  %v6303_v26 = vand.u32 65535, %v13098_v52  ;;  %v13136_v42 = vsub.s32 %v6793_v14, %v6796_v6  ;;  %v13138_v11 = vmul.u32 %v6304_v16, %v6279_v63 }
 0x85e   : > { %v6662_v57 = vxor.u32 2147483648, %v6661_v35  ;;  %v6684_v30 = vadd.s32 3, %v6667_v46  ;;  %v6289_v9 = vshll.u32 %v6285_v0, 16  ;;  %v6246_v45 = vshrl.u32 %v15178_v47, %v12838_v37 }
 0x85f   : > { %vm6291_vm5 = vc.u32 %v6283_v56, %v6287_v22  ;;  %v6293_v27 = vadd.s32 %v6287_v22, %v6283_v56  ;;  %vm6798_vm10 = vcmp.lt.s32.totalorder %v13136_v42, 0  ;;  %v6799_v15 = vsub.s32 0, %v13136_v42 }
 0x860   : > { %v6292_v4 = vsel %vm6291_vm5, 1, %v15173_v2  ;;  %v6663_v14 = vsel %vm6542_vm4, %v6662_v57, %v6661_v35  ;;  %v6267_v52 = vsel %vm6265_vm0, %v13063_v61, 2102212464  ;;  %v13150_v55 = vmul.u32 %v6303_v26, %v6280_v32 }
 0x861   : > { %v6294_v49 = vadd.s32 %v6292_v4, %v6286_v8  ;;  %vm6295_vm7 = vc.u32 %v6293_v27, %v6289_v9  ;;  %v13155_v19 = vsel %vm13109_vm8, %v12803_v38, %v6663_v14  ;;  %v6800_v3 = vsel %vm6798_vm10, %v6799_v15, %v13136_v42 }
 0x862   : > { %v6296_v37 = vsel %vm6295_vm7, 1, %v15173_v2  ;;  %v6309_v34 = vshll.u32 %v13138_v11, 16  ;;  %v6668_v48 = vmul.f32 %v13155_v19, %v13155_v19  ;;  %v13162_v29 = vand.u32 3, %v6684_v30 }
 0x863   : > { %v6801_v61 = vclz %v6800_v3  ;;  %v6298_v24 = vadd.s32 %v6296_v37, %v6294_v49  ;;  %v6789_v40 = vadd.s32 %v13071_v17, %v13057_v43  ;;  %v6266_v62 = vsel %vm6262_vm13, %v6246_v45, %v13059_v23 }
 0x864   : > { %v6288_v12 = vshrl.u32 %v6284_v39, 16  ;;  %v6305_v46 = vmul.u32 %v6303_v26, %v6279_v63  ;;  %v6669_v6 = vmul.f32 -0.001358992, %v6668_v48  ;;  %v6676_v56 = vmul.f32 -0.00019511016, %v6668_v48 }
 0x865   : > { %v8525_v22 = vadd.s32 4294967294, %v6801_v61  ;;  %v6268_v35 = vsel %vm6264_vm3, %v13061_v44, %v6267_v52  ;;  %v6311_v27 = vshll.u32 %v13150_v55, 16  ;;  %v6290_v17 = vshrl.u32 %v6285_v0, 16 }
 0x866   : > { %v6299_v8 = vadd.s32 %v6298_v24, %v6288_v12  ;;  %vm6313_vm0 = vc.u32 %v6305_v46, %v6309_v34  ;;  %v6315_v57 = vadd.s32 %v6309_v34, %v6305_v46  ;;  %v6670_v30 = vadd.f32 0.041655596, %v6669_v6 }
 0x867   : > { %v6677_v43 = vadd.f32 0.008332121, %v6676_v56  ;;  %vm8526_vm12 = vcmp.lt.s32.totalorder %v8525_v22, 0  ;;  %v6308_v23 = vmul.u32 %v6304_v16, %v6280_v32  ;;  %v6314_v63 = vsel %vm6313_vm0, 1, %v15173_v2 }
 0x868   : > { %v6804_v9 = vsel %vm8526_vm12, 0, %v8525_v22  ;;  %vm6317_vm14 = vc.u32 %v6315_v57, %v6311_v27  ;;  %v6671_v39 = vmul.f32 %v6670_v30, %v6668_v48  ;;  %v6385_v15 = vand.u32 2147483647, %v12783_v5 }
 0x869   : > { %v6678_v26 = vmul.f32 %v6677_v43, %v6668_v48  ;;  %v6805_v4 = vsub.s32 32, %v6804_v9  ;;  %vm6697_vm13 = vcmp.lt.s32.totalorder %v12853_v59, 0  ;;  %v6809_v44 = vsub.s32 4294967266, %v6804_v9 }
 0x86a   : > { %v13176_v45 = vadd.s32 %v6299_v8, %v6290_v17  ;;  %v6316_v49 = vadd.s32 %v6314_v63, %v6308_v23  ;;  %v6318_v14 = vsel %vm6317_vm14, 1, %v15173_v2  ;;  %v6672_v52 = vadd.f32 -0.4999988, %v6671_v39 }
 0x86b   : > { %v6679_v0 = vadd.f32 -0.16666654, %v6678_v26  ;;  %v6806_v32 = vshll.u32 %v13136_v42, %v6804_v9  ;;  %v6807_v16 = vshrl.u32 %v6789_v40, %v6805_v4  ;;  %vm6687_vm15 = vcmp.eq.s32.totalorder %v13162_v29, 0 }
 0x86c   : > { %vm6690_vm3 = vcmp.eq.s32.totalorder %v13162_v29, 2  ;;  %v6810_v3 = vadd.s32 127, %v6809_v44  ;;  %v6269_v37 = vsel %vm6263_vm11, %v6266_v62, %v6268_v35  ;;  %v6310_v34 = vshrl.u32 %v13138_v11, 16 }
 0x86d   : > { %v6320_v61 = vadd.s32 %v6318_v14, %v6316_v49  ;;  %v6673_v24 = vmul.f32 %v6672_v52, %v6668_v48  ;;  %v6680_v12 = vmul.f32 %v6679_v0, %v6668_v48  ;;  %vm6686_vm4 = vcmp.lt.s32.totalorder %v13162_v29, 2 }
 0x86e   : > { %v15226_v46 = vand.u32 2147483647, %v12853_v59  ;;  %v6808_v40 = vor.u32 %v6807_v16, %v6806_v32  ;;  %v13192_v6 = vadd.s32 %v6315_v57, %v6311_v27  ;;  %vm6683_vm5 = vweird.f32 %v12803_v38 }
 0x86f   : > { %v6811_v50 = vshll.u32 %v6810_v3, 23  ;;  %v6819_v62 = vsub.s32 4, %v13120_v54  ;;  %v6312_v11 = vshrl.u32 %v13150_v55, 16  ;;  %v6321_v56 = vadd.s32 %v6320_v61, %v6310_v34 }
 0x870   : > { %vm13188_vm8 = vcmp.le.f32.partialorder %v15226_v46, 0.7853982  ;;  %v6674_v48 = vadd.f32 1.0, %v6673_v24  ;;  %v6681_v22 = vadd.f32 1.0, %v6680_v12  ;;  %vm6325_vm11 = vc.u32 %v13176_v45, %v13192_v6 }
 0x871   : > { %v6392_v35 = vand.u32 8388607, %v6385_v15  ;;  %v6812_v8 = vor.u32 4788187, %v6811_v50  ;;  %v6815_v30 = vcvt.s32.f32 %v6808_v40  ;;  %v6322_v27 = vadd.s32 %v6321_v56, %v6312_v11 }
 0x872   : > { %v6406_v57 = vshrl.u32 %v15180_v1, %v13009_v28  ;;  %v6682_v43 = vmul.f32 %v6681_v22, %v13155_v19  ;;  %v6691_v17 = vxor.u32 2147483648, %v6674_v48  ;;  %v6403_v55 = vshrl.u32 %v15179_v18, %v13009_v28 }
 0x873   : > { %v6405_v9 = vshll.u32 %v15179_v18, %v12904_v51  ;;  %v6813_v23 = vand.u32 2147483647, %v6812_v8  ;;  %v6326_v63 = vadd.s32 1, %v6322_v27  ;;  %v6408_v39 = vshll.u32 %v15180_v1, %v12904_v51 }
 0x874   : > { %v6409_v26 = vshrl.u32 %v15181_v41, %v13009_v28  ;;  %v6688_v4 = vxor.u32 2147483648, %v6682_v43  ;;  %v6820_v19 = vsel %vm6697_vm13, %v6819_v62, %v13120_v54  ;;  %v6323_v44 = vmul.u32 %v13104_v20, %v6269_v37 }
 0x875   : > { %v6402_v49 = vshll.u32 %v15178_v47, %v12904_v51  ;;  %v6816_v14 = vmul.f32 %v6815_v30, %v6813_v23  ;;  %v6327_v52 = vsel %vm6325_vm11, %v6326_v63, %v6322_v27  ;;  %v13221_v0 = vor.u32 %v6406_v57, %v6405_v9 }
 0x876   : > { %v13223_v32 = vor.u32 %v6409_v26, %v6408_v39  ;;  %v6689_v16 = vsel %vm6687_vm15, %v6674_v48, %v6688_v4  ;;  %v6692_v54 = vsel %vm6690_vm3, %v6691_v17, %v6682_v43  ;;  %v6328_v3 = vadd.s32 %v6327_v52, %v6323_v44 }
 0x877   : > { %v6393_v20 = vor.u32 8388608, %v6392_v35  ;;  %v6693_v51 = vsel %vm6686_vm4, %v6689_v16, %v6692_v54  ;;  %v6817_v37 = vxor.u32 2147483648, %v6816_v14  ;;  %v6822_v34 = vsel %vm13188_vm8, 0, %v6820_v19 }
 0x878   : > { %v13233_v61 = vor.u32 %v6403_v55, %v6402_v49  ;;  %v6694_v24 = vsel %vm6683_vm5, nan, %v6693_v51  ;;  %v6329_v12 = vadd.s32 536870912, %v6328_v3  ;;  %vm6417_vm10 = vcmp.lt.s32.totalorder %v12902_v13, 1  ;;  %v15230_v55 = vld [vmem:[#allocation28_spill] sm:$0xff] }
 0x879   : > { %vm6419_vm7 = vcmp.lt.s32.totalorder %v12902_v13, 3  ;;  %6895 = vmatpush.msra.mxu2 %v6694_v24  ;;  %v6818_v46 = vsel %vm6697_vm13, %v6817_v37, %v6816_v14  ;;  %vm6418_vm0 = vcmp.lt.s32.totalorder %v12902_v13, 2  ;;  %v6429_v29 = vsel %vm6417_vm10, %v13221_v0, %v13223_v32 }
 0x87a   : > { %v6431_v38 = vsel %vm6419_vm7, %v13065_v7, %v13133_v31  ;;  %v13253_v40 = vsel %vm13188_vm8, %v12853_v59, %v6818_v46  ;;  %v13255_v50 = vshrl.u32 %v6329_v12, 30  ;;  %v13259_v11 = vshll.u32 %v6393_v20, 8 }
 0x87b   : > { %v6432_v62 = vsel %vm6418_vm0, %v6429_v29, %v6431_v38  ;;  %v6823_v56 = vmul.f32 %v13253_v40, %v13253_v40  ;;  %v6839_v48 = vadd.s32 3, %v6822_v34  ;;  %v6425_v7 = vsel %vm6417_vm10, %v13233_v61, %v13221_v0 }
 0x87c   : > { %v6437_v31 = vshrl.u32 %v6432_v62, 16  ;;  %v6331_v42 = vshll.u32 %v13255_v50, 30  ;;  %v6427_v22 = vsel %vm6419_vm7, %v13223_v32, %v13126_v21  ;;  %v6434_v35 = vand.u32 65535, %v13259_v11 }
 0x87d   : > { %v6436_v8 = vand.u32 65535, %v6432_v62  ;;  %v15229_v30 = vor.u32 %v12826_v36, %v12845_v25  ;;  %v13282_v57 = vshll.u32 %v15182_v60, %v12814_v10  ;;  %v6824_v43 = vmul.f32 -0.001358992, %v6823_v56  ;;  %v15231_v36 = vld [vmem:[#allocation29_spill] sm:$0xff] }
 0x87e   : > { %v6831_v17 = vmul.f32 -0.00019511016, %v6823_v56  ;;  %v13286_v9 = vor.u32 %v15230_v55, %v12859_v53  ;;  %v13288_v21 = vsub.s32 %v6328_v3, %v6331_v42  ;;  %v6435_v23 = vshrl.u32 %v13259_v11, 16 }
 0x87f   : > { %v13278_v27 = vsel %vm5955_vm1, %v15229_v30, 1326507024  ;;  %v13291_v63 = vmul.u32 %v6437_v31, %v6434_v35  ;;  %v6106_v25 = vor.u32 %v15231_v36, %v13282_v57  ;;  %v6825_v39 = vadd.f32 0.041655596, %v6824_v43 }
 0x880   : > { %v6832_v26 = vadd.f32 0.008332121, %v6831_v17  ;;  %v6428_v4 = vsel %vm6418_vm0, %v6425_v7, %v6427_v22  ;;  %v13297_v19 = vand.u32 3, %v6839_v48  ;;  %vm6333_vm12 = vcmp.lt.s32.totalorder %v13288_v21, 0 }
 0x881   : > { %v6334_v53 = vsub.s32 0, %v13288_v21  ;;  %v13301_v44 = vmul.u32 %v6436_v8, %v6435_v23  ;;  %v6826_v49 = vmul.f32 %v6825_v39, %v6823_v56  ;;  %v6438_v52 = vmul.u32 %v6436_v8, %v6434_v35 }
 0x882   : > { %v6833_v14 = vmul.f32 %v6832_v26, %v6823_v56  ;;  %v6442_v16 = vshll.u32 %v13291_v63, 16  ;;  %v6324_v54 = vadd.s32 %v13192_v6, %v13176_v45  ;;  %v6401_v20 = vshrl.u32 %v15178_v47, %v13009_v28 }
 0x883   : > { %v6335_v3 = vsel %vm6333_vm12, %v6334_v53, %v13288_v21  ;;  %v6459_v51 = vshrl.u32 %v6428_v4, 16  ;;  %v6827_v37 = vadd.f32 -0.4999988, %v6826_v49  ;;  %vm6842_vm13 = vcmp.eq.s32.totalorder %v13297_v19, 0 }
 0x884   : > { %v6834_v34 = vadd.f32 -0.16666654, %v6833_v14  ;;  %v6336_v24 = vclz %v6335_v3  ;;  %vm6446_vm14 = vc.u32 %v6438_v52, %v6442_v16  ;;  %vm6845_vm15 = vcmp.eq.s32.totalorder %v13297_v19, 2 }
 0x885   : > { %v6441_v12 = vmul.u32 %v6437_v31, %v6435_v23  ;;  %v6444_v46 = vshll.u32 %v13301_v44, 16  ;;  %v6447_v29 = vsel %vm6446_vm14, 1, %v15173_v2  ;;  %v6458_v45 = vand.u32 65535, %v6428_v4 }
 0x886   : > { %v6828_v6 = vmul.f32 %v6827_v37, %v6823_v56  ;;  %v6835_v38 = vmul.f32 %v6834_v34, %v6823_v56  ;;  %vm6841_vm3 = vcmp.lt.s32.totalorder %v13297_v19, 2  ;;  %v8516_v28 = vadd.s32 4294967294, %v6336_v24  ;;  %v15233_v19 = vld [vmem:[#allocation9_spill] sm:$0xff] }
 0x887   : > { %v6448_v62 = vadd.s32 %v6442_v16, %v6438_v52  ;;  %vm6838_vm4 = vweird.f32 %v12853_v59  ;;  %v6421_v48 = vsel %vm6417_vm10, %v6401_v20, %v13233_v61  ;;  %v6422_v7 = vsel %vm6420_vm9, %v13223_v32, 2102212464  ;;  %v15232_v20 = vld [vmem:[#allocation12_spill] sm:$0xff] }
 0x888   : > { %v6449_v31 = vadd.s32 %v6447_v29, %v6441_v12  ;;  %v6461_v42 = vmul.u32 %v6459_v51, %v6434_v35  ;;  %v6829_v22 = vadd.f32 1.0, %v6828_v6  ;;  %v6836_v8 = vadd.f32 1.0, %v6835_v38 }
 0x889   : > { %vm8517_vm8 = vcmp.lt.s32.totalorder %v8516_v28, 0  ;;  %vm6450_vm5 = vc.u32 %v6448_v62, %v6444_v46  ;;  %v6462_v43 = vmul.u32 %v6458_v45, %v6435_v23  ;;  %v6423_v61 = vsel %vm6419_vm7, %v13221_v0, %v6422_v7 }
 0x88a   : > { %v6339_v56 = vsel %vm8517_vm8, 0, %v8516_v28  ;;  %v6451_v30 = vsel %vm6450_vm5, 1, %v15173_v2  ;;  %v6464_v17 = vshll.u32 %v6461_v42, 16  ;;  %v6837_v55 = vmul.f32 %v6836_v8, %v13253_v40 }
 0x88b   : > { %v6846_v39 = vxor.u32 2147483648, %v6829_v22  ;;  %v6340_v26 = vsub.s32 32, %v6339_v56  ;;  %v6344_v32 = vsub.s32 4294967266, %v6339_v56  ;;  %v6443_v4 = vshrl.u32 %v13291_v63, 16 }
 0x88c   : > { %v6453_v53 = vadd.s32 %v6451_v30, %v6449_v31  ;;  %v6460_v49 = vmul.u32 %v6458_v45, %v6434_v35  ;;  %v6843_v14 = vxor.u32 2147483648, %v6837_v55  ;;  %v6341_v52 = vshll.u32 %v13288_v21, %v6339_v56  ;;  %v15234_v56 = vld [vmem:[#allocation17_spill] sm:$0xff] }
 0x88d   : > { %v6342_v16 = vshrl.u32 %v6324_v54, %v6340_v26  ;;  %v6463_v3 = vmul.u32 %v6459_v51, %v6435_v23  ;;  %vm6232_vm9 = vcmp.lt.s32.totalorder %v15232_v20, 0  ;;  %v6345_v37 = vadd.s32 127, %v6344_v32 }
 0x88e   : > { %v6466_v40 = vshll.u32 %v6462_v43, 16  ;;  %vm6468_vm11 = vc.u32 %v6460_v49, %v6464_v17  ;;  %v6470_v34 = vadd.s32 %v6464_v17, %v6460_v49  ;;  %v6844_v24 = vsel %vm6842_vm13, %v6829_v22, %v6843_v14  ;;  %v15235_v17 = vld [vmem:[#allocation15_spill] sm:$0xff] }
 0x88f   : > { %v6847_v0 = vsel %vm6845_vm15, %v6846_v39, %v6837_v55  ;;  %v6454_v63 = vadd.s32 %v6453_v53, %v6443_v4  ;;  %v6469_v35 = vsel %vm6468_vm11, 1, %v15173_v2  ;;  %v6343_v54 = vor.u32 %v6342_v16, %v6341_v52 }
 0x890   : > { %v6848_v21 = vsel %vm6841_vm3, %v6844_v24, %v6847_v0  ;;  %v6346_v23 = vshll.u32 %v6345_v37, 23  ;;  %v6471_v51 = vadd.s32 %v6469_v35, %v6463_v3  ;;  %v6424_v46 = vsel %vm6418_vm0, %v6421_v48, %v6423_v61 }
 0x891   : > { %v6849_v12 = vsel %vm6838_vm4, nan, %v6848_v21  ;;  %v6445_v29 = vshrl.u32 %v13301_v44, 16  ;;  %vm6472_vm10 = vc.u32 %v6470_v34, %v6466_v40  ;;  %v6354_v6 = vsub.s32 4, %v13255_v50 }
 0x892   : > { %6924 = vmatpush.msra.mxu3 %v6849_v12  ;;  %v6347_v45 = vor.u32 4788187, %v6346_v23  ;;  %v6473_v38 = vsel %vm6472_vm10, 1, %v15173_v2  ;;  %v5920_v28 = vand.u32 2147483647, %v15233_v19  ;;  %v6465_v7 = vshrl.u32 %v6461_v42, 16 }
 0x893   : > { %v13344_v62 = vadd.s32 %v6454_v63, %v6445_v29  ;;  %v6467_v31 = vshrl.u32 %v6462_v43, 16  ;;  %v6475_v59 = vadd.s32 %v6473_v38, %v6471_v51  ;;  %v6350_v8 = vcvt.s32.f32 %v6343_v54  ;;  %v15236_v42 = vld [vmem:[#allocation26_spill] sm:$0xff] }
 0x894   : > { %v6348_v22 = vand.u32 2147483647, %v6347_v45  ;;  %v13346_v13 = vadd.s32 %v6470_v34, %v6466_v40  ;;  %v5927_v44 = vand.u32 8388607, %v5920_v28  ;;  %v5938_v30 = vshrl.u32 %v15179_v18, %v15234_v56  ;;  %v15237_v40 = vld [vmem:[#allocation23_spill] sm:$0xff] }
 0x895   : > { %v6476_v48 = vadd.s32 %v6475_v59, %v6465_v7  ;;  %v5940_v55 = vshll.u32 %v15179_v18, %v15235_v17  ;;  %v5941_v39 = vshrl.u32 %v15180_v1, %v15234_v56  ;;  %vm6110_vm7 = vcmp.lt.s32.totalorder %v15236_v42, 4 }
 0x896   : > { %v6351_v43 = vmul.f32 %v6350_v8, %v6348_v22  ;;  %v5937_v26 = vshll.u32 %v15178_v47, %v15235_v17  ;;  %v5943_v61 = vshll.u32 %v15180_v1, %v15235_v17  ;;  %v5944_v32 = vshrl.u32 %v15181_v41, %v15234_v56 }
 0x897   : > { %v6355_v4 = vsel %vm6232_vm9, %v6354_v6, %v13255_v50  ;;  %v6477_v53 = vadd.s32 %v6476_v48, %v6467_v31  ;;  %vm6480_vm0 = vc.u32 %v13344_v62, %v13346_v13  ;;  %v5942_v49 = vor.u32 %v5941_v39, %v5940_v55 }
 0x898   : > { %v6352_v14 = vxor.u32 2147483648, %v6351_v43  ;;  %v5939_v52 = vor.u32 %v5938_v30, %v5937_v26  ;;  %v5945_v16 = vor.u32 %v5944_v32, %v5943_v61  ;;  %vm5954_vm12 = vcmp.lt.s32.totalorder %v12820_v58, 3 }
 0x899   : > { %v6481_v3 = vadd.s32 1, %v6477_v53  ;;  %v5928_v37 = vor.u32 8388608, %v5927_v44  ;;  %vm5952_vm14 = vcmp.lt.s32.totalorder %v12820_v58, 1  ;;  %v5966_v34 = vsel %vm5954_vm12, %v15237_v40, %v13278_v27 }
 0x89a   : > { %v15238_v50 = vand.u32 2147483647, %v15232_v20  ;;  %v6353_v0 = vsel %vm6232_vm9, %v6352_v14, %v6351_v43  ;;  %v6478_v63 = vmul.u32 %v13259_v11, %v6424_v46  ;;  %v5964_v35 = vsel %vm5952_vm14, %v5942_v49, %v5945_v16  ;;  %v15241_v46 = vld [vmem:[#allocation27_spill] sm:$0xff] }
 0x89b   : > { %v6482_v54 = vsel %vm6480_vm0, %v6481_v3, %v6477_v53  ;;  %vm5953_vm15 = vcmp.lt.s32.totalorder %v12820_v58, 2  ;;  %v5960_v51 = vsel %vm5952_vm14, %v5939_v52, %v5942_v49  ;;  %v5962_v29 = vsel %vm5954_vm12, %v5945_v16, %v15241_v46 }
 0x89c   : > { %vm13376_vm13 = vcmp.le.f32.partialorder %v15238_v50, 0.7853982  ;;  %v6483_v23 = vadd.s32 %v6482_v54, %v6478_v63  ;;  %v5967_v12 = vsel %vm5953_vm15, %v5964_v35, %v5966_v34  ;;  %v13405_v45 = vshll.u32 %v5928_v37, 8 }
 0x89d   : > { %v13388_v21 = vsel %vm13376_vm13, %v15232_v20, %v6353_v0  ;;  %v6357_v27 = vsel %vm13376_vm13, 0, %v6355_v4  ;;  %v5971_v6 = vand.u32 65535, %v5967_v12  ;;  %v5972_v38 = vshrl.u32 %v5967_v12, 16 }
 0x89e   : > { %v6358_v11 = vmul.f32 %v13388_v21, %v13388_v21  ;;  %v6374_v59 = vadd.s32 3, %v6357_v27  ;;  %v6484_v22 = vadd.s32 536870912, %v6483_v23  ;;  %v13410_v8 = vsel %vm6110_vm7, %v13286_v9, 920167782 }
 0x89f   : > { %v13417_v44 = vsel %vm6110_vm7, %v6106_v25, 1326507024  ;;  %v5969_v48 = vand.u32 65535, %v13405_v45  ;;  %v5970_v30 = vshrl.u32 %v13405_v45, 16  ;;  %v5963_v43 = vsel %vm5953_vm15, %v5960_v51, %v5962_v29 }
 0x8a0   : > { %v6359_v7 = vmul.f32 -0.001358992, %v6358_v11  ;;  %v6366_v31 = vmul.f32 -0.00019511016, %v6358_v11  ;;  %v13421_v39 = vshrl.u32 %v6484_v22, 30  ;;  %v5936_v26 = vshrl.u32 %v15178_v47, %v15234_v56 }
 0x8a1   : > { %v5957_v57 = vsel %vm5955_vm1, %v5945_v16, 2102212464  ;;  %v5974_v36 = vmul.u32 %v5972_v38, %v5969_v48  ;;  %v13429_v25 = vmul.u32 %v5971_v6, %v5970_v30  ;;  %v6375_v4 = vand.u32 3, %v6374_v59 }
 0x8a2   : > { %v6360_v17 = vadd.f32 0.041655596, %v6359_v7  ;;  %v6367_v55 = vadd.f32 0.008332121, %v6366_v31  ;;  %v6486_v53 = vshll.u32 %v13421_v39, 30  ;;  %v5956_v14 = vsel %vm5952_vm14, %v5936_v26, %v5939_v52 }
 0x8a3   : > { %v5973_v3 = vmul.u32 %v5971_v6, %v5969_v48  ;;  %v5977_v37 = vshll.u32 %v5974_v36, 16  ;;  %v5994_v40 = vshrl.u32 %v5963_v43, 16  ;;  %v5958_v16 = vsel %vm5954_vm12, %v5942_v49, %v5957_v57 }
 0x8a4   : > { %v6361_v61 = vmul.f32 %v6360_v17, %v6358_v11  ;;  %v6368_v32 = vmul.f32 %v6367_v55, %v6358_v11  ;;  %v13434_v56 = vsub.s32 %v6483_v23, %v6486_v53  ;;  %v5976_v24 = vmul.u32 %v5972_v38, %v5970_v30 }
 0x8a5   : > { %v5979_v0 = vshll.u32 %v13429_v25, 16  ;;  %vm5981_vm1 = vc.u32 %v5973_v3, %v5977_v37  ;;  %v5983_v63 = vadd.s32 %v5977_v37, %v5973_v3  ;;  %vm6376_vm3 = vcmp.lt.s32.totalorder %v6375_v4, 2 }
 0x8a6   : > { %v6362_v34 = vadd.f32 -0.4999988, %v6361_v61  ;;  %v6369_v50 = vadd.f32 -0.16666654, %v6368_v32  ;;  %vm6488_vm4 = vcmp.lt.s32.totalorder %v13434_v56, 0  ;;  %v6489_v52 = vsub.s32 0, %v13434_v56 }
 0x8a7   : > { %vm6373_vm8 = vweird.f32 %v15232_v20  ;;  %v5982_v54 = vsel %vm5981_vm1, 1, %v15173_v2  ;;  %vm5985_vm5 = vc.u32 %v5983_v63, %v5979_v0  ;;  %v5993_v23 = vand.u32 65535, %v5963_v43 }
 0x8a8   : > { %v6363_v35 = vmul.f32 %v6362_v34, %v6358_v11  ;;  %v6370_v27 = vmul.f32 %v6369_v50, %v6358_v11  ;;  %v5996_v51 = vmul.u32 %v5994_v40, %v5969_v48  ;;  %v6490_v46 = vsel %vm6488_vm4, %v6489_v52, %v13434_v56 }
 0x8a9   : > { %v5984_v29 = vadd.s32 %v5982_v54, %v5976_v24  ;;  %vm6377_vm9 = vcmp.eq.s32.totalorder %v6375_v4, 0  ;;  %vm6380_vm11 = vcmp.eq.s32.totalorder %v6375_v4, 2  ;;  %vm6387_vm10 = vcmp.lt.s32.totalorder %v12783_v5, 0  ;;  %v15242_v24 = vld [vmem:[#allocation11_spill] sm:$0xff] }
 0x8aa   : > { %v6364_v49 = vadd.f32 1.0, %v6363_v35  ;;  %v6371_v12 = vadd.f32 1.0, %v6370_v27  ;;  %v6491_v11 = vclz %v6490_v46  ;;  %v5986_v6 = vsel %vm5985_vm5, 1, %v15173_v2  ;;  %v15251_v27 = vld [vmem:[#allocation21_spill] sm:$0xff] }
 0x8ab   : > { %v6479_v31 = vadd.s32 %v13346_v13, %v13344_v62  ;;  %v5988_v59 = vadd.s32 %v5986_v6, %v5984_v29  ;;  %v6509_v17 = vsub.s32 4, %v13421_v39  ;;  %v13452_v55 = vsel %vm5953_vm15, %v5956_v14, %v5958_v16 }
 0x8ac   : > { %v6372_v38 = vmul.f32 %v6371_v12, %v13388_v21  ;;  %v6381_v7 = vxor.u32 2147483648, %v6364_v49  ;;  %v8519_v22 = vadd.s32 4294967294, %v6491_v11  ;;  %v5997_v43 = vmul.u32 %v5993_v23, %v5970_v30  ;;  %v15245_v11 = vld [vmem:[#allocation25_spill] sm:$0xff] }
 0x8ad   : > { %v5978_v57 = vshrl.u32 %v5974_v36, 16  ;;  %v5995_v61 = vmul.u32 %v5993_v23, %v5969_v48  ;;  %v5999_v32 = vshll.u32 %v5996_v51, 16  ;;  %v5980_v21 = vshrl.u32 %v13429_v25, 16 }
 0x8ae   : > { %v6378_v26 = vxor.u32 2147483648, %v6372_v38  ;;  %v6382_v53 = vsel %vm6380_vm11, %v6381_v7, %v6372_v38  ;;  %vm8520_vm0 = vcmp.lt.s32.totalorder %v8519_v22, 0  ;;  %v5998_v3 = vmul.u32 %v5994_v40, %v5970_v30 }
 0x8af   : > { %v6494_v13 = vsel %vm8520_vm0, 0, %v8519_v22  ;;  %v5989_v37 = vadd.s32 %v5988_v59, %v5978_v57  ;;  %vm6003_vm12 = vc.u32 %v5995_v61, %v5999_v32  ;;  %v6001_v50 = vshll.u32 %v5997_v43, 16 }
 0x8b0   : > { %v6379_v62 = vsel %vm6377_vm9, %v6364_v49, %v6378_v26  ;;  %v6495_v14 = vsub.s32 32, %v6494_v13  ;;  %v6499_v34 = vsub.s32 4294967266, %v6494_v13  ;;  %v6004_v36 = vsel %vm6003_vm12, 1, %v15173_v2 }
 0x8b1   : > { %v6383_v58 = vsel %vm6376_vm3, %v6379_v62, %v6382_v53  ;;  %v6005_v16 = vadd.s32 %v5999_v32, %v5995_v61  ;;  %v6075_v0 = vand.u32 2147483647, %v15242_v24  ;;  %v6496_v30 = vshll.u32 %v13434_v56, %v6494_v13 }
 0x8b2   : > { %v6384_v48 = vsel %vm6373_vm8, nan, %v6383_v58  ;;  %v6497_v25 = vshrl.u32 %v6479_v31, %v6495_v14  ;;  %v6500_v40 = vadd.s32 127, %v6499_v34  ;;  %v6006_v63 = vadd.s32 %v6004_v36, %v5998_v3  ;;  %v15246_v58 = vld [vmem:[#allocation24_spill] sm:$0xff] }
 0x8b3   : > { %6896 = vmatpush.msra.mxu2 %v6384_v48  ;;  %v6510_v4 = vsel %vm6387_vm10, %v6509_v17, %v13421_v39  ;;  %v6000_v35 = vshrl.u32 %v5996_v51, 16  ;;  %vm6007_vm14 = vc.u32 %v6005_v16, %v6001_v50  ;;  %v6082_v20 = vand.u32 8388607, %v6075_v0 }
 0x8b4   : > { %vm13470_vm13 = vcmp.le.f32.partialorder %v6385_v15, 0.7853982  ;;  %v6498_v52 = vor.u32 %v6497_v25, %v6496_v30  ;;  %v6501_v56 = vshll.u32 %v6500_v40, 23  ;;  %v13474_v54 = vadd.s32 %v5989_v37, %v5980_v21 }
 0x8b5   : > { %v6008_v23 = vsel %vm6007_vm14, 1, %v15173_v2  ;;  %v6002_v49 = vshrl.u32 %v5997_v43, 16  ;;  %v13477_v12 = vadd.s32 %v6005_v16, %v6001_v50  ;;  %v6092_v51 = vshll.u32 %v15178_v47, %v12814_v10 }
 0x8b6   : > { %v6010_v39 = vadd.s32 %v6008_v23, %v6006_v63  ;;  %v6502_v46 = vor.u32 4788187, %v6501_v56  ;;  %v6083_v29 = vor.u32 8388608, %v6082_v20  ;;  %v6093_v15 = vshrl.u32 %v15179_v18, %v15245_v11  ;;  %v15247_v63 = vld [vmem:[#allocation18_spill] sm:$0xff]  ;;  %v15250_v20 = vld [vmem:[#allocation16_spill] sm:$0xff] }
 0x8b7   : > { %v6095_v6 = vshll.u32 %v15179_v18, %v12814_v10  ;;  %v6096_v7 = vshrl.u32 %v15180_v1, %v15245_v11  ;;  %v6098_v31 = vshll.u32 %v15180_v1, %v12814_v10  ;;  %v6099_v59 = vshrl.u32 %v15181_v41, %v15245_v11 }
 0x8b8   : > { %v6011_v38 = vadd.s32 %v6010_v39, %v6000_v35  ;;  %v6503_v22 = vand.u32 2147483647, %v6502_v46  ;;  %v6505_v17 = vcvt.s32.f32 %v6498_v52  ;;  %vm6015_vm15 = vc.u32 %v13474_v54, %v13477_v12 }
 0x8b9   : > { %v13493_v43 = vor.u32 %v6093_v15, %v6092_v51  ;;  %v13495_v57 = vor.u32 %v6096_v7, %v6095_v6  ;;  %v6100_v61 = vor.u32 %v6099_v59, %v6098_v31  ;;  %vm6109_vm1 = vcmp.lt.s32.totalorder %v15236_v42, 3 }
 0x8ba   : > { %v6012_v26 = vadd.s32 %v6011_v38, %v6002_v49  ;;  %v6506_v32 = vmul.f32 %v6505_v17, %v6503_v22  ;;  %vm6107_vm3 = vcmp.lt.s32.totalorder %v15236_v42, 1  ;;  %v6121_v10 = vsel %vm6109_vm1, %v13286_v9, %v13417_v44 }
 0x8bb   : > { %v13503_v53 = vshll.u32 %v6083_v29, 8  ;;  %vm6108_vm4 = vcmp.lt.s32.totalorder %v15236_v42, 2  ;;  %v6115_v3 = vsel %vm6107_vm3, %v13493_v43, %v13495_v57  ;;  %v6117_v62 = vsel %vm6109_vm1, %v6100_v61, %v13410_v8 }
 0x8bc   : > { %v6016_v21 = vadd.s32 1, %v6012_v26  ;;  %v6507_v13 = vxor.u32 2147483648, %v6506_v32  ;;  %v6013_v37 = vmul.u32 %v13405_v45, %v13452_v55  ;;  %v13517_v9 = vsel %vm6108_vm4, %v6115_v3, %v6117_v62 }
 0x8bd   : > { %v6119_v44 = vsel %vm6107_vm3, %v13495_v57, %v6100_v61  ;;  %v13523_v14 = vsub.s32 32, %v15246_v58  ;;  %v6512_v34 = vsel %vm13470_vm13, 0, %v6510_v4  ;;  %v6124_v48 = vand.u32 65535, %v13503_v53  ;;  %v15248_v4 = vld [vmem:[#allocation19_spill] sm:$0xff] }
 0x8be   : > { %v6017_v8 = vsel %vm6015_vm15, %v6016_v21, %v6012_v26  ;;  %v6122_v45 = vsel %vm6108_vm4, %v6119_v44, %v6121_v10  ;;  %v6508_v55 = vsel %vm6387_vm10, %v6507_v13, %v6506_v32  ;;  %v6125_v30 = vshrl.u32 %v13503_v53, 16 }
 0x8bf   : > { %v6018_v50 = vadd.s32 %v6017_v8, %v6013_v37  ;;  %v6126_v36 = vand.u32 65535, %v6122_v45  ;;  %v13538_v16 = vsel %vm13470_vm13, %v12783_v5, %v6508_v55  ;;  %v6127_v25 = vshrl.u32 %v6122_v45, 16 }
 0x8c0   : > { %v6149_v40 = vshrl.u32 %v13517_v9, 16  ;;  %v15249_v35 = vor.u32 %v15247_v63, %v15248_v4  ;;  %v6513_v56 = vmul.f32 %v13538_v16, %v13538_v16  ;;  %v6529_v23 = vadd.s32 3, %v6512_v34 }
 0x8c1   : > { %v6019_v49 = vadd.s32 536870912, %v6018_v50  ;;  %v13552_v39 = vshrl.u32 %v15251_v27, 5  ;;  %v13556_v51 = vshll.u32 %v15181_v41, %v15246_v58  ;;  %v6129_v46 = vmul.u32 %v6127_v25, %v6124_v48 }
 0x8c2   : > { %v13547_v52 = vsel %vm5645_vm2, %v15249_v35, 1326507024  ;;  %v13558_v29 = vmul.u32 %v6126_v36, %v6125_v30  ;;  %v13562_v15 = vshll.u32 %v15182_v60, %v15246_v58  ;;  %v6514_v6 = vmul.f32 -0.001358992, %v6513_v56 }
 0x8c3   : > { %v6521_v38 = vmul.f32 -0.00019511016, %v6513_v56  ;;  %v13564_v7 = vshrl.u32 %v6019_v49, 30  ;;  %v13568_v31 = vshrl.u32 %v15182_v60, %v13523_v14  ;;  %v6128_v59 = vmul.u32 %v6126_v36, %v6124_v48 }
 0x8c4   : > { %v6132_v22 = vshll.u32 %v6129_v46, 16  ;;  %v13570_v17 = vmul.u32 %v6149_v40, %v6124_v48  ;;  %v6515_v26 = vadd.f32 0.041655596, %v6514_v6  ;;  %v13572_v10 = vand.u32 3, %v6529_v23 }
 0x8c5   : > { %v6522_v32 = vadd.f32 0.008332121, %v6521_v38  ;;  %v6021_v21 = vshll.u32 %v13564_v7, 30  ;;  %v6134_v3 = vshll.u32 %v13558_v29, 16  ;;  %v6148_v13 = vand.u32 65535, %v13517_v9 }
 0x8c6   : > { %vm6136_vm8 = vc.u32 %v6128_v59, %v6132_v22  ;;  %v6138_v62 = vadd.s32 %v6132_v22, %v6128_v59  ;;  %v6516_v37 = vmul.f32 %v6515_v26, %v6513_v56  ;;  %v6112_v8 = vsel %vm6110_vm7, %v6100_v61, 2102212464 }
 0x8c7   : > { %v6523_v44 = vmul.f32 %v6522_v32, %v6513_v56  ;;  %v13577_v34 = vsub.s32 %v6018_v50, %v6021_v21  ;;  %v6131_v45 = vmul.u32 %v6127_v25, %v6125_v30  ;;  %v6137_v55 = vsel %vm6136_vm8, 1, %v15173_v2 }
 0x8c8   : > { %vm6140_vm5 = vc.u32 %v6138_v62, %v6134_v3  ;;  %v6154_v36 = vshll.u32 %v13570_v17, 16  ;;  %v6517_v63 = vadd.f32 -0.4999988, %v6516_v37  ;;  %vm6532_vm11 = vcmp.eq.s32.totalorder %v13572_v10, 0 }
 0x8c9   : > { %v6524_v4 = vadd.f32 -0.16666654, %v6523_v44  ;;  %vm6023_vm9 = vcmp.lt.s32.totalorder %v13577_v34, 0  ;;  %v6024_v35 = vsub.s32 0, %v13577_v34  ;;  %vm6535_vm10 = vcmp.eq.s32.totalorder %v13572_v10, 2 }
 0x8ca   : > { %v6139_v9 = vadd.s32 %v6137_v55, %v6131_v45  ;;  %v6141_v50 = vsel %vm6140_vm5, 1, %v15173_v2  ;;  %v6150_v61 = vmul.u32 %v6148_v13, %v6124_v48  ;;  %v6152_v25 = vmul.u32 %v6148_v13, %v6125_v30 }
 0x8cb   : > { %v6518_v23 = vmul.f32 %v6517_v63, %v6513_v56  ;;  %v6525_v49 = vmul.f32 %v6524_v4, %v6513_v56  ;;  %vm6531_vm7 = vcmp.lt.s32.totalorder %v13572_v10, 2  ;;  %v6025_v27 = vsel %vm6023_vm9, %v6024_v35, %v13577_v34 }
 0x8cc   : > { %v6133_v6 = vshrl.u32 %v6129_v46, 16  ;;  %vm6528_vm0 = vweird.f32 %v12783_v5  ;;  %v6026_v38 = vclz %v6025_v27  ;;  %v6143_v59 = vadd.s32 %v6141_v50, %v6139_v9  ;;  %v15252_v27 = vld [vmem:[#allocation8_spill] sm:$0xff] }
 0x8cd   : > { %v6153_v22 = vmul.u32 %v6149_v40, %v6125_v30  ;;  %vm6158_vm12 = vc.u32 %v6150_v61, %v6154_v36  ;;  %v6519_v26 = vadd.f32 1.0, %v6518_v23  ;;  %v6526_v32 = vadd.f32 1.0, %v6525_v49 }
 0x8ce   : > { %v6159_v21 = vsel %vm6158_vm12, 1, %v15173_v2  ;;  %v6160_v3 = vadd.s32 %v6154_v36, %v6150_v61  ;;  %v6014_v48 = vadd.s32 %v13477_v12, %v13474_v54  ;;  %v8510_v56 = vadd.s32 4294967294, %v6026_v38 }
 0x8cf   : > { %v6091_v62 = vshrl.u32 %v15178_v47, %v15245_v11  ;;  %v6156_v13 = vshll.u32 %v6152_v25, 16  ;;  %v6527_v46 = vmul.f32 %v6526_v32, %v13538_v16  ;;  %v6536_v37 = vxor.u32 2147483648, %v6519_v26  ;;  %v15255_v32 = vld [vmem:[#allocation14_spill] sm:$0xff] }
 0x8d0   : > { %v6144_v44 = vadd.s32 %v6143_v59, %v6133_v6  ;;  %v6161_v45 = vadd.s32 %v6159_v21, %v6153_v22  ;;  %vm8511_vm14 = vcmp.lt.s32.totalorder %v8510_v56, 0  ;;  %v6113_v40 = vsel %vm6109_vm1, %v13495_v57, %v6112_v8 }
 0x8d1   : > { %v6111_v30 = vsel %vm6107_vm3, %v6091_v62, %v13493_v43  ;;  %vm6162_vm13 = vc.u32 %v6160_v3, %v6156_v13  ;;  %v6533_v54 = vxor.u32 2147483648, %v6527_v46  ;;  %v6029_v12 = vsel %vm8511_vm14, 0, %v8510_v56  ;;  %v15256_v56 = vld [vmem:[#allocation13_spill] sm:$0xff] }
 0x8d2   : > { %v6044_v11 = vsub.s32 4, %v13564_v7  ;;  %v6135_v55 = vshrl.u32 %v13558_v29, 16  ;;  %v6030_v16 = vsub.s32 32, %v6029_v12  ;;  %v6034_v36 = vsub.s32 4294967266, %v6029_v12 }
 0x8d3   : > { %v6155_v63 = vshrl.u32 %v13570_v17, 16  ;;  %v6163_v4 = vsel %vm6162_vm13, 1, %v15173_v2  ;;  %v6534_v43 = vsel %vm6532_vm11, %v6519_v26, %v6533_v54  ;;  %v6537_v35 = vsel %vm6535_vm10, %v6536_v37, %v6527_v46 }
 0x8d4   : > { %v13611_v57 = vadd.s32 %v6144_v44, %v6135_v55  ;;  %v6165_v8 = vadd.s32 %v6163_v4, %v6161_v45  ;;  %v6538_v9 = vsel %vm6531_vm7, %v6534_v43, %v6537_v35  ;;  %v6031_v29 = vshll.u32 %v13577_v34, %v6029_v12 }
 0x8d5   : > { %v6032_v50 = vshrl.u32 %v6014_v48, %v6030_v16  ;;  %v6035_v61 = vadd.s32 127, %v6034_v36  ;;  %v6539_v17 = vsel %vm6528_vm0, nan, %v6538_v9  ;;  %v6157_v23 = vshrl.u32 %v6152_v25, 16  ;;  %v15257_v16 = vld [vmem:[#allocation20_spill] sm:$0xff] }
 0x8d6   : > { %v6166_v49 = vadd.s32 %v6165_v8, %v6155_v63  ;;  %v5610_v6 = vand.u32 2147483647, %v15252_v27  ;;  %6925 = vmatpush.msra.mxu3 %v6539_v17  ;;  %v6114_v22 = vsel %vm6108_vm4, %v6111_v30, %v6113_v40  ;;  %v13621_v26 = vadd.s32 %v6160_v3, %v6156_v13 }
 0x8d7   : > { %v6033_v38 = vor.u32 %v6032_v50, %v6031_v29  ;;  %v6036_v59 = vshll.u32 %v6035_v61, 23  ;;  %vm13625_vm15 = vcmp.le.f32.partialorder %v5920_v28, 0.7853982  ;;  %vm5922_vm1 = vcmp.lt.s32.totalorder %v15233_v19, 0 }
 0x8d8   : > { %v6167_v5 = vadd.s32 %v6166_v49, %v6157_v23  ;;  %v5617_v34 = vand.u32 8388607, %v5610_v6  ;;  %v6045_v42 = vsel %vm5922_vm1, %v6044_v11, %v13564_v7  ;;  %vm6170_vm3 = vc.u32 %v13611_v57, %v13621_v26 }
 0x8d9   : > { %v6037_v25 = vor.u32 4788187, %v6036_v59  ;;  %v5631_v28 = vshrl.u32 %v15180_v1, %v15255_v32  ;;  %v6168_v21 = vmul.u32 %v13503_v53, %v6114_v22  ;;  %v5630_v62 = vshll.u32 %v15179_v18, %v15256_v56 }
 0x8da   : > { %v6171_v3 = vadd.s32 1, %v6167_v5  ;;  %v5618_v48 = vor.u32 8388608, %v5617_v34  ;;  %v6040_v46 = vcvt.s32.f32 %v6033_v38  ;;  %v5633_v37 = vshll.u32 %v15180_v1, %v15256_v56 }
 0x8db   : > { %v6038_v13 = vand.u32 2147483647, %v6037_v25  ;;  %v5634_v7 = vshrl.u32 %v15181_v41, %v15255_v32  ;;  %v6047_v44 = vsel %vm13625_vm15, 0, %v6045_v42  ;;  %v5628_v53 = vshrl.u32 %v15179_v18, %v15255_v32 }
 0x8dc   : > { %v6172_v45 = vsel %vm6170_vm3, %v6171_v3, %v6167_v5  ;;  %v5632_v30 = vor.u32 %v5631_v28, %v5630_v62  ;;  %vm5644_vm4 = vcmp.lt.s32.totalorder %v15250_v20, 3  ;;  %v13653_v11 = vshrl.u32 %v15183_v33, %v13523_v14 }
 0x8dd   : > { %v6041_v40 = vmul.f32 %v6040_v46, %v6038_v13  ;;  %v6173_v54 = vadd.s32 %v6172_v45, %v6168_v21  ;;  %v5635_v12 = vor.u32 %v5634_v7, %v5633_v37  ;;  %v5627_v55 = vshll.u32 %v15178_v47, %v15256_v56 }
 0x8de   : > { %v5656_v36 = vsel %vm5644_vm4, %v15257_v16, %v13547_v52  ;;  %v13661_v63 = vshll.u32 %v5618_v48, 8  ;;  %v6064_v43 = vadd.s32 3, %v6047_v44  ;;  %vm5642_vm8 = vcmp.lt.s32.totalorder %v15250_v20, 1  ;;  %v15258_v48 = vld [vmem:[#allocation22_spill] sm:$0xff] }
 0x8df   : > { %v6042_v4 = vxor.u32 2147483648, %v6041_v40  ;;  %v6174_v35 = vadd.s32 536870912, %v6173_v54  ;;  %v13666_v8 = vor.u32 %v13568_v31, %v13556_v51  ;;  %v5629_v9 = vor.u32 %v5628_v53, %v5627_v55 }
 0x8e0   : > { %vm5643_vm5 = vcmp.lt.s32.totalorder %v15250_v20, 2  ;;  %v5654_v29 = vsel %vm5642_vm8, %v5632_v30, %v5635_v12  ;;  %v13678_v17 = vand.u32 65535, %v13661_v63  ;;  %v13686_v31 = vshrl.u32 %v13661_v63, 16 }
 0x8e1   : > { %v6043_v52 = vsel %vm5922_vm1, %v6042_v4, %v6041_v40  ;;  %v13673_v50 = vshrl.u32 %v6174_v35, 30  ;;  %v5657_v61 = vsel %vm5643_vm5, %v5654_v29, %v5656_v36  ;;  %v5796_v38 = vor.u32 %v13653_v11, %v13562_v15 }
 0x8e2   : > { %v13683_v51 = vsel %vm13625_vm15, %v15233_v19, %v6043_v52  ;;  %v5661_v23 = vand.u32 65535, %v5657_v61  ;;  %v5662_v49 = vshrl.u32 %v5657_v61, 16  ;;  %v13692_v22 = vand.u32 3, %v6064_v43 }
 0x8e3   : > { %v6048_v59 = vmul.f32 %v13683_v51, %v13683_v51  ;;  %v6176_v5 = vshll.u32 %v13673_v50, 30  ;;  %v5626_v10 = vshrl.u32 %v15178_v47, %v15255_v32  ;;  %v5650_v34 = vsel %vm5642_vm8, %v5629_v9, %v5632_v30 }
 0x8e4   : > { %v13700_v25 = vmul.u32 %v5662_v49, %v13678_v17  ;;  %v13703_v42 = vmul.u32 %v5661_v23, %v13686_v31  ;;  %v5652_v56 = vsel %vm5644_vm4, %v5635_v12, %v15258_v48  ;;  %v5647_v62 = vsel %vm5645_vm2, %v5635_v12, 2102212464 }
 0x8e5   : > { %v6049_v28 = vmul.f32 -0.001358992, %v6048_v59  ;;  %v6056_v21 = vmul.f32 -0.00019511016, %v6048_v59  ;;  %v13705_v3 = vsub.s32 %v6173_v54, %v6176_v5  ;;  %v5646_v32 = vsel %vm5642_vm8, %v5626_v10, %v5629_v9 }
 0x8e6   : > { %v5663_v13 = vmul.u32 %v5661_v23, %v13678_v17  ;;  %v5667_v46 = vshll.u32 %v13700_v25, 16  ;;  %v5653_v45 = vsel %vm5643_vm5, %v5650_v34, %v5652_v56  ;;  %v5669_v53 = vshll.u32 %v13703_v42, 16 }
 0x8e7   : > { %v6050_v37 = vadd.f32 0.041655596, %v6049_v28  ;;  %v6057_v7 = vadd.f32 0.008332121, %v6056_v21  ;;  %vm6178_vm9 = vcmp.lt.s32.totalorder %v13705_v3, 0  ;;  %v6179_v44 = vsub.s32 0, %v13705_v3 }
 0x8e8   : > { %vm5671_vm11 = vc.u32 %v5663_v13, %v5667_v46  ;;  %v5673_v40 = vadd.s32 %v5667_v46, %v5663_v13  ;;  %v5648_v4 = vsel %vm5644_vm4, %v5632_v30, %v5647_v62  ;;  %v5666_v43 = vmul.u32 %v5662_v49, %v13686_v31  ;;  %v15259_v49 = vld [vmem:[#allocation10_spill] sm:$0xff] }
 0x8e9   : > { %v6051_v54 = vmul.f32 %v6050_v37, %v6048_v59  ;;  %v6058_v55 = vmul.f32 %v6057_v7, %v6048_v59  ;;  %v6180_v12 = vsel %vm6178_vm9, %v6179_v44, %v13705_v3  ;;  %v5672_v16 = vsel %vm5671_vm11, 1, %v15173_v2 }
 0x8ea   : > { %v6181_v36 = vclz %v6180_v12  ;;  %vm5675_vm2 = vc.u32 %v5673_v40, %v5669_v53  ;;  %v5683_v29 = vand.u32 65535, %v5653_v45  ;;  %v5684_v52 = vshrl.u32 %v5653_v45, 16 }
 0x8eb   : > { %v6052_v35 = vadd.f32 -0.4999988, %v6051_v54  ;;  %v6059_v9 = vadd.f32 -0.16666654, %v6058_v55  ;;  %vm6067_vm10 = vcmp.eq.s32.totalorder %v13692_v22, 0  ;;  %vm6070_vm7 = vcmp.eq.s32.totalorder %v13692_v22, 2 }
 0x8ec   : > { %v6169_v61 = vadd.s32 %v13621_v26, %v13611_v57  ;;  %v8513_v23 = vadd.s32 4294967294, %v6181_v36  ;;  %v5674_v5 = vadd.s32 %v5672_v16, %v5666_v43  ;;  %vm6066_vm0 = vcmp.lt.s32.totalorder %v13692_v22, 2 }
 0x8ed   : > { %v6053_v10 = vmul.f32 %v6052_v35, %v6048_v59  ;;  %v6060_v34 = vmul.f32 %v6059_v9, %v6048_v59  ;;  %v5676_v30 = vsel %vm5675_vm2, 1, %v15173_v2  ;;  %v5765_v28 = vand.u32 2147483647, %v15259_v49 }
 0x8ee   : > { %vm6063_vm12 = vweird.f32 %v15233_v19  ;;  %vm6077_vm14 = vcmp.lt.s32.totalorder %v15242_v24, 0  ;;  %vm8514_vm13 = vcmp.lt.s32.totalorder %v8513_v23, 0  ;;  %v6199_v21 = vsub.s32 4, %v13673_v50 }
 0x8ef   : > { %v13738_v57 = vsel %vm5643_vm5, %v5646_v32, %v5648_v4  ;;  %v5686_v26 = vmul.u32 %v5684_v52, %v13678_v17  ;;  %v6054_v59 = vadd.f32 1.0, %v6053_v10  ;;  %v6061_v48 = vadd.f32 1.0, %v6060_v34 }
 0x8f0   : > { %v6184_v56 = vsel %vm8514_vm13, 0, %v8513_v23  ;;  %v5687_v62 = vmul.u32 %v5683_v29, %v13686_v31  ;;  %v5678_v37 = vadd.s32 %v5676_v30, %v5674_v5  ;;  %v5668_v53 = vshrl.u32 %v13700_v25, 16 }
 0x8f1   : > { %v6185_v13 = vsub.s32 32, %v6184_v56  ;;  %v6189_v46 = vsub.s32 4294967266, %v6184_v56  ;;  %v5689_v7 = vshll.u32 %v5686_v26, 16  ;;  %v6062_v44 = vmul.f32 %v6061_v48, %v13683_v51 }
 0x8f2   : > { %v6071_v45 = vxor.u32 2147483648, %v6054_v59  ;;  %v5685_v20 = vmul.u32 %v5683_v29, %v13678_v17  ;;  %v6186_v32 = vshll.u32 %v13705_v3, %v6184_v56  ;;  %v5688_v55 = vmul.u32 %v5684_v52, %v13686_v31 }
 0x8f3   : > { %v6187_v40 = vshrl.u32 %v6169_v61, %v6185_v13  ;;  %v6190_v54 = vadd.s32 127, %v6189_v46  ;;  %vm5800_vm15 = vcmp.lt.s32.totalorder %v13552_v39, 4  ;;  %v6068_v12 = vxor.u32 2147483648, %v6062_v44 }
 0x8f4   : > { %vm13750_vm1 = vcmp.le.f32.partialorder %v6075_v0, 0.7853982  ;;  %v5691_v51 = vshll.u32 %v5687_v62, 16  ;;  %vm5693_vm3 = vc.u32 %v5685_v20, %v5689_v7  ;;  %v5695_v25 = vadd.s32 %v5689_v7, %v5685_v20 }
 0x8f5   : > { %v6188_v36 = vor.u32 %v6187_v40, %v6186_v32  ;;  %v6191_v17 = vshll.u32 %v6190_v54, 23  ;;  %v5679_v4 = vadd.s32 %v5678_v37, %v5668_v53  ;;  %v5694_v3 = vsel %vm5693_vm3, 1, %v15173_v2 }
 0x8f6   : > { %v6069_v31 = vsel %vm6067_vm10, %v6054_v59, %v6068_v12  ;;  %v6072_v43 = vsel %vm6070_vm7, %v6071_v45, %v6062_v44  ;;  %v5696_v35 = vadd.s32 %v5694_v3, %v5688_v55  ;;  %vm5697_vm4 = vc.u32 %v5695_v25, %v5691_v51 }
 0x8f7   : > { %v6073_v0 = vsel %vm6066_vm0, %v6069_v31, %v6072_v43  ;;  %v6192_v9 = vor.u32 4788187, %v6191_v17  ;;  %v5670_v29 = vshrl.u32 %v13703_v42, 16  ;;  %v5698_v52 = vsel %vm5697_vm4, 1, %v15173_v2 }
 0x8f8   : > { %v6074_v61 = vsel %vm6063_vm12, nan, %v6073_v0  ;;  %v6200_v23 = vsel %vm6077_vm14, %v6199_v21, %v13673_v50  ;;  %v5690_v5 = vshrl.u32 %v5686_v26, 16  ;;  %v5700_v10 = vadd.s32 %v5698_v52, %v5696_v35 }
 0x8f9   : > { %6897 = vmatpush.msra.mxu2 %v6074_v61  ;;  %v6193_v34 = vand.u32 2147483647, %v6192_v9  ;;  %v6195_v30 = vcvt.s32.f32 %v6188_v36  ;;  %v13768_v59 = vadd.s32 %v5679_v4, %v5670_v29  ;;  %v5692_v22 = vshrl.u32 %v5687_v62, 16 }
 0x8fa   : > { %v13770_v48 = vadd.s32 %v5695_v25, %v5691_v51  ;;  %v5701_v42 = vadd.s32 %v5700_v10, %v5690_v5  ;;  %v5772_v56 = vand.u32 8388607, %v5765_v28  ;;  %v5783_v19 = vshrl.u32 %v15179_v18, %v13523_v14 }
 0x8fb   : > { %v6196_v13 = vmul.f32 %v6195_v30, %v6193_v34  ;;  %v5782_v50 = vshll.u32 %v15178_v47, %v15246_v58  ;;  %v5785_v21 = vshll.u32 %v15179_v18, %v15246_v58  ;;  %v5786_v26 = vshrl.u32 %v15180_v1, %v13523_v14 }
 0x8fc   : > { %v5702_v62 = vadd.s32 %v5701_v42, %v5692_v22  ;;  %v5773_v46 = vor.u32 8388608, %v5772_v56  ;;  %v5788_v37 = vshll.u32 %v15180_v1, %v15246_v58  ;;  %v5789_v7 = vshrl.u32 %v15181_v41, %v13523_v14 }
 0x8fd   : > { %v5810_v44 = vsel %vm5800_vm15, %v5796_v38, 1326507024  ;;  %v6197_v45 = vxor.u32 2147483648, %v6196_v13  ;;  %v6202_v53 = vsel %vm13750_vm1, 0, %v6200_v23  ;;  %vm5705_vm8 = vc.u32 %v13768_v59, %v13770_v48 }
 0x8fe   : > { %v5706_v20 = vadd.s32 1, %v5702_v62  ;;  %v13795_v32 = vor.u32 %v5783_v19, %v5782_v50  ;;  %v13797_v58 = vor.u32 %v5786_v26, %v5785_v21  ;;  %v13799_v40 = vor.u32 %v5789_v7, %v5788_v37 }
 0x8ff   : > { %v5806_v15 = vsel %vm5800_vm15, %v13666_v8, 920167782  ;;  %v6198_v11 = vsel %vm6077_vm14, %v6197_v45, %v6196_v13  ;;  %v5703_v38 = vmul.u32 %v13661_v63, %v13738_v57  ;;  %vm5799_vm5 = vcmp.lt.s32.totalorder %v13552_v39, 3 }
 0x900   : > { %v6201_v54 = vsel %vm13750_vm1, %v15242_v24, %v6198_v11  ;;  %v5707_v55 = vsel %vm5705_vm8, %v5706_v20, %v5702_v62  ;;  %v5811_v12 = vsel %vm5799_vm5, %v13666_v8, %v5810_v44  ;;  %v13815_v51 = vshll.u32 %v5773_v46, 8 }
 0x901   : > { %v6203_v25 = vmul.f32 %v6201_v54, %v6201_v54  ;;  %v6219_v36 = vadd.s32 3, %v6202_v53  ;;  %v5708_v17 = vadd.s32 %v5707_v55, %v5703_v38  ;;  %vm5797_vm9 = vcmp.lt.s32.totalorder %v13552_v39, 1 }
 0x902   : > { %vm5798_vm11 = vcmp.lt.s32.totalorder %v13552_v39, 2  ;;  %v5805_v63 = vsel %vm5797_vm9, %v13795_v32, %v13797_v58  ;;  %v5807_v57 = vsel %vm5799_vm5, %v13799_v40, %v5806_v15  ;;  %v5809_v8 = vsel %vm5797_vm9, %v13797_v58, %v13799_v40 }
 0x903   : > { %v6204_v16 = vmul.f32 -0.001358992, %v6203_v25  ;;  %v6211_v4 = vmul.f32 -0.00019511016, %v6203_v25  ;;  %v5709_v3 = vadd.s32 536870912, %v5708_v17  ;;  %v5812_v31 = vsel %vm5798_vm11, %v5809_v8, %v5811_v12 }
 0x904   : > { %v5814_v43 = vand.u32 65535, %v13815_v51  ;;  %v5815_v35 = vshrl.u32 %v13815_v51, 16  ;;  %v5816_v0 = vand.u32 65535, %v5812_v31  ;;  %v5817_v9 = vshrl.u32 %v5812_v31, 16 }
 0x905   : > { %v6205_v29 = vadd.f32 0.041655596, %v6204_v16  ;;  %v6212_v52 = vadd.f32 0.008332121, %v6211_v4  ;;  %v13834_v61 = vshrl.u32 %v5709_v3, 30  ;;  %v5808_v23 = vsel %vm5798_vm11, %v5805_v63, %v5807_v57 }
 0x906   : > { %v5819_v5 = vmul.u32 %v5817_v9, %v5814_v43  ;;  %v13838_v10 = vmul.u32 %v5816_v0, %v5815_v35  ;;  %v5818_v42 = vmul.u32 %v5816_v0, %v5814_v43  ;;  %v5839_v19 = vshrl.u32 %v5808_v23, 16 }
 0x907   : > { %v6206_v34 = vmul.f32 %v6205_v29, %v6203_v25  ;;  %v6213_v30 = vmul.f32 %v6212_v52, %v6203_v25  ;;  %v5711_v22 = vshll.u32 %v13834_v61, 30  ;;  %v6220_v21 = vand.u32 3, %v6219_v36 }
 0x908   : > { %v5822_v56 = vshll.u32 %v5819_v5, 16  ;;  %v5821_v62 = vmul.u32 %v5817_v9, %v5815_v35  ;;  %v5824_v46 = vshll.u32 %v13838_v10, 16  ;;  %v5838_v20 = vand.u32 65535, %v5808_v23 }
 0x909   : > { %v6207_v13 = vadd.f32 -0.4999988, %v6206_v34  ;;  %v6214_v50 = vadd.f32 -0.16666654, %v6213_v30  ;;  %v5712_v26 = vsub.s32 %v5708_v17, %v5711_v22  ;;  %v5841_v15 = vmul.u32 %v5839_v19, %v5814_v43 }
 0x90a   : > { %vm5826_vm2 = vc.u32 %v5818_v42, %v5822_v56  ;;  %v5828_v37 = vadd.s32 %v5822_v56, %v5818_v42  ;;  %vm6218_vm0 = vweird.f32 %v15242_v24  ;;  %vm6221_vm12 = vcmp.lt.s32.totalorder %v6220_v21, 2 }
 0x90b   : > { %v6208_v7 = vmul.f32 %v6207_v13, %v6203_v25  ;;  %v6215_v44 = vmul.f32 %v6214_v50, %v6203_v25  ;;  %vm5713_vm10 = vcmp.lt.s32.totalorder %v5712_v26, 0  ;;  %v5714_v45 = vsub.s32 0, %v5712_v26 }
 0x90c   : > { %v5827_v53 = vsel %vm5826_vm2, 1, %v15173_v2  ;;  %vm5830_vm7 = vc.u32 %v5828_v37, %v5824_v46  ;;  %vm6222_vm14 = vcmp.eq.s32.totalorder %v6220_v21, 0  ;;  %vm6225_vm13 = vcmp.eq.s32.totalorder %v6220_v21, 2 }
 0x90d   : > { %v6209_v11 = vadd.f32 1.0, %v6208_v7  ;;  %v6216_v38 = vadd.f32 1.0, %v6215_v44  ;;  %v5715_v55 = vsel %vm5713_vm10, %v5714_v45, %v5712_v26  ;;  %v5829_v12 = vadd.s32 %v5827_v53, %v5821_v62 }
 0x90e   : > { %v5716_v36 = vclz %v5715_v55  ;;  %v5831_v17 = vsel %vm5830_vm7, 1, %v15173_v2  ;;  %v5840_v4 = vmul.u32 %v5838_v20, %v5814_v43  ;;  %v5842_v3 = vmul.u32 %v5838_v20, %v5815_v35 }
 0x90f   : > { %v6217_v63 = vmul.f32 %v6216_v38, %v6201_v54  ;;  %v6226_v57 = vxor.u32 2147483648, %v6209_v11  ;;  %v5833_v8 = vadd.s32 %v5831_v17, %v5829_v12  ;;  %v5844_v31 = vshll.u32 %v5841_v15, 16 }
 0x910   : > { %v8504_v25 = vadd.s32 4294967294, %v5716_v36  ;;  %v5704_v0 = vadd.s32 %v13770_v48, %v13768_v59  ;;  %v5823_v9 = vshrl.u32 %v5819_v5, 16  ;;  %v5843_v29 = vmul.u32 %v5839_v19, %v5815_v35 }
 0x911   : > { %v6223_v16 = vxor.u32 2147483648, %v6217_v63  ;;  %v6227_v54 = vsel %vm6225_vm13, %v6226_v57, %v6217_v63  ;;  %vm5848_vm3 = vc.u32 %v5840_v4, %v5844_v31  ;;  %v5846_v56 = vshll.u32 %v5842_v3, 16 }
 0x912   : > { %vm8505_vm1 = vcmp.lt.s32.totalorder %v8504_v25, 0  ;;  %v5834_v42 = vadd.s32 %v5833_v8, %v5823_v9  ;;  %v5849_v13 = vsel %vm5848_vm3, 1, %v15173_v2  ;;  %v5850_v50 = vadd.s32 %v5844_v31, %v5840_v4 }
 0x913   : > { %v6224_v52 = vsel %vm6222_vm14, %v6209_v11, %v6223_v16  ;;  %v5719_v23 = vsel %vm8505_vm1, 0, %v8504_v25  ;;  %v5851_v5 = vadd.s32 %v5849_v13, %v5843_v29  ;;  %v5781_v19 = vshrl.u32 %v15178_v47, %v13523_v14 }
 0x914   : > { %v6228_v34 = vsel %vm6221_vm12, %v6224_v52, %v6227_v54  ;;  %v5720_v30 = vsub.s32 32, %v5719_v23  ;;  %v5724_v22 = vsub.s32 4294967266, %v5719_v23  ;;  %v5721_v59 = vshll.u32 %v5712_v26, %v5719_v23 }
 0x915   : > { %v6229_v43 = vsel %vm6218_vm0, nan, %v6228_v34  ;;  %v5802_v21 = vsel %vm5800_vm15, %v13799_v40, 2102212464  ;;  %vm5852_vm4 = vc.u32 %v5850_v50, %v5846_v56  ;;  %v5825_v46 = vshrl.u32 %v13838_v10, 16 }
 0x916   : > { %6926 = vmatpush.msra.mxu3 %v6229_v43  ;;  %v5722_v48 = vshrl.u32 %v5704_v0, %v5720_v30  ;;  %v5725_v35 = vadd.s32 127, %v5724_v22  ;;  %v5853_v37 = vsel %vm5852_vm4, 1, %v15173_v2  ;;  %v5845_v7 = vshrl.u32 %v5841_v15, 16 }
 0x917   : > { %v5855_v44 = vadd.s32 %v5853_v37, %v5851_v5  ;;  %v5801_v45 = vsel %vm5797_vm9, %v5781_v19, %v13795_v32  ;;  %v5803_v14 = vsel %vm5799_vm5, %v13797_v58, %v5802_v21  ;;  %v5835_v53 = vadd.s32 %v5834_v42, %v5825_v46 }
 0x918   : > { %v5723_v62 = vor.u32 %v5722_v48, %v5721_v59  ;;  %v5726_v24 = vshll.u32 %v5725_v35, 23  ;;  %v5847_v40 = vshrl.u32 %v5842_v3, 16  ;;  %v5854_v55 = vadd.s32 %v5850_v50, %v5846_v56 }
 0x919   : > { %v5856_v20 = vadd.s32 %v5855_v44, %v5845_v7  ;;  %v5804_v10 = vsel %vm5798_vm11, %v5801_v45, %v5803_v14  ;;  %vm5612_vm8 = vcmp.lt.s32.totalorder %v15252_v27, 0  ;;  %v5734_v58 = vsub.s32 4, %v13834_v61 }
 0x91a   : > { %v5727_v26 = vor.u32 4788187, %v5726_v24  ;;  %v5730_v38 = vcvt.s32.f32 %v5723_v62  ;;  %vm5860_vm15 = vc.u32 %v5835_v53, %v5854_v55  ;;  %v5858_v32 = vmul.u32 %v13815_v51, %v5804_v10 }
 0x91b   : > { %v5857_v15 = vadd.s32 %v5856_v20, %v5847_v40  ;;  %vm13871_vm5 = vcmp.le.f32.partialorder %v5610_v6, 0.7853982  ;;  %v5735_v51 = vsel %vm5612_vm8, %v5734_v58, %v13834_v61  ;;  %v5859_v46 = vadd.s32 %v5854_v55, %v5835_v53  ;;  %v8745_v58 = vld [vmem:[%s15048_s3 + $0x8] sm:$0xff] }
 0x91c   : > { %v5728_v11 = vand.u32 2147483647, %v5727_v26  ;;  %v5737_v6 = vsel %vm13871_vm5, 0, %v5735_v51  ;;  %vm5753_vm7 = vweird.f32 %v15252_v27  ;;  %v8858_v53 = vmov 4   ;;  %v8746_v51 = vld [vmem:[%s15048_s3] sm:$0xff] }
 0x91d   : > { %v5861_v36 = vadd.s32 1, %v5857_v15  ;;  %v5754_v30 = vadd.s32 3, %v5737_v6  ;;  %8655 = vset.pattern.permute.xlu1 %v8858_v53  ;;  %8654 = vset.pattern.permute.xlu0 %v8858_v53  ;;  %vm5767_vm12 = vcmp.lt.s32.totalorder %v15259_v49, 0  ;;  %vm13898_vm14 = vcmp.le.f32.partialorder %v5765_v28, 0.7853982  ;;  %v6853_v6 = vld [vmem:[#allocation2 + $0xb0] sm:$0xff] }
 0x91e   : > { %v5731_v12 = vmul.f32 %v5730_v38, %v5728_v11  ;;  %8656 = vset.pattern.permute.xlu2 %v8858_v53  ;;  %vm5908_vm4 = vweird.f32 %v15259_v49 }
 0x91f   : > { %v5862_v63 = vsel %vm5860_vm15, %v5861_v36, %v5857_v15  ;;  %v5755_v35 = vand.u32 3, %v5754_v30  ;;  %v6851_v15 = vld [vmem:[#allocation2 + $0xa0] sm:$0xff]  ;;  %v8743_v36 = vld [vmem:[%s15048_s3 + $0x10] sm:$0xff]  ;;  %6860 = vperm.xlu2 %8656, %v8745_v58  }
 0x920   : > { %v5732_v17 = vxor.u32 2147483648, %v5731_v12  ;;  %v5863_v25 = vadd.s32 %v5862_v63, %v5858_v32  ;;  %6864 = vperm.xlu1 %8655, %v8743_v36   ;;  %v6852_v63 = vld [vmem:[#allocation2 + $0xa8] sm:$0xff] }
 0x921   : > { %vm5757_vm2 = vcmp.eq.s32.totalorder %v5755_v35, 0  ;;  %vm5760_vm10 = vcmp.eq.s32.totalorder %v5755_v35, 2  ;;  %vm5756_vm0 = vcmp.lt.s32.totalorder %v5755_v35, 2 }
 0x922   : > { %v5733_v39 = vsel %vm5612_vm8, %v5732_v17, %v5731_v12  ;;  %v5864_v4 = vadd.s32 536870912, %v5863_v25  ;;  %v8744_v17 = vld [vmem:[%s15048_s3 + $0x18] sm:$0xff] }
 0x923   : > { %v5736_v8 = vsel %vm13871_vm5, %v15252_v27, %v5733_v39  ;;  %6868 = vperm.xlu0 %8654, %v8744_v17  }
 0x924   : > { %v5738_v16 = vmul.f32 %v5736_v8, %v5736_v8  ;;  %v13879_v0 = vshrl.u32 %v5864_v4, 30 }
 0x926   : > { %v5739_v3 = vmul.f32 -0.001358992, %v5738_v16  ;;  %v5746_v31 = vmul.f32 -0.00019511016, %v5738_v16  ;;  %v5866_v52 = vshll.u32 %v13879_v0, 30 }
 0x928   : > { %v5740_v9 = vadd.f32 0.041655596, %v5739_v3  ;;  %v5747_v29 = vadd.f32 0.008332121, %v5746_v31  ;;  %v5867_v34 = vsub.s32 %v5863_v25, %v5866_v52  ;;  %6856 = vperm.xlu1 %8655, %v8746_v51  }
 0x92a   : > { %v5741_v54 = vmul.f32 %v5740_v9, %v5738_v16  ;;  %v5748_v23 = vmul.f32 %v5747_v29, %v5738_v16  ;;  %vm5868_vm9 = vcmp.lt.s32.totalorder %v5867_v34, 0  ;;  %v5869_v43 = vsub.s32 0, %v5867_v34 }
 0x92c   : > { %v5742_v22 = vadd.f32 -0.4999988, %v5741_v54  ;;  %v5749_v42 = vadd.f32 -0.16666654, %v5748_v23  ;;  %v5870_v13 = vsel %vm5868_vm9, %v5869_v43, %v5867_v34 }
 0x92d   : > { %v5871_v50 = vclz %v5870_v13 }
 0x92e   : > { %v5743_v61 = vmul.f32 %v5742_v22, %v5738_v16  ;;  %v5750_v56 = vmul.f32 %v5749_v42, %v5738_v16 }
 0x92f   : > { %v8507_v5 = vadd.s32 4294967294, %v5871_v50 }
 0x930   : > { %v5744_v59 = vadd.f32 1.0, %v5743_v61  ;;  %v5751_v48 = vadd.f32 1.0, %v5750_v56  ;;  %v6854_v61 = vld [vmem:[#allocation2 + $0xb8] sm:$0xff] }
 0x931   : > { %vm8508_vm11 = vcmp.lt.s32.totalorder %v8507_v5, 0 }
 0x932   : > { %v5752_v19 = vmul.f32 %v5751_v48, %v5736_v8  ;;  %v5761_v21 = vxor.u32 2147483648, %v5744_v59  ;;  %v5874_v24 = vsel %vm8508_vm11, 0, %v8507_v5  ;;  %v5889_v8 = vsub.s32 4, %v13879_v0 }
 0x933   : > { %v5875_v37 = vsub.s32 32, %v5874_v24  ;;  %v5879_v7 = vsub.s32 4294967266, %v5874_v24  ;;  %v5876_v14 = vshll.u32 %v5867_v34, %v5874_v24 }
 0x934   : > { %v5758_v62 = vxor.u32 2147483648, %v5752_v19  ;;  %v5762_v26 = vsel %vm5760_vm10, %v5761_v21, %v5752_v19  ;;  %v5890_v31 = vsel %vm5767_vm12, %v5889_v8, %v13879_v0 }
 0x935   : > { %v5877_v40 = vshrl.u32 %v5859_v46, %v5875_v37  ;;  %v5880_v20 = vadd.s32 127, %v5879_v7  ;;  %v5892_v52 = vsel %vm13898_vm14, 0, %v5890_v31 }
 0x936   : > { %v5759_v44 = vsel %vm5757_vm2, %v5744_v59, %v5758_v62  ;;  %v5909_v22 = vadd.s32 3, %v5892_v52 }
 0x937   : > { %v5763_v45 = vsel %vm5756_vm0, %v5759_v44, %v5762_v26  ;;  %v5878_v38 = vor.u32 %v5877_v40, %v5876_v14  ;;  %v5881_v10 = vshll.u32 %v5880_v20, 23 }
 0x938   : > { %v5764_v11 = vsel %vm5753_vm7, nan, %v5763_v45  ;;  %v5910_v50 = vand.u32 3, %v5909_v22 }
 0x939   : > { %6898 = vmatpush.msra.mxu2 %v5764_v11  ;;  %v5882_v12 = vor.u32 4788187, %v5881_v10  ;;  %v5885_v27 = vcvt.s32.f32 %v5878_v38 }
 0x93a   : > { %8527 = vmatmul.msk.f32.vlgmr.msra.gmra.mxu2 %vm1303_vm6, %v6851_v15  ;;  %vm5912_vm13 = vcmp.eq.s32.totalorder %v5910_v50, 0  ;;  %vm5915_vm1 = vcmp.eq.s32.totalorder %v5910_v50, 2  ;;  %vm5911_vm3 = vcmp.lt.s32.totalorder %v5910_v50, 2 }
 0x93b   : > { %v5883_v55 = vand.u32 2147483647, %v5882_v12 }
 0x93d   : > { %v5886_v32 = vmul.f32 %v5885_v27, %v5883_v55 }
 0x93f   : > { %v5887_v57 = vxor.u32 2147483648, %v5886_v32 }
 0x941   : > { %v5888_v25 = vsel %vm5767_vm12, %v5887_v57, %v5886_v32 }
 0x942   : > { %8528 = vmatmul.msk.f32.gmra.mxu2 %vm1303_vm6, %v6852_v63  ;;  %v5891_v16 = vsel %vm13898_vm14, %v15259_v49, %v5888_v25 }
 0x943   : > { %v5893_v4 = vmul.f32 %v5891_v16, %v5891_v16 }
 0x945   : > { %v5894_v3 = vmul.f32 -0.001358992, %v5893_v4  ;;  %v5901_v28 = vmul.f32 -0.00019511016, %v5893_v4 }
 0x947   : > { %v5895_v9 = vadd.f32 0.041655596, %v5894_v3  ;;  %v5902_v29 = vadd.f32 0.008332121, %v5901_v28 }
 0x949   : > { %v5896_v54 = vmul.f32 %v5895_v9, %v5893_v4  ;;  %v5903_v23 = vmul.f32 %v5902_v29, %v5893_v4 }
 0x94a   : > { %8529 = vmatmul.msk.f32.gmra.mxu2 %vm1303_vm6, %v6853_v6 }
 0x94b   : > { %v5897_v34 = vadd.f32 -0.4999988, %v5896_v54  ;;  %v5904_v30 = vadd.f32 -0.16666654, %v5903_v23 }
 0x94d   : > { %v5898_v42 = vmul.f32 %v5897_v34, %v5893_v4  ;;  %v5905_v43 = vmul.f32 %v5904_v30, %v5893_v4 }
 0x94f   : > { %v5899_v56 = vadd.f32 1.0, %v5898_v42  ;;  %v5906_v13 = vadd.f32 1.0, %v5905_v43 }
 0x951   : > { %v5907_v0 = vmul.f32 %v5906_v13, %v5891_v16  ;;  %v5916_v59 = vxor.u32 2147483648, %v5899_v56 }
 0x952   : > { %8530 = vmatmul.msk.f32.gmra.mxu2 %vm1303_vm6, %v6854_v61 }
 0x953   : > { %v5913_v48 = vxor.u32 2147483648, %v5907_v0  ;;  %v5917_v5 = vsel %vm5915_vm1, %v5916_v59, %v5907_v0 }
 0x955   : > { %v5914_v35 = vsel %vm5912_vm13, %v5899_v56, %v5913_v48 }
 0x956   : > { %v5918_v19 = vsel %vm5911_vm3, %v5914_v35, %v5917_v5 }
 0x957   : > { %v5919_v21 = vsel %vm5908_vm4, nan, %v5918_v19 }
 0x958   : > { %6927 = vmatpush.msra.mxu3 %v5919_v21 }
 0x959   : > { %8531 = vmatmul.msk.f32.vlgmr.msra.gmra.mxu3 %vm1303_vm6, %v6851_v15 }
 0x961   : > { %8532 = vmatmul.msk.f32.gmra.mxu3 %vm1303_vm6, %v6852_v63 }
 0x969   : > { %8533 = vmatmul.msk.f32.gmra.mxu3 %vm1303_vm6, %v6853_v6 }
 0x971   : > { %8534 = vmatmul.msk.f32.gmra.mxu3 %vm1303_vm6, %v6854_v61 }
 0x979   : > { %v6861_v40 = vpop.permute.xlu2 %6860 }
 0x992   : > { %v6865_v62 = vpop.permute.xlu1 %6864 }
 0x995   : > { %v6869_v61 = vpop.permute.xlu0 %6868 }
 0x99a   : > { %v6857_v24 = vpop.permute.xlu1 %6856 }
 0x9bd   : > { %v6900_v46 = vpop.f32.mrf.mxu2 }
 0x9be   : > { %v6901_v37 = vadd.f32 %v6900_v46, %v6857_v24 }
 0x9c0   : > { %v6941_v7 = vmul.f32 30.0, %v6901_v37 }
 0x9c2   : > { %8723 = vtanh.f32 %v6941_v7 }
 0x9c5   : > { %v6903_v20 = vpop.f32.mrf.mxu2 }
 0x9c6   : > { %v6904_v38 = vadd.f32 %v6903_v20, %v6861_v40 }
 0x9c8   : > { %v8724_v44 = vpop.eup %8723  ;;  %v6943_v10 = vmul.f32 30.0, %v6904_v38 }
 0x9c9   : > { %v6957_v49 = vmul.f32 10.0, %v8724_v44 }
 0x9cb   : > { %v6965_v11 = vadd.f32 30.0, %v6957_v49 }
 0x9cd   : > { %v13920_v15 = vmul.f32 %v6965_v11, %v6901_v37  ;;  %v6906_v17 = vpop.f32.mrf.mxu2 }
 0x9ce   : > { %v6907_v58 = vadd.f32 %v6906_v17, %v6865_v62 }
 0x9cf   : > { %15266 = vst [vmem:[#allocation28_spill] sm:$0xff] %v13920_v15  ;;  %v6984_v27 = vand.u32 2139095040, %v13920_v15 }
 0x9d0   : > { %v6945_v25 = vmul.f32 30.0, %v6907_v58 }
 0x9d1   : > { %v6985_v57 = vshrl.u32 %v6984_v27, 23 }
 0x9d3   : > { %v8535_v51 = vadd.s32 4294967169, %v6985_v57 }
 0x9d5   : > { %v6991_v23 = vadd.s32 1, %v8535_v51  ;;  %v6909_v56 = vpop.f32.mrf.mxu2 }
 0x9d6   : > { %v6910_v50 = vadd.f32 %v6909_v56, %v6869_v61 }
 0x9d7   : > { %vm6992_vm15 = vcmp.gt.s32.totalorder %v6991_v23, 0 }
 0x9d8   : > { %v6947_v48 = vmul.f32 30.0, %v6910_v50  ;;  %v6993_v5 = vsel %vm6992_vm15, %v6991_v23, 0 }
 0x9d9   : > { %v13935_v37 = vand.u32 31, %v6993_v5 }
 0x9db   : > { %15269 = vst [vmem:[#allocation9_spill] sm:$0xff] %v13935_v37  ;;  %v13938_v20 = vsub.s32 32, %v13935_v37 }
 0x9dc   : > { %v6929_v26 = vpop.f32.mrf.mxu3 }
 0x9dd   : > { %v6930_v45 = vadd.f32 %v6929_v26, %v6857_v24  ;;  %15270 = vst [vmem:[#allocation17_spill] sm:$0xff] %v13938_v20  ;;  %v7008_v17 = vshrl.u32 %v15182_v60, %v13938_v20 }
 0x9df   : > { %v6942_v14 = vmul.f32 30.0, %v6930_v45 }
 0x9e1   : > { %8725 = vtanh.f32 %v6942_v14 }
 0x9e2   : > { %8727 = vtanh.f32 %v6943_v10 }
 0x9e4   : > { %v6932_v12 = vpop.f32.mrf.mxu3 }
 0x9e5   : > { %v6933_v53 = vadd.f32 %v6932_v12, %v6861_v40 }
 0x9e7   : > { %v6944_v55 = vmul.f32 30.0, %v6933_v53  ;;  %v8726_v36 = vpop.eup %8725 }
 0x9e8   : > { %v8728_v32 = vpop.eup %8727  ;;  %v6958_v39 = vmul.f32 10.0, %v8726_v36 }
 0x9e9   : > { %8729 = vtanh.f32 %v6944_v55  ;;  %v6959_v63 = vmul.f32 10.0, %v8728_v32  ;;  %v7007_v32 = vshll.u32 %v15181_v41, %v13935_v37 }
 0x9ea   : > { %8731 = vtanh.f32 %v6945_v25  ;;  %v6966_v3 = vadd.f32 30.0, %v6958_v39  ;;  %v7011_v39 = vshrl.u32 %v15183_v33, %v13938_v20 }
 0x9eb   : > { %v6967_v8 = vadd.f32 30.0, %v6959_v63  ;;  %v13955_v51 = vor.u32 %v7008_v17, %v7007_v32 }
 0x9ec   : > { %v6935_v31 = vpop.f32.mrf.mxu3  ;;  %v13926_v34 = vmul.f32 %v6966_v3, %v6930_v45  ;;  %v7010_v3 = vshll.u32 %v15182_v60, %v13935_v37 }
 0x9ed   : > { %v13923_v4 = vmul.f32 %v6967_v8, %v6904_v38  ;;  %v6936_v9 = vadd.f32 %v6935_v31, %v6865_v62  ;;  %v13951_v8 = vshrl.u32 %v6993_v5, 5  ;;  %15272 = vst [vmem:[#allocation26_spill] sm:$0xff] %v13955_v51 }
 0x9ee   : > { %15267 = vst [vmem:[#allocation29_spill] sm:$0xff] %v13926_v34  ;;  %v7139_v13 = vand.u32 2139095040, %v13926_v34 }
 0x9ef   : > { %v8730_v16 = vpop.eup %8729  ;;  %v7294_v6 = vand.u32 2139095040, %v13923_v4  ;;  %v6946_v52 = vmul.f32 30.0, %v6936_v9  ;;  %15271 = vst [vmem:[#allocation15_spill] sm:$0xff] %v13951_v8  ;;  %vm7016_vm2 = vcmp.lt.s32.totalorder %v13951_v8, 4 }
 0x9f0   : > { %v6960_v28 = vmul.f32 10.0, %v8730_v16  ;;  %v8732_v54 = vpop.eup %8731  ;;  %v7140_v21 = vshrl.u32 %v7139_v13, 23 }
 0x9f1   : > { %v7295_v30 = vshrl.u32 %v7294_v6, 23  ;;  %v6961_v22 = vmul.f32 10.0, %v8732_v54  ;;  %8733 = vtanh.f32 %v6946_v52 }
 0x9f2   : > { %v6968_v29 = vadd.f32 30.0, %v6960_v28  ;;  %8735 = vtanh.f32 %v6947_v48  ;;  %v8538_v49 = vadd.s32 4294967169, %v7140_v21 }
 0x9f3   : > { %v6969_v43 = vadd.f32 30.0, %v6961_v22  ;;  %v8541_v0 = vadd.s32 4294967169, %v7295_v30  ;;  %v13968_v22 = vsel %vm7016_vm2, %v13955_v51, 920167782 }
 0x9f4   : > { %v13928_v42 = vmul.f32 %v6968_v29, %v6933_v53  ;;  %v6938_v7 = vpop.f32.mrf.mxu3  ;;  %v7146_v10 = vadd.s32 1, %v8538_v49  ;;  %15273 = vst [vmem:[#allocation23_spill] sm:$0xff] %v13968_v22 }
 0x9f5   : > { %v13931_v59 = vmul.f32 %v6969_v43, %v6907_v58  ;;  %v7301_v24 = vadd.s32 1, %v8541_v0  ;;  %v6939_v40 = vadd.f32 %v6938_v7, %v6869_v61 }
 0x9f6   : > { %15268 = vst [vmem:[#allocation12_spill] sm:$0xff] %v13928_v42  ;;  %v7449_v19 = vand.u32 2139095040, %v13928_v42  ;;  %vm7147_vm5 = vcmp.gt.s32.totalorder %v7146_v10, 0 }
 0x9f7   : > { %v8734_v35 = vpop.eup %8733  ;;  %v7604_v62 = vand.u32 2139095040, %v13931_v59  ;;  %vm7302_vm8 = vcmp.gt.s32.totalorder %v7301_v24, 0  ;;  %v6948_v36 = vmul.f32 30.0, %v6939_v40  ;;  %v7148_v28 = vsel %vm7147_vm5, %v7146_v10, 0 }
 0x9f8   : > { %v6962_v46 = vmul.f32 10.0, %v8734_v35  ;;  %v7450_v44 = vshrl.u32 %v7449_v19, 23  ;;  %v8736_v11 = vpop.eup %8735  ;;  %v7303_v12 = vsel %vm7302_vm8, %v7301_v24, 0  ;;  %v13970_v43 = vand.u32 31, %v7148_v28 }
 0x9f9   : > { %v7605_v26 = vshrl.u32 %v7604_v62, 23  ;;  %v6963_v27 = vmul.f32 10.0, %v8736_v11  ;;  %v13946_v58 = vand.u32 31, %v7303_v12  ;;  %8737 = vtanh.f32 %v6948_v36 }
 0x9fa   : > { %v6970_v45 = vadd.f32 30.0, %v6962_v46  ;;  %v8544_v38 = vadd.s32 4294967169, %v7450_v44  ;;  %15274 = vst [vmem:[#allocation27_spill] sm:$0xff] %v13970_v43  ;;  %v13982_v19 = vshrl.u32 %v7148_v28, 5  ;;  %v13993_v46 = vsub.s32 32, %v13970_v43 }
 0x9fb   : > { %v8547_v14 = vadd.s32 4294967169, %v7605_v26  ;;  %v6971_v57 = vadd.f32 30.0, %v6963_v27  ;;  %v13960_v31 = vsub.s32 32, %v13946_v58  ;;  %v7317_v21 = vshll.u32 %v15181_v41, %v13946_v58 }
 0x9fc   : > { %v13940_v53 = vmul.f32 %v6970_v45, %v6936_v9  ;;  %v7456_v63 = vadd.s32 1, %v8544_v38  ;;  %v7012_v9 = vor.u32 %v7011_v39, %v7010_v3  ;;  %15276 = vst [vmem:[#allocation25_spill] sm:$0xff] %v13982_v19  ;;  %v13995_v7 = vshrl.u32 %v7303_v12, 5 }
 0x9fd   : > { %v7611_v55 = vadd.s32 1, %v8547_v14  ;;  %v13953_v16 = vmul.f32 %v6971_v57, %v6910_v50  ;;  %v7318_v56 = vshrl.u32 %v15182_v60, %v13960_v31  ;;  %v13988_v62 = vshrl.u32 %v15183_v33, %v13960_v31  ;;  %15278 = vst [vmem:[#allocation18_spill] sm:$0xff] %v13993_v46 }
 0x9fe   : > { %v7759_v25 = vand.u32 2139095040, %v13940_v53  ;;  %vm7457_vm11 = vcmp.gt.s32.totalorder %v7456_v63, 0  ;;  %v13978_v48 = vsel %vm7016_vm2, %v7012_v9, 1326507024  ;;  %v14001_v45 = vshll.u32 %v15182_v60, %v13946_v58 }
 0x9ff   : > { %vm7612_vm9 = vcmp.gt.s32.totalorder %v7611_v55, 0  ;;  %v7914_v6 = vand.u32 2139095040, %v13953_v16  ;;  %v15100_v54 = vand.u32 2147483647, %v13953_v16  ;;  %v8738_v30 = vpop.eup %8737  ;;  %v7458_v61 = vsel %vm7457_vm11, %v7456_v63, 0  ;;  %15275 = vst [vmem:[#allocation11_spill] sm:$0xff] %v13978_v48 }
 0xa00   : > { %v7613_v29 = vsel %vm7612_vm9, %v7611_v55, 0  ;;  %v7760_v52 = vshrl.u32 %v7759_v25, 23  ;;  %v6964_v0 = vmul.f32 10.0, %v8738_v30  ;;  %v13990_v24 = vand.u32 31, %v7458_v61 }
 0xa01   : > { %v7915_v23 = vshrl.u32 %v7914_v6, 23  ;;  %v13974_v13 = vand.u32 31, %v7613_v29  ;;  %v7918_v5 = vand.u32 8388607, %v15100_v54  ;;  %v13997_v49 = vor.u32 %v7318_v56, %v7317_v21 }
 0xa02   : > { %v8550_v35 = vadd.s32 4294967169, %v7760_v52  ;;  %15277 = vst [vmem:[#allocation24_spill] sm:$0xff] %v13990_v24  ;;  %v6972_v26 = vadd.f32 30.0, %v6964_v0  ;;  %v14003_v14 = vshrl.u32 %v7458_v61, 5  ;;  %v14013_v27 = vsub.s32 32, %v13990_v24 }
 0xa03   : > { %v8553_v50 = vadd.s32 4294967169, %v7915_v23  ;;  %v14006_v11 = vsub.s32 32, %v13974_v13  ;;  %v7919_v55 = vor.u32 8388608, %v7918_v5  ;;  %v14017_v36 = vshll.u32 %v15181_v41, %v13990_v24 }
 0xa04   : > { %15279 = vst [vmem:[#allocation19_spill] sm:$0xff] %v14003_v14  ;;  %v7766_v38 = vadd.s32 1, %v8550_v35  ;;  %v14008_v10 = vmul.f32 %v6972_v26, %v6939_v40  ;;  %v14021_v32 = vshll.u32 %v15182_v60, %v13990_v24  ;;  %v14024_v39 = vshrl.u32 %v7613_v29, 5 }
 0xa05   : > { %v7921_v44 = vadd.s32 1, %v8553_v50  ;;  %v14028_v25 = vshll.u32 %v15181_v41, %v13974_v13  ;;  %v14032_v3 = vshrl.u32 %v15182_v60, %v14006_v11  ;;  %v14036_v28 = vshll.u32 %v15182_v60, %v13974_v13 }
 0xa06   : > { %15280 = vst [vmem:[#allocation16_spill] sm:$0xff] %v14021_v32  ;;  %v8069_v40 = vand.u32 2139095040, %v14008_v10  ;;  %vm7767_vm7 = vcmp.gt.s32.totalorder %v7766_v38, 0  ;;  %v14040_v29 = vshll.u32 %v7919_v55, 8  ;;  %vm7326_vm9 = vcmp.lt.s32.totalorder %v13995_v7, 4 }
 0xa07   : > { %vm7922_vm10 = vcmp.gt.s32.totalorder %v7921_v44, 0 }
 0xa08   : > { %v7923_v17 = vsel %vm7922_vm10, %v7921_v44, 0  ;;  %v8070_v23 = vshrl.u32 %v8069_v40, 23 }
 0xa09   : > { %v7924_v63 = vshrl.u32 %v7923_v17, 5  ;;  %v7925_v57 = vand.u32 31, %v7923_v17 }
 0xa0a   : > { %v8556_v5 = vadd.s32 4294967169, %v8070_v23 }
 0xa0b   : > { %v7926_v6 = vsub.s32 32, %v7925_v57  ;;  %v7937_v9 = vshll.u32 %v15181_v41, %v7925_v57  ;;  %v7940_v52 = vshll.u32 %v15182_v60, %v7925_v57  ;;  %vm7946_vm0 = vcmp.lt.s32.totalorder %v7924_v63, 4 }
 0xa0c   : > { %v7928_v30 = vshll.u32 %v15178_v47, %v7925_v57  ;;  %v7931_v61 = vshll.u32 %v15179_v18, %v7925_v57  ;;  %v7934_v35 = vshll.u32 %v15180_v1, %v7925_v57  ;;  %vm7943_vm12 = vcmp.lt.s32.totalorder %v7924_v63, 1 }
 0xa0d   : > { %v7938_v56 = vshrl.u32 %v15182_v60, %v7926_v6  ;;  %v7941_v50 = vshrl.u32 %v15183_v33, %v7926_v6  ;;  %v7929_v0 = vshrl.u32 %v15179_v18, %v7926_v6  ;;  %v7927_v21 = vshrl.u32 %v15178_v47, %v7926_v6 }
 0xa0e   : > { %v7932_v44 = vshrl.u32 %v15180_v1, %v7926_v6  ;;  %v7935_v26 = vshrl.u32 %v15181_v41, %v7926_v6  ;;  %v8076_v12 = vadd.s32 1, %v8556_v5  ;;  %vm7944_vm14 = vcmp.lt.s32.totalorder %v7924_v63, 2 }
 0xa0f   : > { %v7939_v55 = vor.u32 %v7938_v56, %v7937_v9  ;;  %v7942_v17 = vor.u32 %v7941_v50, %v7940_v52  ;;  %v7930_v40 = vor.u32 %v7929_v0, %v7928_v30  ;;  %vm7945_vm13 = vcmp.lt.s32.totalorder %v7924_v63, 3 }
 0xa10   : > { %v7933_v54 = vor.u32 %v7932_v44, %v7931_v61  ;;  %v7936_v34 = vor.u32 %v7935_v26, %v7934_v35  ;;  %vm8077_vm1 = vcmp.gt.s32.totalorder %v8076_v12, 0  ;;  %v14060_v50 = vshrl.u32 %v15183_v33, %v14006_v11 }
 0xa11   : > { %v7952_v22 = vsel %vm7946_vm0, %v7939_v55, 920167782  ;;  %v7956_v19 = vsel %vm7946_vm0, %v7942_v17, 1326507024  ;;  %v7947_v57 = vsel %vm7943_vm12, %v7927_v21, %v7930_v40  ;;  %v8078_v52 = vsel %vm8077_vm1, %v8076_v12, 0 }
 0xa12   : > { %v7948_v23 = vsel %vm7946_vm0, %v7936_v34, 2102212464  ;;  %v7951_v6 = vsel %vm7943_vm12, %v7930_v40, %v7933_v54  ;;  %v7953_v9 = vsel %vm7945_vm13, %v7936_v34, %v7952_v22  ;;  %v7955_v61 = vsel %vm7943_vm12, %v7933_v54, %v7936_v34 }
 0xa13   : > { %v7949_v30 = vsel %vm7945_vm13, %v7933_v54, %v7948_v23  ;;  %v7954_v56 = vsel %vm7944_vm14, %v7951_v6, %v7953_v9  ;;  %v8080_v0 = vand.u32 31, %v8078_v52  ;;  %v7957_v35 = vsel %vm7945_vm13, %v7939_v55, %v7956_v19 }
 0xa14   : > { %v7960_v5 = vand.u32 65535, %v14040_v29  ;;  %v14063_v21 = vshrl.u32 %v8078_v52, 5  ;;  %v7958_v44 = vsel %vm7944_vm14, %v7955_v61, %v7957_v35  ;;  %v7984_v26 = vand.u32 65535, %v7954_v56 }
 0xa15   : > { %v7985_v22 = vshrl.u32 %v7954_v56, 16  ;;  %v14067_v12 = vsel %vm7767_vm7, %v7766_v38, 0  ;;  %v14069_v17 = vsub.s32 32, %v8080_v0  ;;  %v14072_v34 = vsel %vm7944_vm14, %v7947_v57, %v7949_v30 }
 0xa16   : > { %v7961_v54 = vshrl.u32 %v14040_v29, 16  ;;  %v8092_v19 = vshll.u32 %v15181_v41, %v8080_v0  ;;  %v7962_v55 = vand.u32 65535, %v7958_v44  ;;  %v7963_v40 = vshrl.u32 %v7958_v44, 16 }
 0xa17   : > { %v7987_v23 = vmul.u32 %v7985_v22, %v7960_v5  ;;  %v8093_v6 = vshrl.u32 %v15182_v60, %v14069_v17  ;;  %v8095_v9 = vshll.u32 %v15182_v60, %v8080_v0  ;;  %v8096_v38 = vshrl.u32 %v15183_v33, %v14069_v17 }
 0xa18   : > { %v7988_v52 = vmul.u32 %v7984_v26, %v7961_v54  ;;  %vm8101_vm3 = vcmp.lt.s32.totalorder %v14063_v21, 4  ;;  %v7965_v63 = vmul.u32 %v7963_v40, %v7960_v5  ;;  %v7966_v57 = vmul.u32 %v7962_v55, %v7961_v54 }
 0xa19   : > { %v7986_v30 = vmul.u32 %v7984_v26, %v7960_v5  ;;  %v8094_v56 = vor.u32 %v8093_v6, %v8092_v19  ;;  %v7964_v61 = vmul.u32 %v7962_v55, %v7960_v5  ;;  %v7989_v35 = vmul.u32 %v7985_v22, %v7961_v54 }
 0xa1a   : > { %v7990_v51 = vshll.u32 %v7987_v23, 16  ;;  %v8097_v44 = vor.u32 %v8096_v38, %v8095_v9  ;;  %v7967_v48 = vmul.u32 %v7963_v40, %v7961_v54  ;;  %v7968_v8 = vshll.u32 %v7965_v63, 16 }
 0xa1b   : > { %v7991_v37 = vshrl.u32 %v7987_v23, 16  ;;  %v7969_v20 = vshrl.u32 %v7965_v63, 16  ;;  %v7970_v15 = vshll.u32 %v7966_v57, 16  ;;  %v7971_v46 = vshrl.u32 %v7966_v57, 16 }
 0xa1c   : > { %v7992_v43 = vshll.u32 %v7988_v52, 16  ;;  %vm7972_vm4 = vc.u32 %v7964_v61, %v7968_v8  ;;  %v7974_v24 = vadd.s32 %v7968_v8, %v7964_v61  ;;  %vm7994_vm15 = vc.u32 %v7986_v30, %v7990_v51 }
 0xa1d   : > { %v7996_v42 = vadd.s32 %v7990_v51, %v7986_v30  ;;  %v8107_v32 = vsel %vm8101_vm3, %v8094_v56, 920167782  ;;  %v7973_v26 = vsel %vm7972_vm4, 1, %v15173_v2  ;;  %v7995_v5 = vsel %vm7994_vm15, 1, %v15173_v2 }
 0xa1e   : > { %v15121_v22 = vand.u32 2147483647, %v14008_v10  ;;  %v7975_v54 = vadd.s32 %v7973_v26, %v7967_v48  ;;  %vm7976_vm8 = vc.u32 %v7974_v24, %v7970_v15  ;;  %v7997_v19 = vadd.s32 %v7995_v5, %v7989_v35 }
 0xa1f   : > { %vm7998_vm5 = vc.u32 %v7996_v42, %v7992_v43  ;;  %v8111_v55 = vsel %vm8101_vm3, %v8097_v44, 1326507024  ;;  %v7977_v8 = vsel %vm7976_vm8, 1, %v15173_v2  ;;  %v7993_v40 = vshrl.u32 %v7988_v52, 16 }
 0xa20   : > { %v7999_v51 = vsel %vm7998_vm5, 1, %v15173_v2  ;;  %v7979_v23 = vadd.s32 %v7977_v8, %v7975_v54  ;;  %v8073_v9 = vand.u32 8388607, %v15121_v22  ;;  %v8083_v38 = vshll.u32 %v15178_v47, %v8080_v0 }
 0xa21   : > { %v8001_v6 = vadd.s32 %v7999_v51, %v7997_v19  ;;  %v8084_v15 = vshrl.u32 %v15179_v18, %v14069_v17  ;;  %v8086_v48 = vshll.u32 %v15179_v18, %v8080_v0  ;;  %v8087_v24 = vshrl.u32 %v15180_v1, %v14069_v17 }
 0xa22   : > { %v8089_v52 = vshll.u32 %v15180_v1, %v8080_v0  ;;  %v7980_v63 = vadd.s32 %v7979_v23, %v7969_v20  ;;  %v8074_v30 = vor.u32 8388608, %v8073_v9  ;;  %v8090_v61 = vshrl.u32 %v15181_v41, %v14069_v17 }
 0xa23   : > { %v8002_v57 = vadd.s32 %v8001_v6, %v7991_v37  ;;  %v14103_v35 = vadd.s32 %v7996_v42, %v7992_v43  ;;  %v14105_v44 = vor.u32 %v8084_v15, %v8083_v38  ;;  %v14107_v26 = vor.u32 %v8087_v24, %v8086_v48 }
 0xa24   : > { %vm8098_vm11 = vcmp.lt.s32.totalorder %v14063_v21, 1  ;;  %v14110_v5 = vadd.s32 %v7980_v63, %v7971_v46  ;;  %v8091_v19 = vor.u32 %v8090_v61, %v8089_v52  ;;  %vm8100_vm10 = vcmp.lt.s32.totalorder %v14063_v21, 3 }
 0xa25   : > { %v8003_v54 = vadd.s32 %v8002_v57, %v7993_v40  ;;  %v14115_v37 = vor.u32 %v14032_v3, %v14028_v25  ;;  %v8106_v42 = vsel %vm8098_vm11, %v14105_v44, %v14107_v26  ;;  %v8112_v20 = vsel %vm8100_vm10, %v8094_v56, %v8111_v55 }
 0xa26   : > { %v14123_v43 = vshll.u32 %v8074_v30, 8  ;;  %v7632_v46 = vor.u32 %v14060_v50, %v14036_v28  ;;  %v14128_v0 = vand.u32 31, %v14067_v12  ;;  %vm8006_vm7 = vc.u32 %v14110_v5, %v14103_v35 }
 0xa27   : > { %v8007_v25 = vadd.s32 1, %v8003_v54  ;;  %v8004_v3 = vmul.u32 %v14040_v29, %v14072_v34  ;;  %vm8099_vm0 = vcmp.lt.s32.totalorder %v14063_v21, 2  ;;  %v8108_v56 = vsel %vm8100_vm10, %v8091_v19, %v8107_v32 }
 0xa28   : > { %v8110_v55 = vsel %vm8098_vm11, %v14107_v26, %v8091_v19  ;;  %v8109_v50 = vsel %vm8099_vm0, %v8106_v42, %v8108_v56  ;;  %v8115_v40 = vand.u32 65535, %v14123_v43  ;;  %v8116_v29 = vshrl.u32 %v14123_v43, 16 }
 0xa29   : > { %v8008_v28 = vsel %vm8006_vm7, %v8007_v25, %v8003_v54  ;;  %v8113_v8 = vsel %vm8099_vm0, %v8110_v55, %v8112_v20  ;;  %v14149_v32 = vsel %vm7326_vm9, %v13997_v49, 920167782  ;;  %vm7636_vm12 = vcmp.lt.s32.totalorder %v14024_v39, 4 }
 0xa2a   : > { %v8009_v51 = vadd.s32 %v8008_v28, %v8004_v3  ;;  %v8117_v34 = vand.u32 65535, %v8113_v8  ;;  %v8118_v23 = vshrl.u32 %v8113_v8, 16  ;;  %v8139_v6 = vand.u32 65535, %v8109_v50 }
 0xa2b   : > { %v8140_v9 = vshrl.u32 %v8109_v50, 16  ;;  %v14153_v38 = vshrl.u32 %v14067_v12, 5  ;;  %v14158_v52 = vsel %vm7636_vm12, %v14115_v37, 920167782  ;;  %v14162_v63 = vsel %vm7636_vm12, %v7632_v46, 1326507024 }
 0xa2c   : > { %v8010_v15 = vadd.s32 536870912, %v8009_v51  ;;  %v8120_v48 = vmul.u32 %v8118_v23, %v8115_v40  ;;  %v8121_v24 = vmul.u32 %v8117_v34, %v8116_v29  ;;  %v14165_v57 = vsub.s32 32, %v14128_v0 }
 0xa2d   : > { %v8142_v30 = vmul.u32 %v8140_v9, %v8115_v40  ;;  %v8082_v12 = vshrl.u32 %v15178_v47, %v14069_v17  ;;  %v8119_v54 = vmul.u32 %v8117_v34, %v8115_v40  ;;  %v8122_v20 = vmul.u32 %v8118_v23, %v8116_v29 }
 0xa2e   : > { %v14167_v61 = vshrl.u32 %v8010_v15, 30  ;;  %v8123_v42 = vshll.u32 %v8120_v48, 16  ;;  %v8141_v25 = vmul.u32 %v8139_v6, %v8115_v40  ;;  %v8143_v3 = vmul.u32 %v8139_v6, %v8116_v29 }
 0xa2f   : > { %v8145_v56 = vshll.u32 %v8142_v30, 16  ;;  %v8125_v28 = vshll.u32 %v8121_v24, 16  ;;  %v8103_v50 = vsel %vm8101_vm3, %v8091_v19, 2102212464  ;;  %v8124_v8 = vshrl.u32 %v8120_v48, 16 }
 0xa30   : > { %v8012_v55 = vshll.u32 %v14167_v61, 30  ;;  %vm8127_vm14 = vc.u32 %v8119_v54, %v8123_v42  ;;  %v8129_v46 = vadd.s32 %v8123_v42, %v8119_v54  ;;  %v8144_v34 = vmul.u32 %v8140_v9, %v8116_v29 }
 0xa31   : > { %v8128_v15 = vsel %vm8127_vm14, 1, %v15173_v2  ;;  %vm8149_vm13 = vc.u32 %v8141_v25, %v8145_v56  ;;  %v8147_v23 = vshll.u32 %v8143_v3, 16  ;;  %v8151_v14 = vadd.s32 %v8145_v56, %v8141_v25 }
 0xa32   : > { %v14175_v22 = vsub.s32 %v8009_v51, %v8012_v55  ;;  %v8130_v17 = vadd.s32 %v8128_v15, %v8122_v20  ;;  %vm8131_vm1 = vc.u32 %v8129_v46, %v8125_v28  ;;  %v8150_v6 = vsel %vm8149_vm13, 1, %v15173_v2 }
 0xa33   : > { %v8132_v40 = vsel %vm8131_vm1, 1, %v15173_v2  ;;  %v8152_v48 = vadd.s32 %v8150_v6, %v8144_v34  ;;  %v14183_v42 = vshll.u32 %v15181_v41, %v14128_v0  ;;  %v8102_v51 = vsel %vm8098_vm11, %v8082_v12, %v14105_v44 }
 0xa34   : > { %vm8014_vm4 = vcmp.lt.s32.totalorder %v14175_v22, 0  ;;  %v8015_v54 = vsub.s32 0, %v14175_v22  ;;  %v8134_v19 = vadd.s32 %v8132_v40, %v8130_v17  ;;  %v8104_v29 = vsel %vm8100_vm10, %v14107_v26, %v8103_v50 }
 0xa35   : > { %vm8153_vm3 = vc.u32 %v8151_v14, %v8147_v23  ;;  %v15123_v56 = vand.u32 2147483647, %v13931_v59  ;;  %vm7913_vm15 = vcmp.lt.s32.totalorder %v13953_v16, 0  ;;  %v8126_v28 = vshrl.u32 %v8121_v24, 16 }
 0xa36   : > { %v8016_v9 = vsel %vm8014_vm4, %v8015_v54, %v14175_v22  ;;  %v8135_v20 = vadd.s32 %v8134_v19, %v8124_v8  ;;  %v8154_v25 = vsel %vm8153_vm3, 1, %v15173_v2  ;;  %v8146_v46 = vshrl.u32 %v8142_v30, 16 }
 0xa37   : > { %v8017_v55 = vclz %v8016_v9  ;;  %v8156_v15 = vadd.s32 %v8154_v25, %v8152_v48  ;;  %v14197_v44 = vshll.u32 %v15182_v60, %v14128_v0  ;;  %v8105_v26 = vsel %vm8099_vm0, %v8102_v51, %v8104_v29 }
 0xa38   : > { %v8148_v12 = vshrl.u32 %v8143_v3, 16  ;;  %v7619_v50 = vshrl.u32 %v15179_v18, %v14006_v11  ;;  %v14203_v17 = vadd.s32 %v8135_v20, %v8126_v28  ;;  %v7622_v24 = vshrl.u32 %v15180_v1, %v14006_v11 }
 0xa39   : > { %v8554_v8 = vadd.s32 4294967294, %v8017_v55  ;;  %v8157_v34 = vadd.s32 %v8156_v15, %v8146_v46  ;;  %v7608_v30 = vand.u32 8388607, %v15123_v56  ;;  %v7618_v40 = vshll.u32 %v15178_v47, %v13974_v13 }
 0xa3a   : > { %v7621_v21 = vshll.u32 %v15179_v18, %v13974_v13  ;;  %v7625_v3 = vshrl.u32 %v15181_v41, %v14006_v11  ;;  %v15281_v6 = vand.u32 2147483647, %v13953_v16  ;;  %v8035_v19 = vsub.s32 4, %v14167_v61 }
 0xa3b   : > { %vm8555_vm5 = vcmp.lt.s32.totalorder %v8554_v8, 0  ;;  %v14222_v48 = vadd.s32 %v8151_v14, %v8147_v23  ;;  %v8158_v51 = vadd.s32 %v8157_v34, %v8148_v12  ;;  %v7620_v9 = vor.u32 %v7619_v50, %v7618_v40 }
 0xa3c   : > { %vm14217_vm8 = vcmp.le.f32.partialorder %v15281_v6, 0.7853982  ;;  %v8020_v29 = vsel %vm8555_vm5, 0, %v8554_v8  ;;  %v7623_v20 = vor.u32 %v7622_v24, %v7621_v21  ;;  %v7624_v25 = vshll.u32 %v15180_v1, %v13974_v13 }
 0xa3d   : > { %v8005_v55 = vadd.s32 %v14103_v35, %v14110_v5  ;;  %v8021_v28 = vsub.s32 32, %v8020_v29  ;;  %v8025_v46 = vsub.s32 4294967266, %v8020_v29  ;;  %vm8161_vm11 = vc.u32 %v14203_v17, %v14222_v48 }
 0xa3e   : > { %v8159_v15 = vmul.u32 %v14123_v43, %v8105_v26  ;;  %v8162_v6 = vadd.s32 1, %v8158_v51  ;;  %v7609_v14 = vor.u32 8388608, %v7608_v30  ;;  %v7626_v23 = vor.u32 %v7625_v3, %v7624_v25 }
 0xa3f   : > { %v8022_v12 = vshll.u32 %v14175_v22, %v8020_v29  ;;  %v8023_v50 = vshrl.u32 %v8005_v55, %v8021_v28  ;;  %v8026_v8 = vadd.s32 127, %v8025_v46  ;;  %vm7633_vm10 = vcmp.lt.s32.totalorder %v14024_v39, 1 }
 0xa40   : > { %v8036_v13 = vsel %vm7913_vm15, %v8035_v19, %v14167_v61  ;;  %v8163_v35 = vsel %vm8161_vm11, %v8162_v6, %v8158_v51  ;;  %vm7634_vm7 = vcmp.lt.s32.totalorder %v14024_v39, 2  ;;  %v7641_v5 = vsel %vm7633_vm10, %v7620_v9, %v7623_v20 }
 0xa41   : > { %v8024_v43 = vor.u32 %v8023_v50, %v8022_v12  ;;  %v8027_v26 = vshll.u32 %v8026_v8, 23  ;;  %v8164_v34 = vadd.s32 %v8163_v35, %v8159_v15  ;;  %vm7635_vm0 = vcmp.lt.s32.totalorder %v14024_v39, 3 }
 0xa42   : > { %v7643_v22 = vsel %vm7635_vm0, %v7626_v23, %v14158_v52  ;;  %v7645_v24 = vsel %vm7633_vm10, %v7623_v20, %v7626_v23  ;;  %v7647_v61 = vsel %vm7635_vm0, %v14115_v37, %v14162_v63  ;;  %v14249_v30 = vshll.u32 %v7609_v14, 8 }
 0xa43   : > { %v7783_v40 = vshrl.u32 %v15182_v60, %v14165_v57  ;;  %v8028_v21 = vor.u32 4788187, %v8027_v26  ;;  %v8165_v3 = vadd.s32 536870912, %v8164_v34  ;;  %v7644_v19 = vsel %vm7634_vm7, %v7641_v5, %v7643_v22 }
 0xa44   : > { %v14257_v52 = vshrl.u32 %v15183_v33, %v14165_v57  ;;  %v8031_v51 = vcvt.s32.f32 %v8024_v43  ;;  %v8038_v29 = vsel %vm14217_vm8, 0, %v8036_v13  ;;  %v7648_v37 = vsel %vm7634_vm7, %v7645_v24, %v7647_v61 }
 0xa45   : > { %v8029_v63 = vand.u32 2147483647, %v8028_v21  ;;  %v14263_v25 = vshrl.u32 %v8165_v3, 30  ;;  %v7652_v55 = vand.u32 65535, %v7648_v37  ;;  %v7653_v28 = vshrl.u32 %v7648_v37, 16 }
 0xa46   : > { %v7638_v46 = vsel %vm7636_vm12, %v7626_v23, 2102212464  ;;  %v7650_v15 = vand.u32 65535, %v14249_v30  ;;  %v7651_v6 = vshrl.u32 %v14249_v30, 16  ;;  %v7675_v14 = vshrl.u32 %v7644_v19, 16 }
 0xa47   : > { %v14270_v12 = vor.u32 %v7783_v40, %v14183_v42  ;;  %v8032_v50 = vmul.f32 %v8031_v51, %v8029_v63  ;;  %v8167_v8 = vshll.u32 %v14263_v25, 30  ;;  %v7617_v13 = vshrl.u32 %v15178_v47, %v14006_v11 }
 0xa48   : > { %v8055_v5 = vadd.s32 3, %v8038_v29  ;;  %v7655_v43 = vmul.u32 %v7653_v28, %v7650_v15  ;;  %v14277_v23 = vmul.u32 %v7652_v55, %v7651_v6  ;;  %v7639_v24 = vsel %vm7635_vm0, %v7623_v20, %v7638_v46 }
 0xa49   : > { %v8033_v26 = vxor.u32 2147483648, %v8032_v50  ;;  %v14279_v22 = vsub.s32 %v8164_v34, %v8167_v8  ;;  %v7637_v42 = vsel %vm7633_vm10, %v7617_v13, %v7620_v9  ;;  %v7654_v61 = vmul.u32 %v7652_v55, %v7650_v15 }
 0xa4a   : > { %v7658_v40 = vshll.u32 %v7655_v43, 16  ;;  %v7674_v21 = vand.u32 65535, %v7644_v19  ;;  %v14285_v11 = vmul.u32 %v7675_v14, %v7650_v15  ;;  %v7657_v34 = vmul.u32 %v7653_v28, %v7651_v6 }
 0xa4b   : > { %v8034_v3 = vsel %vm7913_vm15, %v8033_v26, %v8032_v50  ;;  %vm8169_vm12 = vcmp.lt.s32.totalorder %v14279_v22, 0  ;;  %v8170_v51 = vsub.s32 0, %v14279_v22  ;;  %v7660_v20 = vshll.u32 %v14277_v23, 16 }
 0xa4c   : > { %v14294_v9 = vsel %vm14217_vm8, %v13953_v16, %v8034_v3  ;;  %vm7662_vm14 = vc.u32 %v7654_v61, %v7658_v40  ;;  %v7664_v29 = vadd.s32 %v7658_v40, %v7654_v61  ;;  %v8160_v37 = vadd.s32 %v14222_v48, %v14203_v17 }
 0xa4d   : > { %v8039_v19 = vmul.f32 %v14294_v9, %v14294_v9  ;;  %v8171_v63 = vsel %vm8169_vm12, %v8170_v51, %v14279_v22  ;;  %v7663_v55 = vsel %vm7662_vm14, 1, %v15173_v2  ;;  %v7680_v54 = vshll.u32 %v14285_v11, 16 }
 0xa4e   : > { %v8172_v28 = vclz %v8171_v63  ;;  %v7665_v46 = vadd.s32 %v7663_v55, %v7657_v34  ;;  %vm7666_vm13 = vc.u32 %v7664_v29, %v7660_v20  ;;  %v14304_v13 = vand.u32 3, %v8055_v5 }
 0xa4f   : > { %v8040_v50 = vmul.f32 -0.001358992, %v8039_v19  ;;  %v8047_v8 = vmul.f32 -0.00019511016, %v8039_v19  ;;  %v14308_v26 = vsel %vm7634_vm7, %v7637_v42, %v7639_v24  ;;  %v7667_v17 = vsel %vm7666_vm13, 1, %v15173_v2 }
 0xa50   : > { %v8557_v61 = vadd.s32 4294967294, %v8172_v28  ;;  %v7676_v48 = vmul.u32 %v7674_v21, %v7650_v15  ;;  %v7678_v40 = vmul.u32 %v7674_v21, %v7651_v6  ;;  %v8190_v34 = vsub.s32 4, %v14263_v25 }
 0xa51   : > { %v8041_v3 = vadd.f32 0.041655596, %v8040_v50  ;;  %v8048_v51 = vadd.f32 0.008332121, %v8047_v8  ;;  %v7669_v20 = vadd.s32 %v7667_v17, %v7665_v46  ;;  %v7679_v29 = vmul.u32 %v7675_v14, %v7651_v6 }
 0xa52   : > { %vm8558_vm1 = vcmp.lt.s32.totalorder %v8557_v61, 0  ;;  %vm7684_vm4 = vc.u32 %v7676_v48, %v7680_v54  ;;  %v7686_v63 = vadd.s32 %v7680_v54, %v7676_v48  ;;  %vm8068_vm3 = vcmp.lt.s32.totalorder %v14008_v10, 0 }
 0xa53   : > { %v8042_v5 = vmul.f32 %v8041_v3, %v8039_v19  ;;  %v8049_v39 = vmul.f32 %v8048_v51, %v8039_v19  ;;  %v8175_v42 = vsel %vm8558_vm1, 0, %v8557_v61  ;;  %v7659_v24 = vshrl.u32 %v7655_v43, 16 }
 0xa54   : > { %v8176_v55 = vsub.s32 32, %v8175_v42  ;;  %v8180_v28 = vsub.s32 4294967266, %v8175_v42  ;;  %v7682_v56 = vshll.u32 %v7678_v40, 16  ;;  %v7685_v15 = vsel %vm7684_vm4, 1, %v15173_v2 }
 0xa55   : > { %v8043_v21 = vadd.f32 -0.4999988, %v8042_v5  ;;  %v8050_v50 = vadd.f32 -0.16666654, %v8049_v39  ;;  %v7670_v8 = vadd.s32 %v7669_v20, %v7659_v24  ;;  %v7687_v35 = vadd.s32 %v7685_v15, %v7679_v29 }
 0xa56   : > { %vm8058_vm15 = vcmp.eq.s32.totalorder %v14304_v13, 0  ;;  %v8177_v6 = vshll.u32 %v14279_v22, %v8175_v42  ;;  %v8178_v14 = vshrl.u32 %v8160_v37, %v8176_v55  ;;  %v8181_v46 = vadd.s32 127, %v8180_v28 }
 0xa57   : > { %vm7688_vm8 = vc.u32 %v7686_v63, %v7682_v56  ;;  %v8044_v54 = vmul.f32 %v8043_v21, %v8039_v19  ;;  %v8051_v17 = vmul.f32 %v8050_v50, %v8039_v19  ;;  %vm8057_vm5 = vcmp.lt.s32.totalorder %v14304_v13, 2 }
 0xa58   : > { %v7661_v43 = vshrl.u32 %v14277_v23, 16  ;;  %v7689_v61 = vsel %vm7688_vm8, 1, %v15173_v2  ;;  %vm8054_vm11 = vweird.f32 %v13953_v16  ;;  %v8179_v48 = vor.u32 %v8178_v14, %v8177_v6 }
 0xa59   : > { %v8182_v3 = vshll.u32 %v8181_v46, 23  ;;  %v7681_v51 = vshrl.u32 %v14285_v11, 16  ;;  %v7691_v20 = vadd.s32 %v7689_v61, %v7687_v35  ;;  %vm7791_vm10 = vcmp.lt.s32.totalorder %v14153_v38, 4 }
 0xa5a   : > { %v8045_v22 = vadd.f32 1.0, %v8044_v54  ;;  %v8052_v37 = vadd.f32 1.0, %v8051_v17  ;;  %v15284_v29 = vand.u32 2147483647, %v14008_v10  ;;  %v14328_v23 = vadd.s32 %v7670_v8, %v7661_v43 }
 0xa5b   : > { %v7756_v5 = vand.u32 2147483647, %v13940_v53  ;;  %vm8061_vm0 = vcmp.eq.s32.totalorder %v14304_v13, 2  ;;  %v8183_v39 = vor.u32 4788187, %v8182_v3  ;;  %v7683_v42 = vshrl.u32 %v7678_v40, 16 }
 0xa5c   : > { %vm14324_vm7 = vcmp.le.f32.partialorder %v15284_v29, 0.7853982  ;;  %v7692_v11 = vadd.s32 %v7691_v20, %v7681_v51  ;;  %v8053_v35 = vmul.f32 %v8052_v37, %v14294_v9  ;;  %v8062_v24 = vxor.u32 2147483648, %v8045_v22 }
 0xa5d   : > { %v14333_v55 = vadd.s32 %v7686_v63, %v7682_v56  ;;  %v7694_v28 = vmul.u32 %v14249_v30, %v14308_v26  ;;  %v8184_v15 = vand.u32 2147483647, %v8183_v39  ;;  %v8186_v21 = vcvt.s32.f32 %v8179_v48 }
 0xa5e   : > { %v8191_v50 = vsel %vm8068_vm3, %v8190_v34, %v14263_v25  ;;  %v7693_v8 = vadd.s32 %v7692_v11, %v7683_v42  ;;  %v8059_v6 = vxor.u32 2147483648, %v8053_v35  ;;  %v8063_v14 = vsel %vm8061_vm0, %v8062_v24, %v8053_v35 }
 0xa5f   : > { %vm7696_vm12 = vc.u32 %v14328_v23, %v14333_v55  ;;  %v7763_v9 = vand.u32 8388607, %v7756_v5  ;;  %v8187_v56 = vmul.f32 %v8186_v21, %v8184_v15  ;;  %v7776_v30 = vshll.u32 %v15179_v18, %v14128_v0 }
 0xa60   : > { %v7697_v40 = vadd.s32 1, %v7693_v8  ;;  %v7777_v26 = vshrl.u32 %v15180_v1, %v14165_v57  ;;  %v8060_v25 = vsel %vm8058_vm15, %v8045_v22, %v8059_v6  ;;  %v7774_v34 = vshrl.u32 %v15179_v18, %v14165_v57 }
 0xa61   : > { %v7779_v63 = vshll.u32 %v15180_v1, %v14128_v0  ;;  %v7780_v46 = vshrl.u32 %v15181_v41, %v14165_v57  ;;  %v8064_v54 = vsel %vm8057_vm5, %v8060_v25, %v8063_v14  ;;  %v8188_v17 = vxor.u32 2147483648, %v8187_v56 }
 0xa62   : > { %v7698_v43 = vsel %vm7696_vm12, %v7697_v40, %v7693_v8  ;;  %v14358_v61 = vor.u32 %v7777_v26, %v7776_v30  ;;  %v8065_v48 = vsel %vm8054_vm11, nan, %v8064_v54  ;;  %v7773_v51 = vshll.u32 %v15178_v47, %v14128_v0 }
 0xa63   : > { %v7699_v3 = vadd.s32 %v7698_v43, %v7694_v28  ;;  %v7781_v20 = vor.u32 %v7780_v46, %v7779_v63  ;;  %v15287_v22 = vor.u32 %v14257_v52, %v14197_v44  ;;  %8241 = vmatpush.msrb.mxu0 %v8065_v48  ;;  %v8189_v13 = vsel %vm8068_vm3, %v8188_v17, %v8187_v56 }
 0xa64   : > { %v8193_v29 = vsel %vm14324_vm7, 0, %v8191_v50  ;;  %v7764_v16 = vor.u32 8388608, %v7763_v9  ;;  %v14376_v39 = vsel %vm14324_vm7, %v14008_v10, %v8189_v13  ;;  %v7775_v42 = vor.u32 %v7774_v34, %v7773_v51 }
 0xa65   : > { %v7801_v37 = vsel %vm7791_vm10, %v15287_v22, 1326507024  ;;  %v7700_v0 = vadd.s32 536870912, %v7699_v3  ;;  %vm7788_vm14 = vcmp.lt.s32.totalorder %v14153_v38, 1  ;;  %v7797_v44 = vsel %vm7791_vm10, %v14270_v12, 920167782 }
 0xa66   : > { %v8194_v52 = vmul.f32 %v14376_v39, %v14376_v39  ;;  %vm7790_vm13 = vcmp.lt.s32.totalorder %v14153_v38, 3  ;;  %v7800_v11 = vsel %vm7788_vm14, %v14358_v61, %v7781_v20  ;;  %v8210_v19 = vadd.s32 3, %v8193_v29 }
 0xa67   : > { %v7701_v35 = vshrl.u32 %v7700_v0, 30  ;;  %vm7789_vm1 = vcmp.lt.s32.totalorder %v14153_v38, 2  ;;  %v7802_v24 = vsel %vm7790_vm13, %v14270_v12, %v7801_v37  ;;  %v14394_v50 = vshll.u32 %v7764_v16, 8 }
 0xa68   : > { %v8195_v28 = vmul.f32 -0.001358992, %v8194_v52  ;;  %v8202_v15 = vmul.f32 -0.00019511016, %v8194_v52  ;;  %v7803_v21 = vsel %vm7789_vm1, %v7800_v11, %v7802_v24  ;;  %v7796_v6 = vsel %vm7788_vm14, %v7775_v42, %v14358_v61 }
 0xa69   : > { %v7702_v8 = vshll.u32 %v7701_v35, 30  ;;  %v7798_v14 = vsel %vm7790_vm13, %v7781_v20, %v7797_v44  ;;  %v7808_v9 = vshrl.u32 %v7803_v21, 16  ;;  %v15288_v56 = vor.u32 %v13988_v62, %v14001_v45 }
 0xa6a   : > { %v14410_v40 = vshrl.u32 %v15182_v60, %v14013_v27  ;;  %v8196_v30 = vadd.f32 0.041655596, %v8195_v28  ;;  %v8203_v26 = vadd.f32 0.008332121, %v8202_v15  ;;  %v14412_v25 = vand.u32 3, %v8210_v19 }
 0xa6b   : > { %v14406_v12 = vsel %vm7326_vm9, %v15288_v56, 1326507024  ;;  %v14414_v34 = vsub.s32 %v7699_v3, %v7702_v8  ;;  %v7805_v63 = vand.u32 65535, %v14394_v50  ;;  %v7807_v46 = vand.u32 65535, %v7803_v21 }
 0xa6c   : > { %v8197_v54 = vmul.f32 %v8196_v30, %v8194_v52  ;;  %v8204_v17 = vmul.f32 %v8203_v26, %v8194_v52  ;;  %vm7603_vm4 = vcmp.lt.s32.totalorder %v13931_v59, 0  ;;  %v7772_v62 = vshrl.u32 %v15178_v47, %v14165_v57 }
 0xa6d   : > { %v7799_v45 = vsel %vm7789_vm1, %v7796_v6, %v7798_v14  ;;  %vm7704_vm3 = vcmp.lt.s32.totalorder %v14414_v34, 0  ;;  %v7705_v43 = vsub.s32 0, %v14414_v34  ;;  %v7806_v48 = vshrl.u32 %v14394_v50, 16 }
 0xa6e   : > { %v14425_v3 = vmul.u32 %v7808_v9, %v7805_v63  ;;  %v8198_v51 = vadd.f32 -0.4999988, %v8197_v54  ;;  %v8205_v22 = vadd.f32 -0.16666654, %v8204_v17  ;;  %v7695_v37 = vadd.s32 %v14333_v55, %v14328_v23 }
 0xa6f   : > { %v14431_v13 = vsel %vm7788_vm14, %v7772_v62, %v7775_v42  ;;  %vm8213_vm15 = vcmp.eq.s32.totalorder %v14412_v25, 0  ;;  %vm8216_vm8 = vcmp.eq.s32.totalorder %v14412_v25, 2  ;;  %v7706_v57 = vsel %vm7704_vm3, %v7705_v43, %v14414_v34 }
 0xa70   : > { %v14436_v29 = vmul.u32 %v7807_v46, %v7806_v48  ;;  %v7813_v16 = vshll.u32 %v14425_v3, 16  ;;  %v7830_v0 = vshrl.u32 %v7799_v45, 16  ;;  %v8199_v44 = vmul.f32 %v8198_v51, %v8194_v52 }
 0xa71   : > { %v8206_v11 = vmul.f32 %v8205_v22, %v8194_v52  ;;  %vm8212_vm5 = vcmp.lt.s32.totalorder %v14412_v25, 2  ;;  %v7707_v23 = vclz %v7706_v57  ;;  %v7809_v55 = vmul.u32 %v7807_v46, %v7805_v63 }
 0xa72   : > { %vm8209_vm11 = vweird.f32 %v14008_v10  ;;  %v7725_v42 = vsub.s32 4, %v7701_v35  ;;  %v7793_v19 = vsel %vm7791_vm10, %v7781_v20, 2102212464  ;;  %v7812_v24 = vmul.u32 %v7808_v9, %v7806_v48 }
 0xa73   : > { %v7829_v28 = vand.u32 65535, %v7799_v45  ;;  %v8200_v15 = vadd.f32 1.0, %v8199_v44  ;;  %v8207_v21 = vadd.f32 1.0, %v8206_v11  ;;  %v8548_v8 = vadd.s32 4294967294, %v7707_v23 }
 0xa74   : > { %vm7817_vm7 = vc.u32 %v7809_v55, %v7813_v16  ;;  %v7815_v6 = vshll.u32 %v14436_v29, 16  ;;  %v7819_v14 = vadd.s32 %v7813_v16, %v7809_v55  ;;  %v7832_v56 = vmul.u32 %v7830_v0, %v7805_v63 }
 0xa75   : > { %v7818_v52 = vsel %vm7817_vm7, 1, %v15173_v2  ;;  %v8208_v30 = vmul.f32 %v8207_v21, %v14376_v39  ;;  %v8217_v26 = vxor.u32 2147483648, %v8200_v15  ;;  %vm8549_vm0 = vcmp.lt.s32.totalorder %v8548_v8, 0 }
 0xa76   : > { %v7820_v46 = vadd.s32 %v7818_v52, %v7812_v24  ;;  %v7710_v54 = vsel %vm8549_vm0, 0, %v8548_v8  ;;  %v14448_v20 = vsel %vm7603_vm4, %v7725_v42, %v7701_v35  ;;  %v7794_v9 = vsel %vm7790_vm13, %v14358_v61, %v7793_v19 }
 0xa77   : > { %vm7821_vm10 = vc.u32 %v7819_v14, %v7815_v6  ;;  %v8214_v17 = vxor.u32 2147483648, %v8208_v30  ;;  %v7711_v62 = vsub.s32 32, %v7710_v54  ;;  %v7831_v45 = vmul.u32 %v7829_v28, %v7805_v63 }
 0xa78   : > { %v7833_v43 = vmul.u32 %v7829_v28, %v7806_v48  ;;  %v7715_v51 = vsub.s32 4294967266, %v7710_v54  ;;  %v7822_v39 = vsel %vm7821_vm10, 1, %v15173_v2  ;;  %v7834_v22 = vmul.u32 %v7830_v0, %v7806_v48 }
 0xa79   : > { %v7835_v57 = vshll.u32 %v7832_v56, 16  ;;  %v8215_v16 = vsel %vm8213_vm15, %v8200_v15, %v8214_v17  ;;  %v8218_v35 = vsel %vm8216_vm8, %v8217_v26, %v8208_v30  ;;  %v7713_v44 = vshrl.u32 %v7695_v37, %v7711_v62 }
 0xa7a   : > { %v7824_v11 = vadd.s32 %v7822_v39, %v7820_v46  ;;  %v8219_v61 = vsel %vm8212_vm5, %v8215_v16, %v8218_v35  ;;  %v7712_v23 = vshll.u32 %v14414_v34, %v7710_v54  ;;  %v7716_v63 = vadd.s32 127, %v7715_v51 }
 0xa7b   : > { %vm7839_vm12 = vc.u32 %v7831_v45, %v7835_v57  ;;  %v8220_v55 = vsel %vm8209_vm11, nan, %v8219_v61  ;;  %v7814_v48 = vshrl.u32 %v14425_v3, 16  ;;  %v7837_v0 = vshll.u32 %v7833_v43, 16 }
 0xa7c   : > { %v7840_v42 = vsel %vm7839_vm12, 1, %v15173_v2  ;;  %8261 = vmatpush.msrb.mxu1 %v8220_v55  ;;  %v7714_v19 = vor.u32 %v7713_v44, %v7712_v23  ;;  %v7717_v24 = vshll.u32 %v7716_v63, 23  ;;  %v7841_v37 = vadd.s32 %v7835_v57, %v7831_v45 }
 0xa7d   : > { %v7842_v28 = vadd.s32 %v7840_v42, %v7834_v22  ;;  %v14467_v25 = vshrl.u32 %v15183_v33, %v14013_v27  ;;  %v15289_v34 = vand.u32 2147483647, %v13931_v59  ;;  %v7825_v10 = vadd.s32 %v7824_v11, %v7814_v48 }
 0xa7e   : > { %v7291_v3 = vand.u32 2147483647, %v13923_v4  ;;  %v7718_v21 = vor.u32 4788187, %v7717_v24  ;;  %v7795_v6 = vsel %vm7789_vm1, %v14431_v13, %v7794_v9  ;;  %vm7843_vm13 = vc.u32 %v7841_v37, %v7837_v0 }
 0xa7f   : > { %vm14471_vm14 = vcmp.le.f32.partialorder %v15289_v34, 0.7853982  ;;  %v7816_v52 = vshrl.u32 %v14436_v29, 16  ;;  %v7836_v14 = vshrl.u32 %v7832_v56, 16  ;;  %v7844_v30 = vsel %vm7843_vm13, 1, %v15173_v2 }
 0xa80   : > { %v7728_v8 = vsel %vm14471_vm14, 0, %v14448_v20  ;;  %v7298_v26 = vand.u32 8388607, %v7291_v3  ;;  %v7719_v46 = vand.u32 2147483647, %v7718_v21  ;;  %v7721_v54 = vcvt.s32.f32 %v7714_v19 }
 0xa81   : > { %v7838_v17 = vshrl.u32 %v7833_v43, 16  ;;  %v7846_v62 = vadd.s32 %v7844_v30, %v7842_v28  ;;  %v14486_v45 = vadd.s32 %v7825_v10, %v7816_v52  ;;  %v7308_v38 = vshll.u32 %v15178_v47, %v13946_v58 }
 0xa82   : > { %v7299_v20 = vor.u32 8388608, %v7298_v26  ;;  %v7309_v13 = vshrl.u32 %v15179_v18, %v13960_v31  ;;  %v7722_v29 = vmul.f32 %v7721_v54, %v7719_v46  ;;  %v7311_v9 = vshll.u32 %v15179_v18, %v13946_v58 }
 0xa83   : > { %v7847_v56 = vadd.s32 %v7846_v62, %v7836_v14  ;;  %v7312_v51 = vshrl.u32 %v15180_v1, %v13960_v31  ;;  %v14496_v39 = vadd.s32 %v7841_v37, %v7837_v0  ;;  %v7314_v22 = vshll.u32 %v15180_v1, %v13946_v58  ;;  %v15292_v37 = vld [vmem:[#allocation19_spill] sm:$0xff] }
 0xa84   : > { %v14498_v43 = vor.u32 %v7309_v13, %v7308_v38  ;;  %v7315_v57 = vshrl.u32 %v15181_v41, %v13960_v31  ;;  %v7723_v16 = vxor.u32 2147483648, %v7722_v29  ;;  %v7849_v44 = vmul.u32 %v14394_v50, %v7795_v6 }
 0xa85   : > { %v7848_v35 = vadd.s32 %v7847_v56, %v7838_v17  ;;  %v14505_v11 = vor.u32 %v7312_v51, %v7311_v9  ;;  %vm7851_vm1 = vc.u32 %v14486_v45, %v14496_v39  ;;  %vm7323_vm3 = vcmp.lt.s32.totalorder %v13995_v7, 1 }
 0xa86   : > { %v7316_v61 = vor.u32 %v7315_v57, %v7314_v22  ;;  %vm7325_vm15 = vcmp.lt.s32.totalorder %v13995_v7, 3  ;;  %v7724_v58 = vsel %vm7603_vm4, %v7723_v16, %v7722_v29  ;;  %v14517_v50 = vshll.u32 %v7299_v20, 8 }
 0xa87   : > { %v7852_v23 = vadd.s32 1, %v7848_v35  ;;  %v7337_v63 = vsel %vm7325_vm15, %v13997_v49, %v14406_v12  ;;  %v14522_v55 = vsel %vm14471_vm14, %v13931_v59, %v7724_v58  ;;  %v7331_v48 = vsel %vm7323_vm3, %v14498_v43, %v14505_v11 }
 0xa88   : > { %v7333_v0 = vsel %vm7325_vm15, %v7316_v61, %v14149_v32  ;;  %v7335_v49 = vsel %vm7323_vm3, %v14505_v11, %v7316_v61  ;;  %v7729_v12 = vmul.f32 %v14522_v55, %v14522_v55  ;;  %v7745_v42 = vadd.s32 3, %v7728_v8  ;;  %v15293_v8 = vld [vmem:[#allocation16_spill] sm:$0xff] }
 0xa89   : > { %v7853_v19 = vsel %vm7851_vm1, %v7852_v23, %v7848_v35  ;;  %vm7324_vm4 = vcmp.lt.s32.totalorder %v13995_v7, 2  ;;  %v14539_v24 = vor.u32 %v14410_v40, %v14017_v36  ;;  %vm7481_vm8 = vcmp.lt.s32.totalorder %v15292_v37, 4 }
 0xa8a   : > { %v7854_v28 = vadd.s32 %v7853_v19, %v7849_v44  ;;  %v7338_v32 = vsel %vm7324_vm4, %v7335_v49, %v7337_v63  ;;  %v7730_v34 = vmul.f32 -0.001358992, %v7729_v12  ;;  %v7737_v15 = vmul.f32 -0.00019511016, %v7729_v12 }
 0xa8b   : > { %v14546_v10 = vsel %vm7324_vm4, %v7331_v48, %v7333_v0  ;;  %v7342_v21 = vand.u32 65535, %v7338_v32  ;;  %v7477_v6 = vor.u32 %v14467_v25, %v15293_v8  ;;  %v7340_v36 = vand.u32 65535, %v14517_v50 }
 0xa8c   : > { %v7855_v52 = vadd.s32 536870912, %v7854_v28  ;;  %v7343_v40 = vshrl.u32 %v7338_v32, 16  ;;  %v7731_v14 = vadd.f32 0.041655596, %v7730_v34  ;;  %v7738_v30 = vadd.f32 0.008332121, %v7737_v15 }
 0xa8d   : > { %v14551_v26 = vand.u32 3, %v7745_v42  ;;  %v7341_v46 = vshrl.u32 %v14517_v50, 16  ;;  %v14557_v54 = vsel %vm7481_vm8, %v14539_v24, 920167782  ;;  %v7365_v20 = vshrl.u32 %v14546_v10, 16 }
 0xa8e   : > { %v14559_v17 = vshrl.u32 %v7855_v52, 30  ;;  %v7345_v62 = vmul.u32 %v7343_v40, %v7340_v36  ;;  %v7732_v38 = vmul.f32 %v7731_v14, %v7729_v12  ;;  %v7739_v13 = vmul.f32 %v7738_v30, %v7729_v12 }
 0xa8f   : > { %v7307_v29 = vshrl.u32 %v15178_v47, %v13960_v31  ;;  %v14564_v56 = vmul.u32 %v7342_v21, %v7341_v46  ;;  %v7328_v51 = vsel %vm7326_vm9, %v7316_v61, 2102212464  ;;  %v7344_v22 = vmul.u32 %v7342_v21, %v7340_v36 }
 0xa90   : > { %v7857_v9 = vshll.u32 %v14559_v17, 30  ;;  %v7348_v57 = vshll.u32 %v7345_v62, 16  ;;  %v7733_v16 = vadd.f32 -0.4999988, %v7732_v38  ;;  %v7740_v35 = vadd.f32 -0.16666654, %v7739_v13 }
 0xa91   : > { %vm7751_vm5 = vcmp.eq.s32.totalorder %v14551_v26, 2  ;;  %v7347_v44 = vmul.u32 %v7343_v40, %v7341_v46  ;;  %v7364_v58 = vand.u32 65535, %v14546_v10  ;;  %vm7748_vm11 = vcmp.eq.s32.totalorder %v14551_v26, 0 }
 0xa92   : > { %v14572_v23 = vsub.s32 %v7854_v28, %v7857_v9  ;;  %vm7352_vm7 = vc.u32 %v7344_v22, %v7348_v57  ;;  %v7354_v31 = vadd.s32 %v7348_v57, %v7344_v22  ;;  %v14574_v63 = vmul.u32 %v7365_v20, %v7340_v36 }
 0xa93   : > { %v7734_v48 = vmul.f32 %v7733_v16, %v7729_v12  ;;  %v7741_v0 = vmul.f32 %v7740_v35, %v7729_v12  ;;  %vm7747_vm9 = vcmp.lt.s32.totalorder %v14551_v26, 2  ;;  %v7350_v61 = vshll.u32 %v14564_v56, 16 }
 0xa94   : > { %v7353_v49 = vsel %vm7352_vm7, 1, %v15173_v2  ;;  %vm7744_vm0 = vweird.f32 %v13931_v59  ;;  %vm7758_vm10 = vcmp.lt.s32.totalorder %v13940_v53, 0  ;;  %vm7859_vm12 = vcmp.lt.s32.totalorder %v14572_v23, 0 }
 0xa95   : > { %v7860_v42 = vsub.s32 0, %v14572_v23  ;;  %v7327_v19 = vsel %vm7323_vm3, %v7307_v29, %v14498_v43  ;;  %v7355_v28 = vadd.s32 %v7353_v49, %v7347_v44  ;;  %v7735_v12 = vadd.f32 1.0, %v7734_v48 }
 0xa96   : > { %v7742_v32 = vadd.f32 1.0, %v7741_v0  ;;  %v7329_v34 = vsel %vm7325_vm15, %v14505_v11, %v7328_v51  ;;  %vm7356_vm14 = vc.u32 %v7354_v31, %v7350_v61  ;;  %v7368_v21 = vmul.u32 %v7364_v58, %v7341_v46  ;;  %v15296_v61 = vld [vmem:[#allocation12_spill] sm:$0xff] }
 0xa97   : > { %v7861_v15 = vsel %vm7859_vm12, %v7860_v42, %v14572_v23  ;;  %v7357_v10 = vsel %vm7356_vm14, 1, %v15173_v2  ;;  %v7370_v52 = vshll.u32 %v14574_v63, 16  ;;  %v7752_v14 = vxor.u32 2147483648, %v7735_v12 }
 0xa98   : > { %v7743_v40 = vmul.f32 %v7742_v32, %v14522_v55  ;;  %vm14595_vm13 = vcmp.le.f32.partialorder %v7756_v5, 0.7853982  ;;  %v7862_v30 = vclz %v7861_v15  ;;  %v7359_v38 = vadd.s32 %v7357_v10, %v7355_v28 }
 0xa99   : > { %v7850_v11 = vadd.s32 %v14496_v39, %v14486_v45  ;;  %v7880_v13 = vsub.s32 4, %v14559_v17  ;;  %v14604_v29 = vsel %vm7324_vm4, %v7327_v19, %v7329_v34  ;;  %v7366_v9 = vmul.u32 %v7364_v58, %v7340_v36 }
 0xa9a   : > { %v7749_v55 = vxor.u32 2147483648, %v7743_v40  ;;  %v8551_v51 = vadd.s32 4294967294, %v7862_v30  ;;  %v7349_v22 = vshrl.u32 %v7345_v62, 16  ;;  %v7369_v57 = vmul.u32 %v7365_v20, %v7341_v46 }
 0xa9b   : > { %v7753_v5 = vsel %vm7751_vm5, %v7752_v14, %v7743_v40  ;;  %v7372_v16 = vshll.u32 %v7368_v21, 16  ;;  %vm7374_vm1 = vc.u32 %v7366_v9, %v7370_v52  ;;  %v7376_v35 = vadd.s32 %v7370_v52, %v7366_v9  ;;  %v15297_v14 = vld [vmem:[#allocation24_spill] sm:$0xff] }
 0xa9c   : > { %v7750_v45 = vsel %vm7748_vm11, %v7735_v12, %v7749_v55  ;;  %vm8552_vm3 = vcmp.lt.s32.totalorder %v8551_v51, 0  ;;  %v7360_v39 = vadd.s32 %v7359_v38, %v7349_v22  ;;  %v7375_v7 = vsel %vm7374_vm1, 1, %v15173_v2 }
 0xa9d   : > { %v7754_v36 = vsel %vm7747_vm9, %v7750_v45, %v7753_v5  ;;  %v7865_v44 = vsel %vm8552_vm3, 0, %v8551_v51  ;;  %v7377_v58 = vadd.s32 %v7375_v7, %v7369_v57  ;;  %vm7378_vm15 = vc.u32 %v7376_v35, %v7372_v16  ;;  %v15298_v45 = vld [vmem:[#allocation27_spill] sm:$0xff] }
 0xa9e   : > { %v7755_v46 = vsel %vm7744_vm0, nan, %v7754_v36  ;;  %v7866_v62 = vsub.s32 32, %v7865_v44  ;;  %v7870_v20 = vsub.s32 4294967266, %v7865_v44  ;;  %v7881_v31 = vsel %vm7758_vm10, %v7880_v13, %v14559_v17 }
 0xa9f   : > { %8242 = vmatpush.msrb.mxu0 %v7755_v46  ;;  %v7351_v48 = vshrl.u32 %v14564_v56, 16  ;;  %v7371_v0 = vshrl.u32 %v14574_v63, 16  ;;  %v7379_v26 = vsel %vm7378_vm15, 1, %v15173_v2  ;;  %v7446_v49 = vand.u32 2147483647, %v15296_v61 }
 0xaa0   : > { %v7867_v42 = vshll.u32 %v14572_v23, %v7865_v44  ;;  %v7868_v19 = vshrl.u32 %v7850_v11, %v7866_v62  ;;  %v7871_v59 = vadd.s32 127, %v7870_v20  ;;  %v7381_v28 = vadd.s32 %v7379_v26, %v7377_v58  ;;  %v15299_v44 = vld [vmem:[#allocation18_spill] sm:$0xff] }
 0xaa1   : > { %v7491_v17 = vsel %vm7481_vm8, %v7477_v6, 1326507024  ;;  %v7883_v56 = vsel %vm14595_vm13, 0, %v7881_v31  ;;  %v7361_v12 = vadd.s32 %v7360_v39, %v7351_v48  ;;  %v7453_v63 = vand.u32 8388607, %v7446_v49 }
 0xaa2   : > { %v7869_v32 = vor.u32 %v7868_v19, %v7867_v42  ;;  %v7872_v34 = vshll.u32 %v7871_v59, 23  ;;  %v7373_v15 = vshrl.u32 %v7368_v21, 16  ;;  %v7382_v23 = vadd.s32 %v7381_v28, %v7371_v0 }
 0xaa3   : > { %v7380_v10 = vadd.s32 %v7376_v35, %v7372_v16  ;;  %v7384_v52 = vmul.u32 %v14517_v50, %v14604_v29  ;;  %v7454_v40 = vor.u32 8388608, %v7453_v63  ;;  %v7464_v25 = vshrl.u32 %v15179_v18, %v14013_v27 }
 0xaa4   : > { %v7873_v8 = vor.u32 4788187, %v7872_v34  ;;  %v7383_v6 = vadd.s32 %v7382_v23, %v7373_v15  ;;  %v7466_v30 = vshll.u32 %v15179_v18, %v15297_v14  ;;  %v7467_v38 = vshrl.u32 %v15180_v1, %v14013_v27 }
 0xaa5   : > { %vm7386_vm4 = vc.u32 %v7361_v12, %v7380_v10  ;;  %v7463_v21 = vshll.u32 %v15178_v47, %v15297_v14  ;;  %v7469_v11 = vshll.u32 %v15180_v1, %v15297_v14  ;;  %v7470_v50 = vshrl.u32 %v15181_v41, %v14013_v27 }
 0xaa6   : > { %v7874_v13 = vand.u32 2147483647, %v7873_v8  ;;  %v7876_v29 = vcvt.s32.f32 %v7869_v32  ;;  %v7387_v9 = vadd.s32 1, %v7383_v6  ;;  %v14646_v55 = vor.u32 %v7467_v38, %v7466_v30 }
 0xaa7   : > { %v14648_v51 = vor.u32 %v7464_v25, %v7463_v21  ;;  %v7471_v22 = vor.u32 %v7470_v50, %v7469_v11  ;;  %vm7478_vm5 = vcmp.lt.s32.totalorder %v15292_v37, 1  ;;  %vm7480_vm11 = vcmp.lt.s32.totalorder %v15292_v37, 3 }
 0xaa8   : > { %v7877_v57 = vmul.f32 %v7876_v29, %v7874_v13  ;;  %v7388_v5 = vsel %vm7386_vm4, %v7387_v9, %v7383_v6  ;;  %v7492_v16 = vsel %vm7480_vm11, %v14539_v24, %v7491_v17  ;;  %v14655_v35 = vshll.u32 %v7454_v40, 8 }
 0xaa9   : > { %v7162_v39 = vshll.u32 %v15181_v41, %v15298_v45  ;;  %v7389_v7 = vadd.s32 %v7388_v5, %v7384_v52  ;;  %vm7479_vm7 = vcmp.lt.s32.totalorder %v15292_v37, 2  ;;  %v7490_v36 = vsel %vm7478_vm5, %v14646_v55, %v7471_v22 }
 0xaaa   : > { %v7163_v58 = vshrl.u32 %v15182_v60, %v15299_v44  ;;  %v14667_v46 = vshll.u32 %v15182_v60, %v15298_v45  ;;  %v7878_v24 = vxor.u32 2147483648, %v7877_v57  ;;  %v7493_v62 = vsel %vm7479_vm7, %v7490_v36, %v7492_v16 }
 0xaab   : > { %v7900_v20 = vadd.s32 3, %v7883_v56  ;;  %v7390_v31 = vadd.s32 536870912, %v7389_v7  ;;  %v7486_v48 = vsel %vm7478_vm5, %v14648_v51, %v14646_v55  ;;  %v7488_v0 = vsel %vm7480_vm11, %v7471_v22, %v14557_v54 }
 0xaac   : > { %v7879_v26 = vsel %vm7758_vm10, %v7878_v24, %v7877_v57  ;;  %v7495_v60 = vand.u32 65535, %v14655_v35  ;;  %v7497_v42 = vand.u32 65535, %v7493_v62  ;;  %v7498_v19 = vshrl.u32 %v7493_v62, 16 }
 0xaad   : > { %v14683_v59 = vshrl.u32 %v15183_v33, %v15299_v44  ;;  %v14688_v28 = vsel %vm14595_vm13, %v13940_v53, %v7879_v26  ;;  %v14690_v17 = vshrl.u32 %v7390_v31, 30  ;;  %v14693_v54 = vshrl.u32 %v14655_v35, 16 }
 0xaae   : > { %v14695_v56 = vor.u32 %v7163_v58, %v7162_v39  ;;  %v7884_v63 = vmul.f32 %v14688_v28, %v14688_v28  ;;  %v7489_v32 = vsel %vm7479_vm7, %v7486_v48, %v7488_v0  ;;  %v7500_v33 = vmul.u32 %v7498_v19, %v7495_v60 }
 0xaaf   : > { %v14701_v34 = vand.u32 3, %v7900_v20  ;;  %v14703_v15 = vadd.s32 %v7380_v10, %v7361_v12  ;;  %v7392_v43 = vshll.u32 %v14690_v17, 30  ;;  %v14707_v23 = vmul.u32 %v7497_v42, %v14693_v54 }
 0xab0   : > { %v7885_v52 = vmul.f32 -0.001358992, %v7884_v63  ;;  %v7892_v40 = vmul.f32 -0.00019511016, %v7884_v63  ;;  %v7499_v25 = vmul.u32 %v7497_v42, %v7495_v60  ;;  %v7503_v8 = vshll.u32 %v7500_v33, 16 }
 0xab1   : > { %v14709_v6 = vsub.s32 %v7389_v7, %v7392_v43  ;;  %v7483_v14 = vsel %vm7481_vm8, %v7471_v22, 2102212464  ;;  %v7519_v30 = vand.u32 65535, %v7489_v32  ;;  %v7520_v38 = vshrl.u32 %v7489_v32, 16 }
 0xab2   : > { %v7886_v21 = vadd.f32 0.041655596, %v7885_v52  ;;  %v7893_v11 = vadd.f32 0.008332121, %v7892_v40  ;;  %v7502_v12 = vmul.u32 %v7498_v19, %v14693_v54  ;;  %vm7507_vm9 = vc.u32 %v7499_v25, %v7503_v8 }
 0xab3   : > { %vm7394_vm0 = vcmp.lt.s32.totalorder %v14709_v6, 0  ;;  %v7395_v10 = vsub.s32 0, %v14709_v6  ;;  %v7505_v50 = vshll.u32 %v14707_v23, 16  ;;  %v7508_v13 = vsel %vm7507_vm9, 1, %v15173_v2 }
 0xab4   : > { %v7887_v29 = vmul.f32 %v7886_v21, %v7884_v63  ;;  %v7894_v9 = vmul.f32 %v7893_v11, %v7884_v63  ;;  %v7509_v57 = vadd.s32 %v7503_v8, %v7499_v25  ;;  %v7510_v5 = vadd.s32 %v7508_v13, %v7502_v12 }
 0xab5   : > { %v7396_v22 = vsel %vm7394_vm0, %v7395_v10, %v14709_v6  ;;  %v7462_v16 = vshrl.u32 %v15178_v47, %v14013_v27  ;;  %v7522_v39 = vmul.u32 %v7520_v38, %v7495_v60  ;;  %v14722_v7 = vmul.u32 %v7519_v30, %v14693_v54 }
 0xab6   : > { %v7888_v36 = vadd.f32 -0.4999988, %v7887_v29  ;;  %v7895_v58 = vadd.f32 -0.16666654, %v7894_v9  ;;  %vm7906_vm8 = vcmp.eq.s32.totalorder %v14701_v34, 2  ;;  %v7397_v24 = vclz %v7396_v22  ;;  %v15300_v22 = vld [vmem:[#allocation28_spill] sm:$0xff] }
 0xab7   : > { %vm7511_vm10 = vc.u32 %v7509_v57, %v7505_v50  ;;  %vm7903_vm12 = vcmp.eq.s32.totalorder %v14701_v34, 0  ;;  %v7415_v62 = vsub.s32 4, %v14690_v17  ;;  %v7482_v20 = vsel %vm7478_vm5, %v7462_v16, %v14648_v51 }
 0xab8   : > { %v7484_v27 = vsel %vm7480_vm11, %v14646_v55, %v7483_v14  ;;  %v7512_v31 = vsel %vm7511_vm10, 1, %v15173_v2  ;;  %v7889_v48 = vmul.f32 %v7888_v36, %v7884_v63  ;;  %v7896_v0 = vmul.f32 %v7895_v58, %v7884_v63 }
 0xab9   : > { %vm7902_vm14 = vcmp.lt.s32.totalorder %v14701_v34, 2  ;;  %v8542_v26 = vadd.s32 4294967294, %v7397_v24  ;;  %v7514_v42 = vadd.s32 %v7512_v31, %v7510_v5  ;;  %vm7899_vm13 = vweird.f32 %v13940_v53 }
 0xaba   : > { %v7504_v19 = vshrl.u32 %v7500_v33, 16  ;;  %v7506_v32 = vshrl.u32 %v14707_v23, 16  ;;  %v7521_v43 = vmul.u32 %v7519_v30, %v7495_v60  ;;  %v7525_v52 = vshll.u32 %v7522_v39, 16 }
 0xabb   : > { %v7890_v51 = vadd.f32 1.0, %v7889_v48  ;;  %v7897_v40 = vadd.f32 1.0, %v7896_v0  ;;  %vm8543_vm1 = vcmp.lt.s32.totalorder %v8542_v26, 0  ;;  %v7527_v55 = vshll.u32 %v14722_v7, 16 }
 0xabc   : > { %v7400_v25 = vsel %vm8543_vm1, 0, %v8542_v26  ;;  %v7515_v8 = vadd.s32 %v7514_v42, %v7504_v19  ;;  %vm7529_vm3 = vc.u32 %v7521_v43, %v7525_v52  ;;  %v7531_v63 = vadd.s32 %v7525_v52, %v7521_v43 }
 0xabd   : > { %v7898_v14 = vmul.f32 %v7897_v40, %v14688_v28  ;;  %v7907_v21 = vxor.u32 2147483648, %v7890_v51  ;;  %v7401_v11 = vsub.s32 32, %v7400_v25  ;;  %v7524_v12 = vmul.u32 %v7520_v38, %v14693_v54 }
 0xabe   : > { %v7405_v33 = vsub.s32 4294967266, %v7400_v25  ;;  %v7526_v10 = vshrl.u32 %v7522_v39, 16  ;;  %v7530_v60 = vsel %vm7529_vm3, 1, %v15173_v2  ;;  %vm7533_vm15 = vc.u32 %v7531_v63, %v7527_v55 }
 0xabf   : > { %v7904_v23 = vxor.u32 2147483648, %v7898_v14  ;;  %v7402_v30 = vshll.u32 %v14709_v6, %v7400_v25  ;;  %v7403_v50 = vshrl.u32 %v14703_v15, %v7401_v11  ;;  %v7532_v13 = vadd.s32 %v7530_v60, %v7524_v12 }
 0xac0   : > { %v7908_v29 = vsel %vm7906_vm8, %v7907_v21, %v7898_v14  ;;  %v7406_v9 = vadd.s32 127, %v7405_v33  ;;  %v14745_v28 = vadd.s32 %v7515_v8, %v7506_v32  ;;  %v7534_v57 = vsel %vm7533_vm15, 1, %v15173_v2  ;;  %v15304_v32 = vld [vmem:[#allocation9_spill] sm:$0xff]  ;;  %v15305_v21 = vld [vmem:[#allocation15_spill] sm:$0xff] }
 0xac1   : > { %v7905_v54 = vsel %vm7903_vm12, %v7890_v51, %v7904_v23  ;;  %v7404_v38 = vor.u32 %v7403_v50, %v7402_v30  ;;  %v7536_v5 = vadd.s32 %v7534_v57, %v7532_v13  ;;  %v6981_v16 = vand.u32 2147483647, %v15300_v22  ;;  %v15306_v33 = vld [vmem:[#allocation11_spill] sm:$0xff]  ;;  %v15308_v30 = vld [vmem:[#allocation25_spill] sm:$0xff] }
 0xac2   : > { %v7909_v6 = vsel %vm7902_vm14, %v7905_v54, %v7908_v29  ;;  %vm14755_vm4 = vcmp.le.f32.partialorder %v7291_v3, 0.7853982  ;;  %vm7293_vm5 = vcmp.lt.s32.totalorder %v13923_v4, 0  ;;  %v7407_v39 = vshll.u32 %v7406_v9, 23 }
 0xac3   : > { %v7910_v36 = vsel %vm7899_vm13, nan, %v7909_v6  ;;  %v7528_v58 = vshrl.u32 %v14722_v7, 16  ;;  %v14763_v24 = vadd.s32 %v7531_v63, %v7527_v55  ;;  %v7537_v31 = vadd.s32 %v7536_v5, %v7526_v10  ;;  %v15303_v7 = vld [vmem:[#allocation17_spill] sm:$0xff]  ;;  %v15307_v10 = vld [vmem:[#allocation26_spill] sm:$0xff] }
 0xac4   : > { %8262 = vmatpush.msrb.mxu1 %v7910_v36  ;;  %v7408_v34 = vor.u32 4788187, %v7407_v39  ;;  %v7416_v3 = vsel %vm7293_vm5, %v7415_v62, %v14690_v17  ;;  %v7485_v48 = vsel %vm7479_vm7, %v7482_v20, %v7484_v27  ;;  %v6988_v0 = vand.u32 8388607, %v6981_v16 }
 0xac5   : > { %v7411_v26 = vcvt.s32.f32 %v7404_v38  ;;  %v7538_v53 = vadd.s32 %v7537_v31, %v7528_v58  ;;  %vm7541_vm11 = vc.u32 %v14745_v28, %v14763_v24  ;;  %v6999_v42 = vshrl.u32 %v15179_v18, %v15303_v7 }
 0xac6   : > { %v7409_v19 = vand.u32 2147483647, %v7408_v34  ;;  %v6998_v43 = vshll.u32 %v15178_v47, %v15304_v32  ;;  %v7001_v17 = vshll.u32 %v15179_v18, %v15304_v32  ;;  %v7002_v37 = vshrl.u32 %v15180_v1, %v15303_v7 }
 0xac7   : > { %v7542_v62 = vadd.s32 1, %v7538_v53  ;;  %v6989_v20 = vor.u32 8388608, %v6988_v0  ;;  %v7004_v27 = vshll.u32 %v15180_v1, %v15304_v32  ;;  %v7005_v52 = vshrl.u32 %v15181_v41, %v15303_v7 }
 0xac8   : > { %v7412_v51 = vmul.f32 %v7411_v26, %v7409_v19  ;;  %v7418_v40 = vsel %vm14755_vm4, 0, %v7416_v3  ;;  %v7539_v55 = vmul.u32 %v14655_v35, %v7485_v48  ;;  %v7003_v25 = vor.u32 %v7002_v37, %v7001_v17 }
 0xac9   : > { %v7543_v8 = vsel %vm7541_vm11, %v7542_v62, %v7538_v53  ;;  %v7000_v63 = vor.u32 %v6999_v42, %v6998_v43  ;;  %v7006_v14 = vor.u32 %v7005_v52, %v7004_v27  ;;  %vm7015_vm7 = vcmp.lt.s32.totalorder %v15305_v21, 3 }
 0xaca   : > { %v7413_v11 = vxor.u32 2147483648, %v7412_v51  ;;  %v7544_v12 = vadd.s32 %v7543_v8, %v7539_v55  ;;  %vm7013_vm9 = vcmp.lt.s32.totalorder %v15305_v21, 1  ;;  %v7027_v60 = vsel %vm7015_vm7, %v15307_v10, %v15306_v33 }
 0xacb   : > { %v7167_v23 = vor.u32 %v14683_v59, %v14667_v46  ;;  %vm7171_vm0 = vcmp.lt.s32.totalorder %v15308_v30, 4  ;;  %v7025_v35 = vsel %vm7013_vm9, %v7003_v25, %v7006_v14  ;;  %v14800_v50 = vshll.u32 %v6989_v20, 8  ;;  %v15309_v59 = vld [vmem:[#allocation23_spill] sm:$0xff] }
 0xacc   : > { %v7414_v13 = vsel %vm7293_vm5, %v7413_v11, %v7412_v51  ;;  %v7435_v29 = vadd.s32 3, %v7418_v40  ;;  %v7545_v9 = vadd.s32 536870912, %v7544_v12  ;;  %vm7014_vm8 = vcmp.lt.s32.totalorder %v15305_v21, 2 }
 0xacd   : > { %v7417_v57 = vsel %vm14755_vm4, %v13923_v4, %v7414_v13  ;;  %v7021_v46 = vsel %vm7013_vm9, %v7000_v63, %v7003_v25  ;;  %v7023_v54 = vsel %vm7015_vm7, %v7006_v14, %v15309_v59  ;;  %v7028_v38 = vsel %vm7014_vm8, %v7025_v35, %v7027_v60 }
 0xace   : > { %v14818_v5 = vsel %vm7171_vm0, %v14695_v56, 920167782  ;;  %v7419_v6 = vmul.f32 %v7417_v57, %v7417_v57  ;;  %v14820_v39 = vshrl.u32 %v7545_v9, 30  ;;  %v7032_v15 = vand.u32 65535, %v7028_v38 }
 0xacf   : > { %v6997_v36 = vshrl.u32 %v15178_v47, %v15303_v7  ;;  %v7030_v58 = vand.u32 65535, %v14800_v50  ;;  %v7031_v31 = vshrl.u32 %v14800_v50, 16  ;;  %v7033_v34 = vshrl.u32 %v7028_v38, 16 }
 0xad0   : > { %v7420_v3 = vmul.f32 -0.001358992, %v7419_v6  ;;  %v7427_v48 = vmul.f32 -0.00019511016, %v7419_v6  ;;  %v7547_v0 = vshll.u32 %v14820_v39, 30  ;;  %v7024_v26 = vsel %vm7014_vm8, %v7021_v46, %v7023_v54 }
 0xad1   : > { %v14831_v53 = vsel %vm7171_vm0, %v7167_v23, 1326507024  ;;  %v14833_v42 = vand.u32 3, %v7435_v29  ;;  %v7035_v19 = vmul.u32 %v7033_v34, %v7030_v58  ;;  %v14835_v7 = vmul.u32 %v7032_v15, %v7031_v31 }
 0xad2   : > { %v7421_v32 = vadd.f32 0.041655596, %v7420_v3  ;;  %v7428_v43 = vadd.f32 0.008332121, %v7427_v48  ;;  %v14837_v17 = vsub.s32 %v7544_v12, %v7547_v0  ;;  %v7017_v37 = vsel %vm7013_vm9, %v6997_v36, %v7000_v63 }
 0xad3   : > { %v7018_v62 = vsel %vm7016_vm2, %v7006_v14, 2102212464  ;;  %v7034_v20 = vmul.u32 %v7032_v15, %v7030_v58  ;;  %v7038_v27 = vshll.u32 %v7035_v19, 16  ;;  %v7055_v52 = vshrl.u32 %v7024_v26, 16 }
 0xad4   : > { %v7422_v51 = vmul.f32 %v7421_v32, %v7419_v6  ;;  %v7429_v40 = vmul.f32 %v7428_v43, %v7419_v6  ;;  %vm7549_vm10 = vcmp.lt.s32.totalorder %v14837_v17, 0  ;;  %v7550_v55 = vsub.s32 0, %v14837_v17 }
 0xad5   : > { %v7037_v8 = vmul.u32 %v7033_v34, %v7031_v31  ;;  %v7040_v11 = vshll.u32 %v14835_v7, 16  ;;  %vm7042_vm12 = vc.u32 %v7034_v20, %v7038_v27  ;;  %v7044_v12 = vadd.s32 %v7038_v27, %v7034_v20 }
 0xad6   : > { %v7423_v33 = vadd.f32 -0.4999988, %v7422_v51  ;;  %v7430_v10 = vadd.f32 -0.16666654, %v7429_v40  ;;  %v7551_v63 = vsel %vm7549_vm10, %v7550_v55, %v14837_v17  ;;  %v7043_v14 = vsel %vm7042_vm12, 1, %v15173_v2  ;;  %v15310_v40 = vld [vmem:[#allocation29_spill] sm:$0xff] }
 0xad7   : > { %v7552_v60 = vclz %v7551_v63  ;;  %v7019_v23 = vsel %vm7015_vm7, %v7003_v25, %v7018_v62  ;;  %v7045_v35 = vadd.s32 %v7043_v14, %v7037_v8  ;;  %vm7046_vm2 = vc.u32 %v7044_v12, %v7040_v11 }
 0xad8   : > { %v7424_v13 = vmul.f32 %v7423_v33, %v7419_v6  ;;  %v7431_v29 = vmul.f32 %v7430_v10, %v7419_v6  ;;  %vm7437_vm14 = vcmp.lt.s32.totalorder %v14833_v42, 2  ;;  %v7047_v9 = vsel %vm7046_vm2, 1, %v15173_v2 }
 0xad9   : > { %v7054_v46 = vand.u32 65535, %v7024_v26  ;;  %vm7434_vm13 = vweird.f32 %v13923_v4  ;;  %vm7438_vm1 = vcmp.eq.s32.totalorder %v14833_v42, 0  ;;  %vm7441_vm3 = vcmp.eq.s32.totalorder %v14833_v42, 2 }
 0xada   : > { %v7540_v59 = vadd.s32 %v14763_v24, %v14745_v28  ;;  %v8545_v54 = vadd.s32 4294967294, %v7552_v60  ;;  %v7425_v25 = vadd.f32 1.0, %v7424_v13  ;;  %v7432_v38 = vadd.f32 1.0, %v7431_v29 }
 0xadb   : > { %v7049_v15 = vadd.s32 %v7047_v9, %v7045_v35  ;;  %v7057_v36 = vmul.u32 %v7055_v52, %v7030_v58  ;;  %v14859_v6 = vsel %vm7014_vm8, %v7017_v37, %v7019_v23  ;;  %v7039_v34 = vshrl.u32 %v7035_v19, 16 }
 0xadc   : > { %vm8546_vm15 = vcmp.lt.s32.totalorder %v8545_v54, 0  ;;  %v7041_v3 = vshrl.u32 %v14835_v7, 16  ;;  %v7433_v48 = vmul.f32 %v7432_v38, %v7417_v57  ;;  %v7442_v0 = vxor.u32 2147483648, %v7425_v25 }
 0xadd   : > { %v7555_v26 = vsel %vm8546_vm15, 0, %v8545_v54  ;;  %v7058_v32 = vmul.u32 %v7054_v46, %v7031_v31  ;;  %v7056_v28 = vmul.u32 %v7054_v46, %v7030_v58  ;;  %v7060_v24 = vshll.u32 %v7057_v36, 16 }
 0xade   : > { %v7556_v43 = vsub.s32 32, %v7555_v26  ;;  %v7560_v62 = vsub.s32 4294967266, %v7555_v26  ;;  %v7439_v20 = vxor.u32 2147483648, %v7433_v48  ;;  %v7050_v27 = vadd.s32 %v7049_v15, %v7039_v34 }
 0xadf   : > { %v7059_v51 = vmul.u32 %v7055_v52, %v7031_v31  ;;  %v7136_v55 = vand.u32 2147483647, %v15310_v40  ;;  %v7443_v21 = vsel %vm7441_vm3, %v7442_v0, %v7433_v48  ;;  %vm7448_vm4 = vcmp.lt.s32.totalorder %v15296_v61, 0 }
 0xae0   : > { %v7557_v19 = vshll.u32 %v14837_v17, %v7555_v26  ;;  %v7558_v57 = vshrl.u32 %v7540_v59, %v7556_v43  ;;  %v7561_v7 = vadd.s32 127, %v7560_v62  ;;  %v7440_v37 = vsel %vm7438_vm1, %v7425_v25, %v7439_v20 }
 0xae1   : > { %v7062_v8 = vshll.u32 %v7058_v32, 16  ;;  %vm7064_vm5 = vc.u32 %v7056_v28, %v7060_v24  ;;  %v7066_v58 = vadd.s32 %v7060_v24, %v7056_v28  ;;  %v7444_v31 = vsel %vm7437_vm14, %v7440_v37, %v7443_v21 }
 0xae2   : > { %v7559_v52 = vor.u32 %v7558_v57, %v7557_v19  ;;  %v7562_v11 = vshll.u32 %v7561_v7, 23  ;;  %v7065_v12 = vsel %vm7064_vm5, 1, %v15173_v2  ;;  %v7445_v33 = vsel %vm7434_vm13, nan, %v7444_v31 }
 0xae3   : > { %v7570_v17 = vsub.s32 4, %v14820_v39  ;;  %v7067_v10 = vadd.s32 %v7065_v12, %v7059_v51  ;;  %vm7068_vm11 = vc.u32 %v7066_v58, %v7062_v8  ;;  %8243 = vmatpush.msrb.mxu0 %v7445_v33  ;;  %vm14877_vm7 = vcmp.le.f32.partialorder %v7446_v49, 0.7853982 }
 0xae4   : > { %v7563_v42 = vor.u32 4788187, %v7562_v11  ;;  %v14881_v14 = vadd.s32 %v7050_v27, %v7041_v3  ;;  %v7061_v60 = vshrl.u32 %v7057_v36, 16  ;;  %v7069_v23 = vsel %vm7068_vm11, 1, %v15173_v2 }
 0xae5   : > { %v7063_v35 = vshrl.u32 %v7058_v32, 16  ;;  %v14884_v4 = vadd.s32 %v7066_v58, %v7062_v8  ;;  %v7071_v13 = vadd.s32 %v7069_v23, %v7067_v10  ;;  %v7143_v29 = vand.u32 8388607, %v7136_v55 }
 0xae6   : > { %v7564_v9 = vand.u32 2147483647, %v7563_v42  ;;  %v7566_v46 = vcvt.s32.f32 %v7559_v52  ;;  %v7153_v49 = vshll.u32 %v15178_v47, %v15298_v45  ;;  %v7154_v59 = vshrl.u32 %v15179_v18, %v15299_v44 }
 0xae7   : > { %v7072_v54 = vadd.s32 %v7071_v13, %v7061_v60  ;;  %v7144_v25 = vor.u32 8388608, %v7143_v29  ;;  %v7156_v38 = vshll.u32 %v15179_v18, %v15298_v45  ;;  %v7157_v15 = vshrl.u32 %v15180_v1, %v15299_v44 }
 0xae8   : > { %v7567_v36 = vmul.f32 %v7566_v46, %v7564_v9  ;;  %v14896_v34 = vor.u32 %v7154_v59, %v7153_v49  ;;  %v7159_v3 = vshll.u32 %v15180_v1, %v15298_v45  ;;  %v7160_v48 = vshrl.u32 %v15181_v41, %v15299_v44 }
 0xae9   : > { %v7571_v0 = vsel %vm7448_vm4, %v7570_v17, %v14820_v39  ;;  %v7073_v26 = vadd.s32 %v7072_v54, %v7063_v35  ;;  %vm7076_vm9 = vc.u32 %v14881_v14, %v14884_v4  ;;  %v14907_v18 = vor.u32 %v7157_v15, %v7156_v38 }
 0xaea   : > { %v7568_v32 = vxor.u32 2147483648, %v7567_v36  ;;  %v14909_v43 = vor.u32 %v7160_v48, %v7159_v3  ;;  %vm7168_vm8 = vcmp.lt.s32.totalorder %v15308_v30, 1  ;;  %vm7170_vm10 = vcmp.lt.s32.totalorder %v15308_v30, 3 }
 0xaeb   : > { %v7077_v1 = vadd.s32 1, %v7073_v26  ;;  %v7176_v41 = vsel %vm7168_vm8, %v14896_v34, %v14907_v18  ;;  %v7182_v45 = vsel %vm7170_vm10, %v14695_v56, %v14831_v53  ;;  %v14921_v39 = vshll.u32 %v7144_v25, 8 }
 0xaec   : > { %v7569_v62 = vsel %vm7448_vm4, %v7568_v32, %v7567_v36  ;;  %v7074_v28 = vmul.u32 %v14800_v50, %v14859_v6  ;;  %v7178_v24 = vsel %vm7170_vm10, %v14909_v43, %v14818_v5  ;;  %v7180_v20 = vsel %vm7168_vm8, %v14907_v18, %v14909_v43 }
 0xaed   : > { %v7572_v56 = vsel %vm14877_vm7, %v15296_v61, %v7569_v62  ;;  %v7573_v53 = vsel %vm14877_vm7, 0, %v7571_v0  ;;  %v7078_v50 = vsel %vm7076_vm9, %v7077_v1, %v7073_v26  ;;  %vm7169_vm12 = vcmp.lt.s32.totalorder %v15308_v30, 2 }
 0xaee   : > { %v7574_v6 = vmul.f32 %v7572_v56, %v7572_v56  ;;  %v7079_v5 = vadd.s32 %v7078_v50, %v7074_v28  ;;  %v7179_v27 = vsel %vm7169_vm12, %v7176_v41, %v7178_v24  ;;  %v7183_v51 = vsel %vm7169_vm12, %v7180_v20, %v7182_v45 }
 0xaef   : > { %v7185_v21 = vand.u32 65535, %v14921_v39  ;;  %v7186_v19 = vshrl.u32 %v14921_v39, 16  ;;  %v7187_v57 = vand.u32 65535, %v7183_v51  ;;  %v7188_v7 = vshrl.u32 %v7183_v51, 16 }
 0xaf0   : > { %v7575_v37 = vmul.f32 -0.001358992, %v7574_v6  ;;  %v7582_v8 = vmul.f32 -0.00019511016, %v7574_v6  ;;  %v7080_v58 = vadd.s32 536870912, %v7079_v5  ;;  %v7590_v31 = vadd.s32 3, %v7573_v53 }
 0xaf1   : > { %v7190_v52 = vmul.u32 %v7188_v7, %v7185_v21  ;;  %v14950_v11 = vmul.u32 %v7187_v57, %v7186_v19  ;;  %v7210_v10 = vshrl.u32 %v7179_v27, 16  ;;  %v7189_v63 = vmul.u32 %v7187_v57, %v7185_v21 }
 0xaf2   : > { %v7576_v12 = vadd.f32 0.041655596, %v7575_v37  ;;  %v7583_v33 = vadd.f32 0.008332121, %v7582_v8  ;;  %v14952_v17 = vshrl.u32 %v7080_v58, 30  ;;  %v7591_v13 = vand.u32 3, %v7590_v31 }
 0xaf3   : > { %v7193_v42 = vshll.u32 %v7190_v52, 16  ;;  %v7195_v29 = vshll.u32 %v14950_v11, 16  ;;  %v7212_v54 = vmul.u32 %v7210_v10, %v7185_v21  ;;  %v7192_v25 = vmul.u32 %v7188_v7, %v7186_v19 }
 0xaf4   : > { %v7577_v60 = vmul.f32 %v7576_v12, %v7574_v6  ;;  %v7584_v23 = vmul.f32 %v7583_v33, %v7574_v6  ;;  %v7082_v35 = vshll.u32 %v14952_v17, 30  ;;  %v7209_v15 = vand.u32 65535, %v7179_v27 }
 0xaf5   : > { %vm7197_vm2 = vc.u32 %v7189_v63, %v7193_v42  ;;  %v7199_v9 = vadd.s32 %v7193_v42, %v7189_v63  ;;  %vm7589_vm1 = vweird.f32 %v15296_v61  ;;  %v7215_v45 = vshll.u32 %v7212_v54, 16 }
 0xaf6   : > { %v7578_v46 = vadd.f32 -0.4999988, %v7577_v60  ;;  %v7585_v49 = vadd.f32 -0.16666654, %v7584_v23  ;;  %v7083_v59 = vsub.s32 %v7079_v5, %v7082_v35  ;;  %v7198_v38 = vsel %vm7197_vm2, 1, %v15173_v2 }
 0xaf7   : > { %vm7201_vm14 = vc.u32 %v7199_v9, %v7195_v29  ;;  %v7200_v0 = vadd.s32 %v7198_v38, %v7192_v25  ;;  %vm7592_vm3 = vcmp.lt.s32.totalorder %v7591_v13, 2  ;;  %vm7593_vm15 = vcmp.eq.s32.totalorder %v7591_v13, 0 }
 0xaf8   : > { %v7579_v36 = vmul.f32 %v7578_v46, %v7574_v6  ;;  %v7586_v3 = vmul.f32 %v7585_v49, %v7574_v6  ;;  %vm7084_vm13 = vcmp.lt.s32.totalorder %v7083_v59, 0  ;;  %v7085_v48 = vsub.s32 0, %v7083_v59 }
 0xaf9   : > { %v7202_v26 = vsel %vm7201_vm14, 1, %v15173_v2  ;;  %v7213_v28 = vmul.u32 %v7209_v15, %v7186_v19  ;;  %vm7596_vm4 = vcmp.eq.s32.totalorder %v7591_v13, 2  ;;  %v7211_v53 = vmul.u32 %v7209_v15, %v7185_v21 }
 0xafa   : > { %v7580_v32 = vadd.f32 1.0, %v7579_v36  ;;  %v7587_v1 = vadd.f32 1.0, %v7586_v3  ;;  %v7086_v41 = vsel %vm7084_vm13, %v7085_v48, %v7083_v59  ;;  %v7075_v50 = vadd.s32 %v14884_v4, %v14881_v14 }
 0xafb   : > { %v7087_v62 = vclz %v7086_v41  ;;  %v7152_v5 = vshrl.u32 %v15178_v47, %v15299_v44  ;;  %v7204_v27 = vadd.s32 %v7202_v26, %v7200_v0  ;;  %v7194_v57 = vshrl.u32 %v7190_v52, 16 }
 0xafc   : > { %v7588_v24 = vmul.f32 %v7587_v1, %v7572_v56  ;;  %v7597_v20 = vxor.u32 2147483648, %v7580_v32  ;;  %v7214_v7 = vmul.u32 %v7210_v10, %v7186_v19  ;;  %vm7219_vm5 = vc.u32 %v7211_v53, %v7215_v45 }
 0xafd   : > { %v8536_v6 = vadd.s32 4294967294, %v7087_v62  ;;  %v7217_v37 = vshll.u32 %v7213_v28, 16  ;;  %v7220_v8 = vsel %vm7219_vm5, 1, %v15173_v2  ;;  %v7221_v56 = vadd.s32 %v7215_v45, %v7211_v53 }
 0xafe   : > { %v7594_v51 = vxor.u32 2147483648, %v7588_v24  ;;  %v7598_v21 = vsel %vm7596_vm4, %v7597_v20, %v7588_v24  ;;  %v7222_v14 = vadd.s32 %v7220_v8, %v7214_v7  ;;  %v7205_v44 = vadd.s32 %v7204_v27, %v7194_v57 }
 0xaff   : > { %vm8537_vm11 = vcmp.lt.s32.totalorder %v8536_v6, 0  ;;  %v7173_v52 = vsel %vm7171_vm0, %v14909_v43, 2102212464  ;;  %v7196_v33 = vshrl.u32 %v14950_v11, 16  ;;  %vm7223_vm7 = vc.u32 %v7221_v56, %v7217_v37 }
 0xb00   : > { %v7595_v58 = vsel %vm7593_vm15, %v7580_v32, %v7594_v51  ;;  %v7090_v31 = vsel %vm8537_vm11, 0, %v8536_v6  ;;  %v7224_v60 = vsel %vm7223_vm7, 1, %v15173_v2  ;;  %v7172_v23 = vsel %vm7168_vm8, %v7152_v5, %v14896_v34 }
 0xb01   : > { %v7599_v4 = vsel %vm7592_vm3, %v7595_v58, %v7598_v21  ;;  %v7091_v12 = vsub.s32 32, %v7090_v31  ;;  %v7095_v47 = vsub.s32 4294967266, %v7090_v31  ;;  %v7092_v10 = vshll.u32 %v7083_v59, %v7090_v31 }
 0xb02   : > { %v7600_v19 = vsel %vm7589_vm1, nan, %v7599_v4  ;;  %v7216_v35 = vshrl.u32 %v7212_v54, 16  ;;  %v7226_v61 = vadd.s32 %v7224_v60, %v7222_v14  ;;  %v7174_v43 = vsel %vm7170_vm10, %v14907_v18, %v7173_v52 }
 0xb03   : > { %8263 = vmatpush.msrb.mxu1 %v7600_v19  ;;  %v7093_v63 = vshrl.u32 %v7075_v50, %v7091_v12  ;;  %v7096_v42 = vadd.s32 127, %v7095_v47  ;;  %v7206_v11 = vadd.s32 %v7205_v44, %v7196_v33  ;;  %v7218_v9 = vshrl.u32 %v7213_v28, 16 }
 0xb04   : > { %v7227_v46 = vadd.s32 %v7226_v61, %v7216_v35  ;;  %v7225_v59 = vadd.s32 %v7221_v56, %v7217_v37  ;;  %v7175_v2 = vsel %vm7169_vm12, %v7172_v23, %v7174_v43  ;;  %vm6983_vm9 = vcmp.lt.s32.totalorder %v15300_v22, 0  ;;  %v8221_v43 = vld [vmem:[%s15049_s4] sm:$0x7] }
 0xb05   : > { %v7094_v13 = vor.u32 %v7093_v63, %v7092_v10  ;;  %v7097_v29 = vshll.u32 %v7096_v42, 23  ;;  %v7229_v36 = vmul.u32 %v14921_v39, %v7175_v2  ;;  %vm14986_vm8 = vcmp.le.f32.partialorder %v6981_v16, 0.7853982 }
 0xb06   : > { %v7228_v25 = vadd.s32 %v7227_v46, %v7218_v9  ;;  %vm7231_vm0 = vc.u32 %v7206_v11, %v7225_v59  ;;  %v7105_v26 = vsub.s32 4, %v14952_v17  ;;  %v7230_v44 = vadd.s32 %v7225_v59, %v7206_v11 }
 0xb07   : > { %v7098_v49 = vor.u32 4788187, %v7097_v29  ;;  %v7101_v15 = vcvt.s32.f32 %v7094_v13  ;;  %vm7124_vm1 = vweird.f32 %v15300_v22  ;;  %v8859_v9 = vmov 32  }
 0xb08   : > { %v7232_v34 = vadd.s32 1, %v7228_v25  ;;  %v7106_v45 = vsel %vm6983_vm9, %v7105_v26, %v14952_v17  ;;  %8657 = vset.pattern.permute.xlu2 %v8859_v9  ;;  %8658 = vset.pattern.permute.xlu0 %v8859_v9  ;;  %vm7138_vm3 = vcmp.lt.s32.totalorder %v15310_v40, 0  ;;  %vm7137_vm15 = vcmp.le.f32.partialorder %v7136_v55, 0.7853982 }
 0xb09   : > { %v7099_v38 = vand.u32 2147483647, %v7098_v49  ;;  %v7108_v50 = vsel %vm14986_vm8, 0, %v7106_v45  ;;  %8224 = vperm.xlu2 %8657, %v8221_v43   ;;  %vm7279_vm7 = vweird.f32 %v15310_v40 }
 0xb0a   : > { %v7233_v3 = vsel %vm7231_vm0, %v7232_v34, %v7228_v25  ;;  %v7125_v7 = vadd.s32 3, %v7108_v50  ;;  %vm8272_vm0 = vcmask 1043456  }
 0xb0b   : > { %v7102_v54 = vmul.f32 %v7101_v15, %v7099_v38  ;;  %v7234_v0 = vadd.s32 %v7233_v3, %v7229_v36 }
 0xb0c   : > { %v7126_v14 = vand.u32 3, %v7125_v7 }
 0xb0d   : > { %v7103_v48 = vxor.u32 2147483648, %v7102_v54  ;;  %v7235_v32 = vadd.s32 536870912, %v7234_v0 }
 0xb0e   : > { %vm7128_vm2 = vcmp.eq.s32.totalorder %v7126_v14, 0  ;;  %vm7131_vm14 = vcmp.eq.s32.totalorder %v7126_v14, 2  ;;  %vm7127_vm13 = vcmp.lt.s32.totalorder %v7126_v14, 2 }
 0xb0f   : > { %v7104_v30 = vsel %vm6983_vm9, %v7103_v48, %v7102_v54  ;;  %v14994_v41 = vshrl.u32 %v7235_v32, 30 }
 0xb10   : > { %v7107_v1 = vsel %vm14986_vm8, %v15300_v22, %v7104_v30 }
 0xb11   : > { %v7109_v39 = vmul.f32 %v7107_v1, %v7107_v1  ;;  %v7237_v16 = vshll.u32 %v14994_v41, 30  ;;  %v7260_v25 = vsub.s32 4, %v14994_v41 }
 0xb13   : > { %v7110_v62 = vmul.f32 -0.001358992, %v7109_v39  ;;  %v7117_v28 = vmul.f32 -0.00019511016, %v7109_v39  ;;  %v7238_v53 = vsub.s32 %v7234_v0, %v7237_v16  ;;  %v7261_v36 = vsel %vm7138_vm3, %v7260_v25, %v14994_v41 }
 0xb14   : > { %v7263_v0 = vsel %vm7137_vm15, 0, %v7261_v36 }
 0xb15   : > { %v7111_v24 = vadd.f32 0.041655596, %v7110_v62  ;;  %v7118_v20 = vadd.f32 0.008332121, %v7117_v28  ;;  %vm7239_vm10 = vcmp.lt.s32.totalorder %v7238_v53, 0  ;;  %v7240_v27 = vsub.s32 0, %v7238_v53 }
 0xb17   : > { %v7112_v6 = vmul.f32 %v7111_v24, %v7109_v39  ;;  %v7119_v5 = vmul.f32 %v7118_v20, %v7109_v39  ;;  %v7241_v37 = vsel %vm7239_vm10, %v7240_v27, %v7238_v53 }
 0xb18   : > { %v7242_v8 = vclz %v7241_v37 }
 0xb19   : > { %v7113_v51 = vadd.f32 -0.4999988, %v7112_v6  ;;  %v7120_v57 = vadd.f32 -0.16666654, %v7119_v5 }
 0xb1a   : > { %v8539_v58 = vadd.s32 4294967294, %v7242_v8 }
 0xb1b   : > { %v7114_v17 = vmul.f32 %v7113_v51, %v7109_v39  ;;  %v7121_v56 = vmul.f32 %v7120_v57, %v7109_v39 }
 0xb1c   : > { %vm8540_vm12 = vcmp.lt.s32.totalorder %v8539_v58, 0 }
 0xb1d   : > { %v7115_v21 = vadd.f32 1.0, %v7114_v17  ;;  %v7122_v31 = vadd.f32 1.0, %v7121_v56  ;;  %v7245_v47 = vsel %vm8540_vm12, 0, %v8539_v58 }
 0xb1e   : > { %v7246_v19 = vsub.s32 32, %v7245_v47  ;;  %v7250_v52 = vsub.s32 4294967266, %v7245_v47  ;;  %v7247_v10 = vshll.u32 %v7238_v53, %v7245_v47 }
 0xb1f   : > { %v7123_v4 = vmul.f32 %v7122_v31, %v7107_v1  ;;  %v7132_v12 = vxor.u32 2147483648, %v7115_v21  ;;  %v7280_v1 = vadd.s32 3, %v7263_v0 }
 0xb20   : > { %v7248_v63 = vshrl.u32 %v7230_v44, %v7246_v19  ;;  %v7251_v42 = vadd.s32 127, %v7250_v52 }
 0xb21   : > { %v7129_v33 = vxor.u32 2147483648, %v7123_v4  ;;  %v7133_v23 = vsel %vm7131_vm14, %v7132_v12, %v7123_v4  ;;  %v7281_v28 = vand.u32 3, %v7280_v1 }
 0xb22   : > { %v7249_v61 = vor.u32 %v7248_v63, %v7247_v10  ;;  %v7252_v13 = vshll.u32 %v7251_v42, 23 }
 0xb23   : > { %v7130_v60 = vsel %vm7128_vm2, %v7115_v21, %v7129_v33  ;;  %vm7283_vm4 = vcmp.eq.s32.totalorder %v7281_v28, 0  ;;  %vm7286_vm5 = vcmp.eq.s32.totalorder %v7281_v28, 2  ;;  %vm7282_vm11 = vcmp.lt.s32.totalorder %v7281_v28, 2 }
 0xb24   : > { %v7134_v35 = vsel %vm7127_vm13, %v7130_v60, %v7133_v23  ;;  %v7253_v11 = vor.u32 4788187, %v7252_v13  ;;  %v7256_v49 = vcvt.s32.f32 %v7249_v61 }
 0xb25   : > { %v7135_v29 = vsel %vm7124_vm1, nan, %v7134_v35 }
 0xb26   : > { %8244 = vmatpush.msrb.mxu0 %v7135_v29  ;;  %v7254_v46 = vand.u32 2147483647, %v7253_v11 }
 0xb27   : > { %8559 = vmatmul.msk.f32.vlgmr.msrb.gmra.mxu0 %vm1303_vm6, %v8221_v43 }
 0xb28   : > { %v7257_v59 = vmul.f32 %v7256_v49, %v7254_v46 }
 0xb2a   : > { %v7258_v22 = vxor.u32 2147483648, %v7257_v59 }
 0xb2c   : > { %v7259_v2 = vsel %vm7138_vm3, %v7258_v22, %v7257_v59 }
 0xb2d   : > { %v7262_v38 = vsel %vm7137_vm15, %v15310_v40, %v7259_v2 }
 0xb2e   : > { %v7264_v15 = vmul.f32 %v7262_v38, %v7262_v38 }
 0xb30   : > { %v7265_v34 = vmul.f32 -0.001358992, %v7264_v15  ;;  %v7272_v54 = vmul.f32 -0.00019511016, %v7264_v15 }
 0xb32   : > { %v7266_v3 = vadd.f32 0.041655596, %v7265_v34  ;;  %v7273_v48 = vadd.f32 0.008332121, %v7272_v54 }
 0xb34   : > { %v7267_v18 = vmul.f32 %v7266_v3, %v7264_v15  ;;  %v7274_v30 = vmul.f32 %v7273_v48, %v7264_v15 }
 0xb36   : > { %v7268_v26 = vadd.f32 -0.4999988, %v7267_v18  ;;  %v7275_v32 = vadd.f32 -0.16666654, %v7274_v30 }
 0xb38   : > { %v7269_v39 = vmul.f32 %v7268_v26, %v7264_v15  ;;  %v7276_v55 = vmul.f32 %v7275_v32, %v7264_v15 }
 0xb3a   : > { %v7270_v45 = vadd.f32 1.0, %v7269_v39  ;;  %v7277_v62 = vadd.f32 1.0, %v7276_v55 }
 0xb3c   : > { %v7278_v16 = vmul.f32 %v7277_v62, %v7262_v38  ;;  %v7287_v24 = vxor.u32 2147483648, %v7270_v45 }
 0xb3e   : > { %v7284_v20 = vxor.u32 2147483648, %v7278_v16  ;;  %v7288_v53 = vsel %vm7286_vm5, %v7287_v24, %v7278_v16 }
 0xb40   : > { %v7285_v41 = vsel %vm7283_vm4, %v7270_v45, %v7284_v20 }
 0xb41   : > { %v7289_v50 = vsel %vm7282_vm11, %v7285_v41, %v7288_v53 }
 0xb42   : > { %v7290_v6 = vsel %vm7279_vm7, nan, %v7289_v50 }
 0xb43   : > { %8264 = vmatpush.msrb.mxu1 %v7290_v6 }
 0xb44   : > { %8560 = vmatmul.msk.f32.vlgmr.msrb.gmra.mxu1 %vm1303_vm6, %v8221_v43 }
 0xb63   : > { %v8225_v5 = vpop.permute.xlu2 %8224 }
 0xba4   : > { %v8246_v51 = vpop.f32.mrf.mxu0 }
 0xba5   : > { %v8247_v7 = vadd.f32 %v8246_v51, %v8225_v5 }
 0xbc1   : > { %v8266_v27 = vpop.f32.mrf.mxu1 }
 0xbc2   : > { %v8267_v57 = vadd.f32 %v8266_v27, %v8225_v5 }
 0xbc4   : > { %v8271_v40 = vrot.slane %v8267_v57, 4 }
 0xbc6   : > { %v8273_v37 = vsel %vm8272_vm0, %v8247_v7, %v8271_v40 }
 0xbc7   : > { %8275 = vst [vmem:[%s235_s9] sm:$0x77] %v8273_v37 }
 0xbc8   : > { %8804 = shalt.err (!%p8801_p8)
}
 0xbc9   : > { %8571 = dma.vmem_to_hbm [thread:$0]  (%p8928_p5), %s8291_s10, 128, %s8293_s11, %s8277_s22  }
 0xbca PF: > { %p8583_p9 = scmp.ge.s32.totalorder %s8843_s21, 2  ;;  %s8304_s25 = sand.u32 1, %s8831_s18  }
 0xbcb   : > { %s8305_s26 = scalar_lea.sflag [#allocation4], %s8304_s25 }
 0xbcc   : > { %p8578_p10 = pnand %p8583_p9, %p8932_p6 }
 0xbce   : > { %p8579_p11 = pneg %p8578_p10 }
 0xbd0   : > { %8826 = dma.done.wait (%p8579_p11), %s8305_s26, 128  }
 0xbd1   : > { %8828 = vsyncadd (%p8579_p11), %s8305_s26, 4294967168  ;;  %p16_p12 = scmp.ge.s32.totalorder %s8915_s24, 4   ;;  %s15315_s18 = smov %s8835_s19 }
 0xbd2   : > { %s15316_s19 = smov %s8839_s20  ;;  %s15317_s20 = smov %s8926_s27 }
 0xbd3   : > { %s15318_s21 = smov %s8915_s24  ;;  %18 = sbr.rel (!%p16_p12) target bundleno = 4 (0x4), region = 85 }
 0xbd8   :  { %8311 = vsyncpa [#allocation3], 1 }
 0xbd9   :  { %8313 = vsyncpa [#allocation3 + $0x1], 1 }
 0xbda   :  { %8314 = vsyncpa [#allocation4], 1 }
 0xbdb   :  { %8316 = vsyncpa [#allocation4 + $0x1], 1 }

</bundles_post_ra>
